<compile_context>
chip_gen: v7x
topology: tpu7x:2x2x1
jax: 0.10.0
libtpu: 0.0.40
codegen_flags: <defaults>
</compile_context>

<pallas_src>
import math

import jax
import jax.numpy as jnp
from jax.experimental import pallas as pl
from jax.experimental.pallas import tpu as pltpu

D = 8
W = 256
INPUT_CH = 3
INPUT_CH_VIEWS = 3
OUTPUT_CH = 4
SKIPS = (4,)
OUT_PAD = 128  # lane-dense padded output width


def _round_up(n, m):
    return ((n + m - 1) // m) * m


def _nerf_kernel(x_ref, w_first_ref, w_skip_pts_ref, w_hidden_ref,
                 biases_ref, w_out_ref, b_out_ref, out_ref):
    x = x_ref[...]            # (tm, 6) f32; [:, :3] = input_pts, [:, 3:] = views (unused)
    biases = biases_ref[...]  # (8, W) f32

    def pts_fma(w):
        # (tm,3) @ (3,W) done as 3 broadcast-FMAs on the VPU (avoids a near-empty
        # K=3 MXU pass); stays in f32.
        return (x[:, 0:1] * w[0:1, :]
                + x[:, 1:2] * w[1:2, :]
                + x[:, 2:3] * w[2:3, :])

    def dense(h_bf16, idx):
        # bf16 operands on the MXU, f32 accumulation. idx = pts_linears layer - 1.
        return jnp.dot(h_bf16, w_hidden_ref[idx], preferred_element_type=jnp.float32)

    def relu_bf16(y_f32):
        # Store activations as bf16 between layers (half the activation VMEM/vreg
        # traffic); identical to casting right before the next dot.
        return jnp.maximum(y_f32, 0.0).astype(jnp.bfloat16)

    # pts_linears[0]  (f32 VPU path)
    h = relu_bf16(pts_fma(w_first_ref[...]) + biases[0:1, :])

    # pts_linears[1..4]
    for l in range(1, 5):
        h = relu_bf16(dense(h, l - 1) + biases[l:l + 1, :])

    # skip: h = cat([input_pts, h], -1); pts_linears[5] == pts@W5[:3] + h@W5[3:]
    h = relu_bf16(dense(h, 4) + pts_fma(w_skip_pts_ref[...]) + biases[5:6, :])

    # pts_linears[6..7]
    for l in range(6, 8):
        h = relu_bf16(dense(h, l - 1) + biases[l:l + 1, :])

    # output_linear (no activation); lane-padded to 128, wrapper slices [:, :4]
    out = jnp.dot(h, w_out_ref[...], preferred_element_type=jnp.float32) + b_out_ref[...]
    out_ref[...] = out.astype(out_ref.dtype)


def pack_nerf_params(params):
    """Pack the 18 f32 PyTorch-style params into 6 kernel operands."""
    (w0, b0, w1, b1, w2, b2, w3, b3, w4, b4,
     w5, b5, w6, b6, w7, b7, wout, bout) = params
    w_first = w0.astype(jnp.float32)                             # (3, W) f32 (VPU)
    w_skip_pts = w5[:INPUT_CH].astype(jnp.float32)               # (3, W) f32 (VPU)
    w_hidden = jnp.stack(
        [w1, w2, w3, w4, w5[INPUT_CH:], w6, w7]).astype(jnp.bfloat16)   # (7, W, W)
    biases = jnp.concatenate(
        [b0, b1, b2, b3, b4, b5, b6, b7], axis=0).astype(jnp.float32)   # (8, W)
    w_out = jnp.zeros((W, OUT_PAD), jnp.float32).at[:, :OUTPUT_CH].set(
        wout).astype(jnp.bfloat16)                               # (W, 128) bf16
    b_out = jnp.zeros((1, OUT_PAD), jnp.float32).at[:, :OUTPUT_CH].set(bout)
    return w_first, w_skip_pts, w_hidden, biases, w_out, b_out


def nerf_forward_pallas(x, params, *, tm=4096, min_grid_steps=2):
    """x: (N, INPUT_CH + INPUT_CH_VIEWS). Returns (N, OUTPUT_CH) float32."""
    N, C = x.shape
    x = x.astype(jnp.float32)

    # Batch tile: big enough to amortize per-step pipeline + weight-push overhead,
    # capped (tm<=4096 -> working set well under v7x's 64 MiB), and shrunk so the
    # grid has >= min_grid_steps steps (the "parallel" axis then shards across both
    # v7x TensorCores even for small N). v5e/v6e (1 TC) are unaffected.
    tm_eff = min(tm, _round_up(-(-N // min_grid_steps), 128))
    tm_eff = max(tm_eff, 128)
    n_pad = _round_up(N, tm_eff)
    if n_pad != N:
        x = jnp.pad(x, ((0, n_pad - N), (0, 0)))

    weight_args = list(pack_nerf_params(params))

    def resident_spec(a):
        nd = a.ndim
        # Constant index_map -> pipeline keeps the operand resident in VMEM.
        # TODO(synk): single-buffer these (pipeline_mode=pl.Buffered(1)) once
        # confirmed supported by pallas_call pipelining; saves ~1 MiB of VMEM.
        return pl.BlockSpec(a.shape, lambda i: (0,) * nd)

    in_specs = ([pl.BlockSpec((tm_eff, C), lambda i: (i, 0))]
                + [resident_spec(a) for a in weight_args])

    flops = 2 * n_pad * (2 * INPUT_CH * W + (D - 1) * W * W + W * OUT_PAD)
    weight_bytes = sum(int(a.size) * a.dtype.itemsize for a in weight_args)
    bytes_accessed = weight_bytes + n_pad * (C * 4 + OUT_PAD * 4)

    out = pl.pallas_call(
        _nerf_kernel,
        out_shape=jax.ShapeDtypeStruct((n_pad, OUT_PAD), jnp.float32),
        grid_spec=pltpu.PrefetchScalarGridSpec(
            num_scalar_prefetch=0,
            grid=(n_pad // tm_eff,),
            in_specs=in_specs,
            out_specs=pl.BlockSpec((tm_eff, OUT_PAD), lambda i: (i, 0)),
        ),
        compiler_params=pltpu.CompilerParams(
            dimension_semantics=("parallel",),
            vmem_limit_bytes=48 * 1024 * 1024,
        ),
        cost_estimate=pl.CostEstimate(
            flops=flops, transcendentals=0, bytes_accessed=bytes_accessed),
    )(x, *weight_args)
    # TODO(synk): downstream consumers that can read the padded (n_pad, 128) buffer
    # directly (or tolerate a bf16 output) would save this extra HBM slice pass.
    return out[:N, :OUTPUT_CH]


def init_nerf_params(key):
    """Deterministic xavier_uniform init matching DenseLayer.reset_parameters.
    Weights stored as (in_dim, out_dim); biases zero, shaped (1, out_dim)."""
    relu_gain = math.sqrt(2.0)
    linear_gain = 1.0

    def xavier(key, fan_in, fan_out, gain):
        bound = gain * math.sqrt(6.0 / (fan_in + fan_out))
        return jax.random.uniform(key, (fan_in, fan_out), jnp.float32,
                                  minval=-bound, maxval=bound)

    in_dims = [INPUT_CH] + [W + INPUT_CH if (i - 1) in SKIPS else W for i in range(1, D)]
    params = []
    keys = jax.random.split(key, D + 1)
    for i in range(D):
        w = xavier(keys[i], in_dims[i], W, relu_gain)
        b = jnp.zeros((1, W), jnp.float32)
        params.extend([w, b])
    wout = xavier(keys[D], W, OUTPUT_CH, linear_gain)
    bout = jnp.zeros((1, OUTPUT_CH), jnp.float32)
    params.extend([wout, bout])
    return tuple(params)


def nerf_forward_ref_f32(x, params):
    """Pure-f32 JAX reference reproducing the PyTorch forward (use_viewdirs=False)."""
    pts = x[:, :INPUT_CH]
    (w0, b0, w1, b1, w2, b2, w3, b3, w4, b4,
     w5, b5, w6, b6, w7, b7, wout, bout) = params
    ws = [w0, w1, w2, w3, w4, w5, w6, w7]
    bs = [b0, b1, b2, b3, b4, b5, b6, b7]
    h = pts
    for i in range(D):
        h = jnp.maximum(h @ ws[i] + bs[i], 0.0)
        if i in SKIPS:
            h = jnp.concatenate([pts, h], axis=-1)
    return h @ wout + bout


def nerf_forward_ref_mixed(x, params):
    """Reference with the same bf16/f32 mixed precision as the kernel."""
    pts = x[:, :INPUT_CH]
    (w0, b0, w1, b1, w2, b2, w3, b3, w4, b4,
     w5, b5, w6, b6, w7, b7, wout, bout) = params
    h = jnp.maximum(pts @ w0 + b0, 0.0)  # layer 0 in f32 (VPU path)
    hidden_ws = [w1, w2, w3, w4, w5[INPUT_CH:], w6, w7]
    hidden_bs = [b1, b2, b3, b4, b5, b6, b7]
    w5a = w5[:INPUT_CH]
    for j, (w, b) in enumerate(zip(hidden_ws, hidden_bs)):
        y = jnp.dot(h.astype(jnp.bfloat16), w.astype(jnp.bfloat16),
                    preferred_element_type=jnp.float32) + b
        if j == 4:  # layer 5: skip's pts contribution, in f32
            y = y + pts @ w5a
        h = jnp.maximum(y, 0.0)
    return jnp.dot(h.astype(jnp.bfloat16), wout.astype(jnp.bfloat16),
                   preferred_element_type=jnp.float32) + bout


if __name__ == "__main__":
    key = jax.random.PRNGKey(0)
    k_params, k_x = jax.random.split(key)

    params = init_nerf_params(k_params)

    # Not a multiple of the tile -> exercises padding, and small enough that the
    # min-grid-steps logic kicks in (tm_eff=512, grid=2).
    N = 1000
    x = jax.random.normal(k_x, (N, INPUT_CH + INPUT_CH_VIEWS), jnp.float32)

    out = nerf_forward_pallas(x, params)
    out = jax.block_until_ready(out)
    assert out.shape == (N, OUTPUT_CH)

    ref_mixed = nerf_forward_ref_mixed(x, params)
    assert jnp.allclose(out, ref_mixed, atol=1e-2, rtol=1e-2), \
        "Pallas output mismatch vs mixed-precision reference"

    ref_f32 = nerf_forward_ref_f32(x, params)
    assert jnp.allclose(out, ref_f32, atol=1e-1, rtol=1e-1), \
        "Pallas output mismatch vs f32 reference"

    print("KERNEL_OK")
</pallas_src>

<mosaic_0001>
module attributes {stable_mosaic.version = 11 : i64} {
  func.func @_nerf_kernel(%arg0: i32, %arg1: memref<512x6xf32, #tpu.memory_space<vmem>>, %arg2: memref<3x256xf32, #tpu.memory_space<vmem>>, %arg3: memref<3x256xf32, #tpu.memory_space<vmem>>, %arg4: memref<7x256x256xbf16, #tpu.memory_space<vmem>>, %arg5: memref<8x256xf32, #tpu.memory_space<vmem>>, %arg6: memref<256x128xbf16, #tpu.memory_space<vmem>>, %arg7: memref<1x128xf32, #tpu.memory_space<vmem>>, %arg8: memref<512x128xf32, #tpu.memory_space<vmem>>) attributes {dimension_semantics = [#tpu.dimension_semantics<parallel>], iteration_bounds = array<i64: 2>, scalar_prefetch = 0 : i64, scratch_operands = 0 : i64, tpu.core_type = #tpu.core_type<tc>, window_params = [{transform_indices = @transform_0, window_bounds = array<i64: 512, 6>}, {pipeline_mode = #tpu.pipeline_mode<synchronous>, transform_indices = @transform_1, window_bounds = array<i64: 3, 256>}, {pipeline_mode = #tpu.pipeline_mode<synchronous>, transform_indices = @transform_2, window_bounds = array<i64: 3, 256>}, {pipeline_mode = #tpu.pipeline_mode<synchronous>, transform_indices = @transform_3, window_bounds = array<i64: 7, 256, 256>}, {pipeline_mode = #tpu.pipeline_mode<synchronous>, transform_indices = @transform_4, window_bounds = array<i64: 8, 256>}, {pipeline_mode = #tpu.pipeline_mode<synchronous>, transform_indices = @transform_5, window_bounds = array<i64: 256, 128>}, {pipeline_mode = #tpu.pipeline_mode<synchronous>, transform_indices = @transform_6, window_bounds = array<i64: 1, 128>}, {transform_indices = @transform_7, window_bounds = array<i64: 512, 128>}]} {
    %c0 = arith.constant 0 : index
    %c0_0 = arith.constant 0 : index
    %0 = vector.load %arg1[%c0, %c0_0] : memref<512x6xf32, #tpu.memory_space<vmem>>, vector<512x6xf32>
    %c0_1 = arith.constant 0 : index
    %c0_2 = arith.constant 0 : index
    %1 = vector.load %arg5[%c0_1, %c0_2] : memref<8x256xf32, #tpu.memory_space<vmem>>, vector<8x256xf32>
    %c0_3 = arith.constant 0 : index
    %c0_4 = arith.constant 0 : index
    %2 = vector.load %arg2[%c0_3, %c0_4] : memref<3x256xf32, #tpu.memory_space<vmem>>, vector<3x256xf32>
    %3 = vector.extract_strided_slice %0 {offsets = [0, 0], sizes = [512, 1], strides = [1, 1]} : vector<512x6xf32> to vector<512x1xf32>
    %4 = vector.extract_strided_slice %2 {offsets = [0, 0], sizes = [1, 256], strides = [1, 1]} : vector<3x256xf32> to vector<1x256xf32>
    %5 = vector.broadcast %3 : vector<512x1xf32> to vector<512x256xf32>
    %6 = vector.broadcast %4 : vector<1x256xf32> to vector<512x256xf32>
    %7 = arith.mulf %5, %6 : vector<512x256xf32>
    %8 = vector.extract_strided_slice %0 {offsets = [0, 1], sizes = [512, 1], strides = [1, 1]} : vector<512x6xf32> to vector<512x1xf32>
    %9 = vector.extract_strided_slice %2 {offsets = [1, 0], sizes = [1, 256], strides = [1, 1]} : vector<3x256xf32> to vector<1x256xf32>
    %10 = vector.broadcast %8 : vector<512x1xf32> to vector<512x256xf32>
    %11 = vector.broadcast %9 : vector<1x256xf32> to vector<512x256xf32>
    %12 = arith.mulf %10, %11 : vector<512x256xf32>
    %13 = arith.addf %7, %12 : vector<512x256xf32>
    %14 = vector.extract_strided_slice %0 {offsets = [0, 2], sizes = [512, 1], strides = [1, 1]} : vector<512x6xf32> to vector<512x1xf32>
    %15 = vector.extract_strided_slice %2 {offsets = [2, 0], sizes = [1, 256], strides = [1, 1]} : vector<3x256xf32> to vector<1x256xf32>
    %16 = vector.broadcast %14 : vector<512x1xf32> to vector<512x256xf32>
    %17 = vector.broadcast %15 : vector<1x256xf32> to vector<512x256xf32>
    %18 = arith.mulf %16, %17 : vector<512x256xf32>
    %19 = arith.addf %13, %18 : vector<512x256xf32>
    %20 = vector.extract_strided_slice %1 {offsets = [0, 0], sizes = [1, 256], strides = [1, 1]} : vector<8x256xf32> to vector<1x256xf32>
    %21 = vector.broadcast %20 : vector<1x256xf32> to vector<512x256xf32>
    %22 = arith.addf %19, %21 : vector<512x256xf32>
    %cst = arith.constant 0.000000e+00 : f32
    %23 = vector.broadcast %cst : f32 to vector<512x256xf32>
    %24 = arith.maximumf %22, %23 : vector<512x256xf32>
    %25 = arith.truncf %24 : vector<512x256xf32> to vector<512x256xbf16>
    %c0_5 = arith.constant 0 : index
    %c0_6 = arith.constant 0 : index
    %c0_7 = arith.constant 0 : index
    %26 = vector.load %arg4[%c0_5, %c0_6, %c0_7] : memref<7x256x256xbf16, #tpu.memory_space<vmem>>, vector<1x256x256xbf16>
    %27 = vector.shape_cast %26 : vector<1x256x256xbf16> to vector<256x256xbf16>
    %cst_8 = arith.constant dense<0.000000e+00> : vector<512x256xf32>
    %28 = tpu.matmul %25, %27, %cst_8 {dimension_numbers = #tpu.dot_dimension_numbers<[1], [0], [0], [1], [0, 0, 1, 1], [], []>} : vector<512x256xbf16>, vector<256x256xbf16>, vector<512x256xf32> -> vector<512x256xf32>
    %29 = vector.extract_strided_slice %1 {offsets = [1, 0], sizes = [1, 256], strides = [1, 1]} : vector<8x256xf32> to vector<1x256xf32>
    %30 = vector.broadcast %29 : vector<1x256xf32> to vector<512x256xf32>
    %31 = arith.addf %28, %30 : vector<512x256xf32>
    %cst_9 = arith.constant 0.000000e+00 : f32
    %32 = vector.broadcast %cst_9 : f32 to vector<512x256xf32>
    %33 = arith.maximumf %31, %32 : vector<512x256xf32>
    %34 = arith.truncf %33 : vector<512x256xf32> to vector<512x256xbf16>
    %c1 = arith.constant 1 : index
    %c0_10 = arith.constant 0 : index
    %c0_11 = arith.constant 0 : index
    %35 = vector.load %arg4[%c1, %c0_10, %c0_11] : memref<7x256x256xbf16, #tpu.memory_space<vmem>>, vector<1x256x256xbf16>
    %36 = vector.shape_cast %35 : vector<1x256x256xbf16> to vector<256x256xbf16>
    %cst_12 = arith.constant dense<0.000000e+00> : vector<512x256xf32>
    %37 = tpu.matmul %34, %36, %cst_12 {dimension_numbers = #tpu.dot_dimension_numbers<[1], [0], [0], [1], [0, 0, 1, 1], [], []>} : vector<512x256xbf16>, vector<256x256xbf16>, vector<512x256xf32> -> vector<512x256xf32>
    %38 = vector.extract_strided_slice %1 {offsets = [2, 0], sizes = [1, 256], strides = [1, 1]} : vector<8x256xf32> to vector<1x256xf32>
    %39 = vector.broadcast %38 : vector<1x256xf32> to vector<512x256xf32>
    %40 = arith.addf %37, %39 : vector<512x256xf32>
    %cst_13 = arith.constant 0.000000e+00 : f32
    %41 = vector.broadcast %cst_13 : f32 to vector<512x256xf32>
    %42 = arith.maximumf %40, %41 : vector<512x256xf32>
    %43 = arith.truncf %42 : vector<512x256xf32> to vector<512x256xbf16>
    %c2 = arith.constant 2 : index
    %c0_14 = arith.constant 0 : index
    %c0_15 = arith.constant 0 : index
    %44 = vector.load %arg4[%c2, %c0_14, %c0_15] : memref<7x256x256xbf16, #tpu.memory_space<vmem>>, vector<1x256x256xbf16>
    %45 = vector.shape_cast %44 : vector<1x256x256xbf16> to vector<256x256xbf16>
    %cst_16 = arith.constant dense<0.000000e+00> : vector<512x256xf32>
    %46 = tpu.matmul %43, %45, %cst_16 {dimension_numbers = #tpu.dot_dimension_numbers<[1], [0], [0], [1], [0, 0, 1, 1], [], []>} : vector<512x256xbf16>, vector<256x256xbf16>, vector<512x256xf32> -> vector<512x256xf32>
    %47 = vector.extract_strided_slice %1 {offsets = [3, 0], sizes = [1, 256], strides = [1, 1]} : vector<8x256xf32> to vector<1x256xf32>
    %48 = vector.broadcast %47 : vector<1x256xf32> to vector<512x256xf32>
    %49 = arith.addf %46, %48 : vector<512x256xf32>
    %cst_17 = arith.constant 0.000000e+00 : f32
    %50 = vector.broadcast %cst_17 : f32 to vector<512x256xf32>
    %51 = arith.maximumf %49, %50 : vector<512x256xf32>
    %52 = arith.truncf %51 : vector<512x256xf32> to vector<512x256xbf16>
    %c3 = arith.constant 3 : index
    %c0_18 = arith.constant 0 : index
    %c0_19 = arith.constant 0 : index
    %53 = vector.load %arg4[%c3, %c0_18, %c0_19] : memref<7x256x256xbf16, #tpu.memory_space<vmem>>, vector<1x256x256xbf16>
    %54 = vector.shape_cast %53 : vector<1x256x256xbf16> to vector<256x256xbf16>
    %cst_20 = arith.constant dense<0.000000e+00> : vector<512x256xf32>
    %55 = tpu.matmul %52, %54, %cst_20 {dimension_numbers = #tpu.dot_dimension_numbers<[1], [0], [0], [1], [0, 0, 1, 1], [], []>} : vector<512x256xbf16>, vector<256x256xbf16>, vector<512x256xf32> -> vector<512x256xf32>
    %56 = vector.extract_strided_slice %1 {offsets = [4, 0], sizes = [1, 256], strides = [1, 1]} : vector<8x256xf32> to vector<1x256xf32>
    %57 = vector.broadcast %56 : vector<1x256xf32> to vector<512x256xf32>
    %58 = arith.addf %55, %57 : vector<512x256xf32>
    %cst_21 = arith.constant 0.000000e+00 : f32
    %59 = vector.broadcast %cst_21 : f32 to vector<512x256xf32>
    %60 = arith.maximumf %58, %59 : vector<512x256xf32>
    %61 = arith.truncf %60 : vector<512x256xf32> to vector<512x256xbf16>
    %c4 = arith.constant 4 : index
    %c0_22 = arith.constant 0 : index
    %c0_23 = arith.constant 0 : index
    %62 = vector.load %arg4[%c4, %c0_22, %c0_23] : memref<7x256x256xbf16, #tpu.memory_space<vmem>>, vector<1x256x256xbf16>
    %63 = vector.shape_cast %62 : vector<1x256x256xbf16> to vector<256x256xbf16>
    %cst_24 = arith.constant dense<0.000000e+00> : vector<512x256xf32>
    %64 = tpu.matmul %61, %63, %cst_24 {dimension_numbers = #tpu.dot_dimension_numbers<[1], [0], [0], [1], [0, 0, 1, 1], [], []>} : vector<512x256xbf16>, vector<256x256xbf16>, vector<512x256xf32> -> vector<512x256xf32>
    %c0_25 = arith.constant 0 : index
    %c0_26 = arith.constant 0 : index
    %65 = vector.load %arg3[%c0_25, %c0_26] : memref<3x256xf32, #tpu.memory_space<vmem>>, vector<3x256xf32>
    %66 = vector.extract_strided_slice %0 {offsets = [0, 0], sizes = [512, 1], strides = [1, 1]} : vector<512x6xf32> to vector<512x1xf32>
    %67 = vector.extract_strided_slice %65 {offsets = [0, 0], sizes = [1, 256], strides = [1, 1]} : vector<3x256xf32> to vector<1x256xf32>
    %68 = vector.broadcast %66 : vector<512x1xf32> to vector<512x256xf32>
    %69 = vector.broadcast %67 : vector<1x256xf32> to vector<512x256xf32>
    %70 = arith.mulf %68, %69 : vector<512x256xf32>
    %71 = vector.extract_strided_slice %0 {offsets = [0, 1], sizes = [512, 1], strides = [1, 1]} : vector<512x6xf32> to vector<512x1xf32>
    %72 = vector.extract_strided_slice %65 {offsets = [1, 0], sizes = [1, 256], strides = [1, 1]} : vector<3x256xf32> to vector<1x256xf32>
    %73 = vector.broadcast %71 : vector<512x1xf32> to vector<512x256xf32>
    %74 = vector.broadcast %72 : vector<1x256xf32> to vector<512x256xf32>
    %75 = arith.mulf %73, %74 : vector<512x256xf32>
    %76 = arith.addf %70, %75 : vector<512x256xf32>
    %77 = vector.extract_strided_slice %0 {offsets = [0, 2], sizes = [512, 1], strides = [1, 1]} : vector<512x6xf32> to vector<512x1xf32>
    %78 = vector.extract_strided_slice %65 {offsets = [2, 0], sizes = [1, 256], strides = [1, 1]} : vector<3x256xf32> to vector<1x256xf32>
    %79 = vector.broadcast %77 : vector<512x1xf32> to vector<512x256xf32>
    %80 = vector.broadcast %78 : vector<1x256xf32> to vector<512x256xf32>
    %81 = arith.mulf %79, %80 : vector<512x256xf32>
    %82 = arith.addf %76, %81 : vector<512x256xf32>
    %83 = arith.addf %64, %82 : vector<512x256xf32>
    %84 = vector.extract_strided_slice %1 {offsets = [5, 0], sizes = [1, 256], strides = [1, 1]} : vector<8x256xf32> to vector<1x256xf32>
    %85 = vector.broadcast %84 : vector<1x256xf32> to vector<512x256xf32>
    %86 = arith.addf %83, %85 : vector<512x256xf32>
    %cst_27 = arith.constant 0.000000e+00 : f32
    %87 = vector.broadcast %cst_27 : f32 to vector<512x256xf32>
    %88 = arith.maximumf %86, %87 : vector<512x256xf32>
    %89 = arith.truncf %88 : vector<512x256xf32> to vector<512x256xbf16>
    %c5 = arith.constant 5 : index
    %c0_28 = arith.constant 0 : index
    %c0_29 = arith.constant 0 : index
    %90 = vector.load %arg4[%c5, %c0_28, %c0_29] : memref<7x256x256xbf16, #tpu.memory_space<vmem>>, vector<1x256x256xbf16>
    %91 = vector.shape_cast %90 : vector<1x256x256xbf16> to vector<256x256xbf16>
    %cst_30 = arith.constant dense<0.000000e+00> : vector<512x256xf32>
    %92 = tpu.matmul %89, %91, %cst_30 {dimension_numbers = #tpu.dot_dimension_numbers<[1], [0], [0], [1], [0, 0, 1, 1], [], []>} : vector<512x256xbf16>, vector<256x256xbf16>, vector<512x256xf32> -> vector<512x256xf32>
    %93 = vector.extract_strided_slice %1 {offsets = [6, 0], sizes = [1, 256], strides = [1, 1]} : vector<8x256xf32> to vector<1x256xf32>
    %94 = vector.broadcast %93 : vector<1x256xf32> to vector<512x256xf32>
    %95 = arith.addf %92, %94 : vector<512x256xf32>
    %cst_31 = arith.constant 0.000000e+00 : f32
    %96 = vector.broadcast %cst_31 : f32 to vector<512x256xf32>
    %97 = arith.maximumf %95, %96 : vector<512x256xf32>
    %98 = arith.truncf %97 : vector<512x256xf32> to vector<512x256xbf16>
    %c6 = arith.constant 6 : index
    %c0_32 = arith.constant 0 : index
    %c0_33 = arith.constant 0 : index
    %99 = vector.load %arg4[%c6, %c0_32, %c0_33] : memref<7x256x256xbf16, #tpu.memory_space<vmem>>, vector<1x256x256xbf16>
    %100 = vector.shape_cast %99 : vector<1x256x256xbf16> to vector<256x256xbf16>
    %cst_34 = arith.constant dense<0.000000e+00> : vector<512x256xf32>
    %101 = tpu.matmul %98, %100, %cst_34 {dimension_numbers = #tpu.dot_dimension_numbers<[1], [0], [0], [1], [0, 0, 1, 1], [], []>} : vector<512x256xbf16>, vector<256x256xbf16>, vector<512x256xf32> -> vector<512x256xf32>
    %102 = vector.extract_strided_slice %1 {offsets = [7, 0], sizes = [1, 256], strides = [1, 1]} : vector<8x256xf32> to vector<1x256xf32>
    %103 = vector.broadcast %102 : vector<1x256xf32> to vector<512x256xf32>
    %104 = arith.addf %101, %103 : vector<512x256xf32>
    %cst_35 = arith.constant 0.000000e+00 : f32
    %105 = vector.broadcast %cst_35 : f32 to vector<512x256xf32>
    %106 = arith.maximumf %104, %105 : vector<512x256xf32>
    %107 = arith.truncf %106 : vector<512x256xf32> to vector<512x256xbf16>
    %c0_36 = arith.constant 0 : index
    %c0_37 = arith.constant 0 : index
    %108 = vector.load %arg6[%c0_36, %c0_37] : memref<256x128xbf16, #tpu.memory_space<vmem>>, vector<256x128xbf16>
    %cst_38 = arith.constant dense<0.000000e+00> : vector<512x128xf32>
    %109 = tpu.matmul %107, %108, %cst_38 {dimension_numbers = #tpu.dot_dimension_numbers<[1], [0], [0], [1], [0, 0, 1, 1], [], []>} : vector<512x256xbf16>, vector<256x128xbf16>, vector<512x128xf32> -> vector<512x128xf32>
    %c0_39 = arith.constant 0 : index
    %c0_40 = arith.constant 0 : index
    %110 = vector.load %arg7[%c0_39, %c0_40] : memref<1x128xf32, #tpu.memory_space<vmem>>, vector<1x128xf32>
    %111 = vector.broadcast %110 : vector<1x128xf32> to vector<512x128xf32>
    %112 = arith.addf %109, %111 : vector<512x128xf32>
    %c0_41 = arith.constant 0 : index
    %c0_42 = arith.constant 0 : index
    %113 = vector.load %arg8[%c0_41, %c0_42] : memref<512x128xf32, #tpu.memory_space<vmem>>, vector<512x128xf32>
    tpu.vector_store %arg8[%c0_41, %c0_42], %112 {strides = array<i32>} : memref<512x128xf32, #tpu.memory_space<vmem>>, vector<512x128xf32>,
    return
  }
  func.func @transform_0(%arg0: i32) -> (i32, i32) {
    %c0_i32 = arith.constant 0 : i32
    %c0_i32_0 = arith.constant 0 : i32
    return %arg0, %c0_i32 : i32, i32
  }
  func.func @transform_1(%arg0: i32) -> (i32, i32) {
    %c0_i32 = arith.constant 0 : i32
    %c0_i32_0 = arith.constant 0 : i32
    %c0_i32_1 = arith.constant 0 : i32
    return %c0_i32, %c0_i32_0 : i32, i32
  }
  func.func @transform_2(%arg0: i32) -> (i32, i32) {
    %c0_i32 = arith.constant 0 : i32
    %c0_i32_0 = arith.constant 0 : i32
    %c0_i32_1 = arith.constant 0 : i32
    return %c0_i32, %c0_i32_0 : i32, i32
  }
  func.func @transform_3(%arg0: i32) -> (i32, i32, i32) {
    %c0_i32 = arith.constant 0 : i32
    %c0_i32_0 = arith.constant 0 : i32
    %c0_i32_1 = arith.constant 0 : i32
    %c0_i32_2 = arith.constant 0 : i32
    return %c0_i32, %c0_i32_0, %c0_i32_1 : i32, i32, i32
  }
  func.func @transform_4(%arg0: i32) -> (i32, i32) {
    %c0_i32 = arith.constant 0 : i32
    %c0_i32_0 = arith.constant 0 : i32
    %c0_i32_1 = arith.constant 0 : i32
    return %c0_i32, %c0_i32_0 : i32, i32
  }
  func.func @transform_5(%arg0: i32) -> (i32, i32) {
    %c0_i32 = arith.constant 0 : i32
    %c0_i32_0 = arith.constant 0 : i32
    %c0_i32_1 = arith.constant 0 : i32
    return %c0_i32, %c0_i32_0 : i32, i32
  }
  func.func @transform_6(%arg0: i32) -> (i32, i32) {
    %c0_i32 = arith.constant 0 : i32
    %c0_i32_0 = arith.constant 0 : i32
    %c0_i32_1 = arith.constant 0 : i32
    return %c0_i32, %c0_i32_0 : i32, i32
  }
  func.func @transform_7(%arg0: i32) -> (i32, i32) {
    %c0_i32 = arith.constant 0 : i32
    %c0_i32_0 = arith.constant 0 : i32
    return %arg0, %c0_i32 : i32, i32
  }
}

</mosaic_0001>

<bundles_post_ra>
// kernel: tpu_custom_call.1
= control target key start
LH: loop header
LB: loop body
LE: loop exit
PB: predicated region body
PF: predicated region fallthrough
CT: control target
= control target key end

     0   :  { %12 = vsyncpa [#allocation3], 0  ;;  %s13827_s0 = inlined_call_operand.vmem [shape: f32[1024,6], index: 0, kind: input, shape index: {}]   ;;  %s13828_s1 = inlined_call_operand.vmem [shape: f32[3,256], index: 1, kind: input, shape index: {}]   ;;  %s13829_s2 = inlined_call_operand.vmem [shape: f32[3,256], index: 2, kind: input, shape index: {}]   ;;  %s13830_s3 = inlined_call_operand.hbm [shape: bf16[7,256,256], index: 3, kind: input, shape index: {}]   ;;  %s13831_s4 = inlined_call_operand.vmem [shape: f32[8,256], index: 4, kind: input, shape index: {}]   ;;  %s13832_s5 = inlined_call_operand.vmem [shape: bf16[256,128], index: 5, kind: input, shape index: {}]   ;;  %s13833_s6 = inlined_call_operand.vmem [shape: f32[1,128], index: 6, kind: input, shape index: {}]   ;;  %s13834_s7 = inlined_call_operand.hbm [shape: f32[1024,128], index: 7, kind: output, shape index: {}]  }
   0x1   :  { %13 = vsyncpa [#allocation4], 0 }
   0x2   :  { %15 = vsyncpa [#allocation4 + $0x1], 0  ;;  %s9783_s24 = smov 0   ;;  %s9785_s25 = smov 0  }
   0x3   :  { %s9787_s26 = smov 0   ;;  %s9789_s27 = smov 0  }
   0x4 LB: > { %s9804_s28 = sadd.s32 4294967295, %s9732_s27   ;;  %s8839_s29 = sadd.s32 4294967294, %s9732_s27   ;;  %s9732_s27 = sphi %s9789_s27, %s14485_s27   ;;  %s9728_s26 = sphi %s9787_s26, %s14484_s26   ;;  %s9724_s25 = sphi %s9785_s25, %s14483_s25   ;;  %s9720_s24 = sphi %s9783_s24, %s14482_s24  }
   0x5   : > { %s9808_s30 = sadd.s32 1, %s9732_s27   ;;  %s180_s8 = sadd.s32 1, %s9728_s26 }
   0x6   : > { %s177_s9 = ssub.s32 %s9732_s27, %s9808_s30  ;;  %p190_p0 = scmp.ne.s32.totalorder %s9728_s26, %s9724_s25 }
   0x7   : > { %p178_p1 = scmp.eq.s32.totalorder %s177_s9, 0  ;;  %p191_p2 = scmp.eq.s32.totalorder %s9804_s28, 1 }
   0x8   : > { %p196_p3 = scmp.ne.s32.totalorder %s9724_s25, %s9720_s24  ;;  %p197_p4 = scmp.eq.s32.totalorder %s8839_s29, 1 }
   0x9   : > { %s9819_s10 = scalar_select %p178_p1, %s9728_s26, %s180_s8  }
   0xa   : > { %p9821_p5 = por %p191_p2, %p190_p0  ;;  %p9825_p6 = por %p197_p4, %p196_p3 }
   0xb   : > { %p8840_p7 = scmp.ge.s32.totalorder %s9732_s27, 1  ;;  %p204_p8 = scmp.lt.s32.totalorder %s9732_s27, 3 }
   0xc   : > { %s14087_s11 = scalar_select %p9821_p5, 1, 0 }
   0xd   : > { %s14088_s12 = scalar_select %p9825_p6, 1, 0 }
   0xe   : > { %p13835_p9 = scmp.eq.s32.totalorder %s9804_s28, 0  ;;  %p9832_p10 = pnand %p8840_p7, %p204_p8 }
   0xf   : > { %s9734_s14 = smov [#allocation2]   ;;  %s9638_s19 = scalar_lea.hbm %s13830_s3, 28672 }
  0x10   : > { %s14089_s13 = scalar_select %p9832_p10, 1, 0 }
  0x11   : > { %s222_s15 = sshll.u32 %s9734_s14, 4  ;;  %p9101_p11 = pneg %p9832_p10  ;;  %s223_s15 = int_to_ptr.vmem [resolvable:$true] %s222_s15 }
  0x12   : > { %p9639_p13 = scmp.ne.s32.totalorder %s13830_s3, %s9638_s19  ;;  %p9645_p3 = scmp.lt.u32.totalorder %s9638_s19, %s13830_s3 }
  0x13   : > { %p9840_p12 = pnand %p13835_p9, %p9101_p11 }
  0x15   : > { %p9640_p0 = pneg %p9840_p12 }
  0x17   : > { %p9641_p1 = pnand %p9640_p0, %p9639_p13 }
  0x19   : > { %p9642_p2 = pneg %p9641_p1 }
  0x1b   : > { %p9647_p4 = pnand %p9645_p3, %p9642_p2 }
  0x1d   : > { %9650 = shalt.err (!%p9647_p4)
}
  0x1e   : > { %s9651_s29 = scalar_lea.vmem %s223_s15, 28672  ;;  %p9659_p9 = scmp.lt.s32.totalorder %s223_s15, %s223_s15 }
  0x1f   : > { %p9652_p7 = scmp.ne.s32.totalorder %s223_s15, %s9651_s29  ;;  %p9660_p6 = scmp.lt.s32.totalorder %s9651_s29, %s9651_s29 }
  0x21   : > { %p9654_p8 = pnand %p9652_p7, %p9640_p0  ;;  %p9661_p5 = por %p9660_p6, %p9659_p9 }
  0x23   : > { %p9655_p11 = pneg %p9654_p8 }
  0x25   : > { %p9662_p10 = pnand %p9661_p5, %p9655_p11 }
  0x27   : > { %9665 = shalt.err (!%p9662_p10)
}
  0x28   : > { %s9735_s8 = smov 128   ;;  %s9736_s9 = smov 8  }
  0x29   : > { %9104 = dma.hbm_to_vmem [thread:$0]  (!%p9840_p12), %s13830_s3, 28672, %s223_s15, [#allocation3], %s9735_s8, %s9735_s8, %s9736_s9  }
  0x2a   : > { %p14091_p13 = scmp.ne.s32.totalorder %s14089_s13, 0 }
  0x2c   : > { %256 = sbr.rel (%p14091_p13) target bundleno = 2586 (0xa1a), region = 48 }
  0x33   : > { %p14092_p1 = scmp.eq.s32.totalorder %s9804_s28, 0 }
  0x35   : > { %9711 = dma.done.wait (%p14092_p1), [#allocation3], 28672   ;;  %p14093_p0 = pmov %p14092_p1 }
  0x36   : > { %s8846_s18 = sshll.u32 %s9804_s28, 6  ;;  %v13838_v0 = vmov 2   ;;  %v13840_v1 = vmov 1   ;;  %v9256_v5 = vld [vmem:[#allocation2 + $0x4] ss:$8 sps:$4 sm:$0xff]   ;;  %v13842_v14 = vmov 0  }
  0x37   : > { %9713 = vsyncadd (%p14093_p0), [#allocation3], 4294938624  ;;  %9153 = vset.pattern.permute.xlu0 %v13838_v0  ;;  %9152 = vset.pattern.permute.xlu1 %v13840_v1  ;;  %p289_p5 = scmp.lt.s32.totalorder %s8846_s18, 127  ;;  %v9258_v7 = vld [vmem:[#allocation2] ss:$8 sps:$4 sm:$0xff]   ;;  %s285_s13 = sand.u32 1, %s9724_s25  }
  0x38   : > { %2418 = vmatprep.subr.bf16.mxu0 %v9256_v5  ;;  %v9259_v8 = vld [vmem:[#allocation2 + $0x14] ss:$8 sps:$4 sm:$0xff]   ;;  %v9261_v9 = vld [vmem:[#allocation2 + $0x10] ss:$8 sps:$4 sm:$0xff]   ;;  %v9262_v10 = vld [vmem:[#allocation2 + $0x24] ss:$8 sps:$4 sm:$0xff]  }
  0x39   : > { %s14487_s18 = smov (!%p289_p5, %s8846_s18), 127  ;;  %2419 = vmatpush1.bf16.msra.mxu0 %v9258_v7  ;;  %v9264_v12 = vld [vmem:[#allocation2 + $0x20] ss:$8 sps:$4 sm:$0xff]   ;;  %v9265_v13 = vld [vmem:[#allocation2 + $0x34] ss:$8 sps:$4 sm:$0xff]   ;;  %s9094_s23 = sshll.u32 %s9804_s28, 13 }
  0x3a   : > { %s8847_s15 = sshll.u32 %s14487_s18, 3  ;;  %2420 = vmatprep.subr.bf16.mxu0 %v9259_v8  ;;  %v9267_v16 = vld [vmem:[#allocation2 + $0x30] ss:$8 sps:$4 sm:$0xff]   ;;  %v9268_v17 = vld [vmem:[#allocation2 + $0x44] ss:$8 sps:$4 sm:$0xff]   ;;  %s13777_s14 = scalar_lea.hbm %s13834_s7, %s9094_s23 }
  0x3b   : > { %s9872_s19 = scalar_lea.vmem %s13827_s0, %s8847_s15  ;;  %v9270_v20 = vld [vmem:[#allocation2 + $0x40] ss:$8 sps:$4 sm:$0xff]   ;;  %v9271_v21 = vld [vmem:[#allocation2 + $0x54] ss:$8 sps:$4 sm:$0xff]   ;;  %v9273_v23 = vld [vmem:[#allocation2 + $0x50] ss:$8 sps:$4 sm:$0xff]  }
  0x3c   : > { %v296_v2 = vld [vmem:[%s9872_s19] sm:$0xff]  ;;  %v298_v3 = vld [vmem:[%s9872_s19 + $0x10] sm:$0xff]  ;;  %v297_v4 = vld [vmem:[%s9872_s19 + $0x8] sm:$0xff]  ;;  %s13786_s28 = scalar_lea.sflag [#allocation4], %s285_s13  ;;  %p14480_p9 = scmp.ne.s32.totalorder %s14087_s11, 0 }
  0x3d   : > { %1361 = vperm.xlu0 %9153, %v296_v2   ;;  %831 = vperm.xlu1 %9152, %v296_v2   ;;  %v9878_v6 = vld [vmem:[%s9872_s19 + $0x20] sm:$0xff]  ;;  %v9883_v11 = vld [vmem:[%s9872_s19 + $0x30] sm:$0xff]  ;;  %v299_v19 = vld [vmem:[%s9872_s19 + $0x18] sm:$0xff]  ;;  %s9740_s18 = smov [#allocation5]  }
  0x3e   : > { %2421 = vmatpush1.bf16.msra.mxu0 %v9261_v9  ;;  %v9888_v15 = vld [vmem:[%s9872_s19 + $0x40] sm:$0xff]  ;;  %v9892_v18 = vld [vmem:[%s9872_s19 + $0x50] sm:$0xff]  ;;  %v301_v31 = vld [vmem:[%s9872_s19 + $0x28] sm:$0xff]  ;;  %s9670_s15 = sshll.u32 %s9740_s18, 4  ;;  %s9671_s15 = int_to_ptr.vmem [resolvable:$false] %s9670_s15 }
  0x3f   : > { %2422 = vmatprep.subr.bf16.mxu0 %v9262_v10  ;;  %v9898_v22 = vld [vmem:[%s9872_s19 + $0x60] sm:$0xff]  ;;  %v9277_v26 = vld [vmem:[#allocation2 + $0x74] ss:$8 sps:$4 sm:$0xff]   ;;  %v9279_v27 = vld [vmem:[#allocation2 + $0x70] ss:$8 sps:$4 sm:$0xff]   ;;  %v684_v10 = vlaneseq  ;;  %s9672_s16 = scalar_lea.vmem %s9671_s15, 16384 }
  0x40   : > { %v9274_v24 = vld [vmem:[#allocation2 + $0x64] ss:$8 sps:$4 sm:$0xff]   ;;  %v9276_v25 = vld [vmem:[#allocation2 + $0x60] ss:$8 sps:$4 sm:$0xff]   ;;  %v9283_v30 = vld [vmem:[#allocation2 + $0x94] ss:$8 sps:$4 sm:$0xff]  }
  0x41   : > { %1369 = vperm.xlu0 %9153, %v298_v3   ;;  %835 = vperm.xlu1 %9152, %v297_v4   ;;  %v9280_v28 = vld [vmem:[#allocation2 + $0x84] ss:$8 sps:$4 sm:$0xff]   ;;  %v9282_v29 = vld [vmem:[#allocation2 + $0x80] ss:$8 sps:$4 sm:$0xff]   ;;  %v9285_v32 = vld [vmem:[#allocation2 + $0x90] ss:$8 sps:$4 sm:$0xff]  }
  0x42   : > { %2423 = vmatpush1.bf16.msra.mxu0 %v9264_v12  ;;  %v303_v33 = vld [vmem:[%s9872_s19 + $0x38] sm:$0xff]  ;;  %v9286_v34 = vld [vmem:[#allocation2 + $0xa4] ss:$8 sps:$4 sm:$0xff]   ;;  %v9288_v35 = vld [vmem:[#allocation2 + $0xa0] ss:$8 sps:$4 sm:$0xff]  }
  0x43   : > { %2424 = vmatprep.subr.bf16.mxu0 %v9265_v13  ;;  %v9289_v36 = vld [vmem:[#allocation2 + $0xb4] ss:$8 sps:$4 sm:$0xff]   ;;  %v305_v37 = vld [vmem:[%s9872_s19 + $0x48] sm:$0xff]  ;;  %v9291_v38 = vld [vmem:[#allocation2 + $0xb0] ss:$8 sps:$4 sm:$0xff]  }
  0x44   : > { %v9292_v39 = vld [vmem:[#allocation2 + $0xc4] ss:$8 sps:$4 sm:$0xff]   ;;  %v9912_v40 = vld [vmem:[%s9872_s19 + $0x58] sm:$0xff]  ;;  %v9294_v41 = vld [vmem:[#allocation2 + $0xc0] ss:$8 sps:$4 sm:$0xff]  }
  0x45   : > { %1377 = vperm.xlu0 %9153, %v9878_v6   ;;  %9154 = vset.pattern.permute.xlu1 %v13838_v0  ;;  %v9295_v42 = vld [vmem:[#allocation2 + $0xd4] ss:$8 sps:$4 sm:$0xff]   ;;  %v9917_v43 = vld [vmem:[%s9872_s19 + $0x68] sm:$0xff]  ;;  %v9297_v44 = vld [vmem:[#allocation2 + $0xd0] ss:$8 sps:$4 sm:$0xff]  }
  0x46   : > { %1365 = vperm.xlu1 %9154, %v297_v4   ;;  %2425 = vmatpush1.bf16.msra.mxu0 %v9267_v16  ;;  %v9298_v45 = vld [vmem:[#allocation2 + $0xe4] ss:$8 sps:$4 sm:$0xff]   ;;  %v9922_v46 = vld [vmem:[%s9872_s19 + $0x78] sm:$0xff]  ;;  %v9300_v47 = vld [vmem:[#allocation2 + $0xe0] ss:$8 sps:$4 sm:$0xff]  }
  0x47   : > { %2426 = vmatprep.subr.bf16.mxu0 %v9268_v17  ;;  %v9301_v48 = vld [vmem:[#allocation2 + $0xf4] ss:$8 sps:$4 sm:$0xff]   ;;  %v9927_v49 = vld [vmem:[%s9872_s19 + $0x88] sm:$0xff]  ;;  %v9303_v50 = vld [vmem:[#allocation2 + $0xf0] ss:$8 sps:$4 sm:$0xff]  }
  0x48   : > { %v9931_v51 = vld [vmem:[%s9872_s19 + $0x98] sm:$0xff]  ;;  %v9936_v52 = vld [vmem:[%s9872_s19 + $0xa8] sm:$0xff]  ;;  %v310_v56 = vld [vmem:[%s9872_s19 + $0x70] sm:$0xff] }
  0x49   : > { %1385 = vperm.xlu0 %9153, %v9883_v11   ;;  %v9942_v53 = vld [vmem:[%s9872_s19 + $0xb8] sm:$0xff]  ;;  %v9948_v54 = vld [vmem:[%s9872_s19 + $0xc8] sm:$0xff]  ;;  %v9959_v57 = vld [vmem:[%s9872_s19 + $0x80] sm:$0xff] }
  0x4a   : > { %9155 = vset.pattern.permute.xlu1 %v13842_v14  ;;  %2427 = vmatpush1.bf16.msra.mxu0 %v9270_v20  ;;  %v323_v55 = vld [vmem:[%s9872_s19 + $0xd8] sm:$0xff]  ;;  %v9965_v58 = vld [vmem:[%s9872_s19 + $0x90] sm:$0xff]  ;;  %v9970_v59 = vld [vmem:[%s9872_s19 + $0xa0] sm:$0xff] }
  0x4b   : > { %375 = vperm.xlu1 %9155, %v298_v3   ;;  %2428 = vmatprep.subr.bf16.mxu0 %v9271_v21  ;;  %v9976_v60 = vld [vmem:[%s9872_s19 + $0xb0] sm:$0xff]  ;;  %v9982_v61 = vld [vmem:[%s9872_s19 + $0xc0] sm:$0xff]  ;;  %v10030_v17 = vld [vmem:[%s9872_s19 + $0xe8] sm:$0xff] }
  0x4c   : > { %v9988_v62 = vld [vmem:[%s9872_s19 + $0xd0] sm:$0xff]  ;;  %v9993_v63 = vld [vmem:[%s9872_s19 + $0xe0] sm:$0xff] }
  0x4d   : > { %1393 = vperm.xlu0 %9153, %v9888_v15   ;;  %v328_v5 = vld [vmem:[%s9872_s19 + $0x100] sm:$0xff]  ;;  %v330_v8 = vld [vmem:[%s9872_s19 + $0x110] sm:$0xff] }
  0x4e   : > { %2429 = vmatpush1.bf16.msra.mxu0 %v9273_v23  ;;  %v332_v12 = vld [vmem:[%s9872_s19 + $0x120] sm:$0xff] }
  0x4f   : > { %9156 = vset.pattern.permute.xlu1 %v13840_v1  ;;  %2430 = vmatprep.subr.bf16.mxu0 %v9274_v24 }
  0x50   : > { %839 = vperm.xlu1 %9156, %v298_v3  }
  0x51   : > { %1401 = vperm.xlu0 %9153, %v9892_v18  }
  0x52   : > { %2431 = vmatpush1.bf16.msra.mxu0 %v9276_v25 }
  0x53   : > { %2432 = vmatprep.subr.bf16.mxu0 %v9277_v26 }
  0x54   : > { %843 = vperm.xlu1 %9156, %v299_v19  }
  0x55   : > { %1409 = vperm.xlu0 %9153, %v9898_v22  }
  0x56   : > { %2433 = vmatpush1.bf16.msra.mxu0 %v9279_v27 }
  0x57   : > { %2434 = vmatprep.subr.bf16.mxu0 %v9280_v28 }
  0x58   : > { %9157 = vset.pattern.permute.xlu1 %v13838_v0 }
  0x59   : > { %9172 = vset.pattern.permute.xlu0 %v13842_v14  ;;  %1373 = vperm.xlu1 %9157, %v299_v19  }
  0x5a   : > { %365 = vperm.xlu0 %9172, %v296_v2   ;;  %2435 = vmatpush1.bf16.msra.mxu0 %v9282_v29  ;;  %v9999_v2 = vld [vmem:[%s9872_s19 + $0xf0] sm:$0xff] }
  0x5b   : > { %2436 = vmatprep.subr.bf16.mxu0 %v9283_v30 }
  0x5d   : > { %9158 = vset.pattern.permute.xlu1 %v13842_v14 }
  0x5e   : > { %370 = vperm.xlu0 %9172, %v297_v4   ;;  %385 = vperm.xlu1 %9158, %v9878_v6  }
  0x5f   : > { %2437 = vmatpush1.bf16.msra.mxu0 %v9285_v32 }
  0x60   : > { %2438 = vmatprep.subr.bf16.mxu0 %v9286_v34 }
  0x62   : > { %380 = vperm.xlu0 %9172, %v299_v19   ;;  %9159 = vset.pattern.permute.xlu1 %v13840_v1 }
  0x63   : > { %847 = vperm.xlu1 %9159, %v9878_v6   ;;  %2439 = vmatpush1.bf16.msra.mxu0 %v9288_v35 }
  0x64   : > { %2440 = vmatprep.subr.bf16.mxu0 %v9289_v36 }
  0x66   : > { %390 = vperm.xlu0 %9172, %v301_v31  }
  0x67   : > { %851 = vperm.xlu1 %9159, %v301_v31   ;;  %2441 = vmatpush1.bf16.msra.mxu0 %v9291_v38 }
  0x68   : > { %2442 = vmatprep.subr.bf16.mxu0 %v9292_v39 }
  0x6a   : > { %400 = vperm.xlu0 %9172, %v303_v33  }
  0x6b   : > { %9160 = vset.pattern.permute.xlu1 %v13838_v0  ;;  %2443 = vmatpush1.bf16.msra.mxu0 %v9294_v41 }
  0x6c   : > { %1381 = vperm.xlu1 %9160, %v301_v31   ;;  %2444 = vmatprep.subr.bf16.mxu0 %v9295_v42 }
  0x6e   : > { %410 = vperm.xlu0 %9172, %v305_v37  }
  0x6f   : > { %2445 = vmatpush1.bf16.msra.mxu0 %v9297_v44 }
  0x70   : > { %9161 = vset.pattern.permute.xlu1 %v13842_v14  ;;  %2446 = vmatprep.subr.bf16.mxu0 %v9298_v45 }
  0x71   : > { %395 = vperm.xlu1 %9161, %v9883_v11  }
  0x72   : > { %420 = vperm.xlu0 %9172, %v9912_v40  }
  0x73   : > { %2447 = vmatpush1.bf16.msra.mxu0 %v9300_v47  ;;  %v361_v47 = vld [vmem:[%s13831_s4 + $0x8] sm:$0xff] }
  0x74   : > { %2448 = vmatprep.subr.bf16.mxu0 %v9301_v48 }
  0x75   : > { %9162 = vset.pattern.permute.xlu1 %v13840_v1 }
  0x76   : > { %855 = vperm.xlu1 %9162, %v9883_v11   ;;  %430 = vperm.xlu0 %9172, %v9917_v43  }
  0x77   : > { %2449 = vmatpush1.bf16.msra.mxu0 %v9303_v50 }
  0x7a   : > { %859 = vperm.xlu1 %9162, %v303_v33   ;;  %440 = vperm.xlu0 %9172, %v9922_v46  }
  0x7e   : > { %9163 = vset.pattern.permute.xlu1 %v13838_v0  ;;  %450 = vperm.xlu0 %9172, %v9927_v49  }
  0x7f   : > { %1389 = vperm.xlu1 %9163, %v303_v33  }
  0x82   : > { %460 = vperm.xlu0 %9172, %v9931_v51  }
  0x83   : > { %9164 = vset.pattern.permute.xlu1 %v13842_v14 }
  0x84   : > { %405 = vperm.xlu1 %9164, %v9888_v15  }
  0x86   : > { %470 = vperm.xlu0 %9172, %v9936_v52  }
  0x88   : > { %9165 = vset.pattern.permute.xlu1 %v13840_v1 }
  0x89   : > { %863 = vperm.xlu1 %9165, %v9888_v15   ;;  %v10022_v15 = vshrl.u32 %v684_v10, 7 }
  0x8a   : > { %480 = vperm.xlu0 %9172, %v9942_v53  }
  0x8b   : > { %14101 = vst [vmem:[#allocation15_spill] sm:$0xff] %v10022_v15  ;;  %v10036_v19 = vsub.s32 1, %v10022_v15  ;;  %v10039_v20 = vsub.s32 4, %v10022_v15  ;;  %v10042_v21 = vsub.s32 5, %v10022_v15  ;;  %v10051_v24 = vsub.s32 2, %v10022_v15 }
  0x8c   : > { %v10054_v25 = vsub.s32 0, %v10022_v15  ;;  %v10061_v28 = vsub.s32 6, %v10022_v15  ;;  %v9396_v15 = vld [vmem:[#allocation2 + $0x2e4] ss:$8 sps:$4 sm:$0xff]  }
  0x8d   : > { %867 = vperm.xlu1 %9165, %v305_v37   ;;  %14104 = vst [vmem:[#allocation18_spill] sm:$0xff] %v10039_v20  ;;  %14105 = vst [vmem:[#allocation19_spill] sm:$0xff] %v10042_v21 }
  0x8e   : > { %490 = vperm.xlu0 %9172, %v9948_v54   ;;  %14108 = vst [vmem:[#allocation22_spill] sm:$0xff] %v10061_v28 }
  0x91   : > { %9166 = vset.pattern.permute.xlu1 %v13838_v0 }
  0x92   : > { %1397 = vperm.xlu1 %9166, %v305_v37   ;;  %500 = vperm.xlu0 %9172, %v323_v55  }
  0x96   : > { %9167 = vset.pattern.permute.xlu1 %v13842_v14  ;;  %9193 = vset.pattern.permute.xlu0 %v13838_v0 }
  0x97   : > { %415 = vperm.xlu1 %9167, %v9892_v18   ;;  %1417 = vperm.xlu0 %9193, %v310_v56  }
  0x9b   : > { %9168 = vset.pattern.permute.xlu1 %v13840_v1  ;;  %1425 = vperm.xlu0 %9193, %v9959_v57  }
  0x9c   : > { %871 = vperm.xlu1 %9168, %v9892_v18  }
  0x9f   : > { %1433 = vperm.xlu0 %9193, %v9965_v58  }
  0xa0   : > { %875 = vperm.xlu1 %9168, %v9912_v40  }
  0xa3   : > { %1441 = vperm.xlu0 %9193, %v9970_v59  }
  0xa4   : > { %9169 = vset.pattern.permute.xlu1 %v13838_v0 }
  0xa5   : > { %1405 = vperm.xlu1 %9169, %v9912_v40  }
  0xa7   : > { %1449 = vperm.xlu0 %9193, %v9976_v60  }
  0xa9   : > { %9170 = vset.pattern.permute.xlu1 %v13842_v14 }
  0xaa   : > { %425 = vperm.xlu1 %9170, %v9898_v22  }
  0xab   : > { %1457 = vperm.xlu0 %9193, %v9982_v61  }
  0xae   : > { %9171 = vset.pattern.permute.xlu1 %v13840_v1 }
  0xaf   : > { %879 = vperm.xlu1 %9171, %v9898_v22   ;;  %1465 = vperm.xlu0 %9193, %v9988_v62   ;;  %v362_v22 = vld [vmem:[%s13828_s1] sm:$0x77] }
  0xb0   : > { %v1089_v27 = vrot.slane %v362_v22, %v10036_v19  ;;  %v691_v29 = vrot.slane %v362_v22, %v10039_v20  ;;  %v1093_v30 = vrot.slane %v362_v22, %v10042_v21  ;;  %v1619_v32 = vrot.slane %v362_v22, %v10051_v24 }
  0xb1   : > { %v687_v33 = vrot.slane %v362_v22, %v10054_v25  ;;  %v1623_v36 = vrot.slane %v362_v22, %v10061_v28 }
  0xb2   : > { %v10073_v35 = vrot.slane %v1089_v27, %v10036_v19  ;;  %v10077_v37 = vrot.slane %v691_v29, %v10054_v25  ;;  %v10080_v38 = vrot.slane %v1093_v30, %v10036_v19  ;;  %v10086_v40 = vrot.slane %v1619_v32, %v10051_v24 }
  0xb3   : > { %883 = vperm.xlu1 %9171, %v9917_v43   ;;  %1473 = vperm.xlu0 %9193, %v9993_v63   ;;  %v10089_v41 = vrot.slane %v687_v33, %v10054_v25  ;;  %v10096_v44 = vrot.slane %v1623_v36, %v10051_v24  ;;  %v10124_v27 = vrot.slane %v361_v47, %v10054_v25 }
  0xb7   : > { %9173 = vset.pattern.permute.xlu1 %v13838_v0  ;;  %1481 = vperm.xlu0 %9193, %v9999_v2  }
  0xb8   : > { %1413 = vperm.xlu1 %9173, %v9917_v43  }
  0xbb   : > { %1489 = vperm.xlu0 %9193, %v328_v5  }
  0xbc   : > { %9174 = vset.pattern.permute.xlu1 %v13842_v14  ;;  %v10003_v3 = vpop.permute.xlu1 %831  ;;  %v10005_v4 = vpop.permute.xlu0 %1361 }
  0xbd   : > { %14094 = vst [vmem:[#allocation8_spill] sm:$0xff] %v10003_v3  ;;  %14095 = vst [vmem:[#allocation9_spill] sm:$0xff] %v10005_v4  ;;  %435 = vperm.xlu1 %9174, %v310_v56   ;;  %v1104_v43 = vmul.f32 %v10073_v35, %v10003_v3  ;;  %v1634_v48 = vmul.f32 %v10086_v40, %v10005_v4  ;;  %v1635_v10 = vmul.f32 %v10096_v44, %v10005_v4 }
  0xbf   : > { %1497 = vperm.xlu0 %9193, %v330_v8  }
  0xc0   : > { %v10008_v6 = vpop.permute.xlu1 %835  ;;  %v10010_v7 = vpop.permute.xlu0 %1369 }
  0xc1   : > { %14096 = vst [vmem:[#allocation10_spill] sm:$0xff] %v10008_v6  ;;  %14097 = vst [vmem:[#allocation11_spill] sm:$0xff] %v10010_v7  ;;  %9175 = vset.pattern.permute.xlu1 %v13840_v1  ;;  %v1639_v5 = vmul.f32 %v10096_v44, %v10010_v7  ;;  %v1106_v30 = vmul.f32 %v10073_v35, %v10008_v6  ;;  %v1638_v32 = vmul.f32 %v10086_v40, %v10010_v7 }
  0xc2   : > { %887 = vperm.xlu1 %9175, %v310_v56   ;;  %v1105_v56 = vmul.f32 %v10080_v38, %v10003_v3 }
  0xc3   : > { %1505 = vperm.xlu0 %9193, %v332_v12  }
  0xc4   : > { %v10014_v9 = vpop.permute.xlu0 %1377 }
  0xc5   : > { %14098 = vst [vmem:[#allocation12_spill] sm:$0xff] %v10014_v9  ;;  %v10016_v11 = vpop.permute.xlu1 %1365 }
  0xc6   : > { %14099 = vst [vmem:[#allocation13_spill] sm:$0xff] %v10016_v11  ;;  %891 = vperm.xlu1 %9175, %v9922_v46  }
  0xc7   : > { %9210 = vset.pattern.permute.xlu0 %v13842_v14 }
  0xc8   : > { %v10020_v13 = vpop.permute.xlu0 %1385  ;;  %510 = vperm.xlu0 %9210, %v10030_v17  }
  0xc9   : > { %14100 = vst [vmem:[#allocation14_spill] sm:$0xff] %v10020_v13 }
  0xca   : > { %9176 = vset.pattern.permute.xlu1 %v13838_v0  ;;  %v10025_v16 = vpop.permute.xlu1 %375 }
  0xcb   : > { %14102 = vst [vmem:[#allocation16_spill] sm:$0xff] %v10025_v16  ;;  %1421 = vperm.xlu1 %9176, %v9922_v46   ;;  %v707_v45 = vmul.f32 %v10077_v37, %v10025_v16  ;;  %v706_v33 = vmul.f32 %v10089_v41, %v10025_v16 }
  0xcc   : > { %v10032_v18 = vpop.permute.xlu0 %1393 }
  0xcd   : > { %14103 = vst [vmem:[#allocation17_spill] sm:$0xff] %v10032_v18 }
  0xcf   : > { %9177 = vset.pattern.permute.xlu1 %v13842_v14  ;;  %v10048_v23 = vpop.permute.xlu1 %839 }
  0xd0   : > { %14106 = vst [vmem:[#allocation20_spill] sm:$0xff] %v10048_v23  ;;  %445 = vperm.xlu1 %9177, %v9959_v57   ;;  %v10057_v26 = vpop.permute.xlu0 %1401  ;;  %v1109_v39 = vmul.f32 %v10080_v38, %v10048_v23  ;;  %v1108_v8 = vmul.f32 %v10073_v35, %v10048_v23 }
  0xd1   : > { %14107 = vst [vmem:[#allocation21_spill] sm:$0xff] %v10057_v26 }
  0xd2   : > { %v1237_v12 = vadd.f32 %v1109_v39, %v707_v45  ;;  %v1236_v14 = vadd.f32 %v1108_v8, %v706_v33 }
  0xd3   : > { %v10065_v31 = vpop.permute.xlu1 %843 }
  0xd4   : > { %14109 = vst [vmem:[#allocation23_spill] sm:$0xff] %v10065_v31  ;;  %9178 = vset.pattern.permute.xlu1 %v13840_v1  ;;  %v10070_v34 = vpop.permute.xlu0 %1409 }
  0xd5   : > { %14110 = vst [vmem:[#allocation24_spill] sm:$0xff] %v10070_v34  ;;  %895 = vperm.xlu1 %9178, %v9959_v57   ;;  %v360_v57 = vld [vmem:[%s13831_s4] sm:$0xff] }
  0xd6   : > { %v10138_v45 = vrot.slane %v360_v57, %v10054_v25  ;;  %v1767_v57 = vadd.f32 %v1639_v5, %v1237_v12 }
  0xd8   : > { %v10091_v42 = vpop.permute.xlu1 %1373 }
  0xd9   : > { %14111 = vst [vmem:[#allocation25_spill] sm:$0xff] %v10091_v42  ;;  %v10100_v46 = vpop.permute.xlu0 %365  ;;  %899 = vperm.xlu1 %9178, %v9927_v49  }
  0xda   : > { %14112 = vst [vmem:[#allocation26_spill] sm:$0xff] %v10100_v46  ;;  %v702_v50 = vmul.f32 %v10089_v41, %v10100_v46  ;;  %v703_v55 = vmul.f32 %v10077_v37, %v10100_v46  ;;  %v1636_v46 = vmul.f32 %v10086_v40, %v10016_v11 }
  0xdc   : > { %v1233_v22 = vadd.f32 %v1105_v56, %v703_v55  ;;  %v1232_v29 = vadd.f32 %v1104_v43, %v702_v50  ;;  %v1643_v43 = vmul.f32 %v10096_v44, %v10014_v9  ;;  %v1107_v55 = vmul.f32 %v10080_v38, %v10008_v6  ;;  %v10150_v56 = vld [vmem:[%s9872_s19 + $0xf8] sm:$0xff] }
  0xdd   : > { %v10132_v36 = vpop.permute.xlu0 %370  ;;  %9179 = vset.pattern.permute.xlu1 %v13838_v0  ;;  %v10135_v39 = vpop.permute.xlu1 %385  ;;  %520 = vperm.xlu0 %9210, %v10150_v56   ;;  %v1111_v6 = vmul.f32 %v10080_v38, %v10065_v31 }
  0xde   : > { %14113 = vst [vmem:[#allocation27_spill] sm:$0xff] %v10132_v36  ;;  %14114 = vst [vmem:[#allocation28_spill] sm:$0xff] %v10135_v39  ;;  %v704_v47 = vmul.f32 %v10089_v41, %v10132_v36  ;;  %1429 = vperm.xlu1 %9179, %v9927_v49   ;;  %v705_v50 = vmul.f32 %v10077_v37, %v10132_v36  ;;  %v1763_v0 = vadd.f32 %v1635_v10, %v1233_v22  ;;  %v14116_v22 = vmov 0  }
  0xdf   : > { %v1762_v1 = vadd.f32 %v1634_v48, %v1232_v29  ;;  %v1637_v49 = vmul.f32 %v10096_v44, %v10016_v11  ;;  %v1110_v36 = vmul.f32 %v10073_v35, %v10065_v31 }
  0xe0   : > { %v1235_v7 = vadd.f32 %v1107_v55, %v705_v50  ;;  %v1234_v16 = vadd.f32 %v1106_v30, %v704_v47  ;;  %v1899_v48 = vadd.f32 %v10124_v27, %v1763_v0  ;;  %v711_v47 = vmul.f32 %v10077_v37, %v10135_v39 }
  0xe1   : > { %v10161_v10 = vpop.permute.xlu0 %380  ;;  %v1898_v5 = vadd.f32 %v10138_v45, %v1762_v1  ;;  %v1903_v1 = vadd.f32 %v10124_v27, %v1767_v57  ;;  %v1766_v50 = vadd.f32 %v1638_v32, %v1236_v14 }
  0xe2   : > { %14115 = vst [vmem:[#allocation29_spill] sm:$0xff] %v10161_v10  ;;  %v708_v8 = vmul.f32 %v10089_v41, %v10161_v10  ;;  %v709_v12 = vmul.f32 %v10077_v37, %v10161_v10  ;;  %9180 = vset.pattern.permute.xlu1 %v14116_v22  ;;  %v10170_v29 = vpop.permute.xlu1 %847  ;;  %v1765_v30 = vadd.f32 %v1637_v49, %v1235_v7  ;;  %v2027_v4 = vmax.f32 %v1899_v48, 0.0 }
  0xe3   : > { %14117 = vst [vmem:[#allocation30_spill] sm:$0xff] %v10170_v29  ;;  %v1764_v33 = vadd.f32 %v1636_v46, %v1234_v16  ;;  %v1113_v0 = vmul.f32 %v10080_v38, %v10170_v29  ;;  %455 = vperm.xlu1 %9180, %v9965_v58   ;;  %v1640_v7 = vmul.f32 %v10086_v40, %v10091_v42  ;;  %v2026_v32 = vmax.f32 %v1898_v5, 0.0 }
  0xe4   : > { %v1901_v55 = vadd.f32 %v10124_v27, %v1765_v30  ;;  %v1239_v31 = vadd.f32 %v1111_v6, %v709_v12  ;;  %v1238_v11 = vadd.f32 %v1110_v36, %v708_v8  ;;  %v1641_v16 = vmul.f32 %v10096_v44, %v10091_v42 }
  0xe5   : > { %v1900_v10 = vadd.f32 %v10138_v45, %v1764_v33  ;;  %v1112_v46 = vmul.f32 %v10073_v35, %v10170_v29  ;;  %v10186_v49 = vpop.permute.xlu0 %390  ;;  %v1241_v33 = vadd.f32 %v1113_v0, %v711_v47  ;;  %v14120_v8 = vmov 1  }
  0xe6   : > { %14118 = vst [vmem:[#allocation31_spill] sm:$0xff] %v10186_v49  ;;  %v10188_v57 = vpop.permute.xlu1 %851  ;;  %v2029_v14 = vmax.f32 %v1901_v55, 0.0  ;;  %v712_v6 = vmul.f32 %v10089_v41, %v10186_v49  ;;  %v713_v36 = vmul.f32 %v10077_v37, %v10186_v49  ;;  %v1769_v12 = vadd.f32 %v1641_v16, %v1239_v31 }
  0xe7   : > { %14119 = vst [vmem:[#allocation32_spill] sm:$0xff] %v10188_v57  ;;  %v2028_v30 = vmax.f32 %v1900_v10, 0.0  ;;  %9181 = vset.pattern.permute.xlu1 %v14120_v8  ;;  %v1768_v42 = vadd.f32 %v1640_v7, %v1238_v11  ;;  %v1114_v29 = vmul.f32 %v10073_v35, %v10188_v57  ;;  %v1115_v48 = vmul.f32 %v10080_v38, %v10188_v57 }
  0xe8   : > { %903 = vperm.xlu1 %9181, %v9965_v58   ;;  %v2155_v10 = vpack.c.bf16 %v2029_v14, %v2027_v4  ;;  %v710_v47 = vmul.f32 %v10089_v41, %v10135_v39  ;;  %v1905_v0 = vadd.f32 %v10124_v27, %v1769_v12  ;;  %v1642_v11 = vmul.f32 %v10086_v40, %v10014_v9 }
  0xe9   : > { %v2154_v5 = vpack.c.bf16 %v2028_v30, %v2026_v32  ;;  %v1904_v55 = vadd.f32 %v10138_v45, %v1768_v42  ;;  %v1771_v31 = vadd.f32 %v1643_v43, %v1241_v33  ;;  %v2031_v16 = vmax.f32 %v1903_v1, 0.0 }
  0xea   : > { %2450 = vmatprep.mubr.bf16.mxu0 %v2155_v10  ;;  %v2033_v57 = vmax.f32 %v1905_v0, 0.0  ;;  %v1902_v58 = vadd.f32 %v10138_v45, %v1766_v50  ;;  %v1240_v4 = vadd.f32 %v1112_v46, %v710_v47  ;;  %v1243_v42 = vadd.f32 %v1115_v48, %v713_v36 }
  0xeb   : > { %2451 = vmatmul.mubr.bf16.vlgmr.msra.gmra.mrb[0].mxu0 %v2154_v5  ;;  %v10206_v7 = vpop.permute.xlu1 %1381  ;;  %v1242_v30 = vadd.f32 %v1114_v29, %v712_v6  ;;  %v2032_v33 = vmax.f32 %v1904_v55, 0.0  ;;  %v1907_v1 = vadd.f32 %v10124_v27, %v1771_v31  ;;  %v14122_v5 = vmov 2  }
  0xec   : > { %14121 = vst [vmem:[#allocation33_spill] sm:$0xff] %v10206_v7  ;;  %v1644_v14 = vmul.f32 %v10086_v40, %v10206_v7  ;;  %v1645_v32 = vmul.f32 %v10096_v44, %v10206_v7  ;;  %907 = vperm.xlu1 %9181, %v9931_v51   ;;  %v2157_v43 = vpack.c.bf16 %v2033_v57, %v2031_v16  ;;  %v2030_v50 = vmax.f32 %v1902_v58, 0.0  ;;  %v10222_v57 = vld [vmem:[%s9872_s19 + $0x108] sm:$0xff] }
  0xed   : > { %v1770_v46 = vadd.f32 %v1642_v11, %v1240_v4  ;;  %v2035_v6 = vmax.f32 %v1907_v1, 0.0  ;;  %530 = vperm.xlu0 %9210, %v10222_v57  }
  0xee   : > { %v1773_v12 = vadd.f32 %v1645_v32, %v1243_v42  ;;  %v1772_v10 = vadd.f32 %v1644_v14, %v1242_v30  ;;  %2460 = vmatprep.mubr.bf16.mxu0 %v2157_v43  ;;  %v2156_v36 = vpack.c.bf16 %v2032_v33, %v2030_v50  ;;  %v10238_v32 = vpop.permute.xlu0 %400  ;;  %v1646_v30 = vmul.f32 %v10086_v40, %v10020_v13 }
  0xef   : > { %v1906_v55 = vadd.f32 %v10138_v45, %v1770_v46  ;;  %14125 = vst [vmem:[#allocation36_spill] sm:$0xff] %v10238_v32  ;;  %v1647_v43 = vmul.f32 %v10096_v44, %v10020_v13  ;;  %v716_v50 = vmul.f32 %v10089_v41, %v10238_v32  ;;  %v717_v46 = vmul.f32 %v10077_v37, %v10238_v32  ;;  %v9388_v13 = vld [vmem:[#allocation2 + $0x2c0] ss:$8 sps:$4 sm:$0xff]  }
  0xf0   : > { %9182 = vset.pattern.permute.xlu1 %v14122_v5  ;;  %v10216_v47 = vpop.permute.xlu1 %395  ;;  %v1909_v0 = vadd.f32 %v10124_v27, %v1773_v12  ;;  %v1908_v29 = vadd.f32 %v10138_v45, %v1772_v10 }
  0xf1   : > { %14123 = vst [vmem:[#allocation34_spill] sm:$0xff] %v10216_v47  ;;  %1437 = vperm.xlu1 %9182, %v9931_v51   ;;  %v714_v4 = vmul.f32 %v10089_v41, %v10216_v47  ;;  %v715_v14 = vmul.f32 %v10077_v37, %v10216_v47  ;;  %v2034_v42 = vmax.f32 %v1906_v55, 0.0  ;;  %v9325_v47 = vld [vmem:[#allocation2 + $0x174] ss:$8 sps:$4 sm:$0xff]  }
  0xf2   : > { %v2037_v48 = vmax.f32 %v1909_v0, 0.0  ;;  %v2036_v16 = vmax.f32 %v1908_v29, 0.0 }
  0xf3   : > { %2461 = vmatmul.mubr.bf16.gmra.mrb[4].mxu0 %v2156_v36 }
  0xf4   : > { %v2159_v11 = vpack.c.bf16 %v2037_v48, %v2035_v6  ;;  %v2158_v12 = vpack.c.bf16 %v2036_v16, %v2034_v42 }
  0xf5   : > { %9183 = vset.pattern.permute.xlu1 %v14116_v22  ;;  %v10227_v31 = vpop.permute.xlu1 %855 }
  0xf6   : > { %14124 = vst [vmem:[#allocation35_spill] sm:$0xff] %v10227_v31  ;;  %v1116_v51 = vmul.f32 %v10073_v35, %v10227_v31  ;;  %v1117_v58 = vmul.f32 %v10080_v38, %v10227_v31  ;;  %465 = vperm.xlu1 %9183, %v9970_v59   ;;  %2470 = vmatprep.mubr.bf16.mxu0 %v2159_v11  ;;  %v9342_v31 = vld [vmem:[#allocation2 + $0x1c0] ss:$8 sps:$4 sm:$0xff]  }
  0xf8   : > { %v1245_v1 = vadd.f32 %v1117_v58, %v715_v14  ;;  %v1244_v10 = vadd.f32 %v1116_v51, %v714_v4 }
  0xf9   : > { %v10244_v33 = vpop.permute.xlu1 %859 }
  0xfa   : > { %14126 = vst [vmem:[#allocation37_spill] sm:$0xff] %v10244_v33  ;;  %9184 = vset.pattern.permute.xlu1 %v14120_v8  ;;  %v1118_v0 = vmul.f32 %v10073_v35, %v10244_v33  ;;  %v1119_v36 = vmul.f32 %v10080_v38, %v10244_v33  ;;  %v1775_v29 = vadd.f32 %v1647_v43, %v1245_v1 }
  0xfb   : > { %911 = vperm.xlu1 %9184, %v9970_v59   ;;  %2471 = vmatmul.mubr.bf16.gmra.mrb[8].mxu0 %v2158_v12  ;;  %v1774_v6 = vadd.f32 %v1646_v30, %v1244_v10  ;;  %v10272_v12 = vld [vmem:[%s9872_s19 + $0x118] sm:$0xff] }
  0xfc   : > { %v1247_v16 = vadd.f32 %v1119_v36, %v717_v46  ;;  %v1246_v51 = vadd.f32 %v1118_v0, %v716_v50  ;;  %v1911_v4 = vadd.f32 %v10124_v27, %v1775_v29  ;;  %540 = vperm.xlu0 %9210, %v10272_v12  }
  0xfd   : > { %v1910_v14 = vadd.f32 %v10138_v45, %v1774_v6  ;;  %v10278_v6 = vpop.permute.xlu0 %410 }
  0xfe   : > { %v10256_v48 = vpop.permute.xlu1 %1389  ;;  %v2039_v1 = vmax.f32 %v1911_v4, 0.0  ;;  %14130 = vst [vmem:[#allocation41_spill] sm:$0xff] %v10278_v6  ;;  %v1651_v4 = vmul.f32 %v10096_v44, %v10032_v18 }
  0xff   : > { %14127 = vst [vmem:[#allocation38_spill] sm:$0xff] %v10256_v48  ;;  %v1648_v55 = vmul.f32 %v10086_v40, %v10256_v48  ;;  %v1649_v11 = vmul.f32 %v10096_v44, %v10256_v48  ;;  %915 = vperm.xlu1 %9184, %v9936_v52   ;;  %v2038_v50 = vmax.f32 %v1910_v14, 0.0  ;;  %v9307_v14 = vld [vmem:[#allocation2 + $0x114] ss:$8 sps:$4 sm:$0xff]  }
 0x101   : > { %v1777_v58 = vadd.f32 %v1649_v11, %v1247_v16  ;;  %v1776_v59 = vadd.f32 %v1648_v55, %v1246_v51  ;;  %v9304_v55 = vld [vmem:[#allocation2 + $0x104] ss:$8 sps:$4 sm:$0xff]   ;;  %v9306_v51 = vld [vmem:[#allocation2 + $0x100] ss:$8 sps:$4 sm:$0xff]  }
 0x102   : > { %3164 = vmatprep.subr.bf16.mxu1 %v9304_v55 }
 0x103   : > { %9185 = vset.pattern.permute.xlu1 %v14122_v5  ;;  %v10266_v42 = vpop.permute.xlu1 %405  ;;  %v1913_v30 = vadd.f32 %v10124_v27, %v1777_v58  ;;  %v1912_v43 = vadd.f32 %v10138_v45, %v1776_v59  ;;  %3165 = vmatpush1.bf16.msra.mxu1 %v9306_v51  ;;  %v9310_v51 = vld [vmem:[#allocation2 + $0x124] ss:$8 sps:$4 sm:$0xff]  }
 0x104   : > { %14128 = vst [vmem:[#allocation39_spill] sm:$0xff] %v10266_v42  ;;  %1445 = vperm.xlu1 %9185, %v9936_v52   ;;  %v719_v52 = vmul.f32 %v10077_v37, %v10266_v42  ;;  %v718_v58 = vmul.f32 %v10089_v41, %v10266_v42  ;;  %3166 = vmatprep.subr.bf16.mxu1 %v9307_v14  ;;  %v9312_v42 = vld [vmem:[#allocation2 + $0x120] ss:$8 sps:$4 sm:$0xff]  }
 0x105   : > { %v2041_v10 = vmax.f32 %v1913_v30, 0.0  ;;  %v2040_v46 = vmax.f32 %v1912_v43, 0.0  ;;  %v1650_v30 = vmul.f32 %v10086_v40, %v10032_v18 }
 0x107   : > { %v2161_v0 = vpack.c.bf16 %v2041_v10, %v2039_v1  ;;  %v2160_v36 = vpack.c.bf16 %v2040_v46, %v2038_v50  ;;  %v10295_v10 = vpop.permute.xlu0 %420  ;;  %v9309_v50 = vld [vmem:[#allocation2 + $0x110] ss:$8 sps:$4 sm:$0xff]   ;;  %v720_v46 = vmul.f32 %v10089_v41, %v10278_v6 }
 0x108   : > { %9186 = vset.pattern.permute.xlu1 %v14116_v22  ;;  %v10276_v29 = vpop.permute.xlu1 %863  ;;  %14132 = vst [vmem:[#allocation43_spill] sm:$0xff] %v10295_v10  ;;  %3167 = vmatpush1.bf16.msra.mxu1 %v9309_v50 }
 0x109   : > { %14129 = vst [vmem:[#allocation40_spill] sm:$0xff] %v10276_v29  ;;  %v1120_v11 = vmul.f32 %v10073_v35, %v10276_v29  ;;  %v1121_v16 = vmul.f32 %v10080_v38, %v10276_v29  ;;  %475 = vperm.xlu1 %9186, %v9976_v60   ;;  %2480 = vmatprep.mubr.bf16.mxu0 %v2161_v0 }
 0x10a   : > { %2481 = vmatmul.mubr.bf16.gmra.mrb[12].mxu0 %v2160_v36  ;;  %v721_v0 = vmul.f32 %v10077_v37, %v10278_v6  ;;  %3168 = vmatprep.subr.bf16.mxu1 %v9310_v51  ;;  %v9318_v51 = vld [vmem:[#allocation2 + $0x140] ss:$8 sps:$4 sm:$0xff]  }
 0x10b   : > { %v1249_v59 = vadd.f32 %v1121_v16, %v719_v52  ;;  %v1248_v1 = vadd.f32 %v1120_v11, %v718_v58  ;;  %v10308_v52 = vld [vmem:[%s9872_s19 + $0x128] sm:$0xff] }
 0x10c   : > { %v10293_v43 = vpop.permute.xlu1 %867  ;;  %550 = vperm.xlu0 %9210, %v10308_v52   ;;  %3169 = vmatpush1.bf16.msra.mxu1 %v9312_v42 }
 0x10d   : > { %14131 = vst [vmem:[#allocation42_spill] sm:$0xff] %v10293_v43  ;;  %9187 = vset.pattern.permute.xlu1 %v14120_v8  ;;  %v1122_v36 = vmul.f32 %v10073_v35, %v10293_v43  ;;  %v1123_v55 = vmul.f32 %v10080_v38, %v10293_v43  ;;  %v1779_v11 = vadd.f32 %v1651_v4, %v1249_v59  ;;  %v10318_v4 = vpop.permute.xlu0 %430  ;;  %v10321_v59 = vld [vmem:[%s9872_s19 + $0x138] sm:$0xff] }
 0x10e   : > { %919 = vperm.xlu1 %9187, %v9976_v60   ;;  %v1778_v16 = vadd.f32 %v1650_v30, %v1248_v1  ;;  %14134 = vst [vmem:[#allocation45_spill] sm:$0xff] %v10318_v4  ;;  %v9313_v30 = vld [vmem:[#allocation2 + $0x134] ss:$8 sps:$4 sm:$0xff]  }
 0x10f   : > { %v1251_v60 = vadd.f32 %v1123_v55, %v721_v0  ;;  %v1250_v6 = vadd.f32 %v1122_v36, %v720_v46  ;;  %v1915_v14 = vadd.f32 %v10124_v27, %v1779_v11  ;;  %3170 = vmatprep.subr.bf16.mxu1 %v9313_v30 }
 0x110   : > { %v1914_v48 = vadd.f32 %v10138_v45, %v1778_v16  ;;  %560 = vperm.xlu0 %9210, %v10321_v59  }
 0x111   : > { %v10311_v58 = vpop.permute.xlu1 %1397  ;;  %v10335_v16 = vpop.permute.xlu0 %440 }
 0x112   : > { %14133 = vst [vmem:[#allocation44_spill] sm:$0xff] %v10311_v58  ;;  %v1652_v29 = vmul.f32 %v10086_v40, %v10311_v58  ;;  %v1653_v43 = vmul.f32 %v10096_v44, %v10311_v58  ;;  %923 = vperm.xlu1 %9187, %v9942_v53   ;;  %v9315_v58 = vld [vmem:[#allocation2 + $0x130] ss:$8 sps:$4 sm:$0xff]   ;;  %v2042_v55 = vmax.f32 %v1914_v48, 0.0  ;;  %14136 = vst [vmem:[#allocation47_spill] sm:$0xff] %v10335_v16 }
 0x113   : > { %3171 = vmatpush1.bf16.msra.mxu1 %v9315_v58  ;;  %v9319_v58 = vld [vmem:[#allocation2 + $0x154] ss:$8 sps:$4 sm:$0xff]  }
 0x114   : > { %v1781_v1 = vadd.f32 %v1653_v43, %v1251_v60  ;;  %v1780_v50 = vadd.f32 %v1652_v29, %v1250_v6  ;;  %v10333_v43 = vld [vmem:[%s9872_s19 + $0x148] sm:$0xff]  ;;  %v2043_v6 = vmax.f32 %v1915_v14, 0.0 }
 0x115   : > { %v9316_v29 = vld [vmem:[#allocation2 + $0x144] ss:$8 sps:$4 sm:$0xff]   ;;  %570 = vperm.xlu0 %9210, %v10333_v43  }
 0x116   : > { %9188 = vset.pattern.permute.xlu1 %v14122_v5  ;;  %v10327_v46 = vpop.permute.xlu1 %415  ;;  %v1917_v0 = vadd.f32 %v10124_v27, %v1781_v1  ;;  %v1916_v36 = vadd.f32 %v10138_v45, %v1780_v50  ;;  %3172 = vmatprep.subr.bf16.mxu1 %v9316_v29  ;;  %v339_v1 = vld [vmem:[%s9872_s19 + $0x158] sm:$0xff]  ;;  %v10351_v29 = vpop.permute.xlu0 %450 }
 0x117   : > { %14135 = vst [vmem:[#allocation46_spill] sm:$0xff] %v10327_v46  ;;  %1453 = vperm.xlu1 %9188, %v9942_v53   ;;  %v722_v50 = vmul.f32 %v10089_v41, %v10327_v46  ;;  %3173 = vmatpush1.bf16.msra.mxu1 %v9318_v51  ;;  %14138 = vst [vmem:[#allocation49_spill] sm:$0xff] %v10351_v29  ;;  %v725_v51 = vmul.f32 %v10077_v37, %v10295_v10 }
 0x118   : > { %v2045_v42 = vmax.f32 %v1917_v0, 0.0  ;;  %v2044_v11 = vmax.f32 %v1916_v36, 0.0  ;;  %v723_v0 = vmul.f32 %v10077_v37, %v10327_v46  ;;  %v9321_v36 = vld [vmem:[#allocation2 + $0x150] ss:$8 sps:$4 sm:$0xff]   ;;  %3174 = vmatprep.subr.bf16.mxu1 %v9319_v58  ;;  %v724_v58 = vmul.f32 %v10089_v41, %v10295_v10 }
 0x119   : > { %580 = vperm.xlu0 %9210, %v339_v1   ;;  %v9322_v1 = vld [vmem:[#allocation2 + $0x164] ss:$8 sps:$4 sm:$0xff]  }
 0x11a   : > { %v2163_v60 = vpack.c.bf16 %v2045_v42, %v2043_v6  ;;  %v2162_v30 = vpack.c.bf16 %v2044_v11, %v2042_v55  ;;  %v1654_v6 = vmul.f32 %v10086_v40, %v10057_v26  ;;  %v1655_v42 = vmul.f32 %v10096_v44, %v10057_v26  ;;  %v10373_v32 = vpop.permute.xlu0 %460 }
 0x11b   : > { %9189 = vset.pattern.permute.xlu1 %v14116_v22  ;;  %v10339_v53 = vpop.permute.xlu1 %871  ;;  %3175 = vmatpush1.bf16.msra.mxu1 %v9321_v36  ;;  %14141 = vst [vmem:[#allocation52_spill] sm:$0xff] %v10373_v32 }
 0x11c   : > { %14137 = vst [vmem:[#allocation48_spill] sm:$0xff] %v10339_v53  ;;  %v1124_v14 = vmul.f32 %v10073_v35, %v10339_v53  ;;  %v1125_v48 = vmul.f32 %v10080_v38, %v10339_v53  ;;  %485 = vperm.xlu1 %9189, %v9982_v61   ;;  %2490 = vmatprep.mubr.bf16.mxu0 %v2163_v60  ;;  %v341_v53 = vld [vmem:[%s9872_s19 + $0x168] sm:$0xff] }
 0x11d   : > { %2491 = vmatmul.mubr.bf16.gmra.mrb[16].mxu0 %v2162_v30  ;;  %590 = vperm.xlu0 %9210, %v341_v53   ;;  %v9327_v53 = vld [vmem:[#allocation2 + $0x170] ss:$8 sps:$4 sm:$0xff]  }
 0x11e   : > { %v1253_v11 = vadd.f32 %v1125_v48, %v723_v0  ;;  %v1252_v60 = vadd.f32 %v1124_v14, %v722_v50  ;;  %v9324_v14 = vld [vmem:[#allocation2 + $0x160] ss:$8 sps:$4 sm:$0xff]   ;;  %3176 = vmatprep.subr.bf16.mxu1 %v9322_v1  ;;  %v343_v0 = vld [vmem:[%s9872_s19 + $0x178] sm:$0xff] }
 0x11f   : > { %v10357_v55 = vpop.permute.xlu1 %875  ;;  %3177 = vmatpush1.bf16.msra.mxu1 %v9324_v14  ;;  %v9330_v1 = vld [vmem:[#allocation2 + $0x180] ss:$8 sps:$4 sm:$0xff]  }
 0x120   : > { %14139 = vst [vmem:[#allocation50_spill] sm:$0xff] %v10357_v55  ;;  %v1127_v30 = vmul.f32 %v10080_v38, %v10357_v55  ;;  %9190 = vset.pattern.permute.xlu1 %v14120_v8  ;;  %v1126_v46 = vmul.f32 %v10073_v35, %v10357_v55  ;;  %v1783_v48 = vadd.f32 %v1655_v42, %v1253_v11 }
 0x121   : > { %927 = vperm.xlu1 %9190, %v9982_v61   ;;  %v1782_v50 = vadd.f32 %v1654_v6, %v1252_v60  ;;  %600 = vperm.xlu0 %9210, %v343_v0   ;;  %v9328_v60 = vld [vmem:[#allocation2 + $0x184] ss:$8 sps:$4 sm:$0xff]  }
 0x122   : > { %v1255_v7 = vadd.f32 %v1127_v30, %v725_v51  ;;  %v1254_v61 = vadd.f32 %v1126_v46, %v724_v58  ;;  %3178 = vmatprep.subr.bf16.mxu1 %v9325_v47  ;;  %v1919_v6 = vadd.f32 %v10124_v27, %v1783_v48  ;;  %v10388_v47 = vpop.permute.xlu0 %470 }
 0x123   : > { %v1918_v11 = vadd.f32 %v10138_v45, %v1782_v50  ;;  %3179 = vmatpush1.bf16.msra.mxu1 %v9327_v53  ;;  %14143 = vst [vmem:[#allocation54_spill] sm:$0xff] %v10388_v47 }
 0x124   : > { %v10371_v33 = vpop.permute.xlu1 %1405  ;;  %3180 = vmatprep.subr.bf16.mxu1 %v9328_v60 }
 0x125   : > { %14140 = vst [vmem:[#allocation51_spill] sm:$0xff] %v10371_v33  ;;  %v1656_v10 = vmul.f32 %v10086_v40, %v10371_v33  ;;  %v1657_v55 = vmul.f32 %v10096_v44, %v10371_v33  ;;  %931 = vperm.xlu1 %9190, %v9948_v54   ;;  %9225 = vset.pattern.permute.xlu0 %v14122_v5  ;;  %v2046_v14 = vmax.f32 %v1918_v11, 0.0 }
 0x126   : > { %v10407_v60 = vpop.permute.xlu0 %480 }
 0x127   : > { %v1785_v36 = vadd.f32 %v1657_v55, %v1255_v7  ;;  %v1784_v42 = vadd.f32 %v1656_v10, %v1254_v61  ;;  %v10391_v7 = vld [vmem:[%s9872_s19 + $0x130] sm:$0xff]  ;;  %v2047_v55 = vmax.f32 %v1919_v6, 0.0  ;;  %3181 = vmatpush1.bf16.msra.mxu1 %v9330_v1  ;;  %v9334_v6 = vld [vmem:[#allocation2 + $0x1a4] ss:$8 sps:$4 sm:$0xff]   ;;  %14145 = vst [vmem:[#allocation56_spill] sm:$0xff] %v10407_v60  ;;  %v1659_v1 = vmul.f32 %v10096_v44, %v10070_v34 }
 0x128   : > { %v9331_v10 = vld [vmem:[#allocation2 + $0x194] ss:$8 sps:$4 sm:$0xff]   ;;  %1513 = vperm.xlu0 %9225, %v10391_v7   ;;  %v9333_v61 = vld [vmem:[#allocation2 + $0x190] ss:$8 sps:$4 sm:$0xff]  }
 0x129   : > { %9191 = vset.pattern.permute.xlu1 %v14122_v5  ;;  %v10383_v51 = vpop.permute.xlu1 %425  ;;  %v1921_v30 = vadd.f32 %v10124_v27, %v1785_v36  ;;  %v1920_v46 = vadd.f32 %v10138_v45, %v1784_v42  ;;  %3182 = vmatprep.subr.bf16.mxu1 %v9331_v10 }
 0x12a   : > { %14142 = vst [vmem:[#allocation53_spill] sm:$0xff] %v10383_v51  ;;  %1461 = vperm.xlu1 %9191, %v9948_v54   ;;  %v726_v42 = vmul.f32 %v10089_v41, %v10383_v51  ;;  %v727_v11 = vmul.f32 %v10077_v37, %v10383_v51 }
 0x12b   : > { %v2049_v58 = vmax.f32 %v1921_v30, 0.0  ;;  %v2048_v48 = vmax.f32 %v1920_v46, 0.0  ;;  %3183 = vmatpush1.bf16.msra.mxu1 %v9333_v61  ;;  %v9336_v30 = vld [vmem:[#allocation2 + $0x1a0] ss:$8 sps:$4 sm:$0xff]   ;;  %v1658_v46 = vmul.f32 %v10086_v40, %v10070_v34  ;;  %v9337_v61 = vld [vmem:[#allocation2 + $0x1b4] ss:$8 sps:$4 sm:$0xff]  }
 0x12c   : > { %3184 = vmatprep.subr.bf16.mxu1 %v9334_v6  ;;  %v10428_v6 = vpop.permute.xlu0 %490 }
 0x12d   : > { %v2165_v50 = vpack.c.bf16 %v2049_v58, %v2047_v55  ;;  %v2164_v0 = vpack.c.bf16 %v2048_v48, %v2046_v14  ;;  %v728_v14 = vmul.f32 %v10089_v41, %v10318_v4  ;;  %v729_v48 = vmul.f32 %v10077_v37, %v10318_v4  ;;  %14147 = vst [vmem:[#allocation58_spill] sm:$0xff] %v10428_v6  ;;  %v9340_v4 = vld [vmem:[#allocation2 + $0x1c4] ss:$8 sps:$4 sm:$0xff]  }
 0x12e   : > { %9192 = vset.pattern.permute.xlu1 %v14116_v22  ;;  %v10396_v54 = vpop.permute.xlu1 %879 }
 0x12f   : > { %14144 = vst [vmem:[#allocation55_spill] sm:$0xff] %v10396_v54  ;;  %v1128_v53 = vmul.f32 %v10073_v35, %v10396_v54  ;;  %v1129_v36 = vmul.f32 %v10080_v38, %v10396_v54  ;;  %495 = vperm.xlu1 %9192, %v9988_v62   ;;  %2500 = vmatprep.mubr.bf16.mxu0 %v2165_v50 }
 0x130   : > { %2501 = vmatmul.mubr.bf16.gmra.mrb[20].mxu0 %v2164_v0  ;;  %3185 = vmatpush1.bf16.msra.mxu1 %v9336_v30  ;;  %v10443_v49 = vpop.permute.xlu0 %500 }
 0x131   : > { %v1257_v55 = vadd.f32 %v1129_v36, %v727_v11  ;;  %v1256_v58 = vadd.f32 %v1128_v53, %v726_v42  ;;  %v10426_v53 = vld [vmem:[%s9872_s19 + $0x140] sm:$0xff]  ;;  %v9339_v36 = vld [vmem:[#allocation2 + $0x1b0] ss:$8 sps:$4 sm:$0xff]   ;;  %3186 = vmatprep.subr.bf16.mxu1 %v9337_v61  ;;  %14150 = vst [vmem:[#allocation61_spill] sm:$0xff] %v10443_v49 }
 0x132   : > { %v10413_v10 = vpop.permute.xlu1 %883  ;;  %1521 = vperm.xlu0 %9225, %v10426_v53  }
 0x133   : > { %14146 = vst [vmem:[#allocation57_spill] sm:$0xff] %v10413_v10  ;;  %9194 = vset.pattern.permute.xlu1 %v14120_v8  ;;  %v1130_v50 = vmul.f32 %v10073_v35, %v10413_v10  ;;  %v1131_v0 = vmul.f32 %v10080_v38, %v10413_v10  ;;  %v1787_v42 = vadd.f32 %v1659_v1, %v1257_v55  ;;  %v9608_v10 = vld [vmem:[%s9872_s19 + $0xd8] sm:$0xff] }
 0x134   : > { %935 = vperm.xlu1 %9194, %v9988_v62   ;;  %v1786_v11 = vadd.f32 %v1658_v46, %v1256_v58  ;;  %3187 = vmatpush1.bf16.msra.mxu1 %v9339_v36 }
 0x135   : > { %v1259_v30 = vadd.f32 %v1131_v0, %v729_v48  ;;  %v1258_v33 = vadd.f32 %v1130_v50, %v728_v14  ;;  %v1923_v46 = vadd.f32 %v10124_v27, %v1787_v42  ;;  %3188 = vmatprep.subr.bf16.mxu1 %v9340_v4  ;;  %v9343_v48 = vld [vmem:[#allocation2 + $0x1d4] ss:$8 sps:$4 sm:$0xff]   ;;  %v9345_v50 = vld [vmem:[#allocation2 + $0x1d0] ss:$8 sps:$4 sm:$0xff]  }
 0x136   : > { %v1922_v58 = vadd.f32 %v10138_v45, %v1786_v11  ;;  %v9346_v11 = vld [vmem:[#allocation2 + $0x1e4] ss:$8 sps:$4 sm:$0xff]  }
 0x137   : > { %v10431_v51 = vpop.permute.xlu1 %1413  ;;  %v2051_v0 = vmax.f32 %v1923_v46, 0.0 }
 0x138   : > { %14148 = vst [vmem:[#allocation59_spill] sm:$0xff] %v10431_v51  ;;  %v1660_v54 = vmul.f32 %v10086_v40, %v10431_v51  ;;  %v1661_v62 = vmul.f32 %v10096_v44, %v10431_v51  ;;  %939 = vperm.xlu1 %9194, %v9608_v10   ;;  %3189 = vmatpush1.bf16.msra.mxu1 %v9342_v31 }
 0x139   : > { %3190 = vmatprep.subr.bf16.mxu1 %v9343_v48 }
 0x13a   : > { %v1789_v1 = vadd.f32 %v1661_v62, %v1259_v30  ;;  %v1788_v55 = vadd.f32 %v1660_v54, %v1258_v33  ;;  %v2050_v33 = vmax.f32 %v1922_v58, 0.0  ;;  %v9348_v30 = vld [vmem:[#allocation2 + $0x1e0] ss:$8 sps:$4 sm:$0xff]  }
 0x13c   : > { %9195 = vset.pattern.permute.xlu1 %v14122_v5  ;;  %v10441_v61 = vpop.permute.xlu1 %435  ;;  %v1925_v51 = vadd.f32 %v10124_v27, %v1789_v1  ;;  %v1924_v14 = vadd.f32 %v10138_v45, %v1788_v55  ;;  %3191 = vmatpush1.bf16.msra.mxu1 %v9345_v50  ;;  %v9349_v55 = vld [vmem:[#allocation2 + $0x1f4] ss:$8 sps:$4 sm:$0xff]  }
 0x13d   : > { %14149 = vst [vmem:[#allocation60_spill] sm:$0xff] %v10441_v61  ;;  %1469 = vperm.xlu1 %9195, %v9608_v10   ;;  %v730_v10 = vmul.f32 %v10089_v41, %v10441_v61  ;;  %v731_v46 = vmul.f32 %v10077_v37, %v10441_v61  ;;  %3192 = vmatprep.subr.bf16.mxu1 %v9346_v11  ;;  %v10478_v11 = vld [vmem:[%s9872_s19 + $0x150] sm:$0xff] }
 0x13e   : > { %v2053_v36 = vmax.f32 %v1925_v51, 0.0  ;;  %v2052_v54 = vmax.f32 %v1924_v14, 0.0  ;;  %v10455_v51 = vpop.permute.xlu0 %1417  ;;  %1529 = vperm.xlu0 %9225, %v10478_v11  }
 0x13f   : > { %14152 = vst [vmem:[#allocation63_spill] sm:$0xff] %v10455_v51  ;;  %v1662_v48 = vmul.f32 %v10086_v40, %v10455_v51  ;;  %v1663_v50 = vmul.f32 %v10096_v44, %v10455_v51 }
 0x140   : > { %v2167_v4 = vpack.c.bf16 %v2053_v36, %v2051_v0  ;;  %v2166_v42 = vpack.c.bf16 %v2052_v54, %v2050_v33  ;;  %3193 = vmatpush1.bf16.msra.mxu1 %v9348_v30  ;;  %v9351_v36 = vld [vmem:[#allocation2 + $0x1f0] ss:$8 sps:$4 sm:$0xff]   ;;  %v732_v33 = vmul.f32 %v10089_v41, %v10335_v16  ;;  %v733_v54 = vmul.f32 %v10077_v37, %v10335_v16 }
 0x141   : > { %9196 = vset.pattern.permute.xlu1 %v14116_v22  ;;  %v10448_v62 = vpop.permute.xlu1 %887  ;;  %3194 = vmatprep.subr.bf16.mxu1 %v9349_v55 }
 0x142   : > { %14151 = vst [vmem:[#allocation62_spill] sm:$0xff] %v10448_v62  ;;  %v1132_v1 = vmul.f32 %v10073_v35, %v10448_v62  ;;  %v1133_v31 = vmul.f32 %v10080_v38, %v10448_v62  ;;  %505 = vperm.xlu1 %9196, %v9993_v63   ;;  %2510 = vmatprep.mubr.bf16.mxu0 %v2167_v4 }
 0x143   : > { %2511 = vmatmul.mubr.bf16.gmra.mrb[24].mxu0 %v2166_v42 }
 0x144   : > { %v1260_v58 = vadd.f32 %v1132_v1, %v730_v10  ;;  %v1261_v14 = vadd.f32 %v1133_v31, %v731_v46  ;;  %3195 = vmatpush1.bf16.msra.mxu1 %v9351_v36 }
 0x145   : > { %v10465_v0 = vpop.permute.xlu1 %891 }
 0x146   : > { %14153 = vst [vmem:[#allocation64_spill] sm:$0xff] %v10465_v0  ;;  %9197 = vset.pattern.permute.xlu1 %v14120_v8  ;;  %v1134_v4 = vmul.f32 %v10073_v35, %v10465_v0  ;;  %v1135_v42 = vmul.f32 %v10080_v38, %v10465_v0  ;;  %v1790_v30 = vadd.f32 %v1662_v48, %v1260_v58 }
 0x147   : > { %943 = vperm.xlu1 %9197, %v9993_v63   ;;  %v1791_v1 = vadd.f32 %v1663_v50, %v1261_v14 }
 0x148   : > { %v1263_v0 = vadd.f32 %v1135_v42, %v733_v54  ;;  %v1262_v63 = vadd.f32 %v1134_v4, %v732_v33  ;;  %v1926_v58 = vadd.f32 %v10138_v45, %v1790_v30 }
 0x149   : > { %v1927_v61 = vadd.f32 %v10124_v27, %v1791_v1 }
 0x14a   : > { %v10481_v31 = vpop.permute.xlu1 %1421  ;;  %v2054_v54 = vmax.f32 %v1926_v58, 0.0  ;;  %v736_v58 = vmul.f32 %v10089_v41, %v10351_v29 }
 0x14b   : > { %14154 = vst [vmem:[#allocation65_spill] sm:$0xff] %v10481_v31  ;;  %v1664_v10 = vmul.f32 %v10086_v40, %v10481_v31  ;;  %v1665_v46 = vmul.f32 %v10096_v44, %v10481_v31  ;;  %947 = vperm.xlu1 %9197, %v10030_v17   ;;  %v2055_v36 = vmax.f32 %v1927_v61, 0.0 }
 0x14d   : > { %v1793_v55 = vadd.f32 %v1665_v46, %v1263_v0  ;;  %v1792_v62 = vadd.f32 %v1664_v10, %v1262_v63 }
 0x14f   : > { %9198 = vset.pattern.permute.xlu1 %v14122_v5  ;;  %v10491_v14 = vpop.permute.xlu1 %445  ;;  %v1929_v48 = vadd.f32 %v10124_v27, %v1793_v55  ;;  %v1928_v50 = vadd.f32 %v10138_v45, %v1792_v62 }
 0x150   : > { %14155 = vst [vmem:[#allocation66_spill] sm:$0xff] %v10491_v14  ;;  %1477 = vperm.xlu1 %9198, %v10030_v17   ;;  %v10504_v17 = vpop.permute.xlu0 %1425  ;;  %v734_v61 = vmul.f32 %v10089_v41, %v10491_v14  ;;  %v735_v62 = vmul.f32 %v10077_v37, %v10491_v14 }
 0x151   : > { %v2057_v31 = vmax.f32 %v1929_v48, 0.0  ;;  %v2056_v33 = vmax.f32 %v1928_v50, 0.0  ;;  %14157 = vst [vmem:[#allocation68_spill] sm:$0xff] %v10504_v17  ;;  %v1666_v46 = vmul.f32 %v10086_v40, %v10504_v17  ;;  %v1667_v63 = vmul.f32 %v10096_v44, %v10504_v17 }
 0x152   : > { %v737_v48 = vmul.f32 %v10077_v37, %v10351_v29 }
 0x153   : > { %v2169_v0 = vpack.c.bf16 %v2057_v31, %v2055_v36  ;;  %v2168_v4 = vpack.c.bf16 %v2056_v33, %v2054_v54  ;;  %v10527_v54 = vld [vmem:[%s9872_s19 + $0x160] sm:$0xff] }
 0x154   : > { %9199 = vset.pattern.permute.xlu1 %v14116_v22  ;;  %v10497_v42 = vpop.permute.xlu1 %895  ;;  %1537 = vperm.xlu0 %9225, %v10527_v54  }
 0x155   : > { %14156 = vst [vmem:[#allocation67_spill] sm:$0xff] %v10497_v42  ;;  %v1136_v30 = vmul.f32 %v10073_v35, %v10497_v42  ;;  %v1137_v1 = vmul.f32 %v10080_v38, %v10497_v42  ;;  %515 = vperm.xlu1 %9199, %v9999_v2   ;;  %2520 = vmatprep.mubr.bf16.mxu0 %v2169_v0 }
 0x156   : > { %2521 = vmatmul.mubr.bf16.gmra.mrb[28].mxu0 %v2168_v4 }
 0x157   : > { %v1264_v31 = vadd.f32 %v1136_v30, %v734_v61  ;;  %v1265_v10 = vadd.f32 %v1137_v1, %v735_v62 }
 0x158   : > { %v10514_v55 = vpop.permute.xlu1 %899 }
 0x159   : > { %14158 = vst [vmem:[#allocation69_spill] sm:$0xff] %v10514_v55  ;;  %9200 = vset.pattern.permute.xlu1 %v14120_v8  ;;  %v1138_v50 = vmul.f32 %v10073_v35, %v10514_v55  ;;  %v1139_v36 = vmul.f32 %v10080_v38, %v10514_v55  ;;  %v1794_v33 = vadd.f32 %v1666_v46, %v1264_v31 }
 0x15a   : > { %951 = vperm.xlu1 %9200, %v9999_v2   ;;  %v1795_v0 = vadd.f32 %v1667_v63, %v1265_v10 }
 0x15b   : > { %v1267_v61 = vadd.f32 %v1139_v36, %v737_v48  ;;  %v1266_v62 = vadd.f32 %v1138_v50, %v736_v58  ;;  %v1930_v42 = vadd.f32 %v10138_v45, %v1794_v33 }
 0x15c   : > { %v1931_v2 = vadd.f32 %v10124_v27, %v1795_v0 }
 0x15d   : > { %v10530_v4 = vpop.permute.xlu1 %1429  ;;  %v2058_v58 = vmax.f32 %v1930_v42, 0.0 }
 0x15e   : > { %14159 = vst [vmem:[#allocation70_spill] sm:$0xff] %v10530_v4  ;;  %v1668_v30 = vmul.f32 %v10086_v40, %v10530_v4  ;;  %v1669_v1 = vmul.f32 %v10096_v44, %v10530_v4  ;;  %955 = vperm.xlu1 %9200, %v10150_v56   ;;  %v2059_v63 = vmax.f32 %v1931_v2, 0.0 }
 0x160   : > { %v1797_v55 = vadd.f32 %v1669_v1, %v1267_v61  ;;  %v1796_v14 = vadd.f32 %v1668_v30, %v1266_v62  ;;  %v9609_v1 = vld [vmem:[%s9872_s19 + $0x100] sm:$0xff] }
 0x162   : > { %9201 = vset.pattern.permute.xlu1 %v14122_v5  ;;  %v10540_v31 = vpop.permute.xlu1 %455  ;;  %v1933_v10 = vadd.f32 %v10124_v27, %v1797_v55  ;;  %v1932_v46 = vadd.f32 %v10138_v45, %v1796_v14 }
 0x163   : > { %14160 = vst [vmem:[#allocation71_spill] sm:$0xff] %v10540_v31  ;;  %1485 = vperm.xlu1 %9201, %v10150_v56   ;;  %v10553_v56 = vpop.permute.xlu0 %1433  ;;  %v738_v14 = vmul.f32 %v10089_v41, %v10540_v31  ;;  %v739_v42 = vmul.f32 %v10077_v37, %v10540_v31 }
 0x164   : > { %v2061_v48 = vmax.f32 %v1933_v10, 0.0  ;;  %v2060_v50 = vmax.f32 %v1932_v46, 0.0  ;;  %14162 = vst [vmem:[#allocation73_spill] sm:$0xff] %v10553_v56  ;;  %v1670_v2 = vmul.f32 %v10086_v40, %v10553_v56  ;;  %v1671_v10 = vmul.f32 %v10096_v44, %v10553_v56 }
 0x166   : > { %v2171_v36 = vpack.c.bf16 %v2061_v48, %v2059_v63  ;;  %v2170_v0 = vpack.c.bf16 %v2060_v50, %v2058_v58  ;;  %v740_v63 = vmul.f32 %v10089_v41, %v10373_v32  ;;  %v741_v48 = vmul.f32 %v10077_v37, %v10373_v32 }
 0x167   : > { %9202 = vset.pattern.permute.xlu1 %v14116_v22  ;;  %v10546_v33 = vpop.permute.xlu1 %903 }
 0x168   : > { %14161 = vst [vmem:[#allocation72_spill] sm:$0xff] %v10546_v33  ;;  %v1140_v30 = vmul.f32 %v10073_v35, %v10546_v33  ;;  %v1141_v55 = vmul.f32 %v10080_v38, %v10546_v33  ;;  %525 = vperm.xlu1 %9202, %v9609_v1   ;;  %2530 = vmatprep.mubr.bf16.mxu0 %v2171_v36  ;;  %v10575_v36 = vld [vmem:[%s9872_s19 + $0x170] sm:$0xff] }
 0x169   : > { %2531 = vmatmul.mubr.bf16.gmra.mrb[32].mxu0 %v2170_v0  ;;  %1545 = vperm.xlu0 %9225, %v10575_v36  }
 0x16a   : > { %v1268_v61 = vadd.f32 %v1140_v30, %v738_v14  ;;  %v1269_v62 = vadd.f32 %v1141_v55, %v739_v42 }
 0x16b   : > { %v10563_v46 = vpop.permute.xlu1 %907 }
 0x16c   : > { %14163 = vst [vmem:[#allocation74_spill] sm:$0xff] %v10563_v46  ;;  %9203 = vset.pattern.permute.xlu1 %v14120_v8  ;;  %v1142_v58 = vmul.f32 %v10073_v35, %v10563_v46  ;;  %v1143_v50 = vmul.f32 %v10080_v38, %v10563_v46  ;;  %v1798_v0 = vadd.f32 %v1670_v2, %v1268_v61 }
 0x16d   : > { %959 = vperm.xlu1 %9203, %v9609_v1   ;;  %v1799_v30 = vadd.f32 %v1671_v10, %v1269_v62 }
 0x16e   : > { %v1271_v31 = vadd.f32 %v1143_v50, %v741_v48  ;;  %v1270_v33 = vadd.f32 %v1142_v58, %v740_v63  ;;  %v1934_v56 = vadd.f32 %v10138_v45, %v1798_v0 }
 0x16f   : > { %v1935_v1 = vadd.f32 %v10124_v27, %v1799_v30  ;;  %v10604_v30 = vld [vmem:[%s9872_s19 + $0x180] sm:$0xff] }
 0x170   : > { %v10578_v55 = vpop.permute.xlu1 %1437  ;;  %1553 = vperm.xlu0 %9225, %v10604_v30  }
 0x171   : > { %14164 = vst [vmem:[#allocation75_spill] sm:$0xff] %v10578_v55  ;;  %v1672_v14 = vmul.f32 %v10086_v40, %v10578_v55  ;;  %v1673_v42 = vmul.f32 %v10096_v44, %v10578_v55  ;;  %963 = vperm.xlu1 %9203, %v10222_v57   ;;  %v2063_v10 = vmax.f32 %v1935_v1, 0.0 }
 0x173   : > { %v1801_v46 = vadd.f32 %v1673_v42, %v1271_v31  ;;  %v1800_v4 = vadd.f32 %v1672_v14, %v1270_v33  ;;  %v2062_v31 = vmax.f32 %v1934_v56, 0.0 }
 0x175   : > { %9204 = vset.pattern.permute.xlu1 %v14122_v5  ;;  %v10588_v61 = vpop.permute.xlu1 %465  ;;  %v1937_v62 = vadd.f32 %v10124_v27, %v1801_v46  ;;  %v1936_v2 = vadd.f32 %v10138_v45, %v1800_v4  ;;  %v9610_v4 = vld [vmem:[%s9872_s19 + $0x110] sm:$0xff] }
 0x176   : > { %14165 = vst [vmem:[#allocation76_spill] sm:$0xff] %v10588_v61  ;;  %1493 = vperm.xlu1 %9204, %v10222_v57   ;;  %v10601_v57 = vpop.permute.xlu0 %1441  ;;  %v742_v56 = vmul.f32 %v10089_v41, %v10588_v61  ;;  %v743_v14 = vmul.f32 %v10077_v37, %v10588_v61 }
 0x177   : > { %v2065_v63 = vmax.f32 %v1937_v62, 0.0  ;;  %v2064_v48 = vmax.f32 %v1936_v2, 0.0  ;;  %14167 = vst [vmem:[#allocation78_spill] sm:$0xff] %v10601_v57  ;;  %v1674_v62 = vmul.f32 %v10086_v40, %v10601_v57  ;;  %v1675_v2 = vmul.f32 %v10096_v44, %v10601_v57 }
 0x179   : > { %v2173_v58 = vpack.c.bf16 %v2065_v63, %v2063_v10  ;;  %v2172_v33 = vpack.c.bf16 %v2064_v48, %v2062_v31  ;;  %v744_v63 = vmul.f32 %v10089_v41, %v10388_v47  ;;  %v745_v31 = vmul.f32 %v10077_v37, %v10388_v47 }
 0x17a   : > { %9205 = vset.pattern.permute.xlu1 %v14116_v22  ;;  %v10594_v50 = vpop.permute.xlu1 %911 }
 0x17b   : > { %14166 = vst [vmem:[#allocation77_spill] sm:$0xff] %v10594_v50  ;;  %v1144_v0 = vmul.f32 %v10073_v35, %v10594_v50  ;;  %v1145_v46 = vmul.f32 %v10080_v38, %v10594_v50  ;;  %535 = vperm.xlu1 %9205, %v9610_v4   ;;  %2540 = vmatprep.mubr.bf16.mxu0 %v2173_v58 }
 0x17c   : > { %2541 = vmatmul.mubr.bf16.gmra.mrb[36].mxu0 %v2172_v33  ;;  %v10627_v33 = vld [vmem:[%s9872_s19 + $0x190] sm:$0xff] }
 0x17d   : > { %v1272_v42 = vadd.f32 %v1144_v0, %v742_v56  ;;  %v1273_v1 = vadd.f32 %v1145_v46, %v743_v14  ;;  %1561 = vperm.xlu0 %9225, %v10627_v33  }
 0x17e   : > { %v10615_v10 = vpop.permute.xlu1 %915 }
 0x17f   : > { %14168 = vst [vmem:[#allocation79_spill] sm:$0xff] %v10615_v10  ;;  %9206 = vset.pattern.permute.xlu1 %v14120_v8  ;;  %v1146_v48 = vmul.f32 %v10073_v35, %v10615_v10  ;;  %v1147_v58 = vmul.f32 %v10080_v38, %v10615_v10  ;;  %v1802_v0 = vadd.f32 %v1674_v62, %v1272_v42 }
 0x180   : > { %967 = vperm.xlu1 %9206, %v9610_v4   ;;  %v1803_v46 = vadd.f32 %v1675_v2, %v1273_v1  ;;  %v348_v4 = vld [vmem:[%s9872_s19 + $0x1a0] sm:$0xff] }
 0x181   : > { %v1275_v61 = vadd.f32 %v1147_v58, %v745_v31  ;;  %v1274_v10 = vadd.f32 %v1146_v48, %v744_v63  ;;  %1569 = vperm.xlu0 %9225, %v348_v4   ;;  %v1938_v1 = vadd.f32 %v10138_v45, %v1802_v0  ;;  %v10648_v63 = vld [vmem:[%s9872_s19 + $0x188] sm:$0xff] }
 0x182   : > { %v1939_v57 = vadd.f32 %v10124_v27, %v1803_v46  ;;  %v9611_v46 = vld [vmem:[%s9872_s19 + $0x120] sm:$0xff] }
 0x183   : > { %v10630_v56 = vpop.permute.xlu1 %1445 }
 0x184   : > { %14169 = vst [vmem:[#allocation80_spill] sm:$0xff] %v10630_v56  ;;  %v1676_v14 = vmul.f32 %v10086_v40, %v10630_v56  ;;  %v1677_v55 = vmul.f32 %v10096_v44, %v10630_v56  ;;  %971 = vperm.xlu1 %9206, %v10272_v12  }
 0x185   : > { %9236 = vset.pattern.permute.xlu0 %v14116_v22 }
 0x186   : > { %v1805_v50 = vadd.f32 %v1677_v55, %v1275_v61  ;;  %v1804_v42 = vadd.f32 %v1676_v14, %v1274_v10  ;;  %v2067_v55 = vmax.f32 %v1939_v57, 0.0  ;;  %v2066_v10 = vmax.f32 %v1938_v1, 0.0  ;;  %610 = vperm.xlu0 %9236, %v10648_v63   ;;  %v10659_v57 = vpop.permute.xlu0 %1449 }
 0x187   : > { %14172 = vst [vmem:[#allocation83_spill] sm:$0xff] %v10659_v57  ;;  %v1678_v1 = vmul.f32 %v10086_v40, %v10659_v57 }
 0x188   : > { %9207 = vset.pattern.permute.xlu1 %v14122_v5  ;;  %v10641_v62 = vpop.permute.xlu1 %475  ;;  %v1941_v2 = vadd.f32 %v10124_v27, %v1805_v50  ;;  %v1940_v56 = vadd.f32 %v10138_v45, %v1804_v42 }
 0x189   : > { %14170 = vst [vmem:[#allocation81_spill] sm:$0xff] %v10641_v62  ;;  %1501 = vperm.xlu1 %9207, %v10272_v12   ;;  %v747_v14 = vmul.f32 %v10077_v37, %v10641_v62 }
 0x18a   : > { %v2069_v61 = vmax.f32 %v1941_v2, 0.0  ;;  %v2068_v31 = vmax.f32 %v1940_v56, 0.0  ;;  %v746_v56 = vmul.f32 %v10089_v41, %v10641_v62  ;;  %v1679_v2 = vmul.f32 %v10096_v44, %v10659_v57 }
 0x18c   : > { %v2175_v48 = vpack.c.bf16 %v2069_v61, %v2067_v55  ;;  %v2174_v58 = vpack.c.bf16 %v2068_v31, %v2066_v10  ;;  %v748_v61 = vmul.f32 %v10089_v41, %v10407_v60  ;;  %v749_v10 = vmul.f32 %v10077_v37, %v10407_v60 }
 0x18d   : > { %9208 = vset.pattern.permute.xlu1 %v14116_v22  ;;  %v10652_v50 = vpop.permute.xlu1 %919 }
 0x18e   : > { %14171 = vst [vmem:[#allocation82_spill] sm:$0xff] %v10652_v50  ;;  %v1148_v0 = vmul.f32 %v10073_v35, %v10652_v50  ;;  %v1149_v12 = vmul.f32 %v10080_v38, %v10652_v50  ;;  %545 = vperm.xlu1 %9208, %v9611_v46   ;;  %2550 = vmatprep.mubr.bf16.mxu0 %v2175_v48 }
 0x18f   : > { %2551 = vmatmul.mubr.bf16.gmra.mrb[40].mxu0 %v2174_v58 }
 0x190   : > { %v1276_v4 = vadd.f32 %v1148_v0, %v746_v56  ;;  %v1277_v42 = vadd.f32 %v1149_v12, %v747_v14 }
 0x191   : > { %v10669_v55 = vpop.permute.xlu1 %923 }
 0x192   : > { %14173 = vst [vmem:[#allocation84_spill] sm:$0xff] %v10669_v55  ;;  %9209 = vset.pattern.permute.xlu1 %v14120_v8  ;;  %v1150_v31 = vmul.f32 %v10073_v35, %v10669_v55  ;;  %v1151_v48 = vmul.f32 %v10080_v38, %v10669_v55  ;;  %v1806_v58 = vadd.f32 %v1678_v1, %v1276_v4 }
 0x193   : > { %975 = vperm.xlu1 %9209, %v9611_v46   ;;  %v1807_v0 = vadd.f32 %v1679_v2, %v1277_v42  ;;  %v10696_v2 = vld [vmem:[%s9872_s19 + $0x198] sm:$0xff] }
 0x194   : > { %v1279_v62 = vadd.f32 %v1151_v48, %v749_v10  ;;  %v1278_v50 = vadd.f32 %v1150_v31, %v748_v61  ;;  %v1942_v46 = vadd.f32 %v10138_v45, %v1806_v58  ;;  %620 = vperm.xlu0 %9236, %v10696_v2  }
 0x195   : > { %v1943_v17 = vadd.f32 %v10124_v27, %v1807_v0 }
 0x196   : > { %v10680_v12 = vpop.permute.xlu1 %1453 }
 0x197   : > { %14174 = vst [vmem:[#allocation85_spill] sm:$0xff] %v10680_v12  ;;  %v1680_v56 = vmul.f32 %v10086_v40, %v10680_v12  ;;  %v1681_v14 = vmul.f32 %v10096_v44, %v10680_v12  ;;  %979 = vperm.xlu1 %9209, %v10308_v52   ;;  %v2071_v10 = vmax.f32 %v1943_v17, 0.0 }
 0x199   : > { %v1809_v57 = vadd.f32 %v1681_v14, %v1279_v62  ;;  %v1808_v55 = vadd.f32 %v1680_v56, %v1278_v50  ;;  %v2070_v62 = vmax.f32 %v1942_v46, 0.0  ;;  %v10699_v50 = vpop.permute.xlu0 %1457 }
 0x19a   : > { %14176 = vst [vmem:[#allocation87_spill] sm:$0xff] %v10699_v50 }
 0x19b   : > { %9211 = vset.pattern.permute.xlu1 %v14122_v5  ;;  %v10690_v4 = vpop.permute.xlu1 %485  ;;  %v1945_v42 = vadd.f32 %v10124_v27, %v1809_v57  ;;  %v1944_v1 = vadd.f32 %v10138_v45, %v1808_v55 }
 0x19c   : > { %14175 = vst [vmem:[#allocation86_spill] sm:$0xff] %v10690_v4  ;;  %1509 = vperm.xlu1 %9211, %v10308_v52   ;;  %v750_v17 = vmul.f32 %v10089_v41, %v10690_v4  ;;  %v751_v55 = vmul.f32 %v10077_v37, %v10690_v4 }
 0x19d   : > { %v2073_v61 = vmax.f32 %v1945_v42, 0.0  ;;  %v2072_v31 = vmax.f32 %v1944_v1, 0.0  ;;  %v10713_v56 = vpop.permute.xlu0 %1465  ;;  %v1682_v42 = vmul.f32 %v10086_v40, %v10699_v50  ;;  %v1683_v1 = vmul.f32 %v10096_v44, %v10699_v50 }
 0x19e   : > { %14178 = vst [vmem:[#allocation89_spill] sm:$0xff] %v10713_v56 }
 0x19f   : > { %v2177_v48 = vpack.c.bf16 %v2073_v61, %v2071_v10  ;;  %v2176_v58 = vpack.c.bf16 %v2072_v31, %v2070_v62  ;;  %v752_v61 = vmul.f32 %v10089_v41, %v10428_v6  ;;  %v753_v62 = vmul.f32 %v10077_v37, %v10428_v6 }
 0x1a0   : > { %9212 = vset.pattern.permute.xlu1 %v14116_v22  ;;  %v10702_v0 = vpop.permute.xlu1 %927 }
 0x1a1   : > { %14177 = vst [vmem:[#allocation88_spill] sm:$0xff] %v10702_v0  ;;  %v1152_v57 = vmul.f32 %v10073_v35, %v10702_v0  ;;  %v1153_v52 = vmul.f32 %v10080_v38, %v10702_v0  ;;  %555 = vperm.xlu1 %9212, %v10391_v7   ;;  %2560 = vmatprep.mubr.bf16.mxu0 %v2177_v48 }
 0x1a2   : > { %2561 = vmatmul.mubr.bf16.gmra.mrb[44].mxu0 %v2176_v58 }
 0x1a3   : > { %v1280_v14 = vadd.f32 %v1152_v57, %v750_v17  ;;  %v1281_v46 = vadd.f32 %v1153_v52, %v751_v55  ;;  %v10731_v52 = vpop.permute.xlu0 %1473 }
 0x1a4   : > { %v10719_v10 = vpop.permute.xlu1 %931  ;;  %14180 = vst [vmem:[#allocation91_spill] sm:$0xff] %v10731_v52 }
 0x1a5   : > { %14179 = vst [vmem:[#allocation90_spill] sm:$0xff] %v10719_v10  ;;  %9213 = vset.pattern.permute.xlu1 %v14120_v8  ;;  %v1154_v31 = vmul.f32 %v10073_v35, %v10719_v10  ;;  %v1155_v48 = vmul.f32 %v10080_v38, %v10719_v10  ;;  %v1810_v58 = vadd.f32 %v1682_v42, %v1280_v14 }
 0x1a6   : > { %983 = vperm.xlu1 %9213, %v10391_v7   ;;  %v1811_v57 = vadd.f32 %v1683_v1, %v1281_v46 }
 0x1a7   : > { %v1283_v0 = vadd.f32 %v1155_v48, %v753_v62  ;;  %v1282_v12 = vadd.f32 %v1154_v31, %v752_v61  ;;  %v1946_v46 = vadd.f32 %v10138_v45, %v1810_v58  ;;  %v10751_v61 = vld [vmem:[%s9872_s19 + $0x1a8] sm:$0xff]  ;;  %v351_v58 = vld [vmem:[%s9872_s19 + $0x1b8] sm:$0xff] }
 0x1a8   : > { %v1947_v7 = vadd.f32 %v10124_v27, %v1811_v57  ;;  %630 = vperm.xlu0 %9236, %v10751_v61  }
 0x1a9   : > { %v10733_v17 = vpop.permute.xlu1 %1461 }
 0x1aa   : > { %14181 = vst [vmem:[#allocation92_spill] sm:$0xff] %v10733_v17  ;;  %v1684_v55 = vmul.f32 %v10086_v40, %v10733_v17  ;;  %v1685_v4 = vmul.f32 %v10096_v44, %v10733_v17  ;;  %987 = vperm.xlu1 %9213, %v10321_v59   ;;  %v10747_v17 = vpop.permute.xlu0 %1481 }
 0x1ab   : > { %14183 = vst [vmem:[#allocation94_spill] sm:$0xff] %v10747_v17 }
 0x1ac   : > { %v1813_v10 = vadd.f32 %v1685_v4, %v1283_v0  ;;  %v1812_v14 = vadd.f32 %v1684_v55, %v1282_v12  ;;  %v2075_v4 = vmax.f32 %v1947_v7, 0.0  ;;  %v2074_v12 = vmax.f32 %v1946_v46, 0.0  ;;  %640 = vperm.xlu0 %9236, %v351_v58  }
 0x1ad   : > { %v1687_v46 = vmul.f32 %v10096_v44, %v10713_v56 }
 0x1ae   : > { %9214 = vset.pattern.permute.xlu1 %v14122_v5  ;;  %v10743_v42 = vpop.permute.xlu1 %495  ;;  %v1949_v1 = vadd.f32 %v10124_v27, %v1813_v10  ;;  %v1948_v50 = vadd.f32 %v10138_v45, %v1812_v14  ;;  %v10767_v7 = vpop.permute.xlu0 %1489  ;;  %v1686_v14 = vmul.f32 %v10086_v40, %v10713_v56 }
 0x1af   : > { %14182 = vst [vmem:[#allocation93_spill] sm:$0xff] %v10743_v42  ;;  %1517 = vperm.xlu1 %9214, %v10321_v59   ;;  %v754_v10 = vmul.f32 %v10089_v41, %v10743_v42  ;;  %v755_v59 = vmul.f32 %v10077_v37, %v10743_v42  ;;  %14185 = vst [vmem:[#allocation96_spill] sm:$0xff] %v10767_v7 }
 0x1b0   : > { %v2077_v0 = vmax.f32 %v1949_v1, 0.0  ;;  %v2076_v62 = vmax.f32 %v1948_v50, 0.0 }
 0x1b2   : > { %v2179_v31 = vpack.c.bf16 %v2077_v0, %v2075_v4  ;;  %v2178_v48 = vpack.c.bf16 %v2076_v62, %v2074_v12  ;;  %v353_v0 = vld [vmem:[%s9872_s19 + $0x1c8] sm:$0xff]  ;;  %v757_v62 = vmul.f32 %v10077_v37, %v10443_v49 }
 0x1b3   : > { %9215 = vset.pattern.permute.xlu1 %v14116_v22  ;;  %v10758_v57 = vpop.permute.xlu1 %935  ;;  %650 = vperm.xlu0 %9236, %v353_v0  }
 0x1b4   : > { %14184 = vst [vmem:[#allocation95_spill] sm:$0xff] %v10758_v57  ;;  %v1156_v55 = vmul.f32 %v10073_v35, %v10758_v57  ;;  %v1157_v50 = vmul.f32 %v10080_v38, %v10758_v57  ;;  %565 = vperm.xlu1 %9215, %v10426_v53   ;;  %2570 = vmatprep.mubr.bf16.mxu0 %v2179_v31  ;;  %v355_v57 = vld [vmem:[%s9872_s19 + $0x1d8] sm:$0xff] }
 0x1b5   : > { %2571 = vmatmul.mubr.bf16.gmra.mrb[48].mxu0 %v2178_v48  ;;  %v756_v48 = vmul.f32 %v10089_v41, %v10443_v49 }
 0x1b6   : > { %v1285_v1 = vadd.f32 %v1157_v50, %v755_v59  ;;  %v1284_v4 = vadd.f32 %v1156_v55, %v754_v10  ;;  %v10786_v10 = vpop.permute.xlu0 %1497  ;;  %v9612_v50 = vld [vmem:[%s13831_s4] sm:$0xff] }
 0x1b7   : > { %v10774_v12 = vpop.permute.xlu1 %939  ;;  %14187 = vst [vmem:[#allocation98_spill] sm:$0xff] %v10786_v10  ;;  %v10792_v42 = vrot.slane %v9612_v50, %v10036_v19  ;;  %660 = vperm.xlu0 %9236, %v355_v57  }
 0x1b8   : > { %14186 = vst [vmem:[#allocation97_spill] sm:$0xff] %v10774_v12  ;;  %v1159_v31 = vmul.f32 %v10080_v38, %v10774_v12  ;;  %9216 = vset.pattern.permute.xlu1 %v14120_v8  ;;  %v1158_v58 = vmul.f32 %v10073_v35, %v10774_v12  ;;  %v1815_v59 = vadd.f32 %v1687_v46, %v1285_v1  ;;  %v9613_v12 = vld [vmem:[%s13831_s4 + $0x8] sm:$0xff] }
 0x1b9   : > { %991 = vperm.xlu1 %9216, %v10426_v53   ;;  %v1814_v55 = vadd.f32 %v1686_v14, %v1284_v4  ;;  %v10801_v53 = vrot.slane %v9613_v12, %v10036_v19 }
 0x1ba   : > { %v1287_v0 = vadd.f32 %v1159_v31, %v757_v62  ;;  %v1286_v1 = vadd.f32 %v1158_v58, %v756_v48  ;;  %v1951_v50 = vadd.f32 %v10124_v27, %v1815_v59  ;;  %v10811_v60 = vpop.permute.xlu0 %1505 }
 0x1bb   : > { %v1950_v51 = vadd.f32 %v10138_v45, %v1814_v55  ;;  %14189 = vst [vmem:[#allocation100_spill] sm:$0xff] %v10811_v60  ;;  %v10821_v55 = vld [vmem:[%s9872_s19 + $0x1b0] sm:$0xff]  ;;  %9245 = vset.pattern.permute.xlu0 %v14122_v5 }
 0x1bc   : > { %v10795_v56 = vpop.permute.xlu1 %1469  ;;  %1577 = vperm.xlu0 %9245, %v10821_v55  }
 0x1bd   : > { %14188 = vst [vmem:[#allocation99_spill] sm:$0xff] %v10795_v56  ;;  %v1688_v14 = vmul.f32 %v10086_v40, %v10795_v56  ;;  %v1689_v46 = vmul.f32 %v10096_v44, %v10795_v56  ;;  %995 = vperm.xlu1 %9216, %v10333_v43  }
 0x1be   : > { %v2452_v4 = vpop.f32.mrb[0].mxu0 }
 0x1bf   : > { %v2453_v12 = vadd.f32 %v2452_v4, %v10792_v42  ;;  %v2454_v49 = vpop.f32.mrb[1].mxu0  ;;  %v1817_v62 = vadd.f32 %v1689_v46, %v1287_v0  ;;  %v1816_v31 = vadd.f32 %v1688_v14, %v1286_v1  ;;  %v2079_v0 = vmax.f32 %v1951_v50, 0.0 }
 0x1c0   : > { %v2456_v6 = vpop.f32.mrb[2].mxu0  ;;  %v2455_v56 = vadd.f32 %v2454_v49, %v10801_v53  ;;  %v2078_v14 = vmax.f32 %v1950_v51, 0.0 }
 0x1c1   : > { %v2457_v16 = vadd.f32 %v2456_v6, %v10792_v42  ;;  %v2458_v48 = vpop.f32.mrb[3].mxu0  ;;  %9217 = vset.pattern.permute.xlu1 %v14122_v5  ;;  %v10816_v57 = vpop.permute.xlu1 %505  ;;  %v1953_v58 = vadd.f32 %v10124_v27, %v1817_v62  ;;  %v1952_v59 = vadd.f32 %v10138_v45, %v1816_v31  ;;  %v2771_v6 = vmax.f32 %v2453_v12, 0.0 }
 0x1c2   : > { %14190 = vst [vmem:[#allocation101_spill] sm:$0xff] %v10816_v57  ;;  %1525 = vperm.xlu1 %9217, %v10333_v43   ;;  %v2459_v49 = vadd.f32 %v2458_v48, %v10801_v53  ;;  %v2772_v47 = vmax.f32 %v2455_v56, 0.0  ;;  %v759_v39 = vmul.f32 %v10077_v37, %v10816_v57  ;;  %v10838_v48 = vpop.permute.xlu0 %510 }
 0x1c3   : > { %v2773_v46 = vmax.f32 %v2457_v16, 0.0  ;;  %v2081_v1 = vmax.f32 %v1953_v58, 0.0  ;;  %v2080_v4 = vmax.f32 %v1952_v59, 0.0  ;;  %14192 = vst [vmem:[#allocation103_spill] sm:$0xff] %v10838_v48  ;;  %v758_v58 = vmul.f32 %v10089_v41, %v10816_v57 }
 0x1c4   : > { %v2774_v62 = vmax.f32 %v2459_v49, 0.0 }
 0x1c5   : > { %v2181_v32 = vpack.c.bf16 %v2081_v1, %v2079_v0  ;;  %v2180_v31 = vpack.c.bf16 %v2080_v4, %v2078_v14  ;;  %v2899_v29 = vpack.c.bf16 %v2773_v46, %v2771_v6  ;;  %v1691_v0 = vmul.f32 %v10096_v44, %v10731_v52 }
 0x1c6   : > { %v2462_v34 = vpop.f32.mrb[4].mxu0  ;;  %9218 = vset.pattern.permute.xlu1 %v14116_v22  ;;  %v10830_v43 = vpop.permute.xlu1 %943  ;;  %v2900_v51 = vpack.c.bf16 %v2774_v62, %v2772_v47  ;;  %v760_v46 = vmul.f32 %v10089_v41, %v10838_v48  ;;  %v761_v1 = vmul.f32 %v10077_v37, %v10838_v48 }
 0x1c7   : > { %14191 = vst [vmem:[#allocation102_spill] sm:$0xff] %v10830_v43  ;;  %v2463_v50 = vadd.f32 %v2462_v34, %v10792_v42  ;;  %v1160_v16 = vmul.f32 %v10073_v35, %v10830_v43  ;;  %v1161_v56 = vmul.f32 %v10080_v38, %v10830_v43  ;;  %v2464_v12 = vpop.f32.mrb[5].mxu0  ;;  %575 = vperm.xlu1 %9218, %v10478_v11  }
 0x1c8   : > { %2580 = vmatprep.mubr.bf16.mxu0 %v2181_v32  ;;  %v2465_v59 = vadd.f32 %v2464_v12, %v10801_v53  ;;  %v2466_v47 = vpop.f32.mrb[6].mxu0  ;;  %3196 = vmatprep.mubr.bf16.mxu1 %v2900_v51  ;;  %v1690_v34 = vmul.f32 %v10086_v40, %v10731_v52 }
 0x1c9   : > { %2581 = vmatmul.mubr.bf16.gmra.mrb[52].mxu0 %v2180_v31  ;;  %v2467_v14 = vadd.f32 %v2466_v47, %v10792_v42  ;;  %v2468_v49 = vpop.f32.mrb[7].mxu0  ;;  %3197 = vmatmul.mubr.bf16.vlgmr.msra.gmra.mrb[0].mxu1 %v2899_v29  ;;  %v1289_v32 = vadd.f32 %v1161_v56, %v759_v39  ;;  %v1288_v62 = vadd.f32 %v1160_v16, %v758_v58  ;;  %v2775_v31 = vmax.f32 %v2463_v50, 0.0  ;;  %v10862_v47 = vld [vmem:[%s9872_s19 + $0x1c0] sm:$0xff] }
 0x1ca   : > { %v2469_v6 = vadd.f32 %v2468_v49, %v10801_v53  ;;  %v10853_v4 = vpop.permute.xlu1 %947  ;;  %v2776_v39 = vmax.f32 %v2465_v59, 0.0  ;;  %1585 = vperm.xlu0 %9245, %v10862_v47  }
 0x1cb   : > { %14193 = vst [vmem:[#allocation104_spill] sm:$0xff] %v10853_v4  ;;  %v2777_v51 = vmax.f32 %v2467_v14, 0.0  ;;  %v1162_v12 = vmul.f32 %v10073_v35, %v10853_v4  ;;  %v1163_v29 = vmul.f32 %v10080_v38, %v10853_v4  ;;  %9219 = vset.pattern.permute.xlu1 %v14120_v8  ;;  %v1819_v43 = vadd.f32 %v1691_v0, %v1289_v32 }
 0x1cc   : > { %v2778_v56 = vmax.f32 %v2469_v6, 0.0  ;;  %999 = vperm.xlu1 %9219, %v10478_v11   ;;  %v1818_v58 = vadd.f32 %v1690_v34, %v1288_v62 }
 0x1cd   : > { %v2901_v49 = vpack.c.bf16 %v2777_v51, %v2775_v31  ;;  %v1291_v52 = vadd.f32 %v1163_v29, %v761_v1  ;;  %v1290_v59 = vadd.f32 %v1162_v12, %v760_v46  ;;  %v9614_v31 = vld [vmem:[%s9872_s19 + $0x158] sm:$0xff]  ;;  %v1955_v51 = vadd.f32 %v10124_v27, %v1819_v43 }
 0x1ce   : > { %v2472_v50 = vpop.f32.mrb[8].mxu0  ;;  %v2902_v16 = vpack.c.bf16 %v2778_v56, %v2776_v39  ;;  %v1954_v12 = vadd.f32 %v10138_v45, %v1818_v58 }
 0x1cf   : > { %v2473_v14 = vadd.f32 %v2472_v50, %v10792_v42  ;;  %v2474_v57 = vpop.f32.mrb[9].mxu0  ;;  %v10866_v4 = vpop.permute.xlu1 %1477 }
 0x1d0   : > { %14194 = vst [vmem:[#allocation105_spill] sm:$0xff] %v10866_v4  ;;  %v2475_v6 = vadd.f32 %v2474_v57, %v10801_v53  ;;  %v1692_v11 = vmul.f32 %v10086_v40, %v10866_v4  ;;  %v1693_v0 = vmul.f32 %v10096_v44, %v10866_v4  ;;  %v2476_v32 = vpop.f32.mrb[10].mxu0  ;;  %3206 = vmatprep.mubr.bf16.mxu1 %v2902_v16  ;;  %v2083_v4 = vmax.f32 %v1955_v51, 0.0  ;;  %v10895_v51 = vpop.permute.xlu0 %520 }
 0x1d1   : > { %1003 = vperm.xlu1 %9219, %v9614_v31   ;;  %v2477_v34 = vadd.f32 %v2476_v32, %v10792_v42  ;;  %v2478_v62 = vpop.f32.mrb[11].mxu0  ;;  %3207 = vmatmul.mubr.bf16.gmra.mrb[4].mxu1 %v2901_v49  ;;  %v2779_v29 = vmax.f32 %v2473_v14, 0.0  ;;  %14197 = vst [vmem:[#allocation108_spill] sm:$0xff] %v10895_v51 }
 0x1d2   : > { %v2479_v46 = vadd.f32 %v2478_v62, %v10801_v53  ;;  %v1821_v1 = vadd.f32 %v1693_v0, %v1291_v52  ;;  %v1820_v57 = vadd.f32 %v1692_v11, %v1290_v59  ;;  %v2780_v56 = vmax.f32 %v2475_v6, 0.0 }
 0x1d3   : > { %v2781_v39 = vmax.f32 %v2477_v34, 0.0  ;;  %v2082_v59 = vmax.f32 %v1954_v12, 0.0 }
 0x1d4   : > { %v2782_v50 = vmax.f32 %v2479_v46, 0.0  ;;  %v10879_v16 = vpop.permute.xlu1 %515  ;;  %v1957_v32 = vadd.f32 %v10124_v27, %v1821_v1  ;;  %v1956_v49 = vadd.f32 %v10138_v45, %v1820_v57  ;;  %v1695_v46 = vmul.f32 %v10096_v44, %v10747_v17 }
 0x1d5   : > { %9220 = vset.pattern.permute.xlu1 %v14122_v5  ;;  %14195 = vst [vmem:[#allocation106_spill] sm:$0xff] %v10879_v16  ;;  %v2903_v43 = vpack.c.bf16 %v2781_v39, %v2779_v29  ;;  %v763_v0 = vmul.f32 %v10077_v37, %v10879_v16  ;;  %v1694_v57 = vmul.f32 %v10086_v40, %v10747_v17 }
 0x1d6   : > { %1533 = vperm.xlu1 %9220, %v9614_v31   ;;  %v2904_v62 = vpack.c.bf16 %v2782_v50, %v2780_v56  ;;  %v2085_v52 = vmax.f32 %v1957_v32, 0.0  ;;  %v2084_v11 = vmax.f32 %v1956_v49, 0.0  ;;  %v765_v56 = vmul.f32 %v10077_v37, %v10895_v51 }
 0x1d8   : > { %3216 = vmatprep.mubr.bf16.mxu1 %v2904_v62  ;;  %v2183_v58 = vpack.c.bf16 %v2085_v52, %v2083_v4  ;;  %v2182_v14 = vpack.c.bf16 %v2084_v11, %v2082_v59  ;;  %v762_v4 = vmul.f32 %v10089_v41, %v10879_v16  ;;  %v10916_v11 = vld [vmem:[%s9872_s19 + $0x1d0] sm:$0xff] }
 0x1d9   : > { %3217 = vmatmul.mubr.bf16.gmra.mrb[8].mxu1 %v2903_v43  ;;  %v10884_v6 = vpop.permute.xlu1 %951  ;;  %v764_v43 = vmul.f32 %v10089_v41, %v10895_v51  ;;  %1593 = vperm.xlu0 %9245, %v10916_v11   ;;  %v9615_v51 = vld [vmem:[%s9872_s19 + $0x168] sm:$0xff] }
 0x1da   : > { %9221 = vset.pattern.permute.xlu1 %v14116_v22  ;;  %14196 = vst [vmem:[#allocation107_spill] sm:$0xff] %v10884_v6  ;;  %v1164_v31 = vmul.f32 %v10073_v35, %v10884_v6  ;;  %v1165_v34 = vmul.f32 %v10080_v38, %v10884_v6  ;;  %2590 = vmatprep.mubr.bf16.mxu0 %v2183_v58 }
 0x1db   : > { %585 = vperm.xlu1 %9221, %v10527_v54   ;;  %2591 = vmatmul.mubr.bf16.gmra.mrb[56].mxu0 %v2182_v14 }
 0x1dc   : > { %v1293_v1 = vadd.f32 %v1165_v34, %v763_v0  ;;  %v1292_v39 = vadd.f32 %v1164_v31, %v762_v4 }
 0x1dd   : > { %v2482_v12 = vpop.f32.mrb[12].mxu0  ;;  %v10901_v29 = vpop.permute.xlu1 %955 }
 0x1de   : > { %14198 = vst [vmem:[#allocation109_spill] sm:$0xff] %v10901_v29  ;;  %v2483_v50 = vadd.f32 %v2482_v12, %v10792_v42  ;;  %v1167_v32 = vmul.f32 %v10080_v38, %v10901_v29  ;;  %v2484_v49 = vpop.f32.mrb[13].mxu0  ;;  %v1166_v62 = vmul.f32 %v10073_v35, %v10901_v29  ;;  %v1823_v0 = vadd.f32 %v1695_v46, %v1293_v1 }
 0x1df   : > { %9222 = vset.pattern.permute.xlu1 %v14120_v8  ;;  %v2485_v52 = vadd.f32 %v2484_v49, %v10801_v53  ;;  %v2486_v59 = vpop.f32.mrb[14].mxu0  ;;  %v1822_v34 = vadd.f32 %v1694_v57, %v1292_v39 }
 0x1e0   : > { %1007 = vperm.xlu1 %9222, %v10527_v54   ;;  %v2487_v58 = vadd.f32 %v2486_v59, %v10792_v42  ;;  %v2488_v14 = vpop.f32.mrb[15].mxu0  ;;  %v2783_v4 = vmax.f32 %v2483_v50, 0.0  ;;  %v1295_v49 = vadd.f32 %v1167_v32, %v765_v56  ;;  %v1294_v46 = vadd.f32 %v1166_v62, %v764_v43 }
 0x1e1   : > { %v2489_v31 = vadd.f32 %v2488_v14, %v10801_v53  ;;  %v2784_v12 = vmax.f32 %v2485_v52, 0.0  ;;  %v1959_v14 = vadd.f32 %v10124_v27, %v1823_v0  ;;  %v1958_v52 = vadd.f32 %v10138_v45, %v1822_v34 }
 0x1e2   : > { %v2785_v29 = vmax.f32 %v2487_v58, 0.0  ;;  %v10921_v17 = vpop.permute.xlu1 %1485 }
 0x1e3   : > { %14199 = vst [vmem:[#allocation110_spill] sm:$0xff] %v10921_v17  ;;  %v2786_v16 = vmax.f32 %v2489_v31, 0.0  ;;  %v1696_v54 = vmul.f32 %v10086_v40, %v10921_v17  ;;  %v1697_v59 = vmul.f32 %v10096_v44, %v10921_v17  ;;  %v2087_v43 = vmax.f32 %v1959_v14, 0.0 }
 0x1e4   : > { %1011 = vperm.xlu1 %9222, %v9615_v51   ;;  %v2905_v1 = vpack.c.bf16 %v2785_v29, %v2783_v4  ;;  %v2086_v62 = vmax.f32 %v1958_v52, 0.0 }
 0x1e5   : > { %v2906_v57 = vpack.c.bf16 %v2786_v16, %v2784_v12  ;;  %v1825_v39 = vadd.f32 %v1697_v59, %v1295_v49  ;;  %v1824_v50 = vadd.f32 %v1696_v54, %v1294_v46  ;;  %v10947_v54 = vpop.permute.xlu0 %530  ;;  %v1699_v59 = vmul.f32 %v10096_v44, %v10767_v7 }
 0x1e6   : > { %14202 = vst [vmem:[#allocation113_spill] sm:$0xff] %v10947_v54 }
 0x1e7   : > { %3226 = vmatprep.mubr.bf16.mxu1 %v2906_v57  ;;  %v10931_v56 = vpop.permute.xlu1 %525  ;;  %v1961_v32 = vadd.f32 %v10124_v27, %v1825_v39  ;;  %v1960_v58 = vadd.f32 %v10138_v45, %v1824_v50  ;;  %v769_v50 = vmul.f32 %v10077_v37, %v10947_v54 }
 0x1e8   : > { %9223 = vset.pattern.permute.xlu1 %v14122_v5  ;;  %14200 = vst [vmem:[#allocation111_spill] sm:$0xff] %v10931_v56  ;;  %3227 = vmatmul.mubr.bf16.gmra.mrb[12].mxu1 %v2905_v1  ;;  %v767_v4 = vmul.f32 %v10077_v37, %v10931_v56  ;;  %v1698_v1 = vmul.f32 %v10086_v40, %v10767_v7 }
 0x1e9   : > { %1541 = vperm.xlu1 %9223, %v9615_v51   ;;  %v2089_v29 = vmax.f32 %v1961_v32, 0.0  ;;  %v2088_v0 = vmax.f32 %v1960_v58, 0.0  ;;  %v766_v51 = vmul.f32 %v10089_v41, %v10931_v56 }
 0x1eb   : > { %v2185_v16 = vpack.c.bf16 %v2089_v29, %v2087_v43  ;;  %v2184_v31 = vpack.c.bf16 %v2088_v0, %v2086_v62  ;;  %v768_v43 = vmul.f32 %v10089_v41, %v10947_v54 }
 0x1ec   : > { %v10936_v34 = vpop.permute.xlu1 %959 }
 0x1ed   : > { %9224 = vset.pattern.permute.xlu1 %v14116_v22  ;;  %14201 = vst [vmem:[#allocation112_spill] sm:$0xff] %v10936_v34  ;;  %v1168_v12 = vmul.f32 %v10073_v35, %v10936_v34  ;;  %v1169_v49 = vmul.f32 %v10080_v38, %v10936_v34  ;;  %2600 = vmatprep.mubr.bf16.mxu0 %v2185_v16  ;;  %v356_v16 = vld [vmem:[%s9872_s19 + $0x1e0] sm:$0xff] }
 0x1ee   : > { %595 = vperm.xlu1 %9224, %v10575_v36   ;;  %2601 = vmatmul.mubr.bf16.gmra.mrb[60].mxu0 %v2184_v31 }
 0x1ef   : > { %v1297_v46 = vadd.f32 %v1169_v49, %v767_v4  ;;  %v1296_v39 = vadd.f32 %v1168_v12, %v766_v51  ;;  %1601 = vperm.xlu0 %9245, %v356_v16  }
 0x1f0   : > { %v2492_v14 = vpop.f32.mrb[16].mxu0  ;;  %v10953_v57 = vpop.permute.xlu1 %963 }
 0x1f1   : > { %14203 = vst [vmem:[#allocation114_spill] sm:$0xff] %v10953_v57  ;;  %v2493_v52 = vadd.f32 %v2492_v14, %v10792_v42  ;;  %v1171_v32 = vmul.f32 %v10080_v38, %v10953_v57  ;;  %v2494_v58 = vpop.f32.mrb[17].mxu0  ;;  %v1170_v29 = vmul.f32 %v10073_v35, %v10953_v57  ;;  %v1827_v12 = vadd.f32 %v1699_v59, %v1297_v46 }
 0x1f2   : > { %9226 = vset.pattern.permute.xlu1 %v14120_v8  ;;  %v2495_v62 = vadd.f32 %v2494_v58, %v10801_v53  ;;  %v2496_v0 = vpop.f32.mrb[18].mxu0  ;;  %v1826_v51 = vadd.f32 %v1698_v1, %v1296_v39 }
 0x1f3   : > { %1015 = vperm.xlu1 %9226, %v10575_v36   ;;  %v2497_v31 = vadd.f32 %v2496_v0, %v10792_v42  ;;  %v2498_v4 = vpop.f32.mrb[19].mxu0  ;;  %v2787_v14 = vmax.f32 %v2493_v52, 0.0  ;;  %v1299_v57 = vadd.f32 %v1171_v32, %v769_v50  ;;  %v9616_v0 = vld [vmem:[%s9872_s19 + $0x178] sm:$0xff]  ;;  %v1298_v59 = vadd.f32 %v1170_v29, %v768_v43  ;;  %9250 = vset.pattern.permute.xlu0 %v14116_v22 }
 0x1f4   : > { %v2499_v49 = vadd.f32 %v2498_v4, %v10801_v53  ;;  %v2788_v7 = vmax.f32 %v2495_v62, 0.0  ;;  %v1963_v1 = vadd.f32 %v10124_v27, %v1827_v12  ;;  %v1962_v50 = vadd.f32 %v10138_v45, %v1826_v51 }
 0x1f5   : > { %v2789_v56 = vmax.f32 %v2497_v31, 0.0  ;;  %v10970_v54 = vpop.permute.xlu1 %1493 }
 0x1f6   : > { %14204 = vst [vmem:[#allocation115_spill] sm:$0xff] %v10970_v54  ;;  %v2790_v58 = vmax.f32 %v2499_v49, 0.0  ;;  %v1700_v36 = vmul.f32 %v10086_v40, %v10970_v54  ;;  %v1701_v34 = vmul.f32 %v10096_v44, %v10970_v54  ;;  %v2091_v43 = vmax.f32 %v1963_v1, 0.0 }
 0x1f7   : > { %1019 = vperm.xlu1 %9226, %v9616_v0   ;;  %v2907_v46 = vpack.c.bf16 %v2789_v56, %v2787_v14  ;;  %v357_v56 = vld [vmem:[%s9872_s19 + $0x1e8] sm:$0xff]  ;;  %v2090_v4 = vmax.f32 %v1962_v50, 0.0  ;;  %v1702_v1 = vmul.f32 %v10086_v40, %v10786_v10 }
 0x1f8   : > { %v2908_v39 = vpack.c.bf16 %v2790_v58, %v2788_v7  ;;  %v1829_v52 = vadd.f32 %v1701_v34, %v1299_v57  ;;  %v1828_v62 = vadd.f32 %v1700_v36, %v1298_v59  ;;  %670 = vperm.xlu0 %9250, %v357_v56   ;;  %v10986_v34 = vpop.permute.xlu0 %540  ;;  %v1703_v59 = vmul.f32 %v10096_v44, %v10786_v10 }
 0x1f9   : > { %14206 = vst [vmem:[#allocation117_spill] sm:$0xff] %v10986_v34  ;;  %v773_v50 = vmul.f32 %v10077_v37, %v10986_v34 }
 0x1fa   : > { %3236 = vmatprep.mubr.bf16.mxu1 %v2908_v39  ;;  %v10981_v32 = vpop.permute.xlu1 %535  ;;  %v1965_v16 = vadd.f32 %v10124_v27, %v1829_v52  ;;  %v1964_v31 = vadd.f32 %v10138_v45, %v1828_v62 }
 0x1fb   : > { %9227 = vset.pattern.permute.xlu1 %v14122_v5  ;;  %14205 = vst [vmem:[#allocation116_spill] sm:$0xff] %v10981_v32  ;;  %3237 = vmatmul.mubr.bf16.gmra.mrb[16].mxu1 %v2907_v46  ;;  %v771_v51 = vmul.f32 %v10077_v37, %v10981_v32  ;;  %v770_v36 = vmul.f32 %v10089_v41, %v10981_v32 }
 0x1fc   : > { %1549 = vperm.xlu1 %9227, %v9616_v0   ;;  %v2093_v29 = vmax.f32 %v1965_v16, 0.0  ;;  %v2092_v7 = vmax.f32 %v1964_v31, 0.0  ;;  %v11000_v0 = vpop.permute.xlu0 %550 }
 0x1fd   : > { %14208 = vst [vmem:[#allocation119_spill] sm:$0xff] %v11000_v0 }
 0x1fe   : > { %v2187_v57 = vpack.c.bf16 %v2093_v29, %v2091_v43  ;;  %v2186_v12 = vpack.c.bf16 %v2092_v7, %v2090_v4  ;;  %v772_v43 = vmul.f32 %v10089_v41, %v10986_v34 }
 0x1ff   : > { %v10989_v49 = vpop.permute.xlu1 %967 }
 0x200   : > { %9228 = vset.pattern.permute.xlu1 %v14116_v22  ;;  %14207 = vst [vmem:[#allocation118_spill] sm:$0xff] %v10989_v49  ;;  %v1172_v14 = vmul.f32 %v10073_v35, %v10989_v49  ;;  %v1173_v58 = vmul.f32 %v10080_v38, %v10989_v49  ;;  %2610 = vmatprep.mubr.bf16.mxu0 %v2187_v57 }
 0x201   : > { %605 = vperm.xlu1 %9228, %v10604_v30   ;;  %2611 = vmatmul.mubr.bf16.gmra.mrb[64].mxu0 %v2186_v12 }
 0x202   : > { %v1301_v46 = vadd.f32 %v1173_v58, %v771_v51  ;;  %v1300_v62 = vadd.f32 %v1172_v14, %v770_v36  ;;  %v11022_v58 = vpop.permute.xlu0 %560 }
 0x203   : > { %v2502_v39 = vpop.f32.mrb[20].mxu0  ;;  %v11006_v52 = vpop.permute.xlu1 %971 }
 0x204   : > { %14209 = vst [vmem:[#allocation120_spill] sm:$0xff] %v11006_v52  ;;  %v2503_v16 = vadd.f32 %v2502_v39, %v10792_v42  ;;  %v1175_v31 = vmul.f32 %v10080_v38, %v11006_v52  ;;  %v2504_v56 = vpop.f32.mrb[21].mxu0  ;;  %v1174_v29 = vmul.f32 %v10073_v35, %v11006_v52  ;;  %v1831_v51 = vadd.f32 %v1703_v59, %v1301_v46  ;;  %v359_v39 = vld [vmem:[%s9872_s19 + $0x1f8] sm:$0xff] }
 0x205   : > { %9229 = vset.pattern.permute.xlu1 %v14120_v8  ;;  %v2505_v4 = vadd.f32 %v2504_v56, %v10801_v53  ;;  %v2506_v7 = vpop.f32.mrb[22].mxu0  ;;  %v1830_v36 = vadd.f32 %v1702_v1, %v1300_v62  ;;  %680 = vperm.xlu0 %9250, %v359_v39  }
 0x206   : > { %1023 = vperm.xlu1 %9229, %v10604_v30   ;;  %v2507_v57 = vadd.f32 %v2506_v7, %v10792_v42  ;;  %v2508_v12 = vpop.f32.mrb[23].mxu0  ;;  %v2791_v10 = vmax.f32 %v2503_v16, 0.0  ;;  %v1303_v52 = vadd.f32 %v1175_v31, %v773_v50  ;;  %v1302_v46 = vadd.f32 %v1174_v29, %v772_v43  ;;  %v11040_v29 = vpop.permute.xlu0 %570 }
 0x207   : > { %v2509_v14 = vadd.f32 %v2508_v12, %v10801_v53  ;;  %v2792_v32 = vmax.f32 %v2505_v4, 0.0  ;;  %v1967_v62 = vadd.f32 %v10124_v27, %v1831_v51  ;;  %v1966_v50 = vadd.f32 %v10138_v45, %v1830_v36 }
 0x208   : > { %v2793_v34 = vmax.f32 %v2507_v57, 0.0  ;;  %v11025_v49 = vpop.permute.xlu1 %1501 }
 0x209   : > { %14210 = vst [vmem:[#allocation121_spill] sm:$0xff] %v11025_v49  ;;  %v2794_v56 = vmax.f32 %v2509_v14, 0.0  ;;  %v1704_v30 = vmul.f32 %v10086_v40, %v11025_v49  ;;  %v1705_v59 = vmul.f32 %v10096_v44, %v11025_v49  ;;  %9254 = vset.pattern.permute.xlu0 %v14122_v5 }
 0x20a   : > { %1027 = vperm.xlu1 %9229, %v10648_v63   ;;  %v2909_v1 = vpack.c.bf16 %v2793_v34, %v2791_v10  ;;  %v358_v10 = vld [vmem:[%s9872_s19 + $0x1f0] sm:$0xff] }
 0x20b   : > { %v2910_v16 = vpack.c.bf16 %v2794_v56, %v2792_v32  ;;  %v1833_v4 = vadd.f32 %v1705_v59, %v1303_v52  ;;  %v1832_v7 = vadd.f32 %v1704_v30, %v1302_v46  ;;  %v2095_v32 = vmax.f32 %v1967_v62, 0.0  ;;  %1609 = vperm.xlu0 %9254, %v358_v10   ;;  %v11054_v30 = vpop.permute.xlu0 %580 }
 0x20c   : > { %v2094_v52 = vmax.f32 %v1966_v50, 0.0  ;;  %v1707_v46 = vmul.f32 %v10096_v44, %v10811_v60  ;;  %v1706_v62 = vmul.f32 %v10086_v40, %v10811_v60  ;;  %v777_v50 = vmul.f32 %v10077_v37, %v11000_v0 }
 0x20d   : > { %3246 = vmatprep.mubr.bf16.mxu1 %v2910_v16  ;;  %v11036_v31 = vpop.permute.xlu1 %545  ;;  %v1969_v57 = vadd.f32 %v10124_v27, %v1833_v4  ;;  %v1968_v43 = vadd.f32 %v10138_v45, %v1832_v7 }
 0x20e   : > { %9230 = vset.pattern.permute.xlu1 %v14122_v5  ;;  %14211 = vst [vmem:[#allocation122_spill] sm:$0xff] %v11036_v31  ;;  %3247 = vmatmul.mubr.bf16.gmra.mrb[20].mxu1 %v2909_v1  ;;  %v775_v39 = vmul.f32 %v10077_v37, %v11036_v31  ;;  %v774_v59 = vmul.f32 %v10089_v41, %v11036_v31 }
 0x20f   : > { %1557 = vperm.xlu1 %9230, %v10648_v63   ;;  %v2097_v34 = vmax.f32 %v1969_v57, 0.0  ;;  %v2096_v12 = vmax.f32 %v1968_v43, 0.0 }
 0x211   : > { %v2189_v51 = vpack.c.bf16 %v2097_v34, %v2095_v32  ;;  %v2188_v14 = vpack.c.bf16 %v2096_v12, %v2094_v52  ;;  %v776_v32 = vmul.f32 %v10089_v41, %v11000_v0 }
 0x212   : > { %v11045_v36 = vpop.permute.xlu1 %975 }
 0x213   : > { %9231 = vset.pattern.permute.xlu1 %v14116_v22  ;;  %14212 = vst [vmem:[#allocation123_spill] sm:$0xff] %v11045_v36  ;;  %v1176_v56 = vmul.f32 %v10073_v35, %v11045_v36  ;;  %v1177_v63 = vmul.f32 %v10080_v38, %v11045_v36  ;;  %2620 = vmatprep.mubr.bf16.mxu0 %v2189_v51 }
 0x214   : > { %615 = vperm.xlu1 %9231, %v10627_v33   ;;  %2621 = vmatmul.mubr.bf16.gmra.mrb[68].mxu0 %v2188_v14 }
 0x215   : > { %v1305_v1 = vadd.f32 %v1177_v63, %v775_v39  ;;  %v1304_v7 = vadd.f32 %v1176_v56, %v774_v59  ;;  %v11077_v39 = vpop.permute.xlu0 %590 }
 0x216   : > { %v2512_v16 = vpop.f32.mrb[24].mxu0  ;;  %v11062_v4 = vpop.permute.xlu1 %979 }
 0x217   : > { %14213 = vst [vmem:[#allocation124_spill] sm:$0xff] %v11062_v4  ;;  %v2513_v57 = vadd.f32 %v2512_v16, %v10792_v42  ;;  %v1179_v43 = vmul.f32 %v10080_v38, %v11062_v4  ;;  %v2514_v10 = vpop.f32.mrb[25].mxu0  ;;  %v1178_v34 = vmul.f32 %v10073_v35, %v11062_v4  ;;  %v1835_v56 = vadd.f32 %v1707_v46, %v1305_v1 }
 0x218   : > { %9232 = vset.pattern.permute.xlu1 %v14120_v8  ;;  %v2515_v52 = vadd.f32 %v2514_v10, %v10801_v53  ;;  %v2516_v12 = vpop.f32.mrb[26].mxu0  ;;  %v1834_v59 = vadd.f32 %v1706_v62, %v1304_v7 }
 0x219   : > { %1031 = vperm.xlu1 %9232, %v10627_v33   ;;  %v2517_v51 = vadd.f32 %v2516_v12, %v10792_v42  ;;  %v2518_v14 = vpop.f32.mrb[27].mxu0  ;;  %v2795_v16 = vmax.f32 %v2513_v57, 0.0  ;;  %v1307_v4 = vadd.f32 %v1179_v43, %v777_v50  ;;  %v1306_v12 = vadd.f32 %v1178_v34, %v776_v32 }
 0x21a   : > { %v2519_v63 = vadd.f32 %v2518_v14, %v10801_v53  ;;  %v2796_v60 = vmax.f32 %v2515_v52, 0.0  ;;  %v1971_v1 = vadd.f32 %v10124_v27, %v1835_v56  ;;  %v1970_v52 = vadd.f32 %v10138_v45, %v1834_v59 }
 0x21b   : > { %v2797_v31 = vmax.f32 %v2517_v51, 0.0  ;;  %v11080_v0 = vpop.permute.xlu1 %1509  ;;  %v11089_v51 = vpop.permute.xlu0 %600 }
 0x21c   : > { %14214 = vst [vmem:[#allocation125_spill] sm:$0xff] %v11080_v0  ;;  %v2798_v36 = vmax.f32 %v2519_v63, 0.0  ;;  %v1708_v10 = vmul.f32 %v10086_v40, %v11080_v0  ;;  %v1709_v33 = vmul.f32 %v10096_v44, %v11080_v0 }
 0x21d   : > { %1035 = vperm.xlu1 %9232, %v10696_v2   ;;  %v2911_v46 = vpack.c.bf16 %v2797_v31, %v2795_v16  ;;  %v2099_v31 = vmax.f32 %v1971_v1, 0.0 }
 0x21e   : > { %v2912_v62 = vpack.c.bf16 %v2798_v36, %v2796_v60  ;;  %v1837_v7 = vadd.f32 %v1709_v33, %v1307_v4  ;;  %v1836_v57 = vadd.f32 %v1708_v10, %v1306_v12  ;;  %v5234_v60 = vld [vmem:[%s13829_s2] sm:$0x77]  ;;  %v2098_v4 = vmax.f32 %v1970_v52, 0.0 }
 0x21f   : > { %v5239_v34 = vrot.slane %v5234_v60, %v10054_v25  ;;  %v5243_v56 = vrot.slane %v5234_v60, %v10039_v20  ;;  %v5385_v10 = vrot.slane %v5234_v60, %v10036_v19  ;;  %v5389_v33 = vrot.slane %v5234_v60, %v10042_v21  ;;  %v9391_v20 = vld [vmem:[#allocation2 + $0x2d0] ss:$8 sps:$4 sm:$0xff]  }
 0x220   : > { %3256 = vmatprep.mubr.bf16.mxu1 %v2912_v62  ;;  %v11092_v50 = vpop.permute.xlu1 %555  ;;  %v1973_v43 = vadd.f32 %v10124_v27, %v1837_v7  ;;  %v1972_v14 = vadd.f32 %v10138_v45, %v1836_v57  ;;  %v5659_v12 = vrot.slane %v5234_v60, %v10051_v24  ;;  %v9617_v7 = vld [vmem:[%s9872_s19 + $0x1a0] sm:$0xff]  ;;  %v5663_v52 = vrot.slane %v5234_v60, %v10061_v28 }
 0x221   : > { %9233 = vset.pattern.permute.xlu1 %v14122_v5  ;;  %14215 = vst [vmem:[#allocation126_spill] sm:$0xff] %v11092_v50  ;;  %3257 = vmatmul.mubr.bf16.gmra.mrb[24].mxu1 %v2911_v46  ;;  %v779_v46 = vmul.f32 %v10077_v37, %v11092_v50  ;;  %v778_v57 = vmul.f32 %v10089_v41, %v11092_v50 }
 0x222   : > { %1565 = vperm.xlu1 %9233, %v10696_v2   ;;  %v2101_v36 = vmax.f32 %v1973_v43, 0.0  ;;  %v2100_v32 = vmax.f32 %v1972_v14, 0.0  ;;  %v11105_v2 = vpop.permute.xlu0 %1513  ;;  %v11121_v43 = vrot.slane %v5239_v34, %v10054_v25  ;;  %v11124_v14 = vrot.slane %v5243_v56, %v10054_v25 }
 0x223   : > { %14217 = vst [vmem:[#allocation128_spill] sm:$0xff] %v11105_v2  ;;  %v11133_v60 = vrot.slane %v5385_v10, %v10036_v19 }
 0x224   : > { %v2191_v63 = vpack.c.bf16 %v2101_v36, %v2099_v31  ;;  %v2190_v59 = vpack.c.bf16 %v2100_v32, %v2098_v4  ;;  %v1711_v36 = vmul.f32 %v10096_v44, %v11105_v2  ;;  %v780_v4 = vmul.f32 %v10089_v41, %v11022_v58 }
 0x225   : > { %v11103_v16 = vpop.permute.xlu1 %983 }
 0x226   : > { %9234 = vset.pattern.permute.xlu1 %v14116_v22  ;;  %14216 = vst [vmem:[#allocation127_spill] sm:$0xff] %v11103_v16  ;;  %v1180_v1 = vmul.f32 %v10073_v35, %v11103_v16  ;;  %v1181_v62 = vmul.f32 %v10080_v38, %v11103_v16  ;;  %2630 = vmatprep.mubr.bf16.mxu0 %v2191_v63 }
 0x227   : > { %625 = vperm.xlu1 %9234, %v9617_v7   ;;  %2631 = vmatmul.mubr.bf16.gmra.mrb[72].mxu0 %v2190_v59  ;;  %v1710_v63 = vmul.f32 %v10086_v40, %v11105_v2  ;;  %v5332_v2 = vmul.f32 %v11121_v43, %v11022_v58 }
 0x228   : > { %v1309_v31 = vadd.f32 %v1181_v62, %v779_v46  ;;  %v1308_v32 = vadd.f32 %v1180_v1, %v778_v57  ;;  %v11139_v46 = vrot.slane %v5389_v33, %v10036_v19  ;;  %v11142_v1 = vrot.slane %v5659_v12, %v10051_v24 }
 0x229   : > { %v2522_v59 = vpop.f32.mrb[28].mxu0  ;;  %v988_v50 = vpop.permute.xlu1 %987  ;;  %v781_v62 = vmul.f32 %v10077_v37, %v11022_v58  ;;  %v5333_v19 = vmul.f32 %v11124_v14, %v11022_v58 }
 0x22a   : > { %v2523_v34 = vadd.f32 %v2522_v59, %v10792_v42  ;;  %v1182_v25 = vmul.f32 %v10073_v35, %v988_v50  ;;  %v2524_v56 = vpop.f32.mrb[29].mxu0  ;;  %v1183_v57 = vmul.f32 %v10080_v38, %v988_v50  ;;  %v11149_v59 = vrot.slane %v5663_v52, %v10051_v24 }
 0x22b   : > { %9235 = vset.pattern.permute.xlu1 %v14120_v8  ;;  %v2525_v10 = vadd.f32 %v2524_v56, %v10801_v53  ;;  %v2526_v28 = vpop.f32.mrb[30].mxu0  ;;  %v1839_v33 = vadd.f32 %v1711_v36, %v1309_v31  ;;  %v1838_v0 = vadd.f32 %v1710_v63, %v1308_v32  ;;  %v5478_v52 = vmul.f32 %v11133_v60, %v988_v50 }
 0x22c   : > { %1039 = vperm.xlu1 %9235, %v9617_v7   ;;  %v2527_v12 = vadd.f32 %v2526_v28, %v10792_v42  ;;  %v2528_v16 = vpop.f32.mrb[31].mxu0  ;;  %v2799_v49 = vmax.f32 %v2523_v34, 0.0  ;;  %v1310_v56 = vadd.f32 %v1182_v25, %v780_v4  ;;  %v5479_v48 = vmul.f32 %v11139_v46, %v988_v50 }
 0x22d   : > { %v2529_v54 = vadd.f32 %v2528_v16, %v10801_v53  ;;  %v2800_v17 = vmax.f32 %v2525_v10, 0.0  ;;  %v1311_v26 = vadd.f32 %v1183_v57, %v781_v62  ;;  %v1975_v36 = vadd.f32 %v10124_v27, %v1839_v33 }
 0x22e   : > { %v2801_v7 = vmax.f32 %v2527_v12, 0.0  ;;  %v1518_v6 = vpop.permute.xlu1 %1517  ;;  %v5606_v16 = vadd.f32 %v5478_v52, %v5332_v2  ;;  %v1974_v25 = vadd.f32 %v10138_v45, %v1838_v0 }
 0x22f   : > { %v2802_v21 = vmax.f32 %v2529_v54, 0.0  ;;  %v1712_v58 = vmul.f32 %v10086_v40, %v1518_v6  ;;  %v1713_v31 = vmul.f32 %v10096_v44, %v1518_v6  ;;  %v5752_v4 = vmul.f32 %v11142_v1, %v1518_v6 }
 0x230   : > { %1043 = vperm.xlu1 %9235, %v10751_v61   ;;  %v2913_v28 = vpack.c.bf16 %v2801_v7, %v2799_v49  ;;  %v5607_v54 = vadd.f32 %v5479_v48, %v5333_v19  ;;  %v5753_v2 = vmul.f32 %v11149_v59, %v1518_v6  ;;  %v2103_v10 = vmax.f32 %v1975_v36, 0.0  ;;  %v1522_v19 = vpop.permute.xlu0 %1521 }
 0x231   : > { %v1840_v32 = vadd.f32 %v1712_v58, %v1310_v56  ;;  %v1841_v63 = vadd.f32 %v1713_v31, %v1311_v26  ;;  %v2914_v34 = vpack.c.bf16 %v2802_v21, %v2800_v17  ;;  %v11165_v50 = vadd.f32 %v5752_v4, %v5606_v16 }
 0x232   : > { %v2102_v26 = vmax.f32 %v1974_v25, 0.0  ;;  %v11172_v0 = vadd.f32 %v5753_v2, %v5607_v54  ;;  %v1714_v36 = vmul.f32 %v10086_v40, %v1522_v19 }
 0x233   : > { %14218 = vst [vmem:[#allocation129_spill] sm:$0xff] %v11165_v50  ;;  %3266 = vmatprep.mubr.bf16.mxu1 %v2914_v34  ;;  %v566_v62 = vpop.permute.xlu1 %565  ;;  %v1977_v57 = vadd.f32 %v10124_v27, %v1841_v63  ;;  %v1976_v49 = vadd.f32 %v10138_v45, %v1840_v32  ;;  %v1715_v32 = vmul.f32 %v10096_v44, %v1522_v19 }
 0x234   : > { %9237 = vset.pattern.permute.xlu1 %v14122_v5  ;;  %3267 = vmatmul.mubr.bf16.gmra.mrb[28].mxu1 %v2913_v28  ;;  %14219 = vst [vmem:[#allocation130_spill] sm:$0xff] %v11172_v0  ;;  %v782_v12 = vmul.f32 %v10089_v41, %v566_v62  ;;  %v783_v56 = vmul.f32 %v10077_v37, %v566_v62  ;;  %v9618_v0 = vld [vmem:[%s9872_s19 + $0x1b8] sm:$0xff] }
 0x235   : > { %1573 = vperm.xlu1 %9237, %v10751_v61   ;;  %v2105_v21 = vmax.f32 %v1977_v57, 0.0  ;;  %v2104_v17 = vmax.f32 %v1976_v49, 0.0  ;;  %v5334_v7 = vmul.f32 %v11121_v43, %v566_v62  ;;  %v5335_v28 = vmul.f32 %v11124_v14, %v566_v62 }
 0x236   : > { %v784_v57 = vmul.f32 %v10089_v41, %v11040_v29  ;;  %v785_v62 = vmul.f32 %v10077_v37, %v11040_v29 }
 0x237   : > { %v2193_v48 = vpack.c.bf16 %v2105_v21, %v2103_v10  ;;  %v2192_v33 = vpack.c.bf16 %v2104_v17, %v2102_v26  ;;  %v5336_v21 = vmul.f32 %v11121_v43, %v11040_v29  ;;  %v5337_v26 = vmul.f32 %v11124_v14, %v11040_v29 }
 0x238   : > { %v992_v52 = vpop.permute.xlu1 %991 }
 0x239   : > { %9238 = vset.pattern.permute.xlu1 %v14116_v22  ;;  %v1184_v6 = vmul.f32 %v10073_v35, %v992_v52  ;;  %v1185_v61 = vmul.f32 %v10080_v38, %v992_v52  ;;  %v5480_v58 = vmul.f32 %v11133_v60, %v992_v52  ;;  %v5481_v31 = vmul.f32 %v11139_v46, %v992_v52 }
 0x23a   : > { %635 = vperm.xlu1 %9238, %v10821_v55   ;;  %2640 = vmatprep.mubr.bf16.mxu0 %v2193_v48 }
 0x23b   : > { %v1312_v16 = vadd.f32 %v1184_v6, %v782_v12  ;;  %v1313_v4 = vadd.f32 %v1185_v61, %v783_v56  ;;  %2641 = vmatmul.mubr.bf16.gmra.mrb[76].mxu0 %v2192_v33  ;;  %v5608_v63 = vadd.f32 %v5480_v58, %v5334_v7  ;;  %v5609_v54 = vadd.f32 %v5481_v31, %v5335_v28 }
 0x23c   : > { %v2532_v34 = vpop.f32.mrb[32].mxu0  ;;  %v996_v25 = vpop.permute.xlu1 %995  ;;  %v5754_v6 = vmul.f32 %v11142_v1, %v1522_v19  ;;  %v5755_v31 = vmul.f32 %v11149_v59, %v1522_v19 }
 0x23d   : > { %v2533_v49 = vadd.f32 %v2532_v34, %v10792_v42  ;;  %v1186_v2 = vmul.f32 %v10073_v35, %v996_v25  ;;  %v2534_v10 = vpop.f32.mrb[33].mxu0  ;;  %v1187_v17 = vmul.f32 %v10080_v38, %v996_v25  ;;  %v1842_v12 = vadd.f32 %v1714_v36, %v1312_v16 }
 0x23e   : > { %v2535_v48 = vadd.f32 %v2534_v10, %v10801_v53  ;;  %9239 = vset.pattern.permute.xlu1 %v14120_v8  ;;  %v2536_v33 = vpop.f32.mrb[34].mxu0  ;;  %v1843_v56 = vadd.f32 %v1715_v32, %v1313_v4  ;;  %v5482_v61 = vmul.f32 %v11133_v60, %v996_v25  ;;  %v5483_v29 = vmul.f32 %v11139_v46, %v996_v25 }
 0x23f   : > { %v2537_v7 = vadd.f32 %v2536_v33, %v10792_v42  ;;  %1047 = vperm.xlu1 %9239, %v10821_v55   ;;  %v2538_v52 = vpop.f32.mrb[35].mxu0  ;;  %v2803_v28 = vmax.f32 %v2533_v49, 0.0  ;;  %v1314_v34 = vadd.f32 %v1186_v2, %v784_v57  ;;  %v1315_v36 = vadd.f32 %v1187_v17, %v785_v62 }
 0x240   : > { %v2539_v58 = vadd.f32 %v2538_v52, %v10801_v53  ;;  %v2804_v32 = vmax.f32 %v2535_v48, 0.0  ;;  %v1979_v25 = vadd.f32 %v10124_v27, %v1843_v56  ;;  %v1978_v52 = vadd.f32 %v10138_v45, %v1842_v12 }
 0x241   : > { %v2805_v16 = vmax.f32 %v2537_v7, 0.0  ;;  %v1526_v4 = vpop.permute.xlu1 %1525  ;;  %v11211_v57 = vadd.f32 %v5754_v6, %v5608_v63  ;;  %v11213_v62 = vadd.f32 %v5755_v31, %v5609_v54  ;;  %v5610_v2 = vadd.f32 %v5482_v61, %v5336_v21  ;;  %v1530_v31 = vpop.permute.xlu0 %1529 }
 0x242   : > { %v2806_v10 = vmax.f32 %v2539_v58, 0.0  ;;  %v1716_v55 = vmul.f32 %v10086_v40, %v1526_v4  ;;  %v1717_v33 = vmul.f32 %v10096_v44, %v1526_v4  ;;  %v5756_v17 = vmul.f32 %v11142_v1, %v1526_v4 }
 0x243   : > { %1051 = vperm.xlu1 %9239, %v9618_v0   ;;  %v2915_v50 = vpack.c.bf16 %v2805_v16, %v2803_v28  ;;  %14220 = vst [vmem:[#allocation131_spill] sm:$0xff] %v11211_v57  ;;  %14221 = vst [vmem:[#allocation132_spill] sm:$0xff] %v11213_v62  ;;  %v5611_v28 = vadd.f32 %v5483_v29, %v5337_v26  ;;  %v5757_v56 = vmul.f32 %v11149_v59, %v1526_v4 }
 0x244   : > { %v1844_v18 = vadd.f32 %v1716_v55, %v1314_v34  ;;  %v1845_v19 = vadd.f32 %v1717_v33, %v1315_v36  ;;  %v2916_v49 = vpack.c.bf16 %v2806_v10, %v2804_v32  ;;  %v2107_v12 = vmax.f32 %v1979_v25, 0.0 }
 0x245   : > { %v2106_v34 = vmax.f32 %v1978_v52, 0.0  ;;  %v11220_v21 = vadd.f32 %v5756_v17, %v5610_v2  ;;  %v11222_v6 = vadd.f32 %v5757_v56, %v5611_v28  ;;  %v1718_v55 = vmul.f32 %v10086_v40, %v1530_v31 }
 0x246   : > { %3276 = vmatprep.mubr.bf16.mxu1 %v2916_v49  ;;  %v576_v48 = vpop.permute.xlu1 %575  ;;  %v1981_v7 = vadd.f32 %v10124_v27, %v1845_v19  ;;  %v1980_v58 = vadd.f32 %v10138_v45, %v1844_v18  ;;  %v1719_v33 = vmul.f32 %v10096_v44, %v1530_v31  ;;  %v788_v2 = vmul.f32 %v10089_v41, %v11054_v30 }
 0x247   : > { %9240 = vset.pattern.permute.xlu1 %v14122_v5  ;;  %3277 = vmatmul.mubr.bf16.gmra.mrb[32].mxu1 %v2915_v50  ;;  %14222 = vst [vmem:[#allocation133_spill] sm:$0xff] %v11220_v21  ;;  %14223 = vst [vmem:[#allocation134_spill] sm:$0xff] %v11222_v6  ;;  %v786_v18 = vmul.f32 %v10089_v41, %v576_v48  ;;  %v787_v26 = vmul.f32 %v10077_v37, %v576_v48 }
 0x248   : > { %1581 = vperm.xlu1 %9240, %v9618_v0   ;;  %v2109_v63 = vmax.f32 %v1981_v7, 0.0  ;;  %v2108_v54 = vmax.f32 %v1980_v58, 0.0  ;;  %v5338_v29 = vmul.f32 %v11121_v43, %v576_v48  ;;  %v5339_v16 = vmul.f32 %v11124_v14, %v576_v48 }
 0x249   : > { %v789_v17 = vmul.f32 %v10077_v37, %v11054_v30 }
 0x24a   : > { %v2195_v61 = vpack.c.bf16 %v2109_v63, %v2107_v12  ;;  %v2194_v36 = vpack.c.bf16 %v2108_v54, %v2106_v34  ;;  %v5758_v12 = vmul.f32 %v11142_v1, %v1530_v31  ;;  %v5759_v34 = vmul.f32 %v11149_v59, %v1530_v31 }
 0x24b   : > { %v1000_v4 = vpop.permute.xlu1 %999  ;;  %v5340_v63 = vmul.f32 %v11121_v43, %v11054_v30  ;;  %v5341_v54 = vmul.f32 %v11124_v14, %v11054_v30 }
 0x24c   : > { %9241 = vset.pattern.permute.xlu1 %v14116_v22  ;;  %v1188_v50 = vmul.f32 %v10073_v35, %v1000_v4  ;;  %v1189_v0 = vmul.f32 %v10080_v38, %v1000_v4  ;;  %v5484_v32 = vmul.f32 %v11133_v60, %v1000_v4  ;;  %v5485_v10 = vmul.f32 %v11139_v46, %v1000_v4 }
 0x24d   : > { %645 = vperm.xlu1 %9241, %v10862_v47   ;;  %2650 = vmatprep.mubr.bf16.mxu0 %v2195_v61 }
 0x24e   : > { %v1316_v25 = vadd.f32 %v1188_v50, %v786_v18  ;;  %v1317_v52 = vadd.f32 %v1189_v0, %v787_v26  ;;  %2651 = vmatmul.mubr.bf16.gmra.mrb[80].mxu0 %v2194_v36  ;;  %v5612_v19 = vadd.f32 %v5484_v32, %v5338_v29  ;;  %v5613_v49 = vadd.f32 %v5485_v10, %v5339_v16 }
 0x24f   : > { %v2542_v48 = vpop.f32.mrb[36].mxu0 }
 0x250   : > { %v1004_v7 = vpop.permute.xlu1 %1003  ;;  %v2543_v58 = vadd.f32 %v2542_v48, %v10792_v42  ;;  %v2544_v56 = vpop.f32.mrb[37].mxu0  ;;  %v1846_v26 = vadd.f32 %v1718_v55, %v1316_v25  ;;  %v1847_v29 = vadd.f32 %v1719_v33, %v1317_v52  ;;  %v11256_v6 = vadd.f32 %v5758_v12, %v5612_v19 }
 0x251   : > { %v1190_v28 = vmul.f32 %v10073_v35, %v1004_v7  ;;  %v1191_v61 = vmul.f32 %v10080_v38, %v1004_v7  ;;  %v2545_v36 = vadd.f32 %v2544_v56, %v10801_v53  ;;  %9242 = vset.pattern.permute.xlu1 %v14120_v8  ;;  %v2546_v18 = vpop.f32.mrb[38].mxu0  ;;  %v5486_v16 = vmul.f32 %v11133_v60, %v1004_v7 }
 0x252   : > { %v2547_v4 = vadd.f32 %v2546_v18, %v10792_v42  ;;  %1055 = vperm.xlu1 %9242, %v10862_v47   ;;  %v2548_v31 = vpop.f32.mrb[39].mxu0  ;;  %v2807_v50 = vmax.f32 %v2543_v58, 0.0  ;;  %v5487_v30 = vmul.f32 %v11139_v46, %v1004_v7  ;;  %14224 = vst [vmem:[#allocation135_spill] sm:$0xff] %v11256_v6  ;;  %v11258_v55 = vadd.f32 %v5759_v34, %v5613_v49  ;;  %v9619_v18 = vld [vmem:[%s9872_s19 + $0x1c8] sm:$0xff] }
 0x253   : > { %v1318_v0 = vadd.f32 %v1190_v28, %v788_v2  ;;  %v2549_v32 = vadd.f32 %v2548_v31, %v10801_v53  ;;  %v1319_v10 = vadd.f32 %v1191_v61, %v789_v17  ;;  %v2808_v33 = vmax.f32 %v2545_v36, 0.0 }
 0x254   : > { %v2809_v48 = vmax.f32 %v2547_v4, 0.0  ;;  %14225 = vst [vmem:[#allocation136_spill] sm:$0xff] %v11258_v55  ;;  %v1983_v7 = vadd.f32 %v10124_v27, %v1847_v29  ;;  %v1982_v58 = vadd.f32 %v10138_v45, %v1846_v26  ;;  %v5614_v17 = vadd.f32 %v5486_v16, %v5340_v63 }
 0x255   : > { %v1534_v56 = vpop.permute.xlu1 %1533  ;;  %v2810_v25 = vmax.f32 %v2549_v32, 0.0  ;;  %v5615_v12 = vadd.f32 %v5487_v30, %v5341_v54  ;;  %v1538_v30 = vpop.permute.xlu0 %1537 }
 0x256   : > { %v1720_v52 = vmul.f32 %v10086_v40, %v1534_v56  ;;  %v1721_v47 = vmul.f32 %v10096_v44, %v1534_v56  ;;  %1059 = vperm.xlu1 %9242, %v9619_v18   ;;  %v2917_v2 = vpack.c.bf16 %v2809_v48, %v2807_v50  ;;  %v5760_v49 = vmul.f32 %v11142_v1, %v1534_v56 }
 0x257   : > { %v2918_v19 = vpack.c.bf16 %v2810_v25, %v2808_v33  ;;  %v5761_v34 = vmul.f32 %v11149_v59, %v1534_v56  ;;  %v2111_v26 = vmax.f32 %v1983_v7, 0.0  ;;  %v2110_v29 = vmax.f32 %v1982_v58, 0.0 }
 0x258   : > { %v1848_v28 = vadd.f32 %v1720_v52, %v1318_v0  ;;  %v1849_v61 = vadd.f32 %v1721_v47, %v1319_v10  ;;  %v11269_v50 = vadd.f32 %v5760_v49, %v5614_v17  ;;  %v1722_v7 = vmul.f32 %v10086_v40, %v1538_v30 }
 0x259   : > { %3286 = vmatprep.mubr.bf16.mxu1 %v2918_v19  ;;  %v11272_v0 = vadd.f32 %v5761_v34, %v5615_v12  ;;  %v1723_v58 = vmul.f32 %v10096_v44, %v1538_v30  ;;  %v792_v49 = vmul.f32 %v10089_v41, %v11077_v39  ;;  %v793_v12 = vmul.f32 %v10077_v37, %v11077_v39 }
 0x25a   : > { %v586_v36 = vpop.permute.xlu1 %585  ;;  %v1985_v4 = vadd.f32 %v10124_v27, %v1849_v61  ;;  %v1984_v31 = vadd.f32 %v10138_v45, %v1848_v28  ;;  %14226 = vst [vmem:[#allocation137_spill] sm:$0xff] %v11269_v50  ;;  %9243 = vset.pattern.permute.xlu1 %v14122_v5  ;;  %3287 = vmatmul.mubr.bf16.gmra.mrb[36].mxu1 %v2917_v2 }
 0x25b   : > { %1589 = vperm.xlu1 %9243, %v9619_v18   ;;  %14227 = vst [vmem:[#allocation138_spill] sm:$0xff] %v11272_v0  ;;  %v790_v10 = vmul.f32 %v10089_v41, %v586_v36  ;;  %v791_v48 = vmul.f32 %v10077_v37, %v586_v36  ;;  %v5342_v56 = vmul.f32 %v11121_v43, %v586_v36 }
 0x25c   : > { %v2113_v63 = vmax.f32 %v1985_v4, 0.0  ;;  %v2112_v16 = vmax.f32 %v1984_v31, 0.0  ;;  %v5343_v33 = vmul.f32 %v11124_v14, %v586_v36 }
 0x25e   : > { %v2197_v54 = vpack.c.bf16 %v2113_v63, %v2111_v26  ;;  %v2196_v32 = vpack.c.bf16 %v2112_v16, %v2110_v29  ;;  %v5762_v26 = vmul.f32 %v11142_v1, %v1538_v30  ;;  %v5763_v63 = vmul.f32 %v11149_v59, %v1538_v30 }
 0x25f   : > { %v1008_v25 = vpop.permute.xlu1 %1007  ;;  %9244 = vset.pattern.permute.xlu1 %v14116_v22  ;;  %v5344_v29 = vmul.f32 %v11121_v43, %v11077_v39  ;;  %v5345_v16 = vmul.f32 %v11124_v14, %v11077_v39 }
 0x260   : > { %v1192_v52 = vmul.f32 %v10073_v35, %v1008_v25  ;;  %v1193_v47 = vmul.f32 %v10080_v38, %v1008_v25  ;;  %v5488_v18 = vmul.f32 %v11133_v60, %v1008_v25  ;;  %v5489_v2 = vmul.f32 %v11139_v46, %v1008_v25  ;;  %655 = vperm.xlu1 %9244, %v10916_v11  }
 0x261   : > { %2660 = vmatprep.mubr.bf16.mxu0 %v2197_v54 }
 0x262   : > { %v1320_v17 = vadd.f32 %v1192_v52, %v790_v10  ;;  %v1321_v28 = vadd.f32 %v1193_v47, %v791_v48  ;;  %2661 = vmatmul.mubr.bf16.gmra.mrb[84].mxu0 %v2196_v32  ;;  %v5616_v61 = vadd.f32 %v5488_v18, %v5342_v56  ;;  %v5617_v19 = vadd.f32 %v5489_v2, %v5343_v33  ;;  %v2552_v34 = vpop.f32.mrb[40].mxu0  ;;  %v9352_v48 = vld [vmem:[#allocation2 + $0x200] ss:$8 sps:$4 sm:$0xff]   ;;  %v9354_v56 = vld [vmem:[#allocation2 + $0x204] ss:$8 sps:$4 sm:$0xff]   ;;  %v9620_v47 = vld [vmem:[%s9872_s19 + $0x1d0] sm:$0xff] }
 0x263   : > { %v1012_v36 = vpop.permute.xlu1 %1011  ;;  %v2553_v11 = vadd.f32 %v2552_v34, %v10792_v42  ;;  %v2554_v31 = vpop.f32.mrb[41].mxu0  ;;  %3910 = vmatprep.subr.bf16.mxu0 %v9354_v56 }
 0x264   : > { %v1194_v4 = vmul.f32 %v10073_v35, %v1012_v36  ;;  %v1195_v54 = vmul.f32 %v10080_v38, %v1012_v36  ;;  %v2555_v32 = vadd.f32 %v2554_v31, %v10801_v53  ;;  %9246 = vset.pattern.permute.xlu1 %v14120_v8  ;;  %v2556_v10 = vpop.f32.mrb[42].mxu0  ;;  %v1850_v33 = vadd.f32 %v1722_v7, %v1320_v17 }
 0x265   : > { %v1851_v25 = vadd.f32 %v1723_v58, %v1321_v28  ;;  %v5490_v52 = vmul.f32 %v11133_v60, %v1012_v36  ;;  %v2557_v30 = vadd.f32 %v2556_v10, %v10792_v42  ;;  %1063 = vperm.xlu1 %9246, %v9620_v47   ;;  %v2558_v18 = vpop.f32.mrb[43].mxu0  ;;  %v2811_v39 = vmax.f32 %v2553_v11, 0.0  ;;  %3911 = vmatpush1.bf16.msra.mxu0 %v9352_v48 }
 0x266   : > { %v1322_v2 = vadd.f32 %v1194_v4, %v792_v49  ;;  %v5491_v34 = vmul.f32 %v11139_v46, %v1012_v36  ;;  %v2559_v31 = vadd.f32 %v2558_v18, %v10801_v53  ;;  %v1323_v0 = vadd.f32 %v1195_v54, %v793_v12  ;;  %v9621_v49 = vld [vmem:[%s9872_s19 + $0x1d8] sm:$0xff] }
 0x267   : > { %v2813_v50 = vmax.f32 %v2557_v30, 0.0  ;;  %v11306_v7 = vadd.f32 %v5762_v26, %v5616_v61  ;;  %v11308_v58 = vadd.f32 %v5763_v63, %v5617_v19  ;;  %v2812_v17 = vmax.f32 %v2555_v32, 0.0 }
 0x268   : > { %v1542_v55 = vpop.permute.xlu1 %1541  ;;  %v2814_v28 = vmax.f32 %v2559_v31, 0.0  ;;  %v1987_v4 = vadd.f32 %v10124_v27, %v1851_v25  ;;  %v1986_v12 = vadd.f32 %v10138_v45, %v1850_v33  ;;  %v5618_v54 = vadd.f32 %v5490_v52, %v5344_v29  ;;  %v1546_v29 = vpop.permute.xlu0 %1545  ;;  %v9355_v25 = vld [vmem:[#allocation2 + $0x210] ss:$8 sps:$4 sm:$0xff]  }
 0x269   : > { %14228 = vst [vmem:[#allocation139_spill] sm:$0xff] %v11306_v7  ;;  %14229 = vst [vmem:[#allocation140_spill] sm:$0xff] %v11308_v58  ;;  %v1724_v10 = vmul.f32 %v10086_v40, %v1542_v55  ;;  %v1725_v11 = vmul.f32 %v10096_v44, %v1542_v55  ;;  %1067 = vperm.xlu1 %9246, %v9621_v49   ;;  %v2919_v36 = vpack.c.bf16 %v2813_v50, %v2811_v39  ;;  %v9366_v58 = vld [vmem:[#allocation2 + $0x244] ss:$8 sps:$4 sm:$0xff]  }
 0x26a   : > { %v2920_v61 = vpack.c.bf16 %v2814_v28, %v2812_v17  ;;  %v5764_v19 = vmul.f32 %v11142_v1, %v1542_v55  ;;  %v5619_v26 = vadd.f32 %v5491_v34, %v5345_v16  ;;  %v5765_v63 = vmul.f32 %v11149_v59, %v1542_v55  ;;  %v9360_v34 = vld [vmem:[#allocation2 + $0x224] ss:$8 sps:$4 sm:$0xff]  }
 0x26b   : > { %v1852_v56 = vadd.f32 %v1724_v10, %v1322_v2  ;;  %v1853_v48 = vadd.f32 %v1725_v11, %v1323_v0  ;;  %v2115_v33 = vmax.f32 %v1987_v4, 0.0  ;;  %v9357_v0 = vld [vmem:[#allocation2 + $0x214] ss:$8 sps:$4 sm:$0xff]   ;;  %v2114_v16 = vmax.f32 %v1986_v12, 0.0  ;;  %v9358_v11 = vld [vmem:[#allocation2 + $0x220] ss:$8 sps:$4 sm:$0xff]  }
 0x26c   : > { %3296 = vmatprep.mubr.bf16.mxu1 %v2920_v61  ;;  %v11319_v50 = vadd.f32 %v5764_v19, %v5618_v54  ;;  %v11322_v55 = vadd.f32 %v5765_v63, %v5619_v26  ;;  %3912 = vmatprep.subr.bf16.mxu0 %v9357_v0  ;;  %v11326_v10 = vpop.permute.xlu0 %1553  ;;  %v1726_v61 = vmul.f32 %v10086_v40, %v1546_v29  ;;  %v9363_v19 = vld [vmem:[#allocation2 + $0x234] ss:$8 sps:$4 sm:$0xff]   ;;  %v9361_v0 = vld [vmem:[#allocation2 + $0x230] ss:$8 sps:$4 sm:$0xff]  }
 0x26d   : > { %v596_v32 = vpop.permute.xlu1 %595  ;;  %v1989_v30 = vadd.f32 %v10124_v27, %v1853_v48  ;;  %v1988_v47 = vadd.f32 %v10138_v45, %v1852_v56  ;;  %9247 = vset.pattern.permute.xlu1 %v14122_v5  ;;  %3297 = vmatmul.mubr.bf16.gmra.mrb[40].mxu1 %v2919_v36  ;;  %v9622_v48 = vld [vmem:[%s9872_s19 + $0x1e0] sm:$0xff] }
 0x26e   : > { %14230 = vst [vmem:[#allocation141_spill] sm:$0xff] %v11319_v50  ;;  %1597 = vperm.xlu1 %9247, %v9621_v49   ;;  %14231 = vst [vmem:[#allocation142_spill] sm:$0xff] %v11322_v55  ;;  %3913 = vmatpush1.bf16.msra.mxu0 %v9355_v25  ;;  %v794_v31 = vmul.f32 %v10089_v41, %v596_v32  ;;  %v795_v17 = vmul.f32 %v10077_v37, %v596_v32  ;;  %v9364_v50 = vld [vmem:[#allocation2 + $0x240] ss:$8 sps:$4 sm:$0xff]  }
 0x26f   : > { %v2117_v52 = vmax.f32 %v1989_v30, 0.0  ;;  %v2116_v18 = vmax.f32 %v1988_v47, 0.0  ;;  %v5346_v54 = vmul.f32 %v11121_v43, %v596_v32  ;;  %v5347_v56 = vmul.f32 %v11124_v14, %v596_v32  ;;  %3914 = vmatprep.subr.bf16.mxu0 %v9360_v34 }
 0x270   : > { %v1727_v30 = vmul.f32 %v10096_v44, %v1546_v29  ;;  %v796_v47 = vmul.f32 %v10089_v41, %v11089_v51  ;;  %v5767_v34 = vmul.f32 %v11149_v59, %v1546_v29 }
 0x271   : > { %v2199_v39 = vpack.c.bf16 %v2117_v52, %v2115_v33  ;;  %v2198_v2 = vpack.c.bf16 %v2116_v18, %v2114_v16  ;;  %v797_v33 = vmul.f32 %v10077_v37, %v11089_v51 }
 0x272   : > { %v1016_v28 = vpop.permute.xlu1 %1015  ;;  %9248 = vset.pattern.permute.xlu1 %v14116_v22  ;;  %3915 = vmatpush1.bf16.msra.mxu0 %v9358_v11 }
 0x273   : > { %v1196_v49 = vmul.f32 %v10073_v35, %v1016_v28  ;;  %v1197_v36 = vmul.f32 %v10080_v38, %v1016_v28  ;;  %v5492_v4 = vmul.f32 %v11133_v60, %v1016_v28  ;;  %v5493_v12 = vmul.f32 %v11139_v46, %v1016_v28  ;;  %665 = vperm.xlu1 %9248, %v9622_v48  }
 0x274   : > { %2670 = vmatprep.mubr.bf16.mxu0 %v2199_v39  ;;  %3916 = vmatprep.subr.bf16.mxu0 %v9363_v19  ;;  %v5349_v28 = vmul.f32 %v11124_v14, %v11089_v51 }
 0x275   : > { %v1324_v26 = vadd.f32 %v1196_v49, %v794_v31  ;;  %v1325_v63 = vadd.f32 %v1197_v36, %v795_v17  ;;  %2671 = vmatmul.mubr.bf16.gmra.mrb[88].mxu0 %v2198_v2  ;;  %v2562_v25 = vpop.f32.mrb[44].mxu0  ;;  %v5620_v52 = vadd.f32 %v5492_v4, %v5346_v54  ;;  %v5621_v16 = vadd.f32 %v5493_v12, %v5347_v56  ;;  %v11353_v4 = vpop.permute.xlu0 %1561 }
 0x276   : > { %v1020_v32 = vpop.permute.xlu1 %1019  ;;  %v2563_v18 = vadd.f32 %v2562_v25, %v10792_v42  ;;  %v2564_v31 = vpop.f32.mrb[45].mxu0  ;;  %v5766_v2 = vmul.f32 %v11142_v1, %v1546_v29  ;;  %v5348_v17 = vmul.f32 %v11121_v43, %v11089_v51  ;;  %3917 = vmatpush1.bf16.msra.mxu0 %v9361_v0 }
 0x277   : > { %v1198_v39 = vmul.f32 %v10073_v35, %v1020_v32  ;;  %v1199_v11 = vmul.f32 %v10080_v38, %v1020_v32  ;;  %v2565_v49 = vadd.f32 %v2564_v31, %v10801_v53  ;;  %9249 = vset.pattern.permute.xlu1 %v14120_v8  ;;  %v2566_v36 = vpop.f32.mrb[46].mxu0  ;;  %v1854_v12 = vadd.f32 %v1726_v61, %v1324_v26 }
 0x278   : > { %v1855_v54 = vadd.f32 %v1727_v30, %v1325_v63  ;;  %v5494_v56 = vmul.f32 %v11133_v60, %v1020_v32  ;;  %v2567_v29 = vadd.f32 %v2566_v36, %v10792_v42  ;;  %1071 = vperm.xlu1 %9249, %v9622_v48   ;;  %v2568_v19 = vpop.f32.mrb[47].mxu0  ;;  %v2815_v25 = vmax.f32 %v2563_v18, 0.0  ;;  %3918 = vmatprep.subr.bf16.mxu0 %v9366_v58 }
 0x279   : > { %v1326_v55 = vadd.f32 %v1198_v39, %v796_v47  ;;  %v5495_v51 = vmul.f32 %v11139_v46, %v1020_v32  ;;  %v2569_v31 = vadd.f32 %v2568_v19, %v10801_v53  ;;  %v1327_v7 = vadd.f32 %v1199_v11, %v797_v33  ;;  %v9623_v32 = vld [vmem:[%s9872_s19 + $0x1e8] sm:$0xff] }
 0x27a   : > { %v2817_v6 = vmax.f32 %v2567_v29, 0.0  ;;  %v11359_v26 = vadd.f32 %v5766_v2, %v5620_v52  ;;  %v11361_v63 = vadd.f32 %v5767_v34, %v5621_v16  ;;  %v2816_v30 = vmax.f32 %v2565_v49, 0.0  ;;  %v11368_v2 = vpop.permute.xlu0 %1569  ;;  %3919 = vmatpush1.bf16.msra.mxu0 %v9364_v50  ;;  %v9369_v16 = vld [vmem:[#allocation2 + $0x254] ss:$8 sps:$4 sm:$0xff]   ;;  %v9367_v34 = vld [vmem:[#allocation2 + $0x250] ss:$8 sps:$4 sm:$0xff]  }
 0x27b   : > { %v1550_v61 = vpop.permute.xlu1 %1549  ;;  %v2818_v48 = vmax.f32 %v2569_v31, 0.0  ;;  %v1991_v0 = vadd.f32 %v10124_v27, %v1855_v54  ;;  %v1990_v33 = vadd.f32 %v10138_v45, %v1854_v12  ;;  %v5622_v49 = vadd.f32 %v5494_v56, %v5348_v17  ;;  %3920 = vmatprep.subr.bf16.mxu0 %v9369_v16  ;;  %v9372_v50 = vld [vmem:[#allocation2 + $0x264] ss:$8 sps:$4 sm:$0xff]  }
 0x27c   : > { %14232 = vst [vmem:[#allocation143_spill] sm:$0xff] %v11359_v26  ;;  %14233 = vst [vmem:[#allocation144_spill] sm:$0xff] %v11361_v63  ;;  %v1728_v18 = vmul.f32 %v10086_v40, %v1550_v61  ;;  %v1729_v47 = vmul.f32 %v10096_v44, %v1550_v61  ;;  %1075 = vperm.xlu1 %9249, %v9623_v32   ;;  %v2921_v39 = vpack.c.bf16 %v2817_v6, %v2815_v25 }
 0x27d   : > { %v2922_v52 = vpack.c.bf16 %v2818_v48, %v2816_v30  ;;  %v5768_v29 = vmul.f32 %v11142_v1, %v1550_v61  ;;  %v5623_v19 = vadd.f32 %v5495_v51, %v5349_v28  ;;  %v5769_v58 = vmul.f32 %v11149_v59, %v1550_v61 }
 0x27e   : > { %v1856_v11 = vadd.f32 %v1728_v18, %v1326_v55  ;;  %v1857_v36 = vadd.f32 %v1729_v47, %v1327_v7  ;;  %v2119_v7 = vmax.f32 %v1991_v0, 0.0  ;;  %v2118_v55 = vmax.f32 %v1990_v33, 0.0  ;;  %3921 = vmatpush1.bf16.msra.mxu0 %v9367_v34  ;;  %v611_v61 = vpop.permute.xlu0 %610 }
 0x27f   : > { %3306 = vmatprep.mubr.bf16.mxu1 %v2922_v52  ;;  %v11375_v25 = vadd.f32 %v5768_v29, %v5622_v49  ;;  %v11377_v28 = vadd.f32 %v5769_v58, %v5623_v19  ;;  %3922 = vmatprep.subr.bf16.mxu0 %v9372_v50  ;;  %v9375_v52 = vld [vmem:[#allocation2 + $0x274] ss:$8 sps:$4 sm:$0xff]   ;;  %v1730_v16 = vmul.f32 %v10086_v40, %v11326_v10 }
 0x280   : > { %v606_v6 = vpop.permute.xlu1 %605  ;;  %v1993_v54 = vadd.f32 %v10124_v27, %v1857_v36  ;;  %v1992_v12 = vadd.f32 %v10138_v45, %v1856_v11  ;;  %9251 = vset.pattern.permute.xlu1 %v14122_v5  ;;  %3307 = vmatmul.mubr.bf16.gmra.mrb[44].mxu1 %v2921_v39  ;;  %v9370_v39 = vld [vmem:[#allocation2 + $0x260] ss:$8 sps:$4 sm:$0xff]   ;;  %v1731_v34 = vmul.f32 %v10096_v44, %v11326_v10  ;;  %v9624_v49 = vld [vmem:[%s9872_s19 + $0x1f0] sm:$0xff] }
 0x281   : > { %1605 = vperm.xlu1 %9251, %v9623_v32   ;;  %14234 = vst [vmem:[#allocation145_spill] sm:$0xff] %v11375_v25  ;;  %14235 = vst [vmem:[#allocation146_spill] sm:$0xff] %v11377_v28  ;;  %v798_v30 = vmul.f32 %v10089_v41, %v606_v6  ;;  %v799_v48 = vmul.f32 %v10077_v37, %v606_v6  ;;  %v5350_v18 = vmul.f32 %v11121_v43, %v606_v6 }
 0x282   : > { %v2121_v17 = vmax.f32 %v1993_v54, 0.0  ;;  %v2120_v56 = vmax.f32 %v1992_v12, 0.0  ;;  %v5351_v47 = vmul.f32 %v11124_v14, %v606_v6  ;;  %v800_v29 = vmul.f32 %v10089_v41, %v611_v61  ;;  %3923 = vmatpush1.bf16.msra.mxu0 %v9370_v39 }
 0x283   : > { %v801_v12 = vmul.f32 %v10077_v37, %v611_v61  ;;  %3924 = vmatprep.subr.bf16.mxu0 %v9375_v52  ;;  %v5353_v39 = vmul.f32 %v11124_v14, %v611_v61 }
 0x284   : > { %v2201_v51 = vpack.c.bf16 %v2121_v17, %v2119_v7  ;;  %v2200_v31 = vpack.c.bf16 %v2120_v56, %v2118_v55  ;;  %v5352_v7 = vmul.f32 %v11121_v43, %v611_v61  ;;  %v9373_v17 = vld [vmem:[#allocation2 + $0x270] ss:$8 sps:$4 sm:$0xff]   ;;  %v5770_v56 = vmul.f32 %v11142_v1, %v11326_v10  ;;  %v9376_v61 = vld [vmem:[#allocation2 + $0x280] ss:$8 sps:$4 sm:$0xff]  }
 0x285   : > { %v1024_v32 = vpop.permute.xlu1 %1023  ;;  %9252 = vset.pattern.permute.xlu1 %v14116_v22 }
 0x286   : > { %v1200_v0 = vmul.f32 %v10073_v35, %v1024_v32  ;;  %v1201_v33 = vmul.f32 %v10080_v38, %v1024_v32  ;;  %v5496_v11 = vmul.f32 %v11133_v60, %v1024_v32  ;;  %v5497_v36 = vmul.f32 %v11139_v46, %v1024_v32  ;;  %675 = vperm.xlu1 %9252, %v9624_v49   ;;  %v9378_v32 = vld [vmem:[#allocation2 + $0x284] ss:$8 sps:$4 sm:$0xff]  }
 0x287   : > { %2680 = vmatprep.mubr.bf16.mxu0 %v2201_v51  ;;  %v5771_v51 = vmul.f32 %v11149_v59, %v11326_v10  ;;  %3925 = vmatpush1.bf16.msra.mxu0 %v9373_v17 }
 0x288   : > { %v1328_v19 = vadd.f32 %v1200_v0, %v798_v30  ;;  %v1329_v58 = vadd.f32 %v1201_v33, %v799_v48  ;;  %2681 = vmatmul.mubr.bf16.gmra.mrb[92].mxu0 %v2200_v31  ;;  %v5624_v6 = vadd.f32 %v5496_v11, %v5350_v18  ;;  %v5625_v54 = vadd.f32 %v5497_v36, %v5351_v47  ;;  %v2572_v55 = vpop.f32.mrb[48].mxu0 }
 0x289   : > { %v1028_v50 = vpop.permute.xlu1 %1027  ;;  %v2573_v30 = vadd.f32 %v2572_v55, %v10792_v42  ;;  %v2574_v47 = vpop.f32.mrb[49].mxu0  ;;  %3926 = vmatprep.subr.bf16.mxu0 %v9378_v32  ;;  %v9384_v32 = vld [vmem:[#allocation2 + $0x2a4] ss:$8 sps:$4 sm:$0xff]  }
 0x28a   : > { %v1202_v31 = vmul.f32 %v10073_v35, %v1028_v50  ;;  %v1203_v48 = vmul.f32 %v10080_v38, %v1028_v50  ;;  %v5498_v18 = vmul.f32 %v11133_v60, %v1028_v50  ;;  %v2575_v0 = vadd.f32 %v2574_v47, %v10801_v53  ;;  %9253 = vset.pattern.permute.xlu1 %v14120_v8  ;;  %v2576_v33 = vpop.f32.mrb[50].mxu0 }
 0x28b   : > { %v5499_v10 = vmul.f32 %v11139_v46, %v1028_v50  ;;  %v2577_v11 = vadd.f32 %v2576_v33, %v10792_v42  ;;  %1079 = vperm.xlu1 %9253, %v9624_v49   ;;  %v2578_v36 = vpop.f32.mrb[51].mxu0  ;;  %v1859_v55 = vadd.f32 %v1731_v34, %v1329_v58  ;;  %v1858_v28 = vadd.f32 %v1730_v16, %v1328_v19  ;;  %v9625_v19 = vld [vmem:[%s9872_s19 + $0x1f8] sm:$0xff]  ;;  %s8845_s19 = sshll.u32 %s285_s13, 9 }
 0x28c   : > { %v2819_v25 = vmax.f32 %v2573_v30, 0.0  ;;  %v1330_v63 = vadd.f32 %v1202_v31, %v800_v29  ;;  %v1331_v52 = vadd.f32 %v1203_v48, %v801_v12  ;;  %v2579_v26 = vadd.f32 %v2578_v36, %v10801_v53  ;;  %v9381_v29 = vld [vmem:[#allocation2 + $0x294] ss:$8 sps:$4 sm:$0xff]   ;;  %3927 = vmatpush1.bf16.msra.mxu0 %v9376_v61  ;;  %s13598_s22 = scalar_lea.vmem [#allocation5], %s8845_s19 }
 0x28d   : > { %v2821_v47 = vmax.f32 %v2577_v11, 0.0  ;;  %v11410_v8 = vadd.f32 %v5770_v56, %v5624_v6  ;;  %v11412_v50 = vadd.f32 %v5771_v51, %v5625_v54  ;;  %v5626_v33 = vadd.f32 %v5498_v18, %v5352_v7  ;;  %v9379_v54 = vld [vmem:[#allocation2 + $0x290] ss:$8 sps:$4 sm:$0xff]   ;;  %3928 = vmatprep.subr.bf16.mxu0 %v9381_v29  ;;  %v621_v18 = vpop.permute.xlu0 %620  ;;  %s8765_s29 = sshll.u32 %s13598_s22, 4  ;;  %s13779_s29 = int_to_ptr.vmem [resolvable:$true] %s8765_s29 }
 0x28e   : > { %v1558_v21 = vpop.permute.xlu1 %1557  ;;  %v2820_v49 = vmax.f32 %v2575_v0, 0.0  ;;  %v2822_v62 = vmax.f32 %v2579_v26, 0.0  ;;  %v1995_v12 = vadd.f32 %v10124_v27, %v1859_v55  ;;  %v1994_v17 = vadd.f32 %v10138_v45, %v1858_v28  ;;  %s9666_s17 = scalar_lea.vmem %s13779_s29, 8192  ;;  %p9673_p2 = scmp.lt.s32.totalorder %s13779_s29, %s9671_s15 }
 0x28f   : > { %14236 = vst [vmem:[#allocation147_spill] sm:$0xff] %v11410_v8  ;;  %14237 = vst [vmem:[#allocation148_spill] sm:$0xff] %v11412_v50  ;;  %v1732_v16 = vmul.f32 %v10086_v40, %v1558_v21  ;;  %v1733_v34 = vmul.f32 %v10096_v44, %v1558_v21  ;;  %1083 = vperm.xlu1 %9253, %v9625_v19   ;;  %v2923_v58 = vpack.c.bf16 %v2821_v47, %v2819_v25  ;;  %p9667_p6 = scmp.ne.s32.totalorder %s13779_s29, %s9666_s17  ;;  %p9674_p3 = scmp.lt.s32.totalorder %s9672_s16, %s9666_s17 }
 0x290   : > { %v2924_v56 = vpack.c.bf16 %v2822_v62, %v2820_v49  ;;  %v5772_v26 = vmul.f32 %v11142_v1, %v1558_v21  ;;  %v5627_v7 = vadd.f32 %v5499_v10, %v5353_v39  ;;  %v5773_v51 = vmul.f32 %v11149_v59, %v1558_v21  ;;  %3929 = vmatpush1.bf16.msra.mxu0 %v9379_v54  ;;  %v9382_v49 = vld [vmem:[#allocation2 + $0x2a0] ss:$8 sps:$4 sm:$0xff]  }
 0x291   : > { %v1860_v30 = vadd.f32 %v1732_v16, %v1330_v63  ;;  %v1861_v6 = vadd.f32 %v1733_v34, %v1331_v52  ;;  %v11425_v63 = vmul.f32 %v10086_v40, %v11353_v4  ;;  %v2123_v62 = vmax.f32 %v1995_v12, 0.0  ;;  %3930 = vmatprep.subr.bf16.mxu0 %v9384_v32  ;;  %v9387_v12 = vld [vmem:[#allocation2 + $0x2b4] ss:$8 sps:$4 sm:$0xff]   ;;  %v631_v54 = vpop.permute.xlu0 %630  ;;  %p9668_p10 = pnand %p9667_p6, %p14480_p9  ;;  %p9675_p4 = por %p9674_p3, %p9673_p2 }
 0x292   : > { %3316 = vmatprep.mubr.bf16.mxu1 %v2924_v56  ;;  %v2122_v28 = vmax.f32 %v1994_v17, 0.0  ;;  %v11428_v0 = vadd.f32 %v5772_v26, %v5626_v33  ;;  %v11430_v10 = vadd.f32 %v5773_v51, %v5627_v7  ;;  %v1735_v11 = vmul.f32 %v10096_v44, %v11353_v4  ;;  %v9626_v26 = vld [vmem:[%s13831_s4] sm:$0xff]  ;;  %v9627_v51 = vld [vmem:[%s13831_s4 + $0x8] sm:$0xff] }
 0x293   : > { %v616_v31 = vpop.permute.xlu1 %615  ;;  %v1997_v48 = vadd.f32 %v10124_v27, %v1861_v6  ;;  %v1996_v25 = vadd.f32 %v10138_v45, %v1860_v30  ;;  %9255 = vset.pattern.permute.xlu1 %v14122_v5  ;;  %3317 = vmatmul.mubr.bf16.gmra.mrb[48].mxu1 %v2923_v58  ;;  %v11436_v36 = vmul.f32 %v10086_v40, %v11368_v2  ;;  %p9669_p12 = pneg %p9668_p10 }
 0x294   : > { %1613 = vperm.xlu1 %9255, %v9625_v19   ;;  %14238 = vst [vmem:[#allocation149_spill] sm:$0xff] %v11428_v0  ;;  %14239 = vst [vmem:[#allocation150_spill] sm:$0xff] %v11430_v10  ;;  %v11440_v5 = vmul.f32 %v10096_v44, %v11368_v2  ;;  %v804_v55 = vmul.f32 %v10089_v41, %v621_v18  ;;  %v805_v47 = vmul.f32 %v10077_v37, %v621_v18 }
 0x295   : > { %v2125_v39 = vmax.f32 %v1997_v48, 0.0  ;;  %v2124_v21 = vmax.f32 %v1996_v25, 0.0  ;;  %v11445_v33 = vmul.f32 %v11121_v43, %v621_v18  ;;  %v803_v16 = vmul.f32 %v10077_v37, %v616_v31  ;;  %3931 = vmatpush1.bf16.msra.mxu0 %v9382_v49  ;;  %p9676_p7 = pnand %p9675_p4, %p9669_p12 }
 0x296   : > { %v5354_v34 = vmul.f32 %v11121_v43, %v616_v31  ;;  %v5355_v29 = vmul.f32 %v11124_v14, %v616_v31  ;;  %v11451_v58 = vmul.f32 %v11124_v14, %v621_v18  ;;  %v11461_v7 = vrot.slane %v9626_v26, %v10051_v24  ;;  %3932 = vmatprep.subr.bf16.mxu0 %v9387_v12 }
 0x297   : > { %v2203_v52 = vpack.c.bf16 %v2125_v39, %v2123_v62  ;;  %v2202_v61 = vpack.c.bf16 %v2124_v21, %v2122_v28  ;;  %v11467_v48 = vrot.slane %v9627_v51, %v10051_v24  ;;  %v11471_v25 = vmul.f32 %v11142_v1, %v11353_v4  ;;  %v9385_v28 = vld [vmem:[#allocation2 + $0x2b0] ss:$8 sps:$4 sm:$0xff]  }
 0x298   : > { %v1032_v19 = vpop.permute.xlu1 %1031  ;;  %v11475_v18 = vmul.f32 %v11149_v59, %v11353_v4  ;;  %v802_v32 = vmul.f32 %v10089_v41, %v616_v31  ;;  %v11479_v24 = vmul.f32 %v10089_v41, %v631_v54  ;;  %v11485_v26 = vmul.f32 %v11121_v43, %v631_v54  ;;  %v9390_v31 = vld [vmem:[#allocation2 + $0x2c4] ss:$8 sps:$4 sm:$0xff]  }
 0x299   : > { %v1204_v17 = vmul.f32 %v10073_v35, %v1032_v19  ;;  %v1205_v30 = vmul.f32 %v10080_v38, %v1032_v19  ;;  %v5500_v6 = vmul.f32 %v11133_v60, %v1032_v19  ;;  %v5501_v56 = vmul.f32 %v11139_v46, %v1032_v19  ;;  %2690 = vmatprep.mubr.bf16.mxu0 %v2203_v52 }
 0x29a   : > { %2691 = vmatmul.mubr.bf16.gmra.mrb[96].mxu0 %v2202_v61  ;;  %v11482_v19 = vmul.f32 %v10077_v37, %v631_v54  ;;  %v11488_v4 = vmul.f32 %v11124_v14, %v631_v54 }
 0x29b   : > { %v1333_v62 = vadd.f32 %v1205_v30, %v803_v16  ;;  %v5628_v39 = vadd.f32 %v5500_v6, %v5354_v34  ;;  %v5629_v21 = vadd.f32 %v5501_v56, %v5355_v29  ;;  %v1332_v49 = vadd.f32 %v1204_v17, %v802_v32  ;;  %3933 = vmatpush1.bf16.msra.mxu0 %v9385_v28 }
 0x29c   : > { %v2582_v52 = vpop.f32.mrb[52].mxu0  ;;  %v1036_v61 = vpop.permute.xlu1 %1035  ;;  %14240 = vst [vmem:[#allocation151_spill] sm:$0xff] %v11488_v4  ;;  %3934 = vmatprep.subr.bf16.mxu0 %v9390_v31 }
 0x29d   : > { %v2583_v16 = vadd.f32 %v2582_v52, %v10792_v42  ;;  %v1206_v34 = vmul.f32 %v10073_v35, %v1036_v61  ;;  %v1207_v29 = vmul.f32 %v10080_v38, %v1036_v61  ;;  %v2584_v30 = vpop.f32.mrb[53].mxu0  ;;  %v3198_v6 = vpop.f32.mrb[0].mxu1  ;;  %v11494_v56 = vmul.f32 %v11133_v60, %v1036_v61 }
 0x29e   : > { %v2585_v51 = vadd.f32 %v2584_v30, %v10801_v53  ;;  %v3199_v10 = vadd.f32 %v3198_v6, %v11461_v7  ;;  %v2586_v54 = vpop.f32.mrb[54].mxu0  ;;  %v3200_v0 = vpop.f32.mrb[1].mxu1  ;;  %v1863_v12 = vadd.f32 %v1735_v11, %v1333_v62  ;;  %v11499_v32 = vmul.f32 %v11139_v46, %v1036_v61  ;;  %v9393_v11 = vld [vmem:[#allocation2 + $0x2d4] ss:$8 sps:$4 sm:$0xff]  }
 0x29f   : > { %v2823_v50 = vmax.f32 %v2583_v16, 0.0  ;;  %v1334_v17 = vadd.f32 %v1206_v34, %v804_v55  ;;  %v2587_v52 = vadd.f32 %v2586_v54, %v10792_v42  ;;  %v2588_v8 = vpop.f32.mrb[55].mxu0  ;;  %v3202_v57 = vpop.f32.mrb[2].mxu1  ;;  %v1335_v9 = vadd.f32 %v1207_v29, %v805_v47  ;;  %3935 = vmatpush1.bf16.msra.mxu0 %v9388_v13 }
 0x2a0   : > { %v2824_v3 = vmax.f32 %v2585_v51, 0.0  ;;  %v3201_v30 = vadd.f32 %v3200_v0, %v11467_v48  ;;  %v2589_v6 = vadd.f32 %v2588_v8, %v10801_v53  ;;  %v3204_v23 = vpop.f32.mrb[3].mxu1  ;;  %v3517_v62 = vmax.f32 %v3199_v10, 0.0  ;;  %3936 = vmatprep.subr.bf16.mxu0 %v9393_v11 }
 0x2a1   : > { %v2825_v55 = vmax.f32 %v2587_v52, 0.0  ;;  %v3203_v61 = vadd.f32 %v3202_v57, %v11461_v7  ;;  %v3205_v16 = vadd.f32 %v3204_v23, %v11467_v48  ;;  %v1566_v34 = vpop.permute.xlu1 %1565  ;;  %v1999_v29 = vadd.f32 %v10124_v27, %v1863_v12 }
 0x2a2   : > { %v2826_v54 = vmax.f32 %v2589_v6, 0.0  ;;  %v1736_v28 = vmul.f32 %v10086_v40, %v1566_v34  ;;  %v1737_v47 = vmul.f32 %v10096_v44, %v1566_v34  ;;  %v3518_v0 = vmax.f32 %v3201_v30, 0.0 }
 0x2a3   : > { %v3519_v51 = vmax.f32 %v3203_v61, 0.0  ;;  %v3520_v8 = vmax.f32 %v3205_v16, 0.0  ;;  %v2925_v22 = vpack.c.bf16 %v2825_v55, %v2823_v50  ;;  %v1862_v57 = vadd.f32 %v11425_v63, %v1332_v49  ;;  %3937 = vmatpush1.bf16.msra.mxu0 %v9391_v20 }
 0x2a4   : > { %v1864_v31 = vadd.f32 %v1736_v28, %v1334_v17  ;;  %v1865_v10 = vadd.f32 %v1737_v47, %v1335_v9  ;;  %v2926_v52 = vpack.c.bf16 %v2826_v54, %v2824_v3  ;;  %v3208_v6 = vpop.f32.mrb[4].mxu1  ;;  %v11515_v12 = vadd.f32 %v11471_v25, %v5628_v39  ;;  %v11529_v54 = vpop.permute.xlu0 %640  ;;  %3938 = vmatprep.subr.bf16.mxu0 %v9396_v15 }
 0x2a5   : > { %v11510_v23 = vpack.c.bf16 %v3519_v51, %v3517_v62  ;;  %v11512_v4 = vpack.c.bf16 %v3520_v8, %v3518_v0  ;;  %v11518_v30 = vadd.f32 %v11475_v18, %v5629_v21  ;;  %v3209_v13 = vadd.f32 %v3208_v6, %v11461_v7  ;;  %v3210_v9 = vpop.f32.mrb[5].mxu1 }
 0x2a6   : > { %14241 = vst [vmem:[#allocation152_spill] sm:$0xff] %v11515_v12  ;;  %3326 = vmatprep.mubr.bf16.mxu1 %v2926_v52  ;;  %v626_v3 = vpop.permute.xlu1 %625  ;;  %v2001_v50 = vadd.f32 %v10124_v27, %v1865_v10  ;;  %v1998_v63 = vadd.f32 %v10138_v45, %v1862_v57  ;;  %v2000_v49 = vadd.f32 %v10138_v45, %v1864_v31  ;;  %v3212_v39 = vpop.f32.mrb[6].mxu1  ;;  %v2127_v18 = vmax.f32 %v1999_v29, 0.0 }
 0x2a7   : > { %14242 = vst [vmem:[#allocation153_spill] sm:$0xff] %v11518_v30  ;;  %v3211_v17 = vadd.f32 %v3210_v9, %v11467_v48  ;;  %v807_v11 = vmul.f32 %v10077_v37, %v626_v3  ;;  %v5358_v25 = vmul.f32 %v11121_v43, %v626_v3  ;;  %3327 = vmatmul.mubr.bf16.gmra.mrb[52].mxu1 %v2925_v22  ;;  %v3521_v21 = vmax.f32 %v3209_v13, 0.0  ;;  %v3214_v61 = vpop.f32.mrb[7].mxu1  ;;  %v9394_v22 = vld [vmem:[#allocation2 + $0x2e0] ss:$8 sps:$4 sm:$0xff]  }
 0x2a8   : > { %v5359_v62 = vmul.f32 %v11124_v14, %v626_v3  ;;  %v3213_v55 = vadd.f32 %v3212_v39, %v11461_v7  ;;  %v2129_v16 = vmax.f32 %v2001_v50, 0.0  ;;  %v3215_v47 = vadd.f32 %v3214_v61, %v11467_v48  ;;  %v9399_v13 = vld [vmem:[#allocation2 + $0x2f4] ss:$8 sps:$4 sm:$0xff]   ;;  %v11552_v61 = vpop.permute.xlu0 %650  ;;  %3939 = vmatpush1.bf16.msra.mxu0 %v9394_v22 }
 0x2a9   : > { %v3522_v28 = vmax.f32 %v3211_v17, 0.0  ;;  %v2126_v0 = vmax.f32 %v1998_v63, 0.0  ;;  %v2128_v51 = vmax.f32 %v2000_v49, 0.0  ;;  %v5630_v29 = vadd.f32 %v11494_v56, %v11445_v33  ;;  %3940 = vmatprep.subr.bf16.mxu0 %v9399_v13 }
 0x2aa   : > { %v3523_v8 = vmax.f32 %v3213_v55, 0.0  ;;  %v2205_v31 = vpack.c.bf16 %v2129_v16, %v2127_v18  ;;  %v5776_v10 = vmul.f32 %v11142_v1, %v1566_v34  ;;  %v3524_v52 = vmax.f32 %v3215_v47, 0.0  ;;  %v9397_v16 = vld [vmem:[#allocation2 + $0x2f0] ss:$8 sps:$4 sm:$0xff]  }
 0x2ab   : > { %v1040_v57 = vpop.permute.xlu1 %1039  ;;  %v2204_v6 = vpack.c.bf16 %v2128_v51, %v2126_v0  ;;  %v5631_v20 = vadd.f32 %v11499_v32, %v11451_v58  ;;  %v5777_v9 = vmul.f32 %v11149_v59, %v1566_v34  ;;  %v806_v32 = vmul.f32 %v10089_v41, %v626_v3 }
 0x2ac   : > { %v1208_v50 = vmul.f32 %v10073_v35, %v1040_v57  ;;  %v1209_v15 = vmul.f32 %v10080_v38, %v1040_v57  ;;  %v5504_v63 = vmul.f32 %v11133_v60, %v1040_v57  ;;  %v5505_v49 = vmul.f32 %v11139_v46, %v1040_v57  ;;  %2700 = vmatprep.mubr.bf16.mxu0 %v2205_v31  ;;  %v3218_v33 = vpop.f32.mrb[8].mxu1 }
 0x2ad   : > { %2701 = vmatmul.mubr.bf16.gmra.mrb[100].mxu0 %v2204_v6  ;;  %v11542_v56 = vpack.c.bf16 %v3524_v52, %v3522_v28  ;;  %v11544_v17 = vpack.c.bf16 %v3523_v8, %v3521_v21  ;;  %v11546_v39 = vadd.f32 %v5776_v10, %v5630_v29  ;;  %v11548_v58 = vadd.f32 %v5777_v9, %v5631_v20  ;;  %v3220_v55 = vpop.f32.mrb[9].mxu1 }
 0x2ae   : > { %v1337_v34 = vadd.f32 %v1209_v15, %v807_v11  ;;  %v3219_v18 = vadd.f32 %v3218_v33, %v11461_v7  ;;  %v5632_v47 = vadd.f32 %v5504_v63, %v5358_v25  ;;  %v3221_v28 = vadd.f32 %v3220_v55, %v11467_v48  ;;  %v2592_v0 = vpop.f32.mrb[56].mxu0  ;;  %v3222_v21 = vpop.f32.mrb[10].mxu1  ;;  %3941 = vmatpush1.bf16.msra.mxu0 %v9397_v16 }
 0x2af   : > { %14243 = vst [vmem:[#allocation154_spill] sm:$0xff] %v11546_v39  ;;  %14244 = vst [vmem:[#allocation155_spill] sm:$0xff] %v11548_v58  ;;  %v5778_v51 = vmul.f32 %v11142_v1, %v11368_v2  ;;  %v5633_v8 = vadd.f32 %v5505_v49, %v5359_v62  ;;  %v5779_v3 = vmul.f32 %v11149_v59, %v11368_v2  ;;  %v1044_v10 = vpop.permute.xlu1 %1043  ;;  %v2594_v25 = vpop.f32.mrb[57].mxu0 }
 0x2b0   : > { %v1336_v11 = vadd.f32 %v1208_v50, %v806_v32  ;;  %v3525_v31 = vmax.f32 %v3219_v18, 0.0  ;;  %v2593_v29 = vadd.f32 %v2592_v0, %v10792_v42  ;;  %v3223_v22 = vadd.f32 %v3222_v21, %v11461_v7  ;;  %v3224_v13 = vpop.f32.mrb[11].mxu1  ;;  %v2596_v20 = vpop.f32.mrb[58].mxu0 }
 0x2b1   : > { %v3526_v52 = vmax.f32 %v3221_v28, 0.0  ;;  %v1210_v57 = vmul.f32 %v10073_v35, %v1044_v10  ;;  %v1211_v6 = vmul.f32 %v10080_v38, %v1044_v10  ;;  %v1867_v62 = vadd.f32 %v11440_v5, %v1337_v34  ;;  %v2598_v63 = vpop.f32.mrb[59].mxu0  ;;  %v11572_v34 = vpop.permute.xlu0 %660 }
 0x2b2   : > { %v2827_v9 = vmax.f32 %v2593_v29, 0.0  ;;  %v3527_v15 = vmax.f32 %v3223_v22, 0.0  ;;  %v5506_v2 = vmul.f32 %v11133_v60, %v1044_v10  ;;  %v2595_v50 = vadd.f32 %v2594_v25, %v10801_v53 }
 0x2b3   : > { %v1338_v49 = vadd.f32 %v1210_v57, %v11479_v24  ;;  %v5507_v33 = vmul.f32 %v11139_v46, %v1044_v10  ;;  %v3225_v32 = vadd.f32 %v3224_v13, %v11467_v48  ;;  %v2597_v18 = vadd.f32 %v2596_v20, %v10792_v42 }
 0x2b4   : > { %v1339_v55 = vadd.f32 %v1211_v6, %v11482_v19  ;;  %v2828_v28 = vmax.f32 %v2595_v50, 0.0  ;;  %v2599_v5 = vadd.f32 %v2598_v63, %v10801_v53  ;;  %v1866_v0 = vadd.f32 %v11436_v36, %v1336_v11  ;;  %v1574_v16 = vpop.permute.xlu1 %1573 }
 0x2b5   : > { %v3528_v21 = vmax.f32 %v3225_v32, 0.0  ;;  %v2829_v29 = vmax.f32 %v2597_v18, 0.0  ;;  %v11575_v22 = vpack.c.bf16 %v3527_v15, %v3525_v31  ;;  %v11577_v24 = vadd.f32 %v5778_v51, %v5632_v47  ;;  %v14247_v15 = vld [vmem:[#allocation151_spill] sm:$0xff]  ;;  %v1578_v18 = vpop.permute.xlu0 %1577 }
 0x2b6   : > { %v2830_v10 = vmax.f32 %v2599_v5, 0.0  ;;  %v1740_v25 = vmul.f32 %v10086_v40, %v1574_v16  ;;  %v1741_v57 = vmul.f32 %v10096_v44, %v1574_v16  ;;  %v2003_v19 = vadd.f32 %v10124_v27, %v1867_v62 }
 0x2b7   : > { %14245 = vst [vmem:[#allocation156_spill] sm:$0xff] %v11577_v24  ;;  %v2927_v6 = vpack.c.bf16 %v2829_v29, %v2827_v9  ;;  %v2002_v13 = vadd.f32 %v10138_v45, %v1866_v0  ;;  %v11583_v20 = vpack.c.bf16 %v3528_v21, %v3526_v52  ;;  %v11585_v36 = vadd.f32 %v5779_v3, %v5633_v8 }
 0x2b8   : > { %v1868_v11 = vadd.f32 %v1740_v25, %v1338_v49  ;;  %v1869_v50 = vadd.f32 %v1741_v57, %v1339_v55  ;;  %v2928_v31 = vpack.c.bf16 %v2830_v10, %v2828_v28  ;;  %v5634_v47 = vadd.f32 %v5506_v2, %v11485_v26 }
 0x2b9   : > { %14246 = vst [vmem:[#allocation157_spill] sm:$0xff] %v11585_v36  ;;  %v5780_v51 = vmul.f32 %v11142_v1, %v1574_v16  ;;  %v5635_v63 = vadd.f32 %v5507_v33, %v14247_v15  ;;  %v5781_v32 = vmul.f32 %v11149_v59, %v1574_v16  ;;  %v636_v62 = vpop.permute.xlu1 %635  ;;  %v812_v8 = vmul.f32 %v10089_v41, %v11529_v54 }
 0x2ba   : > { %3336 = vmatprep.mubr.bf16.mxu1 %v2928_v31  ;;  %v2005_v9 = vadd.f32 %v10124_v27, %v1869_v50  ;;  %v2004_v52 = vadd.f32 %v10138_v45, %v1868_v11  ;;  %v813_v3 = vmul.f32 %v10077_v37, %v11529_v54  ;;  %v2131_v26 = vmax.f32 %v2003_v19, 0.0 }
 0x2bb   : > { %3337 = vmatmul.mubr.bf16.gmra.mrb[56].mxu1 %v2927_v6  ;;  %v2130_v2 = vmax.f32 %v2002_v13, 0.0  ;;  %v3228_v49 = vpop.f32.mrb[12].mxu1  ;;  %v11597_v28 = vadd.f32 %v5780_v51, %v5634_v47  ;;  %v11599_v5 = vadd.f32 %v5781_v32, %v5635_v63  ;;  %v11603_v0 = vmul.f32 %v11121_v43, %v11529_v54 }
 0x2bc   : > { %v2133_v33 = vmax.f32 %v2005_v9, 0.0  ;;  %v2132_v55 = vmax.f32 %v2004_v52, 0.0  ;;  %v11607_v21 = vmul.f32 %v11124_v14, %v11529_v54  ;;  %v3229_v29 = vadd.f32 %v3228_v49, %v11461_v7  ;;  %v3230_v16 = vpop.f32.mrb[13].mxu1 }
 0x2bd   : > { %14248 = vst [vmem:[#allocation151_spill] sm:$0xff] %v11597_v28  ;;  %14249 = vst [vmem:[#allocation158_spill] sm:$0xff] %v11599_v5  ;;  %v1742_v10 = vmul.f32 %v10086_v40, %v1578_v18  ;;  %v810_v25 = vmul.f32 %v10089_v41, %v636_v62  ;;  %v3232_v57 = vpop.f32.mrb[14].mxu1  ;;  %v1743_v6 = vmul.f32 %v10096_v44, %v1578_v18 }
 0x2be   : > { %v2207_v19 = vpack.c.bf16 %v2133_v33, %v2131_v26  ;;  %v2206_v13 = vpack.c.bf16 %v2132_v55, %v2130_v2  ;;  %v811_v11 = vmul.f32 %v10077_v37, %v636_v62  ;;  %v5362_v50 = vmul.f32 %v11121_v43, %v636_v62  ;;  %v1048_v47 = vpop.permute.xlu1 %1047  ;;  %v3234_v51 = vpop.f32.mrb[15].mxu1 }
 0x2bf   : > { %v5363_v31 = vmul.f32 %v11124_v14, %v636_v62  ;;  %v3233_v54 = vadd.f32 %v3232_v57, %v11461_v7  ;;  %v3231_v15 = vadd.f32 %v3230_v16, %v11467_v48  ;;  %v1212_v63 = vmul.f32 %v10073_v35, %v1048_v47 }
 0x2c0   : > { %v1213_v32 = vmul.f32 %v10080_v38, %v1048_v47  ;;  %v5508_v9 = vmul.f32 %v11133_v60, %v1048_v47  ;;  %2710 = vmatprep.mubr.bf16.mxu0 %v2207_v19  ;;  %v3529_v52 = vmax.f32 %v3229_v29, 0.0  ;;  %v5509_v2 = vmul.f32 %v11139_v46, %v1048_v47 }
 0x2c1   : > { %v3531_v26 = vmax.f32 %v3233_v54, 0.0  ;;  %v3235_v49 = vadd.f32 %v3234_v51, %v11467_v48  ;;  %2711 = vmatmul.mubr.bf16.gmra.mrb[104].mxu0 %v2206_v13  ;;  %v1340_v62 = vadd.f32 %v1212_v63, %v810_v25  ;;  %v2602_v55 = vpop.f32.mrb[60].mxu0  ;;  %v5782_v16 = vmul.f32 %v11142_v1, %v1578_v18 }
 0x2c2   : > { %v1341_v33 = vadd.f32 %v1213_v32, %v811_v11  ;;  %v5636_v57 = vadd.f32 %v5508_v9, %v5362_v50  ;;  %v2603_v28 = vadd.f32 %v2602_v55, %v10792_v42  ;;  %v1052_v36 = vpop.permute.xlu1 %1051  ;;  %v2604_v24 = vpop.f32.mrb[61].mxu0  ;;  %v5637_v29 = vadd.f32 %v5509_v2, %v5363_v31 }
 0x2c3   : > { %v3532_v5 = vmax.f32 %v3235_v49, 0.0  ;;  %v11625_v58 = vpack.c.bf16 %v3531_v26, %v3529_v52  ;;  %v3530_v19 = vmax.f32 %v3231_v15, 0.0  ;;  %v1214_v54 = vmul.f32 %v10073_v35, %v1052_v36  ;;  %v2606_v13 = vpop.f32.mrb[62].mxu0 }
 0x2c4   : > { %v1215_v47 = vmul.f32 %v10080_v38, %v1052_v36  ;;  %v5783_v25 = vmul.f32 %v11149_v59, %v1578_v18  ;;  %v1870_v11 = vadd.f32 %v1742_v10, %v1340_v62  ;;  %v1871_v50 = vadd.f32 %v1743_v6, %v1341_v33  ;;  %v2608_v32 = vpop.f32.mrb[63].mxu0 }
 0x2c5   : > { %v2831_v51 = vmax.f32 %v2603_v28, 0.0  ;;  %v2605_v63 = vadd.f32 %v2604_v24, %v10801_v53  ;;  %v5510_v9 = vmul.f32 %v11133_v60, %v1052_v36  ;;  %v5511_v52 = vmul.f32 %v11139_v46, %v1052_v36 }
 0x2c6   : > { %v2607_v31 = vadd.f32 %v2606_v13, %v10792_v42  ;;  %v2609_v15 = vadd.f32 %v2608_v32, %v10801_v53  ;;  %v1342_v26 = vadd.f32 %v1214_v54, %v812_v8  ;;  %v1343_v2 = vadd.f32 %v1215_v47, %v813_v3 }
 0x2c7   : > { %v2832_v49 = vmax.f32 %v2605_v63, 0.0  ;;  %v11635_v55 = vpack.c.bf16 %v3532_v5, %v3530_v19  ;;  %v1582_v6 = vpop.permute.xlu1 %1581  ;;  %v11637_v28 = vadd.f32 %v5782_v16, %v5636_v57  ;;  %v11639_v24 = vadd.f32 %v5783_v25, %v5637_v29 }
 0x2c8   : > { %v2833_v18 = vmax.f32 %v2607_v31, 0.0  ;;  %v2834_v10 = vmax.f32 %v2609_v15, 0.0  ;;  %v1744_v62 = vmul.f32 %v10086_v40, %v1582_v6  ;;  %v1745_v36 = vmul.f32 %v10096_v44, %v1582_v6 }
 0x2c9   : > { %14250 = vst [vmem:[#allocation159_spill] sm:$0xff] %v11637_v28  ;;  %14251 = vst [vmem:[#allocation160_spill] sm:$0xff] %v11639_v24  ;;  %v2007_v33 = vadd.f32 %v10124_v27, %v1871_v50  ;;  %v2006_v13 = vadd.f32 %v10138_v45, %v1870_v11  ;;  %v5638_v5 = vadd.f32 %v5510_v9, %v11603_v0  ;;  %v1586_v11 = vpop.permute.xlu0 %1585 }
 0x2ca   : > { %v2930_v8 = vpack.c.bf16 %v2834_v10, %v2832_v49  ;;  %v2929_v3 = vpack.c.bf16 %v2833_v18, %v2831_v51  ;;  %v5784_v19 = vmul.f32 %v11142_v1, %v1582_v6  ;;  %v1872_v54 = vadd.f32 %v1744_v62, %v1342_v26 }
 0x2cb   : > { %v1873_v47 = vadd.f32 %v1745_v36, %v1343_v2  ;;  %v5639_v57 = vadd.f32 %v5511_v52, %v11607_v21  ;;  %v5785_v16 = vmul.f32 %v11149_v59, %v1582_v6  ;;  %v816_v0 = vmul.f32 %v10089_v41, %v11552_v61 }
 0x2cc   : > { %3346 = vmatprep.mubr.bf16.mxu1 %v2930_v8  ;;  %v11649_v29 = vadd.f32 %v5784_v19, %v5638_v5  ;;  %v646_v25 = vpop.permute.xlu1 %645  ;;  %v2008_v51 = vadd.f32 %v10138_v45, %v1872_v54  ;;  %v817_v21 = vmul.f32 %v10077_v37, %v11552_v61  ;;  %v2135_v9 = vmax.f32 %v2007_v33, 0.0 }
 0x2cd   : > { %3347 = vmatmul.mubr.bf16.gmra.mrb[60].mxu1 %v2929_v3  ;;  %v2009_v50 = vadd.f32 %v10124_v27, %v1873_v47  ;;  %v11653_v63 = vadd.f32 %v5785_v16, %v5639_v57  ;;  %v2134_v31 = vmax.f32 %v2006_v13, 0.0  ;;  %v11661_v26 = vmul.f32 %v11121_v43, %v11552_v61 }
 0x2ce   : > { %14252 = vst [vmem:[#allocation161_spill] sm:$0xff] %v11649_v29  ;;  %v3238_v32 = vpop.f32.mrb[16].mxu1  ;;  %v2136_v15 = vmax.f32 %v2008_v51, 0.0  ;;  %v11665_v2 = vmul.f32 %v11124_v14, %v11552_v61  ;;  %v1746_v10 = vmul.f32 %v10086_v40, %v1586_v11  ;;  %v814_v6 = vmul.f32 %v10089_v41, %v646_v25 }
 0x2cf   : > { %14253 = vst [vmem:[#allocation162_spill] sm:$0xff] %v11653_v63  ;;  %v2137_v52 = vmax.f32 %v2009_v50, 0.0  ;;  %v3239_v49 = vadd.f32 %v3238_v32, %v11461_v7  ;;  %v3240_v18 = vpop.f32.mrb[17].mxu1  ;;  %v1747_v33 = vmul.f32 %v10096_v44, %v1586_v11  ;;  %v815_v8 = vmul.f32 %v10077_v37, %v646_v25 }
 0x2d0   : > { %v3242_v62 = vpop.f32.mrb[18].mxu1  ;;  %v2208_v13 = vpack.c.bf16 %v2136_v15, %v2134_v31  ;;  %v5366_v3 = vmul.f32 %v11121_v43, %v646_v25  ;;  %v5367_v5 = vmul.f32 %v11124_v14, %v646_v25  ;;  %v3241_v47 = vadd.f32 %v3240_v18, %v11467_v48 }
 0x2d1   : > { %v2209_v36 = vpack.c.bf16 %v2137_v52, %v2135_v9  ;;  %v3243_v61 = vadd.f32 %v3242_v62, %v11461_v7  ;;  %v1056_v19 = vpop.permute.xlu1 %1055  ;;  %v3244_v54 = vpop.f32.mrb[19].mxu1  ;;  %v3533_v51 = vmax.f32 %v3239_v49, 0.0  ;;  %v5786_v18 = vmul.f32 %v11142_v1, %v1586_v11 }
 0x2d2   : > { %v1216_v57 = vmul.f32 %v10073_v35, %v1056_v19  ;;  %v1217_v16 = vmul.f32 %v10080_v38, %v1056_v19  ;;  %v5512_v50 = vmul.f32 %v11133_v60, %v1056_v19  ;;  %v5513_v9 = vmul.f32 %v11139_v46, %v1056_v19 }
 0x2d3   : > { %2720 = vmatprep.mubr.bf16.mxu0 %v2209_v36  ;;  %v3535_v32 = vmax.f32 %v3243_v61, 0.0  ;;  %v3245_v52 = vadd.f32 %v3244_v54, %v11467_v48  ;;  %v3534_v36 = vmax.f32 %v3241_v47, 0.0 }
 0x2d4   : > { %2721 = vmatmul.mubr.bf16.gmra.mrb[108].mxu0 %v2208_v13  ;;  %v1344_v25 = vadd.f32 %v1216_v57, %v814_v6  ;;  %v1345_v31 = vadd.f32 %v1217_v16, %v815_v8  ;;  %v2612_v15 = vpop.f32.mrb[64].mxu0  ;;  %v5640_v62 = vadd.f32 %v5512_v50, %v5366_v3  ;;  %v5641_v49 = vadd.f32 %v5513_v9, %v5367_v5 }
 0x2d5   : > { %v3536_v63 = vmax.f32 %v3245_v52, 0.0  ;;  %v2613_v29 = vadd.f32 %v2612_v15, %v10792_v42  ;;  %v1060_v24 = vpop.permute.xlu1 %1059  ;;  %v2614_v28 = vpop.f32.mrb[65].mxu0  ;;  %v11683_v39 = vpack.c.bf16 %v3535_v32, %v3533_v51  ;;  %v5787_v6 = vmul.f32 %v11149_v59, %v1586_v11 }
 0x2d6   : > { %v1218_v61 = vmul.f32 %v10073_v35, %v1060_v24  ;;  %v1219_v19 = vmul.f32 %v10080_v38, %v1060_v24  ;;  %v2616_v13 = vpop.f32.mrb[66].mxu0  ;;  %v1874_v8 = vadd.f32 %v1746_v10, %v1344_v25  ;;  %v1875_v3 = vadd.f32 %v1747_v33, %v1345_v31 }
 0x2d7   : > { %14254 = vst [vmem:[#allocation163_spill] sm:$0xff] %v11683_v39  ;;  %v2835_v54 = vmax.f32 %v2613_v29, 0.0  ;;  %v2615_v57 = vadd.f32 %v2614_v28, %v10801_v53  ;;  %v2618_v16 = vpop.f32.mrb[67].mxu0  ;;  %v5514_v50 = vmul.f32 %v11133_v60, %v1060_v24  ;;  %v5515_v51 = vmul.f32 %v11139_v46, %v1060_v24 }
 0x2d8   : > { %v2617_v5 = vadd.f32 %v2616_v13, %v10792_v42  ;;  %v2619_v47 = vadd.f32 %v2618_v16, %v10801_v53  ;;  %v1346_v32 = vadd.f32 %v1218_v61, %v816_v0  ;;  %v1347_v9 = vadd.f32 %v1219_v19, %v817_v21 }
 0x2d9   : > { %v2836_v52 = vmax.f32 %v2615_v57, 0.0  ;;  %v11693_v15 = vpack.c.bf16 %v3536_v63, %v3534_v36  ;;  %v11695_v29 = vadd.f32 %v5786_v18, %v5640_v62  ;;  %v11697_v28 = vadd.f32 %v5787_v6, %v5641_v49 }
 0x2da   : > { %v2837_v11 = vmax.f32 %v2617_v5, 0.0  ;;  %v2838_v10 = vmax.f32 %v2619_v47, 0.0  ;;  %v1590_v33 = vpop.permute.xlu1 %1589  ;;  %v2011_v31 = vadd.f32 %v10124_v27, %v1875_v3  ;;  %v2010_v13 = vadd.f32 %v10138_v45, %v1874_v8  ;;  %v1594_v8 = vpop.permute.xlu0 %1593 }
 0x2db   : > { %14255 = vst [vmem:[#allocation164_spill] sm:$0xff] %v11695_v29  ;;  %14256 = vst [vmem:[#allocation165_spill] sm:$0xff] %v11697_v28  ;;  %v1748_v25 = vmul.f32 %v10086_v40, %v1590_v33  ;;  %v1749_v24 = vmul.f32 %v10096_v44, %v1590_v33  ;;  %v5642_v63 = vadd.f32 %v5514_v50, %v11661_v26 }
 0x2dc   : > { %v2932_v0 = vpack.c.bf16 %v2838_v10, %v2836_v52  ;;  %v2931_v21 = vpack.c.bf16 %v2837_v11, %v2835_v54  ;;  %v5788_v36 = vmul.f32 %v11142_v1, %v1590_v33  ;;  %v5643_v62 = vadd.f32 %v5515_v51, %v11665_v2 }
 0x2dd   : > { %v1876_v61 = vadd.f32 %v1748_v25, %v1346_v32  ;;  %v1877_v19 = vadd.f32 %v1749_v24, %v1347_v9  ;;  %v5789_v18 = vmul.f32 %v11149_v59, %v1590_v33  ;;  %v820_v26 = vmul.f32 %v10089_v41, %v11572_v34 }
 0x2de   : > { %3356 = vmatprep.mubr.bf16.mxu1 %v2932_v0  ;;  %v11707_v49 = vadd.f32 %v5788_v36, %v5642_v63  ;;  %v821_v2 = vmul.f32 %v10077_v37, %v11572_v34  ;;  %v2139_v50 = vmax.f32 %v2011_v31, 0.0  ;;  %v2138_v5 = vmax.f32 %v2010_v13, 0.0 }
 0x2df   : > { %v656_v6 = vpop.permute.xlu1 %655  ;;  %3357 = vmatmul.mubr.bf16.gmra.mrb[64].mxu1 %v2931_v21  ;;  %v2013_v3 = vadd.f32 %v10124_v27, %v1877_v19  ;;  %v2012_v54 = vadd.f32 %v10138_v45, %v1876_v61  ;;  %v11711_v57 = vadd.f32 %v5789_v18, %v5643_v62  ;;  %v11719_v32 = vmul.f32 %v11121_v43, %v11572_v34 }
 0x2e0   : > { %14257 = vst [vmem:[#allocation166_spill] sm:$0xff] %v11707_v49  ;;  %v11723_v9 = vmul.f32 %v11124_v14, %v11572_v34  ;;  %v1750_v10 = vmul.f32 %v10086_v40, %v1594_v8  ;;  %v818_v33 = vmul.f32 %v10089_v41, %v656_v6  ;;  %v1751_v31 = vmul.f32 %v10096_v44, %v1594_v8 }
 0x2e1   : > { %14258 = vst [vmem:[#allocation167_spill] sm:$0xff] %v11711_v57  ;;  %v3248_v16 = vpop.f32.mrb[20].mxu1  ;;  %v2141_v51 = vmax.f32 %v2013_v3, 0.0  ;;  %v2140_v47 = vmax.f32 %v2012_v54, 0.0  ;;  %v819_v0 = vmul.f32 %v10077_v37, %v656_v6  ;;  %v5370_v21 = vmul.f32 %v11121_v43, %v656_v6 }
 0x2e2   : > { %v3249_v52 = vadd.f32 %v3248_v16, %v11461_v7  ;;  %v3250_v11 = vpop.f32.mrb[21].mxu1  ;;  %v5371_v63 = vmul.f32 %v11124_v14, %v656_v6 }
 0x2e3   : > { %v3252_v25 = vpop.f32.mrb[22].mxu1  ;;  %v2211_v24 = vpack.c.bf16 %v2141_v51, %v2139_v50  ;;  %v2210_v13 = vpack.c.bf16 %v2140_v47, %v2138_v5  ;;  %v3251_v19 = vadd.f32 %v3250_v11, %v11467_v48  ;;  %v5790_v11 = vmul.f32 %v11142_v1, %v1594_v8 }
 0x2e4   : > { %v3253_v34 = vadd.f32 %v3252_v25, %v11461_v7  ;;  %v1064_v36 = vpop.permute.xlu1 %1063  ;;  %v3254_v61 = vpop.f32.mrb[23].mxu1  ;;  %v3537_v54 = vmax.f32 %v3249_v52, 0.0 }
 0x2e5   : > { %v1220_v62 = vmul.f32 %v10073_v35, %v1064_v36  ;;  %v1221_v18 = vmul.f32 %v10080_v38, %v1064_v36  ;;  %v5516_v3 = vmul.f32 %v11133_v60, %v1064_v36  ;;  %2730 = vmatprep.mubr.bf16.mxu0 %v2211_v24  ;;  %v5517_v50 = vmul.f32 %v11139_v46, %v1064_v36 }
 0x2e6   : > { %v3539_v16 = vmax.f32 %v3253_v34, 0.0  ;;  %v3255_v51 = vadd.f32 %v3254_v61, %v11467_v48  ;;  %2731 = vmatmul.mubr.bf16.gmra.mrb[112].mxu0 %v2210_v13  ;;  %v3538_v24 = vmax.f32 %v3251_v19, 0.0 }
 0x2e7   : > { %v1348_v6 = vadd.f32 %v1220_v62, %v818_v33  ;;  %v1349_v5 = vadd.f32 %v1221_v18, %v819_v0  ;;  %v2622_v47 = vpop.f32.mrb[68].mxu0  ;;  %v5644_v25 = vadd.f32 %v5516_v3, %v5370_v21  ;;  %v5645_v52 = vadd.f32 %v5517_v50, %v5371_v63 }
 0x2e8   : > { %v3540_v57 = vmax.f32 %v3255_v51, 0.0  ;;  %v2623_v49 = vadd.f32 %v2622_v47, %v10792_v42  ;;  %v1068_v28 = vpop.permute.xlu1 %1067  ;;  %v2624_v29 = vpop.f32.mrb[69].mxu0  ;;  %v11741_v30 = vpack.c.bf16 %v3539_v16, %v3537_v54  ;;  %v5791_v33 = vmul.f32 %v11149_v59, %v1594_v8 }
 0x2e9   : > { %v1222_v34 = vmul.f32 %v10073_v35, %v1068_v28  ;;  %v1223_v36 = vmul.f32 %v10080_v38, %v1068_v28  ;;  %v2626_v13 = vpop.f32.mrb[70].mxu0  ;;  %v1878_v0 = vadd.f32 %v1750_v10, %v1348_v6  ;;  %v1879_v21 = vadd.f32 %v1751_v31, %v1349_v5  ;;  %v11759_v5 = vpop.permute.xlu0 %1601 }
 0x2ea   : > { %14259 = vst [vmem:[#allocation168_spill] sm:$0xff] %v11741_v30  ;;  %v2839_v61 = vmax.f32 %v2623_v49, 0.0  ;;  %v2625_v62 = vadd.f32 %v2624_v29, %v10801_v53  ;;  %v2628_v18 = vpop.f32.mrb[71].mxu0  ;;  %v5518_v3 = vmul.f32 %v11133_v60, %v1068_v28  ;;  %v5519_v54 = vmul.f32 %v11139_v46, %v1068_v28 }
 0x2eb   : > { %v2627_v63 = vadd.f32 %v2626_v13, %v10792_v42  ;;  %v2629_v19 = vadd.f32 %v2628_v18, %v10801_v53  ;;  %v1350_v16 = vadd.f32 %v1222_v34, %v820_v26  ;;  %v1351_v50 = vadd.f32 %v1223_v36, %v821_v2 }
 0x2ec   : > { %v2840_v51 = vmax.f32 %v2625_v62, 0.0  ;;  %v11751_v47 = vpack.c.bf16 %v3540_v57, %v3538_v24  ;;  %v11753_v49 = vadd.f32 %v5790_v11, %v5644_v25  ;;  %v11755_v29 = vadd.f32 %v5791_v33, %v5645_v52 }
 0x2ed   : > { %v2841_v8 = vmax.f32 %v2627_v63, 0.0  ;;  %v2842_v10 = vmax.f32 %v2629_v19, 0.0  ;;  %v1598_v31 = vpop.permute.xlu1 %1597  ;;  %v2015_v13 = vadd.f32 %v10124_v27, %v1879_v21  ;;  %v2014_v26 = vadd.f32 %v10138_v45, %v1878_v0 }
 0x2ee   : > { %14260 = vst [vmem:[#allocation169_spill] sm:$0xff] %v11751_v47  ;;  %14261 = vst [vmem:[#allocation170_spill] sm:$0xff] %v11753_v49  ;;  %v1752_v6 = vmul.f32 %v10086_v40, %v1598_v31  ;;  %v1753_v28 = vmul.f32 %v10096_v44, %v1598_v31  ;;  %v5646_v24 = vadd.f32 %v5518_v3, %v11719_v32 }
 0x2ef   : > { %14262 = vst [vmem:[#allocation171_spill] sm:$0xff] %v11755_v29  ;;  %v2934_v2 = vpack.c.bf16 %v2842_v10, %v2840_v51  ;;  %v2933_v57 = vpack.c.bf16 %v2841_v8, %v2839_v61  ;;  %v5792_v34 = vmul.f32 %v11142_v1, %v1598_v31  ;;  %v5647_v52 = vadd.f32 %v5519_v54, %v11723_v9  ;;  %v671_v61 = vpop.permute.xlu0 %670 }
 0x2f0   : > { %v1880_v25 = vadd.f32 %v1752_v6, %v1350_v16  ;;  %v1881_v11 = vadd.f32 %v1753_v28, %v1351_v50  ;;  %v5793_v36 = vmul.f32 %v11149_v59, %v1598_v31  ;;  %v1754_v32 = vmul.f32 %v10086_v40, %v11759_v5 }
 0x2f1   : > { %3366 = vmatprep.mubr.bf16.mxu1 %v2934_v2  ;;  %v11767_v33 = vadd.f32 %v5792_v34, %v5646_v24  ;;  %v1755_v9 = vmul.f32 %v10096_v44, %v11759_v5  ;;  %v2143_v54 = vmax.f32 %v2015_v13, 0.0  ;;  %v2142_v19 = vmax.f32 %v2014_v26, 0.0 }
 0x2f2   : > { %v666_v62 = vpop.permute.xlu1 %665  ;;  %3367 = vmatmul.mubr.bf16.gmra.mrb[68].mxu1 %v2933_v57  ;;  %v2017_v21 = vadd.f32 %v10124_v27, %v1881_v11  ;;  %v2016_v0 = vadd.f32 %v10138_v45, %v1880_v25  ;;  %v11771_v18 = vadd.f32 %v5793_v36, %v5647_v52  ;;  %v824_v8 = vmul.f32 %v10089_v41, %v671_v61 }
 0x2f3   : > { %14263 = vst [vmem:[#allocation172_spill] sm:$0xff] %v11767_v33  ;;  %v825_v10 = vmul.f32 %v10077_v37, %v671_v61  ;;  %v11781_v31 = vmul.f32 %v11121_v43, %v671_v61  ;;  %v822_v6 = vmul.f32 %v10089_v41, %v666_v62  ;;  %v5377_v13 = vmul.f32 %v11124_v14, %v671_v61 }
 0x2f4   : > { %14264 = vst [vmem:[#allocation173_spill] sm:$0xff] %v11771_v18  ;;  %v3258_v3 = vpop.f32.mrb[24].mxu1  ;;  %v2145_v63 = vmax.f32 %v2017_v21, 0.0  ;;  %v2144_v16 = vmax.f32 %v2016_v0, 0.0  ;;  %v823_v26 = vmul.f32 %v10077_v37, %v666_v62  ;;  %v5374_v24 = vmul.f32 %v11121_v43, %v666_v62 }
 0x2f5   : > { %v3259_v50 = vadd.f32 %v3258_v3, %v11461_v7  ;;  %v3260_v51 = vpop.f32.mrb[25].mxu1  ;;  %v5375_v34 = vmul.f32 %v11124_v14, %v666_v62 }
 0x2f6   : > { %v3262_v28 = vpop.f32.mrb[26].mxu1  ;;  %v2213_v2 = vpack.c.bf16 %v2145_v63, %v2143_v54  ;;  %v2212_v57 = vpack.c.bf16 %v2144_v16, %v2142_v19  ;;  %v3261_v36 = vadd.f32 %v3260_v51, %v11467_v48  ;;  %v5794_v51 = vmul.f32 %v11142_v1, %v11759_v5 }
 0x2f7   : > { %v3263_v25 = vadd.f32 %v3262_v28, %v11461_v7  ;;  %v1072_v11 = vpop.permute.xlu1 %1071  ;;  %v3264_v52 = vpop.f32.mrb[27].mxu1  ;;  %v3541_v61 = vmax.f32 %v3259_v50, 0.0 }
 0x2f8   : > { %v1224_v21 = vmul.f32 %v10073_v35, %v1072_v11  ;;  %v1225_v0 = vmul.f32 %v10080_v38, %v1072_v11  ;;  %v5520_v3 = vmul.f32 %v11133_v60, %v1072_v11  ;;  %2740 = vmatprep.mubr.bf16.mxu0 %v2213_v2  ;;  %v5521_v63 = vmul.f32 %v11139_v46, %v1072_v11 }
 0x2f9   : > { %v3543_v54 = vmax.f32 %v3263_v25, 0.0  ;;  %v3265_v19 = vadd.f32 %v3264_v52, %v11467_v48  ;;  %2741 = vmatmul.mubr.bf16.gmra.mrb[116].mxu0 %v2212_v57  ;;  %v3542_v25 = vmax.f32 %v3261_v36, 0.0 }
 0x2fa   : > { %v1352_v62 = vadd.f32 %v1224_v21, %v822_v6  ;;  %v1353_v16 = vadd.f32 %v1225_v0, %v823_v26  ;;  %v2632_v28 = vpop.f32.mrb[72].mxu0  ;;  %v5648_v18 = vadd.f32 %v5520_v3, %v5374_v24  ;;  %v5649_v50 = vadd.f32 %v5521_v63, %v5375_v34 }
 0x2fb   : > { %v3544_v33 = vmax.f32 %v3265_v19, 0.0  ;;  %v2633_v29 = vadd.f32 %v2632_v28, %v10792_v42  ;;  %v1076_v49 = vpop.permute.xlu1 %1075  ;;  %v2634_v12 = vpop.f32.mrb[73].mxu0  ;;  %v11798_v2 = vpack.c.bf16 %v3543_v54, %v3541_v61  ;;  %v5795_v26 = vmul.f32 %v11149_v59, %v11759_v5 }
 0x2fc   : > { %v1226_v11 = vmul.f32 %v10073_v35, %v1076_v49  ;;  %v1227_v57 = vmul.f32 %v10080_v38, %v1076_v49  ;;  %v2636_v6 = vpop.f32.mrb[74].mxu0  ;;  %v5522_v24 = vmul.f32 %v11133_v60, %v1076_v49  ;;  %v2635_v52 = vadd.f32 %v2634_v12, %v10801_v53 }
 0x2fd   : > { %14265 = vst [vmem:[#allocation174_spill] sm:$0xff] %v11798_v2  ;;  %v2637_v21 = vadd.f32 %v2636_v6, %v10792_v42  ;;  %v2638_v0 = vpop.f32.mrb[75].mxu0  ;;  %v1883_v3 = vadd.f32 %v1755_v9, %v1353_v16  ;;  %v2843_v61 = vmax.f32 %v2633_v29, 0.0  ;;  %v5523_v34 = vmul.f32 %v11139_v46, %v1076_v49  ;;  %v681_v2 = vpop.permute.xlu0 %680 }
 0x2fe   : > { %v2639_v36 = vadd.f32 %v2638_v0, %v10801_v53  ;;  %v1882_v54 = vadd.f32 %v1754_v32, %v1352_v62  ;;  %v1354_v63 = vadd.f32 %v1226_v11, %v824_v8  ;;  %v1355_v19 = vadd.f32 %v1227_v57, %v825_v10 }
 0x2ff   : > { %v2845_v28 = vmax.f32 %v2637_v21, 0.0  ;;  %v11809_v30 = vpack.c.bf16 %v3544_v33, %v3542_v25  ;;  %v2844_v5 = vmax.f32 %v2635_v52, 0.0  ;;  %v11811_v12 = vadd.f32 %v5794_v51, %v5648_v18 }
 0x300   : > { %v2846_v47 = vmax.f32 %v2639_v36, 0.0  ;;  %v1606_v39 = vpop.permute.xlu1 %1605  ;;  %v11813_v6 = vadd.f32 %v5795_v26, %v5649_v50  ;;  %v2019_v32 = vadd.f32 %v10124_v27, %v1883_v3  ;;  %v2018_v10 = vadd.f32 %v10138_v45, %v1882_v54 }
 0x301   : > { %14266 = vst [vmem:[#allocation175_spill] sm:$0xff] %v11811_v12  ;;  %v1756_v29 = vmul.f32 %v10086_v40, %v1606_v39  ;;  %v1757_v49 = vmul.f32 %v10096_v44, %v1606_v39  ;;  %v2935_v9 = vpack.c.bf16 %v2845_v28, %v2843_v61  ;;  %v5650_v33 = vadd.f32 %v5522_v24, %v11781_v31  ;;  %v1610_v26 = vpop.permute.xlu0 %1609 }
 0x302   : > { %14267 = vst [vmem:[#allocation176_spill] sm:$0xff] %v11813_v6  ;;  %v2936_v8 = vpack.c.bf16 %v2846_v47, %v2844_v5  ;;  %v5796_v62 = vmul.f32 %v11142_v1, %v1606_v39  ;;  %v5651_v18 = vadd.f32 %v5523_v34, %v5377_v13  ;;  %v5797_v51 = vmul.f32 %v11149_v59, %v1606_v39  ;;  %v14321_v6 = vld [vmem:[#allocation45_spill] sm:$0xff] }
 0x303   : > { %v1884_v16 = vadd.f32 %v1756_v29, %v1354_v63  ;;  %v1885_v25 = vadd.f32 %v1757_v49, %v1355_v19  ;;  %v828_v31 = vmul.f32 %v10089_v41, %v681_v2  ;;  %v2147_v21 = vmax.f32 %v2019_v32, 0.0 }
 0x304   : > { %3376 = vmatprep.mubr.bf16.mxu1 %v2936_v8  ;;  %v11822_v50 = vadd.f32 %v5796_v62, %v5650_v33  ;;  %v11826_v52 = vadd.f32 %v5797_v51, %v5651_v18  ;;  %v2146_v13 = vmax.f32 %v2018_v10, 0.0  ;;  %v829_v39 = vmul.f32 %v10077_v37, %v681_v2 }
 0x305   : > { %v676_v11 = vpop.permute.xlu1 %675  ;;  %3377 = vmatmul.mubr.bf16.gmra.mrb[72].mxu1 %v2935_v9  ;;  %v2021_v57 = vadd.f32 %v10124_v27, %v1885_v25  ;;  %v2020_v47 = vadd.f32 %v10138_v45, %v1884_v16  ;;  %v11831_v61 = vmul.f32 %v11121_v43, %v681_v2  ;;  %v1758_v54 = vmul.f32 %v10086_v40, %v1610_v26 }
 0x306   : > { %14268 = vst [vmem:[#allocation177_spill] sm:$0xff] %v11822_v50  ;;  %14269 = vst [vmem:[#allocation178_spill] sm:$0xff] %v11826_v52  ;;  %v826_v63 = vmul.f32 %v10089_v41, %v676_v11  ;;  %v1759_v5 = vmul.f32 %v10096_v44, %v1610_v26  ;;  %v827_v49 = vmul.f32 %v10077_v37, %v676_v11 }
 0x307   : > { %v3268_v24 = vpop.f32.mrb[28].mxu1  ;;  %v2149_v0 = vmax.f32 %v2021_v57, 0.0  ;;  %v2148_v3 = vmax.f32 %v2020_v47, 0.0  ;;  %v5378_v9 = vmul.f32 %v11121_v43, %v676_v11  ;;  %v5379_v32 = vmul.f32 %v11124_v14, %v676_v11 }
 0x308   : > { %v3269_v34 = vadd.f32 %v3268_v24, %v11461_v7  ;;  %v3270_v36 = vpop.f32.mrb[29].mxu1  ;;  %v5381_v11 = vmul.f32 %v11124_v14, %v681_v2  ;;  %v12512_v12 = vmul.f32 %v11121_v43, %v14321_v6 }
 0x309   : > { %v3272_v19 = vpop.f32.mrb[30].mxu1  ;;  %v2215_v28 = vpack.c.bf16 %v2149_v0, %v2147_v21  ;;  %v2214_v29 = vpack.c.bf16 %v2148_v3, %v2146_v13  ;;  %v3271_v62 = vadd.f32 %v3270_v36, %v11467_v48  ;;  %v5798_v0 = vmul.f32 %v11142_v1, %v1610_v26 }
 0x30a   : > { %v3273_v8 = vadd.f32 %v3272_v19, %v11461_v7  ;;  %v1080_v10 = vpop.permute.xlu1 %1079  ;;  %v3274_v33 = vpop.f32.mrb[31].mxu1  ;;  %v3545_v18 = vmax.f32 %v3269_v34, 0.0  ;;  %v5799_v13 = vmul.f32 %v11149_v59, %v1610_v26 }
 0x30b   : > { %v1228_v16 = vmul.f32 %v10073_v35, %v1080_v10  ;;  %v1229_v41 = vmul.f32 %v10080_v38, %v1080_v10  ;;  %v5524_v25 = vmul.f32 %v11133_v60, %v1080_v10  ;;  %2750 = vmatprep.mubr.bf16.mxu0 %v2215_v28  ;;  %v5525_v37 = vmul.f32 %v11139_v46, %v1080_v10 }
 0x30c   : > { %v3547_v51 = vmax.f32 %v3273_v8, 0.0  ;;  %v3275_v57 = vadd.f32 %v3274_v33, %v11467_v48  ;;  %2751 = vmatmul.mubr.bf16.gmra.mrb[120].mxu0 %v2214_v29  ;;  %v3546_v2 = vmax.f32 %v3271_v62, 0.0 }
 0x30d   : > { %v1356_v47 = vadd.f32 %v1228_v16, %v826_v63  ;;  %v1357_v24 = vadd.f32 %v1229_v41, %v827_v49  ;;  %v5652_v21 = vadd.f32 %v5524_v25, %v5378_v9  ;;  %v5653_v34 = vadd.f32 %v5525_v37, %v5379_v32 }
 0x30e   : > { %v2642_v3 = vpop.f32.mrb[76].mxu0  ;;  %v1084_v36 = vpop.permute.xlu1 %1083  ;;  %v11850_v19 = vpack.c.bf16 %v3547_v51, %v3545_v18  ;;  %v3548_v28 = vmax.f32 %v3275_v57, 0.0 }
 0x30f   : > { %v1887_v8 = vadd.f32 %v1759_v5, %v1357_v24  ;;  %v2643_v10 = vadd.f32 %v2642_v3, %v10792_v42  ;;  %v1230_v29 = vmul.f32 %v10073_v35, %v1084_v36  ;;  %v2644_v33 = vpop.f32.mrb[77].mxu0  ;;  %v1886_v63 = vadd.f32 %v1758_v54, %v1356_v47 }
 0x310   : > { %v1231_v49 = vmul.f32 %v10080_v38, %v1084_v36  ;;  %v2645_v9 = vadd.f32 %v2644_v33, %v10801_v53  ;;  %v2646_v16 = vpop.f32.mrb[78].mxu0  ;;  %v5526_v41 = vmul.f32 %v11133_v60, %v1084_v36  ;;  %v5527_v25 = vmul.f32 %v11139_v46, %v1084_v36 }
 0x311   : > { %v2847_v26 = vmax.f32 %v2643_v10, 0.0  ;;  %v2647_v32 = vadd.f32 %v2646_v16, %v10792_v42  ;;  %v2648_v5 = vpop.f32.mrb[79].mxu0  ;;  %v1358_v35 = vadd.f32 %v1230_v29, %v828_v31  ;;  %v2023_v62 = vadd.f32 %v10124_v27, %v1887_v8 }
 0x312   : > { %v2848_v18 = vmax.f32 %v2645_v9, 0.0  ;;  %v2649_v51 = vadd.f32 %v2648_v5, %v10801_v53  ;;  %v1359_v37 = vadd.f32 %v1231_v49, %v829_v39  ;;  %v11861_v57 = vpack.c.bf16 %v3548_v28, %v3546_v2 }
 0x313   : > { %v2849_v54 = vmax.f32 %v2647_v32, 0.0  ;;  %v1614_v38 = vpop.permute.xlu1 %1613  ;;  %v11863_v47 = vadd.f32 %v5798_v0, %v5652_v21  ;;  %v2022_v31 = vadd.f32 %v10138_v45, %v1886_v63  ;;  %v11870_v8 = vadd.f32 %v5799_v13, %v5653_v34 }
 0x314   : > { %v2850_v24 = vmax.f32 %v2649_v51, 0.0  ;;  %v1760_v3 = vmul.f32 %v10086_v40, %v1614_v38  ;;  %v1761_v36 = vmul.f32 %v10096_v44, %v1614_v38  ;;  %v5800_v10 = vmul.f32 %v11142_v1, %v1614_v38 }
 0x315   : > { %14270 = vst [vmem:[#allocation179_spill] sm:$0xff] %v11863_v47  ;;  %v5801_v33 = vmul.f32 %v11149_v59, %v1614_v38  ;;  %v2937_v9 = vpack.c.bf16 %v2849_v54, %v2847_v26  ;;  %14271 = vst [vmem:[#allocation180_spill] sm:$0xff] %v11870_v8  ;;  %v5654_v21 = vadd.f32 %v5526_v41, %v11831_v61  ;;  %v2151_v16 = vmax.f32 %v2023_v62, 0.0 }
 0x316   : > { %v1888_v39 = vadd.f32 %v1760_v3, %v1358_v35  ;;  %v1889_v29 = vadd.f32 %v1761_v36, %v1359_v37  ;;  %v2938_v28 = vpack.c.bf16 %v2850_v24, %v2848_v18  ;;  %v5655_v0 = vadd.f32 %v5527_v25, %v5381_v11 }
 0x317   : > { %v11875_v2 = vadd.f32 %v5800_v10, %v5654_v21  ;;  %v2150_v13 = vmax.f32 %v2022_v31, 0.0 }
 0x318   : > { %3386 = vmatprep.mubr.bf16.mxu1 %v2938_v28  ;;  %v2025_v40 = vadd.f32 %v10124_v27, %v1889_v29  ;;  %v2024_v44 = vadd.f32 %v10138_v45, %v1888_v39  ;;  %v11877_v49 = vadd.f32 %v5801_v33, %v5655_v0 }
 0x319   : > { %14272 = vst [vmem:[#allocation181_spill] sm:$0xff] %v11875_v2  ;;  %3387 = vmatmul.mubr.bf16.gmra.mrb[76].mxu1 %v2937_v9 }
 0x31a   : > { %14273 = vst [vmem:[#allocation182_spill] sm:$0xff] %v11877_v49  ;;  %v2153_v63 = vmax.f32 %v2025_v40, 0.0  ;;  %v2152_v34 = vmax.f32 %v2024_v44, 0.0  ;;  %v3278_v26 = vpop.f32.mrb[32].mxu1 }
 0x31b   : > { %v3279_v32 = vadd.f32 %v3278_v26, %v11461_v7  ;;  %v3280_v5 = vpop.f32.mrb[33].mxu1 }
 0x31c   : > { %v2217_v61 = vpack.c.bf16 %v2153_v63, %v2151_v16  ;;  %v2216_v11 = vpack.c.bf16 %v2152_v34, %v2150_v13  ;;  %v3281_v41 = vadd.f32 %v3280_v5, %v11467_v48  ;;  %v3282_v27 = vpop.f32.mrb[34].mxu1 }
 0x31d   : > { %v3283_v45 = vadd.f32 %v3282_v27, %v11461_v7  ;;  %v3284_v25 = vpop.f32.mrb[35].mxu1  ;;  %v3549_v51 = vmax.f32 %v3279_v32, 0.0 }
 0x31e   : > { %2760 = vmatprep.mubr.bf16.mxu0 %v2217_v61  ;;  %v3285_v18 = vadd.f32 %v3284_v25, %v11467_v48  ;;  %v3550_v62 = vmax.f32 %v3281_v41, 0.0 }
 0x31f   : > { %2761 = vmatmul.mubr.bf16.gmra.mrb[124].mxu0 %v2216_v11  ;;  %v3551_v35 = vmax.f32 %v3283_v45, 0.0 }
 0x320   : > { %3942 = vmatprep.mubr.bf16.mxu0 %v11512_v4  ;;  %v3552_v54 = vmax.f32 %v3285_v18, 0.0 }
 0x321   : > { %v2652_v37 = vpop.f32.mrb[80].mxu0  ;;  %v11885_v3 = vpack.c.bf16 %v3551_v35, %v3549_v51 }
 0x322   : > { %v2653_v38 = vadd.f32 %v2652_v37, %v10792_v42  ;;  %v2654_v24 = vpop.f32.mrb[81].mxu0  ;;  %v11888_v33 = vpack.c.bf16 %v3552_v54, %v3550_v62 }
 0x323   : > { %v2655_v36 = vadd.f32 %v2654_v24, %v10801_v53  ;;  %v2656_v10 = vpop.f32.mrb[82].mxu0 }
 0x324   : > { %v2657_v9 = vadd.f32 %v2656_v10, %v10792_v42  ;;  %v2658_v31 = vpop.f32.mrb[83].mxu0  ;;  %v2851_v29 = vmax.f32 %v2653_v38, 0.0 }
 0x325   : > { %v2659_v39 = vadd.f32 %v2658_v31, %v10801_v53  ;;  %v2852_v28 = vmax.f32 %v2655_v36, 0.0  ;;  %v9402_v31 = vld [vmem:[#allocation2 + $0x304] ss:$8 sps:$4 sm:$0xff]  }
 0x326   : > { %v2853_v4 = vmax.f32 %v2657_v9, 0.0  ;;  %v9400_v9 = vld [vmem:[#allocation2 + $0x300] ss:$8 sps:$4 sm:$0xff]   ;;  %4656 = vmatprep.subr.bf16.mxu1 %v9402_v31  ;;  %v9414_v31 = vld [vmem:[#allocation2 + $0x344] ss:$8 sps:$4 sm:$0xff]  }
 0x327   : > { %v2854_v21 = vmax.f32 %v2659_v39, 0.0  ;;  %3943 = vmatmul.mubr.bf16.vlgmr.msra.gmra.mrb[128].mxu0 %v11510_v23  ;;  %4657 = vmatpush1.bf16.msra.mxu1 %v9400_v9 }
 0x328   : > { %3952 = vmatprep.mubr.bf16.mxu0 %v11542_v56  ;;  %v2939_v0 = vpack.c.bf16 %v2853_v4, %v2851_v29 }
 0x329   : > { %v2940_v40 = vpack.c.bf16 %v2854_v21, %v2852_v28 }
 0x32b   : > { %3396 = vmatprep.mubr.bf16.mxu1 %v2940_v40 }
 0x32c   : > { %3397 = vmatmul.mubr.bf16.gmra.mrb[80].mxu1 %v2939_v0 }
 0x32d   : > { %v3288_v44 = vpop.f32.mrb[36].mxu1 }
 0x32e   : > { %v3289_v16 = vadd.f32 %v3288_v44, %v11461_v7  ;;  %v3290_v63 = vpop.f32.mrb[37].mxu1 }
 0x32f   : > { %3953 = vmatmul.mubr.bf16.gmra.mrb[132].mxu0 %v11544_v17  ;;  %v3291_v13 = vadd.f32 %v3290_v63, %v11467_v48  ;;  %v3292_v34 = vpop.f32.mrb[38].mxu1 }
 0x330   : > { %3962 = vmatprep.mubr.bf16.mxu0 %v11583_v20  ;;  %v3293_v26 = vadd.f32 %v3292_v34, %v11461_v7  ;;  %v3294_v23 = vpop.f32.mrb[39].mxu1  ;;  %v3553_v32 = vmax.f32 %v3289_v16, 0.0 }
 0x331   : > { %v3295_v56 = vadd.f32 %v3294_v23, %v11467_v48  ;;  %v3554_v61 = vmax.f32 %v3291_v13, 0.0 }
 0x332   : > { %v3555_v5 = vmax.f32 %v3293_v26, 0.0  ;;  %v14275_v26 = vld [vmem:[#allocation169_spill] sm:$0xff] }
 0x333   : > { %v3556_v11 = vmax.f32 %v3295_v56, 0.0 }
 0x334   : > { %v11901_v25 = vpack.c.bf16 %v3555_v5, %v3553_v32 }
 0x335   : > { %v2662_v41 = vpop.f32.mrb[84].mxu0  ;;  %v11904_v51 = vpack.c.bf16 %v3556_v11, %v3554_v61 }
 0x336   : > { %v2663_v27 = vadd.f32 %v2662_v41, %v10792_v42  ;;  %v2664_v45 = vpop.f32.mrb[85].mxu0 }
 0x337   : > { %v2665_v17 = vadd.f32 %v2664_v45, %v10801_v53  ;;  %v2666_v18 = vpop.f32.mrb[86].mxu0  ;;  %3963 = vmatmul.mubr.bf16.gmra.mrb[136].mxu0 %v11575_v22  ;;  %v9405_v45 = vld [vmem:[#allocation2 + $0x314] ss:$8 sps:$4 sm:$0xff]  }
 0x338   : > { %v2667_v20 = vadd.f32 %v2666_v18, %v10792_v42  ;;  %v2668_v35 = vpop.f32.mrb[87].mxu0  ;;  %3972 = vmatprep.mubr.bf16.mxu0 %v11635_v55  ;;  %v2855_v54 = vmax.f32 %v2663_v27, 0.0  ;;  %v9403_v27 = vld [vmem:[#allocation2 + $0x310] ss:$8 sps:$4 sm:$0xff]   ;;  %4658 = vmatprep.subr.bf16.mxu1 %v9405_v45  ;;  %v9420_v45 = vld [vmem:[#allocation2 + $0x364] ss:$8 sps:$4 sm:$0xff]  }
 0x339   : > { %v2669_v62 = vadd.f32 %v2668_v35, %v10801_v53  ;;  %v2856_v38 = vmax.f32 %v2665_v17, 0.0  ;;  %4659 = vmatpush1.bf16.msra.mxu1 %v9403_v27 }
 0x33a   : > { %v2857_v37 = vmax.f32 %v2667_v20, 0.0 }
 0x33b   : > { %v2858_v24 = vmax.f32 %v2669_v62, 0.0 }
 0x33c   : > { %v2941_v36 = vpack.c.bf16 %v2857_v37, %v2855_v54  ;;  %v14276_v54 = vld [vmem:[#allocation168_spill] sm:$0xff] }
 0x33d   : > { %v2942_v10 = vpack.c.bf16 %v2858_v24, %v2856_v38  ;;  %v9406_v38 = vld [vmem:[#allocation2 + $0x320] ss:$8 sps:$4 sm:$0xff]   ;;  %v9408_v24 = vld [vmem:[#allocation2 + $0x324] ss:$8 sps:$4 sm:$0xff]  }
 0x33e   : > { %4660 = vmatprep.subr.bf16.mxu1 %v9408_v24  ;;  %v9423_v24 = vld [vmem:[#allocation2 + $0x374] ss:$8 sps:$4 sm:$0xff]  }
 0x33f   : > { %3406 = vmatprep.mubr.bf16.mxu1 %v2942_v10  ;;  %3973 = vmatmul.mubr.bf16.gmra.mrb[140].mxu0 %v11625_v58  ;;  %v9409_v10 = vld [vmem:[#allocation2 + $0x330] ss:$8 sps:$4 sm:$0xff]  }
 0x340   : > { %3407 = vmatmul.mubr.bf16.gmra.mrb[84].mxu1 %v2941_v36  ;;  %3982 = vmatprep.mubr.bf16.mxu0 %v11693_v15  ;;  %v3298_v39 = vpop.f32.mrb[40].mxu1  ;;  %v14274_v15 = vld [vmem:[#allocation163_spill] sm:$0xff] }
 0x341   : > { %v3299_v22 = vadd.f32 %v3298_v39, %v11461_v7  ;;  %v3300_v29 = vpop.f32.mrb[41].mxu1  ;;  %v9411_v36 = vld [vmem:[#allocation2 + $0x334] ss:$8 sps:$4 sm:$0xff]   ;;  %4661 = vmatpush1.bf16.msra.mxu1 %v9406_v38  ;;  %v9421_v38 = vld [vmem:[#allocation2 + $0x370] ss:$8 sps:$4 sm:$0xff]  }
 0x342   : > { %v3301_v55 = vadd.f32 %v3300_v29, %v11467_v48  ;;  %v3302_v4 = vpop.f32.mrb[42].mxu1  ;;  %4662 = vmatprep.subr.bf16.mxu1 %v9411_v36  ;;  %v9426_v36 = vld [vmem:[#allocation2 + $0x384] ss:$8 sps:$4 sm:$0xff]  }
 0x343   : > { %v3303_v28 = vadd.f32 %v3302_v4, %v11461_v7  ;;  %v3304_v21 = vpop.f32.mrb[43].mxu1  ;;  %v3557_v40 = vmax.f32 %v3299_v22, 0.0 }
 0x344   : > { %v3305_v0 = vadd.f32 %v3304_v21, %v11467_v48  ;;  %v3558_v44 = vmax.f32 %v3301_v55, 0.0  ;;  %v9412_v21 = vld [vmem:[#allocation2 + $0x340] ss:$8 sps:$4 sm:$0xff]  }
 0x345   : > { %v3559_v58 = vmax.f32 %v3303_v28, 0.0  ;;  %v14277_v28 = vld [vmem:[#allocation174_spill] sm:$0xff]  ;;  %4663 = vmatpush1.bf16.msra.mxu1 %v9409_v10 }
 0x346   : > { %v3560_v16 = vmax.f32 %v3305_v0, 0.0  ;;  %4664 = vmatprep.subr.bf16.mxu1 %v9414_v31 }
 0x347   : > { %3983 = vmatmul.mubr.bf16.gmra.mrb[144].mxu0 %v14274_v15  ;;  %v11919_v23 = vpack.c.bf16 %v3559_v58, %v3557_v40 }
 0x348   : > { %v2672_v63 = vpop.f32.mrb[88].mxu0  ;;  %3992 = vmatprep.mubr.bf16.mxu0 %v14275_v26  ;;  %v11922_v5 = vpack.c.bf16 %v3560_v16, %v3558_v44  ;;  %v9415_v26 = vld [vmem:[#allocation2 + $0x350] ss:$8 sps:$4 sm:$0xff]  }
 0x349   : > { %v2673_v13 = vadd.f32 %v2672_v63, %v10792_v42  ;;  %v2674_v34 = vpop.f32.mrb[89].mxu0  ;;  %4665 = vmatpush1.bf16.msra.mxu1 %v9412_v21 }
 0x34a   : > { %v2675_v56 = vadd.f32 %v2674_v34, %v10801_v53  ;;  %v2676_v32 = vpop.f32.mrb[90].mxu0 }
 0x34b   : > { %v2677_v61 = vadd.f32 %v2676_v32, %v10792_v42  ;;  %v2678_v11 = vpop.f32.mrb[91].mxu0  ;;  %v2859_v17 = vmax.f32 %v2673_v13, 0.0 }
 0x34c   : > { %v2679_v41 = vadd.f32 %v2678_v11, %v10801_v53  ;;  %v2860_v20 = vmax.f32 %v2675_v56, 0.0  ;;  %v9417_v56 = vld [vmem:[#allocation2 + $0x354] ss:$8 sps:$4 sm:$0xff]  }
 0x34d   : > { %v2861_v18 = vmax.f32 %v2677_v61, 0.0  ;;  %4666 = vmatprep.subr.bf16.mxu1 %v9417_v56 }
 0x34e   : > { %v2862_v35 = vmax.f32 %v2679_v41, 0.0  ;;  %4667 = vmatpush1.bf16.msra.mxu1 %v9415_v26 }
 0x34f   : > { %v2943_v62 = vpack.c.bf16 %v2861_v18, %v2859_v17  ;;  %3993 = vmatmul.mubr.bf16.gmra.mrb[148].mxu0 %v14276_v54  ;;  %4668 = vmatprep.subr.bf16.mxu1 %v9420_v45 }
 0x350   : > { %v2944_v37 = vpack.c.bf16 %v2862_v35, %v2860_v20  ;;  %4002 = vmatprep.mubr.bf16.mxu0 %v11809_v30  ;;  %v9418_v20 = vld [vmem:[#allocation2 + $0x360] ss:$8 sps:$4 sm:$0xff]  }
 0x352   : > { %3416 = vmatprep.mubr.bf16.mxu1 %v2944_v37  ;;  %4669 = vmatpush1.bf16.msra.mxu1 %v9418_v20 }
 0x353   : > { %3417 = vmatmul.mubr.bf16.gmra.mrb[88].mxu1 %v2943_v62  ;;  %v3308_v9 = vpop.f32.mrb[44].mxu1  ;;  %4670 = vmatprep.subr.bf16.mxu1 %v9423_v24 }
 0x354   : > { %v3309_v39 = vadd.f32 %v3308_v9, %v11461_v7  ;;  %v3310_v22 = vpop.f32.mrb[45].mxu1 }
 0x355   : > { %v3311_v29 = vadd.f32 %v3310_v22, %v11467_v48  ;;  %v3312_v55 = vpop.f32.mrb[46].mxu1  ;;  %v9429_v22 = vld [vmem:[#allocation2 + $0x394] ss:$8 sps:$4 sm:$0xff]  }
 0x356   : > { %v3313_v4 = vadd.f32 %v3312_v55, %v11461_v7  ;;  %v3314_v30 = vpop.f32.mrb[47].mxu1  ;;  %v3561_v40 = vmax.f32 %v3309_v39, 0.0  ;;  %4671 = vmatpush1.bf16.msra.mxu1 %v9421_v38 }
 0x357   : > { %4003 = vmatmul.mubr.bf16.gmra.mrb[152].mxu0 %v14277_v28  ;;  %v3315_v0 = vadd.f32 %v3314_v30, %v11467_v48  ;;  %v3562_v44 = vmax.f32 %v3311_v29, 0.0  ;;  %4672 = vmatprep.subr.bf16.mxu1 %v9426_v36  ;;  %v9427_v30 = vld [vmem:[#allocation2 + $0x390] ss:$8 sps:$4 sm:$0xff]  }
 0x358   : > { %4012 = vmatprep.mubr.bf16.mxu0 %v11861_v57  ;;  %v3563_v58 = vmax.f32 %v3313_v4, 0.0 }
 0x359   : > { %v3564_v16 = vmax.f32 %v3315_v0, 0.0 }
 0x35a   : > { %v11935_v34 = vpack.c.bf16 %v3563_v58, %v3561_v40 }
 0x35b   : > { %v2682_v63 = vpop.f32.mrb[92].mxu0  ;;  %v11938_v11 = vpack.c.bf16 %v3564_v16, %v3562_v44 }
 0x35c   : > { %v2683_v15 = vadd.f32 %v2682_v63, %v10792_v42  ;;  %v2684_v13 = vpop.f32.mrb[93].mxu0 }
 0x35d   : > { %v2685_v32 = vadd.f32 %v2684_v13, %v10801_v53  ;;  %v2686_v61 = vpop.f32.mrb[94].mxu0 }
 0x35e   : > { %v2687_v57 = vadd.f32 %v2686_v61, %v10792_v42  ;;  %v2688_v41 = vpop.f32.mrb[95].mxu0  ;;  %v2863_v17 = vmax.f32 %v2683_v15, 0.0  ;;  %v9432_v61 = vld [vmem:[#allocation2 + $0x3a4] ss:$8 sps:$4 sm:$0xff]  }
 0x35f   : > { %v2689_v27 = vadd.f32 %v2688_v41, %v10801_v53  ;;  %4013 = vmatmul.mubr.bf16.gmra.mrb[156].mxu0 %v11850_v19  ;;  %v2864_v35 = vmax.f32 %v2685_v32, 0.0  ;;  %v9424_v19 = vld [vmem:[#allocation2 + $0x380] ss:$8 sps:$4 sm:$0xff]  }
 0x360   : > { %v2865_v18 = vmax.f32 %v2687_v57, 0.0  ;;  %4022 = vmatprep.mubr.bf16.mxu0 %v11888_v33  ;;  %4673 = vmatpush1.bf16.msra.mxu1 %v9424_v19  ;;  %v9430_v32 = vld [vmem:[#allocation2 + $0x3a0] ss:$8 sps:$4 sm:$0xff]  }
 0x361   : > { %v2866_v62 = vmax.f32 %v2689_v27, 0.0  ;;  %4674 = vmatprep.subr.bf16.mxu1 %v9429_v22 }
 0x362   : > { %v2945_v54 = vpack.c.bf16 %v2865_v18, %v2863_v17  ;;  %v9435_v17 = vld [vmem:[#allocation2 + $0x3b4] ss:$8 sps:$4 sm:$0xff]  }
 0x363   : > { %v2946_v37 = vpack.c.bf16 %v2866_v62, %v2864_v35  ;;  %v9433_v35 = vld [vmem:[#allocation2 + $0x3b0] ss:$8 sps:$4 sm:$0xff]  }
 0x364   : > { %4675 = vmatpush1.bf16.msra.mxu1 %v9427_v30 }
 0x365   : > { %3426 = vmatprep.mubr.bf16.mxu1 %v2946_v37  ;;  %4676 = vmatprep.subr.bf16.mxu1 %v9432_v61 }
 0x366   : > { %3427 = vmatmul.mubr.bf16.gmra.mrb[92].mxu1 %v2945_v54  ;;  %v3318_v10 = vpop.f32.mrb[48].mxu1  ;;  %v9441_v54 = vld [vmem:[#allocation2 + $0x3d4] ss:$8 sps:$4 sm:$0xff]  }
 0x367   : > { %4023 = vmatmul.mubr.bf16.gmra.mrb[160].mxu0 %v11885_v3  ;;  %v3319_v9 = vadd.f32 %v3318_v10, %v11461_v7  ;;  %v3320_v31 = vpop.f32.mrb[49].mxu1 }
 0x368   : > { %4032 = vmatprep.mubr.bf16.mxu0 %v11904_v51  ;;  %v3321_v33 = vadd.f32 %v3320_v31, %v11467_v48  ;;  %v3322_v39 = vpop.f32.mrb[50].mxu1  ;;  %4677 = vmatpush1.bf16.msra.mxu1 %v9430_v32 }
 0x369   : > { %v3323_v29 = vadd.f32 %v3322_v39, %v11461_v7  ;;  %v3324_v55 = vpop.f32.mrb[51].mxu1  ;;  %v3565_v3 = vmax.f32 %v3319_v9, 0.0  ;;  %4678 = vmatprep.subr.bf16.mxu1 %v9435_v17 }
 0x36a   : > { %v3325_v4 = vadd.f32 %v3324_v55, %v11467_v48  ;;  %v3566_v0 = vmax.f32 %v3321_v33, 0.0 }
 0x36b   : > { %v3567_v28 = vmax.f32 %v3323_v29, 0.0 }
 0x36c   : > { %v3568_v40 = vmax.f32 %v3325_v4, 0.0  ;;  %4679 = vmatpush1.bf16.msra.mxu1 %v9433_v35 }
 0x36d   : > { %v2692_v21 = vpop.f32.mrb[96].mxu0  ;;  %v11952_v63 = vpack.c.bf16 %v3567_v28, %v3565_v3 }
 0x36e   : > { %v2693_v51 = vadd.f32 %v2692_v21, %v10792_v42  ;;  %v2694_v58 = vpop.f32.mrb[97].mxu0  ;;  %v3670_v26 = vpack.c.bf16 %v3568_v40, %v3566_v0  ;;  %v9442_v21 = vld [vmem:[#allocation2 + $0x3e0] ss:$8 sps:$4 sm:$0xff]   ;;  %v9444_v0 = vld [vmem:[#allocation2 + $0x3e4] ss:$8 sps:$4 sm:$0xff]  }
 0x36f   : > { %v2695_v44 = vadd.f32 %v2694_v58, %v10801_v53  ;;  %v2696_v16 = vpop.f32.mrb[98].mxu0  ;;  %4033 = vmatmul.mubr.bf16.gmra.mrb[164].mxu0 %v11901_v25  ;;  %v9436_v25 = vld [vmem:[#allocation2 + $0x3c0] ss:$8 sps:$4 sm:$0xff]  }
 0x370   : > { %v2697_v15 = vadd.f32 %v2696_v16, %v10792_v42  ;;  %v2698_v13 = vpop.f32.mrb[99].mxu0  ;;  %4042 = vmatprep.mubr.bf16.mxu0 %v11922_v5  ;;  %v2867_v57 = vmax.f32 %v2693_v51, 0.0  ;;  %v9438_v5 = vld [vmem:[#allocation2 + $0x3c4] ss:$8 sps:$4 sm:$0xff]   ;;  %v9445_v16 = vld [vmem:[#allocation2 + $0x3f0] ss:$8 sps:$4 sm:$0xff]  }
 0x371   : > { %v2699_v56 = vadd.f32 %v2698_v13, %v10801_v53  ;;  %v2868_v27 = vmax.f32 %v2695_v44, 0.0  ;;  %4680 = vmatprep.subr.bf16.mxu1 %v9438_v5 }
 0x372   : > { %v2869_v41 = vmax.f32 %v2697_v15, 0.0  ;;  %4681 = vmatpush1.bf16.msra.mxu1 %v9436_v25  ;;  %v9447_v15 = vld [vmem:[#allocation2 + $0x3f4] ss:$8 sps:$4 sm:$0xff]  }
 0x373   : > { %v2870_v45 = vmax.f32 %v2699_v56, 0.0  ;;  %4682 = vmatprep.subr.bf16.mxu1 %v9441_v54 }
 0x374   : > { %v2947_v18 = vpack.c.bf16 %v2869_v41, %v2867_v57 }
 0x375   : > { %v2948_v20 = vpack.c.bf16 %v2870_v45, %v2868_v27 }
 0x377   : > { %3436 = vmatprep.mubr.bf16.mxu1 %v2948_v20  ;;  %4043 = vmatmul.mubr.bf16.gmra.mrb[168].mxu0 %v11919_v23  ;;  %v9439_v23 = vld [vmem:[#allocation2 + $0x3d0] ss:$8 sps:$4 sm:$0xff]  }
 0x378   : > { %3437 = vmatmul.mubr.bf16.gmra.mrb[96].mxu1 %v2947_v18  ;;  %4052 = vmatprep.mubr.bf16.mxu0 %v11938_v11 }
 0x379   : > { %4683 = vmatpush1.bf16.msra.mxu1 %v9439_v23 }
 0x37a   : > { %v3328_v62 = vpop.f32.mrb[52].mxu1  ;;  %4684 = vmatprep.subr.bf16.mxu1 %v9444_v0 }
 0x37b   : > { %v3329_v37 = vadd.f32 %v3328_v62, %v11461_v7  ;;  %v3330_v38 = vpop.f32.mrb[53].mxu1 }
 0x37c   : > { %v3331_v24 = vadd.f32 %v3330_v38, %v11467_v48  ;;  %v3332_v36 = vpop.f32.mrb[54].mxu1 }
 0x37d   : > { %v3333_v10 = vadd.f32 %v3332_v36, %v11461_v7  ;;  %v3334_v19 = vpop.f32.mrb[55].mxu1  ;;  %v3569_v11 = vmax.f32 %v3329_v37, 0.0  ;;  %4685 = vmatpush1.bf16.msra.mxu1 %v9442_v21 }
 0x37e   : > { %v3335_v9 = vadd.f32 %v3334_v19, %v11467_v48  ;;  %v3570_v33 = vmax.f32 %v3331_v24, 0.0  ;;  %4686 = vmatprep.subr.bf16.mxu1 %v9447_v15 }
 0x37f   : > { %v3571_v31 = vmax.f32 %v3333_v10, 0.0  ;;  %4053 = vmatmul.mubr.bf16.gmra.mrb[172].mxu0 %v11935_v34 }
 0x380   : > { %v3572_v39 = vmax.f32 %v3335_v9, 0.0  ;;  %v2702_v22 = vpop.f32.mrb[100].mxu0  ;;  %4062 = vmatprep.mubr.bf16.mxu0 %v3670_v26 }
 0x381   : > { %v2703_v29 = vadd.f32 %v2702_v22, %v10792_v42  ;;  %v2704_v55 = vpop.f32.mrb[101].mxu0  ;;  %v3671_v4 = vpack.c.bf16 %v3571_v31, %v3569_v11  ;;  %4687 = vmatpush1.bf16.msra.mxu1 %v9445_v16 }
 0x382   : > { %v2705_v30 = vadd.f32 %v2704_v55, %v10801_v53  ;;  %v2706_v3 = vpop.f32.mrb[102].mxu0  ;;  %v3672_v28 = vpack.c.bf16 %v3572_v39, %v3570_v33 }
 0x383   : > { %v2707_v40 = vadd.f32 %v2706_v3, %v10792_v42  ;;  %v2708_v51 = vpop.f32.mrb[103].mxu0  ;;  %v2871_v34 = vmax.f32 %v2703_v29, 0.0 }
 0x384   : > { %v2709_v58 = vadd.f32 %v2708_v51, %v10801_v53  ;;  %v2872_v13 = vmax.f32 %v2705_v30, 0.0 }
 0x385   : > { %v2873_v44 = vmax.f32 %v2707_v40, 0.0 }
 0x386   : > { %v2874_v26 = vmax.f32 %v2709_v58, 0.0 }
 0x387   : > { %v2949_v56 = vpack.c.bf16 %v2873_v44, %v2871_v34  ;;  %4063 = vmatmul.mubr.bf16.gmra.mrb[176].mxu0 %v11952_v63 }
 0x388   : > { %v2950_v32 = vpack.c.bf16 %v2874_v26, %v2872_v13  ;;  %4072 = vmatprep.mubr.bf16.mxu0 %v3672_v28 }
 0x38a   : > { %3446 = vmatprep.mubr.bf16.mxu1 %v2950_v32 }
 0x38b   : > { %3447 = vmatmul.mubr.bf16.gmra.mrb[100].mxu1 %v2949_v56 }
 0x38e   : > { %v3338_v61 = vpop.f32.mrb[56].mxu1 }
 0x38f   : > { %v3339_v57 = vadd.f32 %v3338_v61, %v11461_v7  ;;  %v3340_v41 = vpop.f32.mrb[57].mxu1  ;;  %4073 = vmatmul.mubr.bf16.gmra.mrb[180].mxu0 %v3671_v4 }
 0x390   : > { %v3341_v27 = vadd.f32 %v3340_v41, %v11467_v48  ;;  %v3342_v45 = vpop.f32.mrb[58].mxu1 }
 0x391   : > { %v3343_v17 = vadd.f32 %v3342_v45, %v11461_v7  ;;  %v3344_v18 = vpop.f32.mrb[59].mxu1  ;;  %v3573_v35 = vmax.f32 %v3339_v57, 0.0 }
 0x392   : > { %v3345_v20 = vadd.f32 %v3344_v18, %v11467_v48  ;;  %v3574_v25 = vmax.f32 %v3341_v27, 0.0 }
 0x393   : > { %v3575_v63 = vmax.f32 %v3343_v17, 0.0 }
 0x394   : > { %v3576_v5 = vmax.f32 %v3345_v20, 0.0  ;;  %v2712_v62 = vpop.f32.mrb[104].mxu0 }
 0x395   : > { %v2713_v54 = vadd.f32 %v2712_v62, %v10792_v42  ;;  %v2714_v37 = vpop.f32.mrb[105].mxu0  ;;  %v3673_v38 = vpack.c.bf16 %v3575_v63, %v3573_v35 }
 0x396   : > { %v2715_v24 = vadd.f32 %v2714_v37, %v10801_v53  ;;  %v2716_v36 = vpop.f32.mrb[106].mxu0  ;;  %v3674_v10 = vpack.c.bf16 %v3576_v5, %v3574_v25 }
 0x397   : > { %v2717_v19 = vadd.f32 %v2716_v36, %v10792_v42  ;;  %v2718_v23 = vpop.f32.mrb[107].mxu0  ;;  %v2875_v11 = vmax.f32 %v2713_v54, 0.0 }
 0x398   : > { %v2719_v9 = vadd.f32 %v2718_v23, %v10801_v53  ;;  %4082 = vmatprep.mubr.bf16.mxu0 %v3674_v10  ;;  %v2876_v33 = vmax.f32 %v2715_v24, 0.0 }
 0x399   : > { %v2877_v31 = vmax.f32 %v2717_v19, 0.0  ;;  %4083 = vmatmul.mubr.bf16.gmra.mrb[184].mxu0 %v3673_v38 }
 0x39a   : > { %v2878_v39 = vmax.f32 %v2719_v9, 0.0 }
 0x39b   : > { %v2951_v22 = vpack.c.bf16 %v2877_v31, %v2875_v11 }
 0x39c   : > { %v2952_v29 = vpack.c.bf16 %v2878_v39, %v2876_v33 }
 0x39e   : > { %3456 = vmatprep.mubr.bf16.mxu1 %v2952_v29 }
 0x39f   : > { %3457 = vmatmul.mubr.bf16.gmra.mrb[104].mxu1 %v2951_v22 }
 0x3a0   : > { %v3348_v55 = vpop.f32.mrb[60].mxu1 }
 0x3a1   : > { %v3349_v4 = vadd.f32 %v3348_v55, %v11461_v7  ;;  %v3350_v30 = vpop.f32.mrb[61].mxu1 }
 0x3a2   : > { %v3351_v3 = vadd.f32 %v3350_v30, %v11467_v48  ;;  %v3352_v28 = vpop.f32.mrb[62].mxu1 }
 0x3a3   : > { %v3353_v21 = vadd.f32 %v3352_v28, %v11461_v7  ;;  %v3354_v0 = vpop.f32.mrb[63].mxu1  ;;  %v3577_v51 = vmax.f32 %v3349_v4, 0.0 }
 0x3a4   : > { %v3355_v40 = vadd.f32 %v3354_v0, %v11467_v48  ;;  %v3578_v34 = vmax.f32 %v3351_v3, 0.0 }
 0x3a5   : > { %v3579_v58 = vmax.f32 %v3353_v21, 0.0 }
 0x3a6   : > { %v3580_v44 = vmax.f32 %v3355_v40, 0.0 }
 0x3a7   : > { %v2722_v16 = vpop.f32.mrb[108].mxu0  ;;  %v3675_v15 = vpack.c.bf16 %v3579_v58, %v3577_v51 }
 0x3a8   : > { %v2723_v13 = vadd.f32 %v2722_v16, %v10792_v42  ;;  %v2724_v26 = vpop.f32.mrb[109].mxu0  ;;  %v3676_v56 = vpack.c.bf16 %v3580_v44, %v3578_v34 }
 0x3a9   : > { %v2725_v32 = vadd.f32 %v2724_v26, %v10801_v53  ;;  %v2726_v61 = vpop.f32.mrb[110].mxu0 }
 0x3aa   : > { %v2727_v57 = vadd.f32 %v2726_v61, %v10792_v42  ;;  %v2728_v41 = vpop.f32.mrb[111].mxu0  ;;  %4092 = vmatprep.mubr.bf16.mxu0 %v3676_v56  ;;  %v2879_v45 = vmax.f32 %v2723_v13, 0.0 }
 0x3ab   : > { %v2729_v27 = vadd.f32 %v2728_v41, %v10801_v53  ;;  %4093 = vmatmul.mubr.bf16.gmra.mrb[188].mxu0 %v3675_v15  ;;  %v2880_v18 = vmax.f32 %v2725_v32, 0.0 }
 0x3ac   : > { %v2881_v17 = vmax.f32 %v2727_v57, 0.0 }
 0x3ad   : > { %v2882_v20 = vmax.f32 %v2729_v27, 0.0 }
 0x3ae   : > { %v2953_v35 = vpack.c.bf16 %v2881_v17, %v2879_v45 }
 0x3af   : > { %v2954_v63 = vpack.c.bf16 %v2882_v20, %v2880_v18 }
 0x3b1   : > { %3466 = vmatprep.mubr.bf16.mxu1 %v2954_v63 }
 0x3b2   : > { %3467 = vmatmul.mubr.bf16.gmra.mrb[108].mxu1 %v2953_v35  ;;  %v3358_v25 = vpop.f32.mrb[64].mxu1 }
 0x3b3   : > { %v3359_v5 = vadd.f32 %v3358_v25, %v11461_v7  ;;  %v3360_v62 = vpop.f32.mrb[65].mxu1 }
 0x3b4   : > { %v3361_v54 = vadd.f32 %v3360_v62, %v11467_v48  ;;  %v3362_v37 = vpop.f32.mrb[66].mxu1 }
 0x3b5   : > { %v3363_v38 = vadd.f32 %v3362_v37, %v11461_v7  ;;  %v3364_v24 = vpop.f32.mrb[67].mxu1  ;;  %v3581_v10 = vmax.f32 %v3359_v5, 0.0 }
 0x3b6   : > { %v3365_v36 = vadd.f32 %v3364_v24, %v11467_v48  ;;  %v3582_v23 = vmax.f32 %v3361_v54, 0.0 }
 0x3b7   : > { %v3583_v19 = vmax.f32 %v3363_v38, 0.0 }
 0x3b8   : > { %v3584_v9 = vmax.f32 %v3365_v36, 0.0 }
 0x3b9   : > { %v2732_v11 = vpop.f32.mrb[112].mxu0  ;;  %v3677_v31 = vpack.c.bf16 %v3583_v19, %v3581_v10 }
 0x3ba   : > { %v2733_v33 = vadd.f32 %v2732_v11, %v10792_v42  ;;  %v2734_v39 = vpop.f32.mrb[113].mxu0  ;;  %v3678_v22 = vpack.c.bf16 %v3584_v9, %v3582_v23 }
 0x3bb   : > { %v2735_v29 = vadd.f32 %v2734_v39, %v10801_v53  ;;  %v2736_v55 = vpop.f32.mrb[114].mxu0 }
 0x3bc   : > { %v2737_v4 = vadd.f32 %v2736_v55, %v10792_v42  ;;  %v2738_v30 = vpop.f32.mrb[115].mxu0  ;;  %4102 = vmatprep.mubr.bf16.mxu0 %v3678_v22  ;;  %v2883_v28 = vmax.f32 %v2733_v33, 0.0 }
 0x3bd   : > { %v2739_v3 = vadd.f32 %v2738_v30, %v10801_v53  ;;  %4103 = vmatmul.mubr.bf16.gmra.mrb[192].mxu0 %v3677_v31  ;;  %v2884_v0 = vmax.f32 %v2735_v29, 0.0 }
 0x3be   : > { %v2885_v21 = vmax.f32 %v2737_v4, 0.0 }
 0x3bf   : > { %v2886_v40 = vmax.f32 %v2739_v3, 0.0 }
 0x3c0   : > { %v2955_v51 = vpack.c.bf16 %v2885_v21, %v2883_v28 }
 0x3c1   : > { %v2956_v58 = vpack.c.bf16 %v2886_v40, %v2884_v0 }
 0x3c3   : > { %3476 = vmatprep.mubr.bf16.mxu1 %v2956_v58 }
 0x3c4   : > { %3477 = vmatmul.mubr.bf16.gmra.mrb[112].mxu1 %v2955_v51 }
 0x3c5   : > { %v3368_v34 = vpop.f32.mrb[68].mxu1 }
 0x3c6   : > { %v3369_v44 = vadd.f32 %v3368_v34, %v11461_v7  ;;  %v3370_v16 = vpop.f32.mrb[69].mxu1 }
 0x3c7   : > { %v3371_v15 = vadd.f32 %v3370_v16, %v11467_v48  ;;  %v3372_v13 = vpop.f32.mrb[70].mxu1 }
 0x3c8   : > { %v3373_v26 = vadd.f32 %v3372_v13, %v11461_v7  ;;  %v3374_v56 = vpop.f32.mrb[71].mxu1  ;;  %v3585_v61 = vmax.f32 %v3369_v44, 0.0 }
 0x3c9   : > { %v3375_v32 = vadd.f32 %v3374_v56, %v11467_v48  ;;  %v3586_v41 = vmax.f32 %v3371_v15, 0.0 }
 0x3ca   : > { %v3587_v57 = vmax.f32 %v3373_v26, 0.0 }
 0x3cb   : > { %v3588_v27 = vmax.f32 %v3375_v32, 0.0 }
 0x3cc   : > { %v2742_v45 = vpop.f32.mrb[116].mxu0  ;;  %v3679_v17 = vpack.c.bf16 %v3587_v57, %v3585_v61 }
 0x3cd   : > { %v2743_v18 = vadd.f32 %v2742_v45, %v10792_v42  ;;  %v2744_v20 = vpop.f32.mrb[117].mxu0  ;;  %v3680_v35 = vpack.c.bf16 %v3588_v27, %v3586_v41 }
 0x3ce   : > { %v2745_v63 = vadd.f32 %v2744_v20, %v10801_v53  ;;  %v2746_v25 = vpop.f32.mrb[118].mxu0 }
 0x3cf   : > { %v2747_v5 = vadd.f32 %v2746_v25, %v10792_v42  ;;  %v2748_v62 = vpop.f32.mrb[119].mxu0  ;;  %4112 = vmatprep.mubr.bf16.mxu0 %v3680_v35  ;;  %v2887_v37 = vmax.f32 %v2743_v18, 0.0 }
 0x3d0   : > { %v2749_v54 = vadd.f32 %v2748_v62, %v10801_v53  ;;  %4113 = vmatmul.mubr.bf16.gmra.mrb[196].mxu0 %v3679_v17  ;;  %v2888_v24 = vmax.f32 %v2745_v63, 0.0 }
 0x3d1   : > { %v2889_v38 = vmax.f32 %v2747_v5, 0.0 }
 0x3d2   : > { %v2890_v36 = vmax.f32 %v2749_v54, 0.0 }
 0x3d3   : > { %v2957_v10 = vpack.c.bf16 %v2889_v38, %v2887_v37 }
 0x3d4   : > { %v2958_v19 = vpack.c.bf16 %v2890_v36, %v2888_v24 }
 0x3d6   : > { %3486 = vmatprep.mubr.bf16.mxu1 %v2958_v19 }
 0x3d7   : > { %3487 = vmatmul.mubr.bf16.gmra.mrb[116].mxu1 %v2957_v10  ;;  %v14278_v10 = vld [vmem:[#allocation15_spill] sm:$0xff] }
 0x3d8   : > { %v3378_v23 = vpop.f32.mrb[72].mxu1  ;;  %v3744_v19 = vsub.s32 3, %v14278_v10 }
 0x3d9   : > { %v3379_v9 = vadd.f32 %v3378_v23, %v11461_v7  ;;  %v3380_v11 = vpop.f32.mrb[73].mxu1 }
 0x3da   : > { %v3381_v31 = vadd.f32 %v3380_v11, %v11467_v48  ;;  %v3382_v33 = vpop.f32.mrb[74].mxu1 }
 0x3db   : > { %v3383_v39 = vadd.f32 %v3382_v33, %v11461_v7  ;;  %v3384_v22 = vpop.f32.mrb[75].mxu1  ;;  %v3589_v55 = vmax.f32 %v3379_v9, 0.0 }
 0x3dc   : > { %v3385_v29 = vadd.f32 %v3384_v22, %v11467_v48  ;;  %v3590_v30 = vmax.f32 %v3381_v31, 0.0 }
 0x3dd   : > { %v3591_v4 = vmax.f32 %v3383_v39, 0.0 }
 0x3de   : > { %v3592_v3 = vmax.f32 %v3385_v29, 0.0 }
 0x3df   : > { %v2752_v28 = vpop.f32.mrb[120].mxu0  ;;  %v3681_v21 = vpack.c.bf16 %v3591_v4, %v3589_v55  ;;  %v9628_v55 = vld [vmem:[%s13831_s4] sm:$0xff] }
 0x3e0   : > { %v2753_v0 = vadd.f32 %v2752_v28, %v10792_v42  ;;  %v2754_v40 = vpop.f32.mrb[121].mxu0  ;;  %v3682_v51 = vpack.c.bf16 %v3592_v3, %v3590_v30  ;;  %v12022_v4 = vrot.slane %v9628_v55, %v3744_v19  ;;  %v9629_v28 = vld [vmem:[%s13831_s4 + $0x8] sm:$0xff] }
 0x3e1   : > { %v2755_v58 = vadd.f32 %v2754_v40, %v10801_v53  ;;  %v2756_v34 = vpop.f32.mrb[122].mxu0 }
 0x3e2   : > { %v2757_v44 = vadd.f32 %v2756_v34, %v10792_v42  ;;  %v2758_v16 = vpop.f32.mrb[123].mxu0  ;;  %4122 = vmatprep.mubr.bf16.mxu0 %v3682_v51  ;;  %v2891_v13 = vmax.f32 %v2753_v0, 0.0 }
 0x3e3   : > { %v2759_v15 = vadd.f32 %v2758_v16, %v10801_v53  ;;  %4123 = vmatmul.mubr.bf16.gmra.mrb[200].mxu0 %v3681_v21  ;;  %v2892_v56 = vmax.f32 %v2755_v58, 0.0 }
 0x3e4   : > { %v2893_v26 = vmax.f32 %v2757_v44, 0.0 }
 0x3e5   : > { %v2894_v32 = vmax.f32 %v2759_v15, 0.0 }
 0x3e6   : > { %v2959_v61 = vpack.c.bf16 %v2893_v26, %v2891_v13 }
 0x3e7   : > { %v2960_v57 = vpack.c.bf16 %v2894_v32, %v2892_v56 }
 0x3e9   : > { %3496 = vmatprep.mubr.bf16.mxu1 %v2960_v57 }
 0x3ea   : > { %3497 = vmatmul.mubr.bf16.gmra.mrb[120].mxu1 %v2959_v61 }
 0x3ec   : > { %v3388_v41 = vpop.f32.mrb[76].mxu1 }
 0x3ed   : > { %v3389_v27 = vadd.f32 %v3388_v41, %v11461_v7  ;;  %v3390_v45 = vpop.f32.mrb[77].mxu1 }
 0x3ee   : > { %v3391_v17 = vadd.f32 %v3390_v45, %v11467_v48  ;;  %v3392_v18 = vpop.f32.mrb[78].mxu1 }
 0x3ef   : > { %v3393_v20 = vadd.f32 %v3392_v18, %v11461_v7  ;;  %v3394_v35 = vpop.f32.mrb[79].mxu1  ;;  %v3593_v25 = vmax.f32 %v3389_v27, 0.0 }
 0x3f0   : > { %v3395_v63 = vadd.f32 %v3394_v35, %v11467_v48  ;;  %v3594_v62 = vmax.f32 %v3391_v17, 0.0 }
 0x3f1   : > { %v3595_v5 = vmax.f32 %v3393_v20, 0.0 }
 0x3f2   : > { %v3596_v54 = vmax.f32 %v3395_v63, 0.0  ;;  %v2762_v37 = vpop.f32.mrb[124].mxu0 }
 0x3f3   : > { %v2763_v38 = vadd.f32 %v2762_v37, %v10792_v42  ;;  %v2764_v24 = vpop.f32.mrb[125].mxu0  ;;  %v3683_v36 = vpack.c.bf16 %v3595_v5, %v3593_v25 }
 0x3f4   : > { %v2765_v23 = vadd.f32 %v2764_v24, %v10801_v53  ;;  %v2766_v9 = vpop.f32.mrb[126].mxu0  ;;  %v3684_v11 = vpack.c.bf16 %v3596_v54, %v3594_v62 }
 0x3f5   : > { %v2767_v31 = vadd.f32 %v2766_v9, %v10792_v42  ;;  %v2768_v33 = vpop.f32.mrb[127].mxu0  ;;  %v2895_v22 = vmax.f32 %v2763_v38, 0.0  ;;  %v12027_v42 = vrot.slane %v9629_v28, %v3744_v19 }
 0x3f6   : > { %v2769_v39 = vadd.f32 %v2768_v33, %v10801_v53  ;;  %4132 = vmatprep.mubr.bf16.mxu0 %v3684_v11  ;;  %v2896_v30 = vmax.f32 %v2765_v23, 0.0 }
 0x3f7   : > { %v2897_v29 = vmax.f32 %v2767_v31, 0.0  ;;  %4133 = vmatmul.mubr.bf16.gmra.mrb[204].mxu0 %v3683_v36 }
 0x3f8   : > { %v2898_v3 = vmax.f32 %v2769_v39, 0.0 }
 0x3f9   : > { %v2961_v21 = vpack.c.bf16 %v2897_v29, %v2895_v22 }
 0x3fa   : > { %v3944_v53 = vpop.f32.mrb[128].mxu0  ;;  %v2962_v0 = vpack.c.bf16 %v2898_v3, %v2896_v30 }
 0x3fb   : > { %v3945_v40 = vadd.f32 %v3944_v53, %v12022_v4  ;;  %v3946_v51 = vpop.f32.mrb[129].mxu0 }
 0x3fc   : > { %v3947_v58 = vadd.f32 %v3946_v51, %v12027_v42  ;;  %3506 = vmatprep.mubr.bf16.mxu1 %v2962_v0  ;;  %v3948_v34 = vpop.f32.mrb[130].mxu0 }
 0x3fd   : > { %v3949_v44 = vadd.f32 %v3948_v34, %v12022_v4  ;;  %3507 = vmatmul.mubr.bf16.gmra.mrb[124].mxu1 %v2961_v21  ;;  %v3950_v16 = vpop.f32.mrb[131].mxu0  ;;  %v4263_v13 = vmax.f32 %v3945_v40, 0.0 }
 0x3fe   : > { %v3951_v15 = vadd.f32 %v3950_v16, %v12027_v42  ;;  %v4264_v32 = vmax.f32 %v3947_v58, 0.0 }
 0x3ff   : > { %v4265_v26 = vmax.f32 %v3949_v44, 0.0  ;;  %v3398_v56 = vpop.f32.mrb[80].mxu1 }
 0x400   : > { %v4266_v61 = vmax.f32 %v3951_v15, 0.0  ;;  %v3399_v57 = vadd.f32 %v3398_v56, %v11461_v7  ;;  %v3400_v41 = vpop.f32.mrb[81].mxu1 }
 0x401   : > { %v4391_v27 = vpack.c.bf16 %v4265_v26, %v4263_v13  ;;  %v3401_v45 = vadd.f32 %v3400_v41, %v11467_v48  ;;  %v3402_v17 = vpop.f32.mrb[82].mxu1 }
 0x402   : > { %v3403_v18 = vadd.f32 %v3402_v17, %v11461_v7  ;;  %v3404_v20 = vpop.f32.mrb[83].mxu1  ;;  %v3954_v35 = vpop.f32.mrb[132].mxu0  ;;  %v4392_v63 = vpack.c.bf16 %v4266_v61, %v4264_v32  ;;  %v3597_v54 = vmax.f32 %v3399_v57, 0.0 }
 0x403   : > { %v3405_v25 = vadd.f32 %v3404_v20, %v11467_v48  ;;  %v3955_v5 = vadd.f32 %v3954_v35, %v12022_v4  ;;  %v3956_v62 = vpop.f32.mrb[133].mxu0  ;;  %v3598_v36 = vmax.f32 %v3401_v45, 0.0 }
 0x404   : > { %v3599_v37 = vmax.f32 %v3403_v18, 0.0  ;;  %v3957_v38 = vadd.f32 %v3956_v62, %v12027_v42  ;;  %v3958_v24 = vpop.f32.mrb[134].mxu0  ;;  %4688 = vmatprep.mubr.bf16.mxu1 %v4392_v63 }
 0x405   : > { %v3600_v19 = vmax.f32 %v3405_v25, 0.0  ;;  %v3959_v23 = vadd.f32 %v3958_v24, %v12022_v4  ;;  %v3960_v9 = vpop.f32.mrb[135].mxu0  ;;  %4689 = vmatmul.mubr.bf16.vlgmr.msra.gmra.mrb[128].mxu1 %v4391_v27  ;;  %v4267_v33 = vmax.f32 %v3955_v5, 0.0 }
 0x406   : > { %v3961_v11 = vadd.f32 %v3960_v9, %v12027_v42  ;;  %v3685_v31 = vpack.c.bf16 %v3599_v37, %v3597_v54  ;;  %v4268_v29 = vmax.f32 %v3957_v38, 0.0 }
 0x407   : > { %v4269_v39 = vmax.f32 %v3959_v23, 0.0  ;;  %v3686_v22 = vpack.c.bf16 %v3600_v19, %v3598_v36 }
 0x408   : > { %v4270_v55 = vmax.f32 %v3961_v11, 0.0 }
 0x409   : > { %4142 = vmatprep.mubr.bf16.mxu0 %v3686_v22  ;;  %v4393_v30 = vpack.c.bf16 %v4269_v39, %v4267_v33 }
 0x40a   : > { %v3964_v3 = vpop.f32.mrb[136].mxu0  ;;  %4143 = vmatmul.mubr.bf16.gmra.mrb[208].mxu0 %v3685_v31  ;;  %v4394_v28 = vpack.c.bf16 %v4270_v55, %v4268_v29 }
 0x40b   : > { %v3965_v21 = vadd.f32 %v3964_v3, %v12022_v4  ;;  %v3966_v53 = vpop.f32.mrb[137].mxu0 }
 0x40c   : > { %v3967_v0 = vadd.f32 %v3966_v53, %v12027_v42  ;;  %v3968_v40 = vpop.f32.mrb[138].mxu0  ;;  %4698 = vmatprep.mubr.bf16.mxu1 %v4394_v28 }
 0x40d   : > { %v3969_v51 = vadd.f32 %v3968_v40, %v12022_v4  ;;  %v3970_v58 = vpop.f32.mrb[139].mxu0  ;;  %4699 = vmatmul.mubr.bf16.gmra.mrb[132].mxu1 %v4393_v30  ;;  %v4271_v44 = vmax.f32 %v3965_v21, 0.0  ;;  %v9448_v40 = vld [vmem:[#allocation2 + $0x400] ss:$8 sps:$4 sm:$0xff]  }
 0x40e   : > { %v3971_v34 = vadd.f32 %v3970_v58, %v12027_v42  ;;  %v4272_v15 = vmax.f32 %v3967_v0, 0.0 }
 0x40f   : > { %v4273_v16 = vmax.f32 %v3969_v51, 0.0  ;;  %v9450_v51 = vld [vmem:[#allocation2 + $0x404] ss:$8 sps:$4 sm:$0xff]  }
 0x410   : > { %v4274_v13 = vmax.f32 %v3971_v34, 0.0  ;;  %6090 = vmatprep.subr.bf16.mxu0 %v9450_v51 }
 0x411   : > { %v4395_v26 = vpack.c.bf16 %v4273_v16, %v4271_v44  ;;  %6091 = vmatpush1.bf16.msra.mxu0 %v9448_v40 }
 0x412   : > { %v3974_v32 = vpop.f32.mrb[140].mxu0  ;;  %v4396_v61 = vpack.c.bf16 %v4274_v13, %v4272_v15 }
 0x413   : > { %v3408_v56 = vpop.f32.mrb[84].mxu1  ;;  %v3975_v41 = vadd.f32 %v3974_v32, %v12022_v4  ;;  %v3976_v45 = vpop.f32.mrb[141].mxu0 }
 0x414   : > { %v3409_v57 = vadd.f32 %v3408_v56, %v11461_v7  ;;  %v3410_v27 = vpop.f32.mrb[85].mxu1  ;;  %v3977_v18 = vadd.f32 %v3976_v45, %v12027_v42  ;;  %v3978_v35 = vpop.f32.mrb[142].mxu0  ;;  %4708 = vmatprep.mubr.bf16.mxu1 %v4396_v61 }
 0x415   : > { %v3411_v17 = vadd.f32 %v3410_v27, %v11467_v48  ;;  %v3412_v20 = vpop.f32.mrb[86].mxu1  ;;  %v3979_v25 = vadd.f32 %v3978_v35, %v12022_v4  ;;  %v3980_v62 = vpop.f32.mrb[143].mxu0  ;;  %4709 = vmatmul.mubr.bf16.gmra.mrb[136].mxu1 %v4395_v26  ;;  %v4275_v24 = vmax.f32 %v3975_v41, 0.0 }
 0x416   : > { %v3413_v63 = vadd.f32 %v3412_v20, %v11461_v7  ;;  %v3414_v5 = vpop.f32.mrb[87].mxu1  ;;  %v3981_v37 = vadd.f32 %v3980_v62, %v12027_v42  ;;  %v3601_v38 = vmax.f32 %v3409_v57, 0.0  ;;  %v4276_v9 = vmax.f32 %v3977_v18, 0.0 }
 0x417   : > { %v3415_v54 = vadd.f32 %v3414_v5, %v11467_v48  ;;  %v4277_v19 = vmax.f32 %v3979_v25, 0.0  ;;  %v3602_v23 = vmax.f32 %v3411_v17, 0.0 }
 0x418   : > { %v3603_v36 = vmax.f32 %v3413_v63, 0.0  ;;  %v4278_v31 = vmax.f32 %v3981_v37, 0.0 }
 0x419   : > { %v3604_v11 = vmax.f32 %v3415_v54, 0.0  ;;  %v4397_v39 = vpack.c.bf16 %v4277_v19, %v4275_v24 }
 0x41a   : > { %v3687_v33 = vpack.c.bf16 %v3603_v36, %v3601_v38  ;;  %v3984_v22 = vpop.f32.mrb[144].mxu0  ;;  %v4398_v55 = vpack.c.bf16 %v4278_v31, %v4276_v9  ;;  %v9453_v9 = vld [vmem:[#allocation2 + $0x414] ss:$8 sps:$4 sm:$0xff]  }
 0x41b   : > { %v3688_v29 = vpack.c.bf16 %v3604_v11, %v3602_v23  ;;  %v3985_v30 = vadd.f32 %v3984_v22, %v12022_v4  ;;  %v3986_v3 = vpop.f32.mrb[145].mxu0  ;;  %v9451_v23 = vld [vmem:[#allocation2 + $0x410] ss:$8 sps:$4 sm:$0xff]   ;;  %6092 = vmatprep.subr.bf16.mxu0 %v9453_v9  ;;  %v9465_v9 = vld [vmem:[#allocation2 + $0x454] ss:$8 sps:$4 sm:$0xff]  }
 0x41c   : > { %v3987_v28 = vadd.f32 %v3986_v3, %v12027_v42  ;;  %v3988_v21 = vpop.f32.mrb[146].mxu0  ;;  %4718 = vmatprep.mubr.bf16.mxu1 %v4398_v55  ;;  %6093 = vmatpush1.bf16.msra.mxu0 %v9451_v23  ;;  %v9463_v23 = vld [vmem:[#allocation2 + $0x450] ss:$8 sps:$4 sm:$0xff]  }
 0x41d   : > { %4152 = vmatprep.mubr.bf16.mxu0 %v3688_v29  ;;  %v3989_v53 = vadd.f32 %v3988_v21, %v12022_v4  ;;  %v3990_v0 = vpop.f32.mrb[147].mxu0  ;;  %4719 = vmatmul.mubr.bf16.gmra.mrb[140].mxu1 %v4397_v39  ;;  %v4279_v34 = vmax.f32 %v3985_v30, 0.0 }
 0x41e   : > { %4153 = vmatmul.mubr.bf16.gmra.mrb[212].mxu0 %v3687_v33  ;;  %v3991_v58 = vadd.f32 %v3990_v0, %v12027_v42  ;;  %v4280_v16 = vmax.f32 %v3987_v28, 0.0 }
 0x41f   : > { %v4281_v44 = vmax.f32 %v3989_v53, 0.0 }
 0x420   : > { %v4282_v15 = vmax.f32 %v3991_v58, 0.0  ;;  %v9454_v58 = vld [vmem:[#allocation2 + $0x420] ss:$8 sps:$4 sm:$0xff]  }
 0x421   : > { %v4399_v13 = vpack.c.bf16 %v4281_v44, %v4279_v34  ;;  %v9456_v34 = vld [vmem:[#allocation2 + $0x424] ss:$8 sps:$4 sm:$0xff]  }
 0x422   : > { %v3994_v26 = vpop.f32.mrb[148].mxu0  ;;  %v4400_v56 = vpack.c.bf16 %v4282_v15, %v4280_v16  ;;  %6094 = vmatprep.subr.bf16.mxu0 %v9456_v34  ;;  %v9466_v34 = vld [vmem:[#allocation2 + $0x460] ss:$8 sps:$4 sm:$0xff]  }
 0x423   : > { %v3995_v32 = vadd.f32 %v3994_v26, %v12022_v4  ;;  %v3996_v61 = vpop.f32.mrb[149].mxu0  ;;  %v9459_v26 = vld [vmem:[#allocation2 + $0x434] ss:$8 sps:$4 sm:$0xff]   ;;  %6095 = vmatpush1.bf16.msra.mxu0 %v9454_v58 }
 0x424   : > { %v3997_v57 = vadd.f32 %v3996_v61, %v12027_v42  ;;  %v3998_v41 = vpop.f32.mrb[150].mxu0  ;;  %4728 = vmatprep.mubr.bf16.mxu1 %v4400_v56  ;;  %6096 = vmatprep.subr.bf16.mxu0 %v9459_v26 }
 0x425   : > { %v3999_v27 = vadd.f32 %v3998_v41, %v12022_v4  ;;  %v4000_v17 = vpop.f32.mrb[151].mxu0  ;;  %4729 = vmatmul.mubr.bf16.gmra.mrb[144].mxu1 %v4399_v13  ;;  %v4283_v63 = vmax.f32 %v3995_v32, 0.0  ;;  %v9457_v32 = vld [vmem:[#allocation2 + $0x430] ss:$8 sps:$4 sm:$0xff]   ;;  %v9462_v41 = vld [vmem:[#allocation2 + $0x444] ss:$8 sps:$4 sm:$0xff]  }
 0x426   : > { %v3418_v45 = vpop.f32.mrb[88].mxu1  ;;  %v4001_v20 = vadd.f32 %v4000_v17, %v12027_v42  ;;  %v4284_v54 = vmax.f32 %v3997_v57, 0.0 }
 0x427   : > { %v3419_v18 = vadd.f32 %v3418_v45, %v11461_v7  ;;  %v3420_v35 = vpop.f32.mrb[89].mxu1  ;;  %v4285_v25 = vmax.f32 %v3999_v27, 0.0  ;;  %6097 = vmatpush1.bf16.msra.mxu0 %v9457_v32 }
 0x428   : > { %v3421_v5 = vadd.f32 %v3420_v35, %v11467_v48  ;;  %v3422_v62 = vpop.f32.mrb[90].mxu1  ;;  %v4286_v37 = vmax.f32 %v4001_v20, 0.0  ;;  %6098 = vmatprep.subr.bf16.mxu0 %v9462_v41 }
 0x429   : > { %v3423_v38 = vadd.f32 %v3422_v62, %v11461_v7  ;;  %v3424_v24 = vpop.f32.mrb[91].mxu1  ;;  %v4401_v19 = vpack.c.bf16 %v4285_v25, %v4283_v63  ;;  %v3605_v11 = vmax.f32 %v3419_v18, 0.0  ;;  %v9460_v63 = vld [vmem:[#allocation2 + $0x440] ss:$8 sps:$4 sm:$0xff]  }
 0x42a   : > { %v3425_v36 = vadd.f32 %v3424_v24, %v11467_v48  ;;  %v4004_v33 = vpop.f32.mrb[152].mxu0  ;;  %v4402_v39 = vpack.c.bf16 %v4286_v37, %v4284_v54  ;;  %v3606_v22 = vmax.f32 %v3421_v5, 0.0 }
 0x42b   : > { %v3607_v31 = vmax.f32 %v3423_v38, 0.0  ;;  %v4005_v55 = vadd.f32 %v4004_v33, %v12022_v4  ;;  %v4006_v30 = vpop.f32.mrb[153].mxu0  ;;  %6099 = vmatpush1.bf16.msra.mxu0 %v9460_v63  ;;  %v9474_v63 = vld [vmem:[#allocation2 + $0x484] ss:$8 sps:$4 sm:$0xff]  }
 0x42c   : > { %v3608_v29 = vmax.f32 %v3425_v36, 0.0  ;;  %v4007_v3 = vadd.f32 %v4006_v30, %v12027_v42  ;;  %v4008_v28 = vpop.f32.mrb[154].mxu0  ;;  %4738 = vmatprep.mubr.bf16.mxu1 %v4402_v39  ;;  %6100 = vmatprep.subr.bf16.mxu0 %v9465_v9 }
 0x42d   : > { %v3689_v21 = vpack.c.bf16 %v3607_v31, %v3605_v11  ;;  %v4009_v53 = vadd.f32 %v4008_v28, %v12022_v4  ;;  %v4010_v0 = vpop.f32.mrb[155].mxu0  ;;  %4739 = vmatmul.mubr.bf16.gmra.mrb[148].mxu1 %v4401_v19  ;;  %v4287_v44 = vmax.f32 %v4005_v55, 0.0 }
 0x42e   : > { %v3690_v40 = vpack.c.bf16 %v3608_v29, %v3606_v22  ;;  %v4011_v51 = vadd.f32 %v4010_v0, %v12027_v42  ;;  %v4288_v15 = vmax.f32 %v4007_v3, 0.0 }
 0x42f   : > { %v4289_v16 = vmax.f32 %v4009_v53, 0.0  ;;  %v9468_v53 = vld [vmem:[#allocation2 + $0x464] ss:$8 sps:$4 sm:$0xff]   ;;  %6101 = vmatpush1.bf16.msra.mxu0 %v9463_v23 }
 0x430   : > { %4162 = vmatprep.mubr.bf16.mxu0 %v3690_v40  ;;  %v4290_v13 = vmax.f32 %v4011_v51, 0.0  ;;  %6102 = vmatprep.subr.bf16.mxu0 %v9468_v53 }
 0x431   : > { %4163 = vmatmul.mubr.bf16.gmra.mrb[216].mxu0 %v3689_v21  ;;  %v4403_v56 = vpack.c.bf16 %v4289_v16, %v4287_v44 }
 0x432   : > { %v4014_v61 = vpop.f32.mrb[156].mxu0  ;;  %v4404_v57 = vpack.c.bf16 %v4290_v13, %v4288_v15 }
 0x433   : > { %v4015_v27 = vadd.f32 %v4014_v61, %v12022_v4  ;;  %v4016_v45 = vpop.f32.mrb[157].mxu0  ;;  %6103 = vmatpush1.bf16.msra.mxu0 %v9466_v34 }
 0x434   : > { %v4017_v17 = vadd.f32 %v4016_v45, %v12027_v42  ;;  %v4018_v18 = vpop.f32.mrb[158].mxu0  ;;  %4748 = vmatprep.mubr.bf16.mxu1 %v4404_v57 }
 0x435   : > { %v4019_v20 = vadd.f32 %v4018_v18, %v12022_v4  ;;  %v4020_v35 = vpop.f32.mrb[159].mxu0  ;;  %4749 = vmatmul.mubr.bf16.gmra.mrb[152].mxu1 %v4403_v56  ;;  %v4291_v5 = vmax.f32 %v4015_v27, 0.0  ;;  %v9471_v18 = vld [vmem:[#allocation2 + $0x474] ss:$8 sps:$4 sm:$0xff]  }
 0x436   : > { %v4021_v25 = vadd.f32 %v4020_v35, %v12027_v42  ;;  %v4292_v54 = vmax.f32 %v4017_v17, 0.0  ;;  %v9469_v17 = vld [vmem:[#allocation2 + $0x470] ss:$8 sps:$4 sm:$0xff]   ;;  %6104 = vmatprep.subr.bf16.mxu0 %v9471_v18 }
 0x437   : > { %v4293_v62 = vmax.f32 %v4019_v20, 0.0  ;;  %6105 = vmatpush1.bf16.msra.mxu0 %v9469_v17  ;;  %v9483_v17 = vld [vmem:[#allocation2 + $0x4b4] ss:$8 sps:$4 sm:$0xff]  }
 0x438   : > { %v4294_v37 = vmax.f32 %v4021_v25, 0.0  ;;  %6106 = vmatprep.subr.bf16.mxu0 %v9474_v63 }
 0x439   : > { %v3428_v38 = vpop.f32.mrb[92].mxu1  ;;  %v4405_v19 = vpack.c.bf16 %v4293_v62, %v4291_v5 }
 0x43a   : > { %v3429_v24 = vadd.f32 %v3428_v38, %v11461_v7  ;;  %v3430_v36 = vpop.f32.mrb[93].mxu1  ;;  %v4024_v33 = vpop.f32.mrb[160].mxu0  ;;  %v4406_v39 = vpack.c.bf16 %v4294_v37, %v4292_v54  ;;  %v9472_v37 = vld [vmem:[#allocation2 + $0x480] ss:$8 sps:$4 sm:$0xff]  }
 0x43b   : > { %v3431_v11 = vadd.f32 %v3430_v36, %v11467_v48  ;;  %v3432_v31 = vpop.f32.mrb[94].mxu1  ;;  %v4025_v29 = vadd.f32 %v4024_v33, %v12022_v4  ;;  %v4026_v30 = vpop.f32.mrb[161].mxu0  ;;  %6107 = vmatpush1.bf16.msra.mxu0 %v9472_v37 }
 0x43c   : > { %v3433_v22 = vadd.f32 %v3432_v31, %v11461_v7  ;;  %v3434_v55 = vpop.f32.mrb[95].mxu1  ;;  %v4027_v28 = vadd.f32 %v4026_v30, %v12027_v42  ;;  %v4028_v21 = vpop.f32.mrb[162].mxu0  ;;  %4758 = vmatprep.mubr.bf16.mxu1 %v4406_v39  ;;  %v3609_v0 = vmax.f32 %v3429_v24, 0.0  ;;  %v9475_v31 = vld [vmem:[#allocation2 + $0x490] ss:$8 sps:$4 sm:$0xff]  }
 0x43d   : > { %v3435_v3 = vadd.f32 %v3434_v55, %v11467_v48  ;;  %v4029_v51 = vadd.f32 %v4028_v21, %v12022_v4  ;;  %v4030_v58 = vpop.f32.mrb[163].mxu0  ;;  %4759 = vmatmul.mubr.bf16.gmra.mrb[156].mxu1 %v4405_v19  ;;  %v3610_v44 = vmax.f32 %v3431_v11, 0.0  ;;  %v4295_v13 = vmax.f32 %v4025_v29, 0.0  ;;  %v9477_v19 = vld [vmem:[#allocation2 + $0x494] ss:$8 sps:$4 sm:$0xff]  }
 0x43e   : > { %v3611_v40 = vmax.f32 %v3433_v22, 0.0  ;;  %v4031_v15 = vadd.f32 %v4030_v58, %v12027_v42  ;;  %v4296_v32 = vmax.f32 %v4027_v28, 0.0  ;;  %6108 = vmatprep.subr.bf16.mxu0 %v9477_v19 }
 0x43f   : > { %v3612_v16 = vmax.f32 %v3435_v3, 0.0  ;;  %v4297_v26 = vmax.f32 %v4029_v51, 0.0  ;;  %6109 = vmatpush1.bf16.msra.mxu0 %v9475_v31 }
 0x440   : > { %v3691_v56 = vpack.c.bf16 %v3611_v40, %v3609_v0  ;;  %v4298_v61 = vmax.f32 %v4031_v15, 0.0  ;;  %v9478_v15 = vld [vmem:[#allocation2 + $0x4a0] ss:$8 sps:$4 sm:$0xff]  }
 0x441   : > { %v3692_v57 = vpack.c.bf16 %v3612_v16, %v3610_v44  ;;  %v4407_v41 = vpack.c.bf16 %v4297_v26, %v4295_v13  ;;  %v9480_v13 = vld [vmem:[#allocation2 + $0x4a4] ss:$8 sps:$4 sm:$0xff]  }
 0x442   : > { %v4034_v27 = vpop.f32.mrb[164].mxu0  ;;  %v4408_v45 = vpack.c.bf16 %v4298_v61, %v4296_v32  ;;  %6110 = vmatprep.subr.bf16.mxu0 %v9480_v13 }
 0x443   : > { %4172 = vmatprep.mubr.bf16.mxu0 %v3692_v57  ;;  %v4035_v20 = vadd.f32 %v4034_v27, %v12022_v4  ;;  %v4036_v35 = vpop.f32.mrb[165].mxu0  ;;  %6111 = vmatpush1.bf16.msra.mxu0 %v9478_v15 }
 0x444   : > { %4173 = vmatmul.mubr.bf16.gmra.mrb[220].mxu0 %v3691_v56  ;;  %v4037_v25 = vadd.f32 %v4036_v35, %v12027_v42  ;;  %v4038_v5 = vpop.f32.mrb[166].mxu0  ;;  %4768 = vmatprep.mubr.bf16.mxu1 %v4408_v45 }
 0x445   : > { %v4039_v62 = vadd.f32 %v4038_v5, %v12022_v4  ;;  %v4040_v54 = vpop.f32.mrb[167].mxu0  ;;  %4769 = vmatmul.mubr.bf16.gmra.mrb[160].mxu1 %v4407_v41  ;;  %v4299_v24 = vmax.f32 %v4035_v20, 0.0  ;;  %v9481_v5 = vld [vmem:[#allocation2 + $0x4b0] ss:$8 sps:$4 sm:$0xff]   ;;  %6112 = vmatprep.subr.bf16.mxu0 %v9483_v17 }
 0x446   : > { %v4041_v38 = vadd.f32 %v4040_v54, %v12027_v42  ;;  %v4300_v23 = vmax.f32 %v4037_v25, 0.0 }
 0x447   : > { %v4301_v36 = vmax.f32 %v4039_v62, 0.0  ;;  %6113 = vmatpush1.bf16.msra.mxu0 %v9481_v5  ;;  %v9493_v5 = vld [vmem:[#allocation2 + $0x4f0] ss:$8 sps:$4 sm:$0xff]  }
 0x448   : > { %v4302_v9 = vmax.f32 %v4041_v38, 0.0 }
 0x449   : > { %v4409_v11 = vpack.c.bf16 %v4301_v36, %v4299_v24 }
 0x44a   : > { %v4044_v33 = vpop.f32.mrb[168].mxu0  ;;  %v4410_v22 = vpack.c.bf16 %v4302_v9, %v4300_v23  ;;  %v9484_v23 = vld [vmem:[#allocation2 + $0x4c0] ss:$8 sps:$4 sm:$0xff]   ;;  %v9486_v9 = vld [vmem:[#allocation2 + $0x4c4] ss:$8 sps:$4 sm:$0xff]  }
 0x44b   : > { %v3438_v39 = vpop.f32.mrb[96].mxu1  ;;  %v4045_v29 = vadd.f32 %v4044_v33, %v12022_v4  ;;  %v4046_v30 = vpop.f32.mrb[169].mxu0  ;;  %v9489_v33 = vld [vmem:[#allocation2 + $0x4d4] ss:$8 sps:$4 sm:$0xff]   ;;  %6114 = vmatprep.subr.bf16.mxu0 %v9486_v9 }
 0x44c   : > { %v3439_v55 = vadd.f32 %v3438_v39, %v11461_v7  ;;  %v3440_v3 = vpop.f32.mrb[97].mxu1  ;;  %v4047_v28 = vadd.f32 %v4046_v30, %v12027_v42  ;;  %v4048_v53 = vpop.f32.mrb[170].mxu0  ;;  %4778 = vmatprep.mubr.bf16.mxu1 %v4410_v22  ;;  %6115 = vmatpush1.bf16.msra.mxu0 %v9484_v23 }
 0x44d   : > { %v3441_v21 = vadd.f32 %v3440_v3, %v11467_v48  ;;  %v3442_v0 = vpop.f32.mrb[98].mxu1  ;;  %v4049_v40 = vadd.f32 %v4048_v53, %v12022_v4  ;;  %v4050_v58 = vpop.f32.mrb[171].mxu0  ;;  %4779 = vmatmul.mubr.bf16.gmra.mrb[164].mxu1 %v4409_v11  ;;  %v4303_v26 = vmax.f32 %v4045_v29, 0.0  ;;  %v9487_v3 = vld [vmem:[#allocation2 + $0x4d0] ss:$8 sps:$4 sm:$0xff]   ;;  %6116 = vmatprep.subr.bf16.mxu0 %v9489_v33 }
 0x44e   : > { %v3443_v51 = vadd.f32 %v3442_v0, %v11461_v7  ;;  %v3444_v34 = vpop.f32.mrb[99].mxu1  ;;  %v4051_v44 = vadd.f32 %v4050_v58, %v12027_v42  ;;  %v3613_v56 = vmax.f32 %v3439_v55, 0.0  ;;  %v4304_v57 = vmax.f32 %v4047_v28, 0.0 }
 0x44f   : > { %v3445_v16 = vadd.f32 %v3444_v34, %v11467_v48  ;;  %v4305_v32 = vmax.f32 %v4049_v40, 0.0  ;;  %v3614_v41 = vmax.f32 %v3441_v21, 0.0 }
 0x450   : > { %v3615_v61 = vmax.f32 %v3443_v51, 0.0  ;;  %v4306_v27 = vmax.f32 %v4051_v44, 0.0  ;;  %6117 = vmatpush1.bf16.msra.mxu0 %v9487_v3 }
 0x451   : > { %v3616_v45 = vmax.f32 %v3445_v16, 0.0  ;;  %v4411_v18 = vpack.c.bf16 %v4305_v32, %v4303_v26  ;;  %v9490_v32 = vld [vmem:[#allocation2 + $0x4e0] ss:$8 sps:$4 sm:$0xff]  }
 0x452   : > { %v3693_v20 = vpack.c.bf16 %v3615_v61, %v3613_v56  ;;  %v4054_v35 = vpop.f32.mrb[172].mxu0  ;;  %v4412_v63 = vpack.c.bf16 %v4306_v27, %v4304_v57  ;;  %v9492_v61 = vld [vmem:[#allocation2 + $0x4e4] ss:$8 sps:$4 sm:$0xff]  }
 0x453   : > { %v3694_v25 = vpack.c.bf16 %v3616_v45, %v3614_v41  ;;  %v4055_v62 = vadd.f32 %v4054_v35, %v12022_v4  ;;  %v4056_v54 = vpop.f32.mrb[173].mxu0  ;;  %6118 = vmatprep.subr.bf16.mxu0 %v9492_v61 }
 0x454   : > { %v4057_v37 = vadd.f32 %v4056_v54, %v12027_v42  ;;  %v4058_v38 = vpop.f32.mrb[174].mxu0  ;;  %4788 = vmatprep.mubr.bf16.mxu1 %v4412_v63  ;;  %6119 = vmatpush1.bf16.msra.mxu0 %v9490_v32 }
 0x455   : > { %4182 = vmatprep.mubr.bf16.mxu0 %v3694_v25  ;;  %v4059_v24 = vadd.f32 %v4058_v38, %v12022_v4  ;;  %v4060_v36 = vpop.f32.mrb[175].mxu0  ;;  %4789 = vmatmul.mubr.bf16.gmra.mrb[168].mxu1 %v4411_v18  ;;  %v4307_v11 = vmax.f32 %v4055_v62, 0.0  ;;  %v9495_v62 = vld [vmem:[#allocation2 + $0x4f4] ss:$8 sps:$4 sm:$0xff]  }
 0x456   : > { %4183 = vmatmul.mubr.bf16.gmra.mrb[224].mxu0 %v3693_v20  ;;  %v4061_v19 = vadd.f32 %v4060_v36, %v12027_v42  ;;  %v4308_v39 = vmax.f32 %v4057_v37, 0.0  ;;  %6120 = vmatprep.subr.bf16.mxu0 %v9495_v62 }
 0x457   : > { %v4309_v31 = vmax.f32 %v4059_v24, 0.0 }
 0x458   : > { %v4310_v22 = vmax.f32 %v4061_v19, 0.0  ;;  %6121 = vmatpush1.bf16.msra.mxu0 %v9493_v5 }
 0x459   : > { %v4413_v29 = vpack.c.bf16 %v4309_v31, %v4307_v11 }
 0x45a   : > { %v4064_v55 = vpop.f32.mrb[176].mxu0  ;;  %v4414_v30 = vpack.c.bf16 %v4310_v22, %v4308_v39 }
 0x45b   : > { %v4065_v28 = vadd.f32 %v4064_v55, %v12022_v4  ;;  %v4066_v21 = vpop.f32.mrb[177].mxu0 }
 0x45c   : > { %v4067_v53 = vadd.f32 %v4066_v21, %v12027_v42  ;;  %v4068_v0 = vpop.f32.mrb[178].mxu0  ;;  %4798 = vmatprep.mubr.bf16.mxu1 %v4414_v30 }
 0x45d   : > { %v4069_v40 = vadd.f32 %v4068_v0, %v12022_v4  ;;  %v4070_v51 = vpop.f32.mrb[179].mxu0  ;;  %4799 = vmatmul.mubr.bf16.gmra.mrb[172].mxu1 %v4413_v29  ;;  %v4311_v34 = vmax.f32 %v4065_v28, 0.0 }
 0x45e   : > { %v3448_v58 = vpop.f32.mrb[100].mxu1  ;;  %v4071_v44 = vadd.f32 %v4070_v51, %v12027_v42  ;;  %v4312_v57 = vmax.f32 %v4067_v53, 0.0 }
 0x45f   : > { %v3449_v16 = vadd.f32 %v3448_v58, %v11461_v7  ;;  %v3450_v15 = vpop.f32.mrb[101].mxu1  ;;  %v4313_v13 = vmax.f32 %v4069_v40, 0.0 }
 0x460   : > { %v3451_v26 = vadd.f32 %v3450_v15, %v11467_v48  ;;  %v3452_v56 = vpop.f32.mrb[102].mxu1  ;;  %v4314_v41 = vmax.f32 %v4071_v44, 0.0 }
 0x461   : > { %v3453_v27 = vadd.f32 %v3452_v56, %v11461_v7  ;;  %v3454_v45 = vpop.f32.mrb[103].mxu1  ;;  %v3617_v17 = vmax.f32 %v3449_v16, 0.0  ;;  %v4415_v20 = vpack.c.bf16 %v4313_v13, %v4311_v34 }
 0x462   : > { %v3455_v18 = vadd.f32 %v3454_v45, %v11467_v48  ;;  %v4074_v63 = vpop.f32.mrb[180].mxu0  ;;  %v4416_v25 = vpack.c.bf16 %v4314_v41, %v4312_v57  ;;  %v3618_v54 = vmax.f32 %v3451_v26, 0.0 }
 0x463   : > { %v3619_v35 = vmax.f32 %v3453_v27, 0.0  ;;  %v4075_v38 = vadd.f32 %v4074_v63, %v12022_v4  ;;  %v4076_v24 = vpop.f32.mrb[181].mxu0 }
 0x464   : > { %v3620_v37 = vmax.f32 %v3455_v18, 0.0  ;;  %v4077_v36 = vadd.f32 %v4076_v24, %v12027_v42  ;;  %v4078_v19 = vpop.f32.mrb[182].mxu0  ;;  %4808 = vmatprep.mubr.bf16.mxu1 %v4416_v25 }
 0x465   : > { %v3695_v23 = vpack.c.bf16 %v3619_v35, %v3617_v17  ;;  %v4079_v9 = vadd.f32 %v4078_v19, %v12022_v4  ;;  %v4080_v11 = vpop.f32.mrb[183].mxu0  ;;  %4809 = vmatmul.mubr.bf16.gmra.mrb[176].mxu1 %v4415_v20  ;;  %v4315_v39 = vmax.f32 %v4075_v38, 0.0 }
 0x466   : > { %v3696_v31 = vpack.c.bf16 %v3620_v37, %v3618_v54  ;;  %v4081_v33 = vadd.f32 %v4080_v11, %v12027_v42  ;;  %v4316_v29 = vmax.f32 %v4077_v36, 0.0 }
 0x467   : > { %v4317_v22 = vmax.f32 %v4079_v9, 0.0 }
 0x468   : > { %4192 = vmatprep.mubr.bf16.mxu0 %v3696_v31  ;;  %v4318_v55 = vmax.f32 %v4081_v33, 0.0 }
 0x469   : > { %4193 = vmatmul.mubr.bf16.gmra.mrb[228].mxu0 %v3695_v23  ;;  %v4417_v30 = vpack.c.bf16 %v4317_v22, %v4315_v39 }
 0x46a   : > { %v4418_v3 = vpack.c.bf16 %v4318_v55, %v4316_v29 }
 0x46c   : > { %v4084_v28 = vpop.f32.mrb[184].mxu0  ;;  %4818 = vmatprep.mubr.bf16.mxu1 %v4418_v3 }
 0x46d   : > { %v4085_v21 = vadd.f32 %v4084_v28, %v12022_v4  ;;  %v4086_v53 = vpop.f32.mrb[185].mxu0  ;;  %4819 = vmatmul.mubr.bf16.gmra.mrb[180].mxu1 %v4417_v30 }
 0x46e   : > { %v4087_v0 = vadd.f32 %v4086_v53, %v12027_v42  ;;  %v4088_v40 = vpop.f32.mrb[186].mxu0 }
 0x46f   : > { %v4089_v51 = vadd.f32 %v4088_v40, %v12022_v4  ;;  %v4090_v58 = vpop.f32.mrb[187].mxu0  ;;  %v4319_v44 = vmax.f32 %v4085_v21, 0.0 }
 0x470   : > { %v4091_v34 = vadd.f32 %v4090_v58, %v12027_v42  ;;  %v4320_v15 = vmax.f32 %v4087_v0, 0.0 }
 0x471   : > { %v4321_v16 = vmax.f32 %v4089_v51, 0.0 }
 0x472   : > { %v4322_v13 = vmax.f32 %v4091_v34, 0.0  ;;  %v3458_v26 = vpop.f32.mrb[104].mxu1 }
 0x473   : > { %v3459_v56 = vadd.f32 %v3458_v26, %v11461_v7  ;;  %v3460_v32 = vpop.f32.mrb[105].mxu1  ;;  %v4419_v61 = vpack.c.bf16 %v4321_v16, %v4319_v44 }
 0x474   : > { %v3461_v57 = vadd.f32 %v3460_v32, %v11467_v48  ;;  %v3462_v41 = vpop.f32.mrb[106].mxu1  ;;  %v4420_v27 = vpack.c.bf16 %v4322_v13, %v4320_v15 }
 0x475   : > { %v3463_v45 = vadd.f32 %v3462_v41, %v11461_v7  ;;  %v3464_v17 = vpop.f32.mrb[107].mxu1  ;;  %v3621_v20 = vmax.f32 %v3459_v56, 0.0 }
 0x476   : > { %v3465_v18 = vadd.f32 %v3464_v17, %v11467_v48  ;;  %4828 = vmatprep.mubr.bf16.mxu1 %v4420_v27  ;;  %v3622_v63 = vmax.f32 %v3461_v57, 0.0 }
 0x477   : > { %v3623_v35 = vmax.f32 %v3463_v45, 0.0  ;;  %4829 = vmatmul.mubr.bf16.gmra.mrb[184].mxu1 %v4419_v61 }
 0x478   : > { %v3624_v25 = vmax.f32 %v3465_v18, 0.0 }
 0x479   : > { %v3697_v5 = vpack.c.bf16 %v3623_v35, %v3621_v20 }
 0x47a   : > { %v3698_v62 = vpack.c.bf16 %v3624_v25, %v3622_v63 }
 0x47c   : > { %4202 = vmatprep.mubr.bf16.mxu0 %v3698_v62 }
 0x47d   : > { %4203 = vmatmul.mubr.bf16.gmra.mrb[232].mxu0 %v3697_v5 }
 0x47e   : > { %v4094_v54 = vpop.f32.mrb[188].mxu0 }
 0x47f   : > { %v4095_v37 = vadd.f32 %v4094_v54, %v12022_v4  ;;  %v4096_v38 = vpop.f32.mrb[189].mxu0 }
 0x480   : > { %v4097_v24 = vadd.f32 %v4096_v38, %v12027_v42  ;;  %v4098_v36 = vpop.f32.mrb[190].mxu0 }
 0x481   : > { %v4099_v19 = vadd.f32 %v4098_v36, %v12022_v4  ;;  %v4100_v23 = vpop.f32.mrb[191].mxu0  ;;  %v4323_v11 = vmax.f32 %v4095_v37, 0.0 }
 0x482   : > { %v4101_v9 = vadd.f32 %v4100_v23, %v12027_v42  ;;  %v4324_v33 = vmax.f32 %v4097_v24, 0.0 }
 0x483   : > { %v4325_v31 = vmax.f32 %v4099_v19, 0.0 }
 0x484   : > { %v4326_v39 = vmax.f32 %v4101_v9, 0.0 }
 0x485   : > { %v3468_v22 = vpop.f32.mrb[108].mxu1  ;;  %v4421_v29 = vpack.c.bf16 %v4325_v31, %v4323_v11 }
 0x486   : > { %v3469_v55 = vadd.f32 %v3468_v22, %v11461_v7  ;;  %v3470_v30 = vpop.f32.mrb[109].mxu1  ;;  %v4422_v3 = vpack.c.bf16 %v4326_v39, %v4324_v33 }
 0x487   : > { %v3471_v28 = vadd.f32 %v3470_v30, %v11467_v48  ;;  %v3472_v21 = vpop.f32.mrb[110].mxu1 }
 0x488   : > { %v3473_v53 = vadd.f32 %v3472_v21, %v11461_v7  ;;  %v3474_v0 = vpop.f32.mrb[111].mxu1  ;;  %4838 = vmatprep.mubr.bf16.mxu1 %v4422_v3  ;;  %v3625_v51 = vmax.f32 %v3469_v55, 0.0 }
 0x489   : > { %v3475_v40 = vadd.f32 %v3474_v0, %v11467_v48  ;;  %4839 = vmatmul.mubr.bf16.gmra.mrb[188].mxu1 %v4421_v29  ;;  %v3626_v34 = vmax.f32 %v3471_v28, 0.0 }
 0x48a   : > { %v3627_v58 = vmax.f32 %v3473_v53, 0.0 }
 0x48b   : > { %v3628_v44 = vmax.f32 %v3475_v40, 0.0 }
 0x48c   : > { %v3699_v16 = vpack.c.bf16 %v3627_v58, %v3625_v51 }
 0x48d   : > { %v3700_v15 = vpack.c.bf16 %v3628_v44, %v3626_v34 }
 0x48f   : > { %4212 = vmatprep.mubr.bf16.mxu0 %v3700_v15 }
 0x490   : > { %4213 = vmatmul.mubr.bf16.gmra.mrb[236].mxu0 %v3699_v16  ;;  %v4104_v13 = vpop.f32.mrb[192].mxu0 }
 0x491   : > { %v4105_v26 = vadd.f32 %v4104_v13, %v12022_v4  ;;  %v4106_v56 = vpop.f32.mrb[193].mxu0 }
 0x492   : > { %v4107_v32 = vadd.f32 %v4106_v56, %v12027_v42  ;;  %v4108_v61 = vpop.f32.mrb[194].mxu0 }
 0x493   : > { %v4109_v57 = vadd.f32 %v4108_v61, %v12022_v4  ;;  %v4110_v41 = vpop.f32.mrb[195].mxu0  ;;  %v4327_v45 = vmax.f32 %v4105_v26, 0.0 }
 0x494   : > { %v4111_v27 = vadd.f32 %v4110_v41, %v12027_v42  ;;  %v4328_v18 = vmax.f32 %v4107_v32, 0.0 }
 0x495   : > { %v4329_v17 = vmax.f32 %v4109_v57, 0.0 }
 0x496   : > { %v4330_v20 = vmax.f32 %v4111_v27, 0.0 }
 0x497   : > { %v3478_v35 = vpop.f32.mrb[112].mxu1  ;;  %v4423_v63 = vpack.c.bf16 %v4329_v17, %v4327_v45 }
 0x498   : > { %v3479_v25 = vadd.f32 %v3478_v35, %v11461_v7  ;;  %v3480_v5 = vpop.f32.mrb[113].mxu1  ;;  %v4424_v62 = vpack.c.bf16 %v4330_v20, %v4328_v18 }
 0x499   : > { %v3481_v54 = vadd.f32 %v3480_v5, %v11467_v48  ;;  %v3482_v37 = vpop.f32.mrb[114].mxu1 }
 0x49a   : > { %v3483_v38 = vadd.f32 %v3482_v37, %v11461_v7  ;;  %v3484_v24 = vpop.f32.mrb[115].mxu1  ;;  %4848 = vmatprep.mubr.bf16.mxu1 %v4424_v62  ;;  %v3629_v19 = vmax.f32 %v3479_v25, 0.0 }
 0x49b   : > { %v3485_v36 = vadd.f32 %v3484_v24, %v11467_v48  ;;  %4849 = vmatmul.mubr.bf16.gmra.mrb[192].mxu1 %v4423_v63  ;;  %v3630_v9 = vmax.f32 %v3481_v54, 0.0 }
 0x49c   : > { %v3631_v23 = vmax.f32 %v3483_v38, 0.0 }
 0x49d   : > { %v3632_v11 = vmax.f32 %v3485_v36, 0.0 }
 0x49e   : > { %v3701_v31 = vpack.c.bf16 %v3631_v23, %v3629_v19 }
 0x49f   : > { %v3702_v33 = vpack.c.bf16 %v3632_v11, %v3630_v9 }
 0x4a1   : > { %4222 = vmatprep.mubr.bf16.mxu0 %v3702_v33 }
 0x4a2   : > { %4223 = vmatmul.mubr.bf16.gmra.mrb[240].mxu0 %v3701_v31 }
 0x4a3   : > { %v4114_v39 = vpop.f32.mrb[196].mxu0 }
 0x4a4   : > { %v4115_v22 = vadd.f32 %v4114_v39, %v12022_v4  ;;  %v4116_v29 = vpop.f32.mrb[197].mxu0 }
 0x4a5   : > { %v4117_v55 = vadd.f32 %v4116_v29, %v12027_v42  ;;  %v4118_v30 = vpop.f32.mrb[198].mxu0 }
 0x4a6   : > { %v4119_v3 = vadd.f32 %v4118_v30, %v12022_v4  ;;  %v4120_v28 = vpop.f32.mrb[199].mxu0  ;;  %v4331_v53 = vmax.f32 %v4115_v22, 0.0 }
 0x4a7   : > { %v4121_v21 = vadd.f32 %v4120_v28, %v12027_v42  ;;  %v4332_v40 = vmax.f32 %v4117_v55, 0.0 }
 0x4a8   : > { %v4333_v0 = vmax.f32 %v4119_v3, 0.0 }
 0x4a9   : > { %v4334_v51 = vmax.f32 %v4121_v21, 0.0 }
 0x4aa   : > { %v3488_v58 = vpop.f32.mrb[116].mxu1  ;;  %v4425_v34 = vpack.c.bf16 %v4333_v0, %v4331_v53 }
 0x4ab   : > { %v3489_v44 = vadd.f32 %v3488_v58, %v11461_v7  ;;  %v3490_v16 = vpop.f32.mrb[117].mxu1  ;;  %v4426_v15 = vpack.c.bf16 %v4334_v51, %v4332_v40 }
 0x4ac   : > { %v3491_v13 = vadd.f32 %v3490_v16, %v11467_v48  ;;  %v3492_v26 = vpop.f32.mrb[118].mxu1 }
 0x4ad   : > { %v3493_v56 = vadd.f32 %v3492_v26, %v11461_v7  ;;  %v3494_v32 = vpop.f32.mrb[119].mxu1  ;;  %4858 = vmatprep.mubr.bf16.mxu1 %v4426_v15  ;;  %v3633_v57 = vmax.f32 %v3489_v44, 0.0 }
 0x4ae   : > { %v3495_v61 = vadd.f32 %v3494_v32, %v11467_v48  ;;  %4859 = vmatmul.mubr.bf16.gmra.mrb[196].mxu1 %v4425_v34  ;;  %v3634_v27 = vmax.f32 %v3491_v13, 0.0 }
 0x4af   : > { %v3635_v41 = vmax.f32 %v3493_v56, 0.0 }
 0x4b0   : > { %v3636_v45 = vmax.f32 %v3495_v61, 0.0 }
 0x4b1   : > { %v3703_v17 = vpack.c.bf16 %v3635_v41, %v3633_v57 }
 0x4b2   : > { %v3704_v18 = vpack.c.bf16 %v3636_v45, %v3634_v27 }
 0x4b4   : > { %4232 = vmatprep.mubr.bf16.mxu0 %v3704_v18 }
 0x4b5   : > { %4233 = vmatmul.mubr.bf16.gmra.mrb[244].mxu0 %v3703_v17 }
 0x4b6   : > { %v4124_v20 = vpop.f32.mrb[200].mxu0 }
 0x4b7   : > { %v4125_v35 = vadd.f32 %v4124_v20, %v12022_v4  ;;  %v4126_v63 = vpop.f32.mrb[201].mxu0 }
 0x4b8   : > { %v4127_v25 = vadd.f32 %v4126_v63, %v12027_v42  ;;  %v4128_v5 = vpop.f32.mrb[202].mxu0 }
 0x4b9   : > { %v4129_v62 = vadd.f32 %v4128_v5, %v12022_v4  ;;  %v4130_v54 = vpop.f32.mrb[203].mxu0  ;;  %v4335_v38 = vmax.f32 %v4125_v35, 0.0 }
 0x4ba   : > { %v4131_v37 = vadd.f32 %v4130_v54, %v12027_v42  ;;  %v4336_v36 = vmax.f32 %v4127_v25, 0.0 }
 0x4bb   : > { %v4337_v24 = vmax.f32 %v4129_v62, 0.0 }
 0x4bc   : > { %v4338_v19 = vmax.f32 %v4131_v37, 0.0  ;;  %v9630_v37 = vld [vmem:[%s13831_s4] sm:$0xff] }
 0x4bd   : > { %v3498_v23 = vpop.f32.mrb[120].mxu1  ;;  %v4427_v9 = vpack.c.bf16 %v4337_v24, %v4335_v38  ;;  %v14279_v38 = vld [vmem:[#allocation18_spill] sm:$0xff] }
 0x4be   : > { %v3499_v11 = vadd.f32 %v3498_v23, %v11461_v7  ;;  %v3500_v31 = vpop.f32.mrb[121].mxu1  ;;  %v4428_v33 = vpack.c.bf16 %v4338_v19, %v4336_v36  ;;  %v12161_v24 = vrot.slane %v9630_v37, %v14279_v38 }
 0x4bf   : > { %v3501_v39 = vadd.f32 %v3500_v31, %v11467_v48  ;;  %v3502_v22 = vpop.f32.mrb[122].mxu1 }
 0x4c0   : > { %v3503_v29 = vadd.f32 %v3502_v22, %v11461_v7  ;;  %v3504_v55 = vpop.f32.mrb[123].mxu1  ;;  %4868 = vmatprep.mubr.bf16.mxu1 %v4428_v33  ;;  %v3637_v3 = vmax.f32 %v3499_v11, 0.0 }
 0x4c1   : > { %v3505_v30 = vadd.f32 %v3504_v55, %v11467_v48  ;;  %4869 = vmatmul.mubr.bf16.gmra.mrb[200].mxu1 %v4427_v9  ;;  %v3638_v21 = vmax.f32 %v3501_v39, 0.0 }
 0x4c2   : > { %v3639_v28 = vmax.f32 %v3503_v29, 0.0 }
 0x4c3   : > { %v3640_v53 = vmax.f32 %v3505_v30, 0.0 }
 0x4c4   : > { %v3705_v0 = vpack.c.bf16 %v3639_v28, %v3637_v3 }
 0x4c5   : > { %v3706_v40 = vpack.c.bf16 %v3640_v53, %v3638_v21 }
 0x4c7   : > { %4242 = vmatprep.mubr.bf16.mxu0 %v3706_v40 }
 0x4c8   : > { %4243 = vmatmul.mubr.bf16.gmra.mrb[248].mxu0 %v3705_v0 }
 0x4ca   : > { %v4134_v51 = vpop.f32.mrb[204].mxu0 }
 0x4cb   : > { %v4135_v58 = vadd.f32 %v4134_v51, %v12022_v4  ;;  %v4136_v34 = vpop.f32.mrb[205].mxu0 }
 0x4cc   : > { %v4137_v44 = vadd.f32 %v4136_v34, %v12027_v42  ;;  %v4138_v16 = vpop.f32.mrb[206].mxu0 }
 0x4cd   : > { %v4139_v15 = vadd.f32 %v4138_v16, %v12022_v4  ;;  %v4140_v13 = vpop.f32.mrb[207].mxu0  ;;  %v4339_v56 = vmax.f32 %v4135_v58, 0.0 }
 0x4ce   : > { %v4141_v26 = vadd.f32 %v4140_v13, %v12027_v42  ;;  %v4340_v61 = vmax.f32 %v4137_v44, 0.0 }
 0x4cf   : > { %v4341_v32 = vmax.f32 %v4139_v15, 0.0 }
 0x4d0   : > { %v4342_v57 = vmax.f32 %v4141_v26, 0.0  ;;  %v3508_v41 = vpop.f32.mrb[124].mxu1 }
 0x4d1   : > { %v3509_v27 = vadd.f32 %v3508_v41, %v11461_v7  ;;  %v3510_v45 = vpop.f32.mrb[125].mxu1  ;;  %v4429_v17 = vpack.c.bf16 %v4341_v32, %v4339_v56 }
 0x4d2   : > { %v3511_v18 = vadd.f32 %v3510_v45, %v11467_v48  ;;  %v3512_v20 = vpop.f32.mrb[126].mxu1  ;;  %v4430_v35 = vpack.c.bf16 %v4342_v57, %v4340_v61 }
 0x4d3   : > { %v3513_v63 = vadd.f32 %v3512_v20, %v11461_v7  ;;  %v3514_v25 = vpop.f32.mrb[127].mxu1  ;;  %v3641_v62 = vmax.f32 %v3509_v27, 0.0  ;;  %v9631_v7 = vld [vmem:[%s13831_s4 + $0x8] sm:$0xff] }
 0x4d4   : > { %v3515_v5 = vadd.f32 %v3514_v25, %v11467_v48  ;;  %4878 = vmatprep.mubr.bf16.mxu1 %v4430_v35  ;;  %v3642_v36 = vmax.f32 %v3511_v18, 0.0  ;;  %v12167_v23 = vrot.slane %v9631_v7, %v14279_v38 }
 0x4d5   : > { %v3643_v54 = vmax.f32 %v3513_v63, 0.0  ;;  %4879 = vmatmul.mubr.bf16.gmra.mrb[204].mxu1 %v4429_v17 }
 0x4d6   : > { %v3644_v19 = vmax.f32 %v3515_v5, 0.0 }
 0x4d7   : > { %v3707_v48 = vpack.c.bf16 %v3643_v54, %v3641_v62 }
 0x4d8   : > { %v4690_v9 = vpop.f32.mrb[128].mxu1  ;;  %v3708_v11 = vpack.c.bf16 %v3644_v19, %v3642_v36 }
 0x4d9   : > { %v4691_v31 = vadd.f32 %v4690_v9, %v12161_v24  ;;  %v4692_v33 = vpop.f32.mrb[129].mxu1 }
 0x4da   : > { %v4693_v39 = vadd.f32 %v4692_v33, %v12167_v23  ;;  %4252 = vmatprep.mubr.bf16.mxu0 %v3708_v11  ;;  %v4694_v22 = vpop.f32.mrb[130].mxu1 }
 0x4db   : > { %v4695_v29 = vadd.f32 %v4694_v22, %v12161_v24  ;;  %4253 = vmatmul.mubr.bf16.gmra.mrb[252].mxu0 %v3707_v48  ;;  %v4696_v55 = vpop.f32.mrb[131].mxu1  ;;  %v5009_v3 = vmax.f32 %v4691_v31, 0.0 }
 0x4dc   : > { %v4697_v30 = vadd.f32 %v4696_v55, %v12167_v23  ;;  %v5010_v53 = vmax.f32 %v4693_v39, 0.0 }
 0x4dd   : > { %v5011_v28 = vmax.f32 %v4695_v29, 0.0  ;;  %v4144_v21 = vpop.f32.mrb[208].mxu0 }
 0x4de   : > { %v5012_v0 = vmax.f32 %v4697_v30, 0.0  ;;  %v4145_v40 = vadd.f32 %v4144_v21, %v12022_v4  ;;  %v4146_v51 = vpop.f32.mrb[209].mxu0 }
 0x4df   : > { %v5137_v58 = vpack.c.bf16 %v5011_v28, %v5009_v3  ;;  %v4147_v34 = vadd.f32 %v4146_v51, %v12027_v42  ;;  %v4148_v44 = vpop.f32.mrb[210].mxu0 }
 0x4e0   : > { %v4149_v16 = vadd.f32 %v4148_v44, %v12022_v4  ;;  %v4150_v15 = vpop.f32.mrb[211].mxu0  ;;  %v4700_v13 = vpop.f32.mrb[132].mxu1  ;;  %v5138_v26 = vpack.c.bf16 %v5012_v0, %v5010_v53  ;;  %v4343_v57 = vmax.f32 %v4145_v40, 0.0 }
 0x4e1   : > { %v4151_v56 = vadd.f32 %v4150_v15, %v12027_v42  ;;  %v4701_v32 = vadd.f32 %v4700_v13, %v12161_v24  ;;  %v4702_v61 = vpop.f32.mrb[133].mxu1  ;;  %v4344_v17 = vmax.f32 %v4147_v34, 0.0 }
 0x4e2   : > { %v4345_v41 = vmax.f32 %v4149_v16, 0.0  ;;  %v4703_v27 = vadd.f32 %v4702_v61, %v12167_v23  ;;  %v4704_v45 = vpop.f32.mrb[134].mxu1  ;;  %6122 = vmatprep.mubr.bf16.mxu0 %v5138_v26 }
 0x4e3   : > { %v4346_v18 = vmax.f32 %v4151_v56, 0.0  ;;  %v4705_v20 = vadd.f32 %v4704_v45, %v12161_v24  ;;  %v4706_v35 = vpop.f32.mrb[135].mxu1  ;;  %6123 = vmatmul.mubr.bf16.vlgmr.msra.gmra.mrb[0].mxu0 %v5137_v58  ;;  %v5013_v5 = vmax.f32 %v4701_v32, 0.0 }
 0x4e4   : > { %v4707_v63 = vadd.f32 %v4706_v35, %v12167_v23  ;;  %v4431_v25 = vpack.c.bf16 %v4345_v41, %v4343_v57  ;;  %v5014_v37 = vmax.f32 %v4703_v27, 0.0 }
 0x4e5   : > { %v5015_v62 = vmax.f32 %v4705_v20, 0.0  ;;  %v4432_v54 = vpack.c.bf16 %v4346_v18, %v4344_v17 }
 0x4e6   : > { %v5016_v38 = vmax.f32 %v4707_v63, 0.0 }
 0x4e7   : > { %v5139_v36 = vpack.c.bf16 %v5015_v62, %v5013_v5  ;;  %4888 = vmatprep.mubr.bf16.mxu1 %v4432_v54 }
 0x4e8   : > { %v4710_v19 = vpop.f32.mrb[136].mxu1  ;;  %4889 = vmatmul.mubr.bf16.gmra.mrb[208].mxu1 %v4431_v25  ;;  %v5140_v7 = vpack.c.bf16 %v5016_v38, %v5014_v37 }
 0x4e9   : > { %v4711_v48 = vadd.f32 %v4710_v19, %v12161_v24  ;;  %v4712_v9 = vpop.f32.mrb[137].mxu1 }
 0x4ea   : > { %v4713_v11 = vadd.f32 %v4712_v9, %v12167_v23  ;;  %v4714_v31 = vpop.f32.mrb[138].mxu1  ;;  %6132 = vmatprep.mubr.bf16.mxu0 %v5140_v7 }
 0x4eb   : > { %v4715_v33 = vadd.f32 %v4714_v31, %v12161_v24  ;;  %v4716_v39 = vpop.f32.mrb[139].mxu1  ;;  %6133 = vmatmul.mubr.bf16.gmra.mrb[4].mxu0 %v5139_v36  ;;  %v5017_v29 = vmax.f32 %v4711_v48, 0.0  ;;  %v9496_v31 = vld [vmem:[#allocation2 + $0x500] ss:$8 sps:$4 sm:$0xff]  }
 0x4ec   : > { %v4717_v22 = vadd.f32 %v4716_v39, %v12167_v23  ;;  %v5018_v30 = vmax.f32 %v4713_v11, 0.0 }
 0x4ed   : > { %v5019_v55 = vmax.f32 %v4715_v33, 0.0  ;;  %v9498_v33 = vld [vmem:[#allocation2 + $0x504] ss:$8 sps:$4 sm:$0xff]  }
 0x4ee   : > { %v5020_v3 = vmax.f32 %v4717_v22, 0.0  ;;  %6972 = vmatprep.subr.bf16.mxu1 %v9498_v33 }
 0x4ef   : > { %v5141_v28 = vpack.c.bf16 %v5019_v55, %v5017_v29  ;;  %6973 = vmatpush1.bf16.msra.mxu1 %v9496_v31 }
 0x4f0   : > { %v4720_v53 = vpop.f32.mrb[140].mxu1  ;;  %v5142_v0 = vpack.c.bf16 %v5020_v3, %v5018_v30 }
 0x4f1   : > { %v4154_v21 = vpop.f32.mrb[212].mxu0  ;;  %v4721_v51 = vadd.f32 %v4720_v53, %v12161_v24  ;;  %v4722_v34 = vpop.f32.mrb[141].mxu1 }
 0x4f2   : > { %v4155_v40 = vadd.f32 %v4154_v21, %v12022_v4  ;;  %v4156_v58 = vpop.f32.mrb[213].mxu0  ;;  %v4723_v16 = vadd.f32 %v4722_v34, %v12167_v23  ;;  %v4724_v13 = vpop.f32.mrb[142].mxu1  ;;  %6142 = vmatprep.mubr.bf16.mxu0 %v5142_v0 }
 0x4f3   : > { %v4157_v44 = vadd.f32 %v4156_v58, %v12027_v42  ;;  %v4158_v15 = vpop.f32.mrb[214].mxu0  ;;  %v4725_v56 = vadd.f32 %v4724_v13, %v12161_v24  ;;  %v4726_v61 = vpop.f32.mrb[143].mxu1  ;;  %6143 = vmatmul.mubr.bf16.gmra.mrb[8].mxu0 %v5141_v28  ;;  %v5021_v45 = vmax.f32 %v4721_v51, 0.0 }
 0x4f4   : > { %v4159_v26 = vadd.f32 %v4158_v15, %v12022_v4  ;;  %v4160_v32 = vpop.f32.mrb[215].mxu0  ;;  %v4727_v41 = vadd.f32 %v4726_v61, %v12167_v23  ;;  %v4347_v27 = vmax.f32 %v4155_v40, 0.0  ;;  %v5022_v35 = vmax.f32 %v4723_v16, 0.0 }
 0x4f5   : > { %v4161_v57 = vadd.f32 %v4160_v32, %v12027_v42  ;;  %v5023_v18 = vmax.f32 %v4725_v56, 0.0  ;;  %v4348_v20 = vmax.f32 %v4157_v44, 0.0 }
 0x4f6   : > { %v4349_v17 = vmax.f32 %v4159_v26, 0.0  ;;  %v5024_v25 = vmax.f32 %v4727_v41, 0.0 }
 0x4f7   : > { %v4350_v63 = vmax.f32 %v4161_v57, 0.0  ;;  %v5143_v5 = vpack.c.bf16 %v5023_v18, %v5021_v45 }
 0x4f8   : > { %v4433_v62 = vpack.c.bf16 %v4349_v17, %v4347_v27  ;;  %v4730_v54 = vpop.f32.mrb[144].mxu1  ;;  %v5144_v38 = vpack.c.bf16 %v5024_v25, %v5022_v35 }
 0x4f9   : > { %v4434_v37 = vpack.c.bf16 %v4350_v63, %v4348_v20  ;;  %v4731_v36 = vadd.f32 %v4730_v54, %v12161_v24  ;;  %v4732_v19 = vpop.f32.mrb[145].mxu1 }
 0x4fa   : > { %v4733_v7 = vadd.f32 %v4732_v19, %v12167_v23  ;;  %v4734_v48 = vpop.f32.mrb[146].mxu1  ;;  %6152 = vmatprep.mubr.bf16.mxu0 %v5144_v38 }
 0x4fb   : > { %4898 = vmatprep.mubr.bf16.mxu1 %v4434_v37  ;;  %v4735_v9 = vadd.f32 %v4734_v48, %v12161_v24  ;;  %v4736_v11 = vpop.f32.mrb[147].mxu1  ;;  %6153 = vmatmul.mubr.bf16.gmra.mrb[12].mxu0 %v5143_v5  ;;  %v5025_v22 = vmax.f32 %v4731_v36, 0.0  ;;  %v9499_v5 = vld [vmem:[#allocation2 + $0x510] ss:$8 sps:$4 sm:$0xff]  }
 0x4fc   : > { %4899 = vmatmul.mubr.bf16.gmra.mrb[212].mxu1 %v4433_v62  ;;  %v4737_v39 = vadd.f32 %v4736_v11, %v12167_v23  ;;  %v5026_v55 = vmax.f32 %v4733_v7, 0.0  ;;  %v9501_v62 = vld [vmem:[#allocation2 + $0x514] ss:$8 sps:$4 sm:$0xff]  }
 0x4fd   : > { %v5027_v29 = vmax.f32 %v4735_v9, 0.0  ;;  %6974 = vmatprep.subr.bf16.mxu1 %v9501_v62 }
 0x4fe   : > { %v5028_v30 = vmax.f32 %v4737_v39, 0.0  ;;  %6975 = vmatpush1.bf16.msra.mxu1 %v9499_v5 }
 0x4ff   : > { %v5145_v3 = vpack.c.bf16 %v5027_v29, %v5025_v22 }
 0x500   : > { %v4740_v28 = vpop.f32.mrb[148].mxu1  ;;  %v5146_v21 = vpack.c.bf16 %v5028_v30, %v5026_v55  ;;  %v9502_v30 = vld [vmem:[#allocation2 + $0x520] ss:$8 sps:$4 sm:$0xff]  }
 0x501   : > { %v4741_v53 = vadd.f32 %v4740_v28, %v12161_v24  ;;  %v4742_v0 = vpop.f32.mrb[149].mxu1 }
 0x502   : > { %v4743_v40 = vadd.f32 %v4742_v0, %v12167_v23  ;;  %v4744_v51 = vpop.f32.mrb[150].mxu1  ;;  %6162 = vmatprep.mubr.bf16.mxu0 %v5146_v21  ;;  %v9507_v21 = vld [vmem:[#allocation2 + $0x534] ss:$8 sps:$4 sm:$0xff]  }
 0x503   : > { %v4745_v58 = vadd.f32 %v4744_v51, %v12161_v24  ;;  %v4746_v44 = vpop.f32.mrb[151].mxu1  ;;  %6163 = vmatmul.mubr.bf16.gmra.mrb[16].mxu0 %v5145_v3  ;;  %v5029_v26 = vmax.f32 %v4741_v53, 0.0  ;;  %v9504_v3 = vld [vmem:[#allocation2 + $0x524] ss:$8 sps:$4 sm:$0xff]  }
 0x504   : > { %v4164_v34 = vpop.f32.mrb[216].mxu0  ;;  %v4747_v15 = vadd.f32 %v4746_v44, %v12167_v23  ;;  %v5030_v57 = vmax.f32 %v4743_v40, 0.0  ;;  %6976 = vmatprep.subr.bf16.mxu1 %v9504_v3 }
 0x505   : > { %v4165_v16 = vadd.f32 %v4164_v34, %v12022_v4  ;;  %v4166_v13 = vpop.f32.mrb[217].mxu0  ;;  %v5031_v56 = vmax.f32 %v4745_v58, 0.0  ;;  %6977 = vmatpush1.bf16.msra.mxu1 %v9502_v30  ;;  %v9505_v58 = vld [vmem:[#allocation2 + $0x530] ss:$8 sps:$4 sm:$0xff]  }
 0x506   : > { %v4167_v32 = vadd.f32 %v4166_v13, %v12027_v42  ;;  %v4168_v61 = vpop.f32.mrb[218].mxu0  ;;  %v5032_v41 = vmax.f32 %v4747_v15, 0.0  ;;  %6978 = vmatprep.subr.bf16.mxu1 %v9507_v21  ;;  %v9510_v13 = vld [vmem:[#allocation2 + $0x544] ss:$8 sps:$4 sm:$0xff]  }
 0x507   : > { %v4169_v27 = vadd.f32 %v4168_v61, %v12022_v4  ;;  %v4170_v45 = vpop.f32.mrb[219].mxu0  ;;  %v5147_v17 = vpack.c.bf16 %v5031_v56, %v5029_v26  ;;  %v4351_v18 = vmax.f32 %v4165_v16, 0.0  ;;  %v9508_v61 = vld [vmem:[#allocation2 + $0x540] ss:$8 sps:$4 sm:$0xff]  }
 0x508   : > { %v4171_v20 = vadd.f32 %v4170_v45, %v12027_v42  ;;  %v4750_v63 = vpop.f32.mrb[152].mxu1  ;;  %v5148_v25 = vpack.c.bf16 %v5032_v41, %v5030_v57  ;;  %v4352_v54 = vmax.f32 %v4167_v32, 0.0 }
 0x509   : > { %v4353_v35 = vmax.f32 %v4169_v27, 0.0  ;;  %v4751_v38 = vadd.f32 %v4750_v63, %v12161_v24  ;;  %v4752_v36 = vpop.f32.mrb[153].mxu1  ;;  %6979 = vmatpush1.bf16.msra.mxu1 %v9505_v58 }
 0x50a   : > { %v4354_v37 = vmax.f32 %v4171_v20, 0.0  ;;  %v4753_v19 = vadd.f32 %v4752_v36, %v12167_v23  ;;  %v4754_v7 = vpop.f32.mrb[154].mxu1  ;;  %6172 = vmatprep.mubr.bf16.mxu0 %v5148_v25  ;;  %6980 = vmatprep.subr.bf16.mxu1 %v9510_v13 }
 0x50b   : > { %v4435_v48 = vpack.c.bf16 %v4353_v35, %v4351_v18  ;;  %v4755_v9 = vadd.f32 %v4754_v7, %v12161_v24  ;;  %v4756_v11 = vpop.f32.mrb[155].mxu1  ;;  %6173 = vmatmul.mubr.bf16.gmra.mrb[20].mxu0 %v5147_v17  ;;  %v5033_v39 = vmax.f32 %v4751_v38, 0.0 }
 0x50c   : > { %v4436_v31 = vpack.c.bf16 %v4354_v37, %v4352_v54  ;;  %v4757_v33 = vadd.f32 %v4756_v11, %v12167_v23  ;;  %v5034_v29 = vmax.f32 %v4753_v19, 0.0 }
 0x50d   : > { %v5035_v22 = vmax.f32 %v4755_v9, 0.0  ;;  %6981 = vmatpush1.bf16.msra.mxu1 %v9508_v61  ;;  %v9517_v61 = vld [vmem:[#allocation2 + $0x570] ss:$8 sps:$4 sm:$0xff]  }
 0x50e   : > { %4908 = vmatprep.mubr.bf16.mxu1 %v4436_v31  ;;  %v5036_v55 = vmax.f32 %v4757_v33, 0.0  ;;  %v9511_v31 = vld [vmem:[#allocation2 + $0x550] ss:$8 sps:$4 sm:$0xff]  }
 0x50f   : > { %4909 = vmatmul.mubr.bf16.gmra.mrb[216].mxu1 %v4435_v48  ;;  %v5149_v28 = vpack.c.bf16 %v5035_v22, %v5033_v39 }
 0x510   : > { %v4760_v53 = vpop.f32.mrb[156].mxu1  ;;  %v5150_v0 = vpack.c.bf16 %v5036_v55, %v5034_v29  ;;  %v9513_v29 = vld [vmem:[#allocation2 + $0x554] ss:$8 sps:$4 sm:$0xff]  }
 0x511   : > { %v4761_v40 = vadd.f32 %v4760_v53, %v12161_v24  ;;  %v4762_v51 = vpop.f32.mrb[157].mxu1  ;;  %6982 = vmatprep.subr.bf16.mxu1 %v9513_v29 }
 0x512   : > { %v4763_v34 = vadd.f32 %v4762_v51, %v12167_v23  ;;  %v4764_v44 = vpop.f32.mrb[158].mxu1  ;;  %6182 = vmatprep.mubr.bf16.mxu0 %v5150_v0  ;;  %v9516_v0 = vld [vmem:[#allocation2 + $0x564] ss:$8 sps:$4 sm:$0xff]   ;;  %6983 = vmatpush1.bf16.msra.mxu1 %v9511_v31  ;;  %v9514_v51 = vld [vmem:[#allocation2 + $0x560] ss:$8 sps:$4 sm:$0xff]  }
 0x513   : > { %v4765_v16 = vadd.f32 %v4764_v44, %v12161_v24  ;;  %v4766_v15 = vpop.f32.mrb[159].mxu1  ;;  %6183 = vmatmul.mubr.bf16.gmra.mrb[24].mxu0 %v5149_v28  ;;  %v5037_v56 = vmax.f32 %v4761_v40, 0.0  ;;  %6984 = vmatprep.subr.bf16.mxu1 %v9516_v0 }
 0x514   : > { %v4767_v26 = vadd.f32 %v4766_v15, %v12167_v23  ;;  %v5038_v57 = vmax.f32 %v4763_v34, 0.0  ;;  %v9519_v15 = vld [vmem:[#allocation2 + $0x574] ss:$8 sps:$4 sm:$0xff]  }
 0x515   : > { %v5039_v32 = vmax.f32 %v4765_v16, 0.0 }
 0x516   : > { %v5040_v41 = vmax.f32 %v4767_v26, 0.0  ;;  %6985 = vmatpush1.bf16.msra.mxu1 %v9514_v51 }
 0x517   : > { %v4174_v27 = vpop.f32.mrb[220].mxu0  ;;  %v5151_v45 = vpack.c.bf16 %v5039_v32, %v5037_v56  ;;  %6986 = vmatprep.subr.bf16.mxu1 %v9519_v15 }
 0x518   : > { %v4175_v17 = vadd.f32 %v4174_v27, %v12022_v4  ;;  %v4176_v18 = vpop.f32.mrb[221].mxu0  ;;  %v4770_v63 = vpop.f32.mrb[160].mxu1  ;;  %v5152_v25 = vpack.c.bf16 %v5040_v41, %v5038_v57  ;;  %v9522_v41 = vld [vmem:[#allocation2 + $0x584] ss:$8 sps:$4 sm:$0xff]  }
 0x519   : > { %v4177_v20 = vadd.f32 %v4176_v18, %v12027_v42  ;;  %v4178_v35 = vpop.f32.mrb[222].mxu0  ;;  %v4771_v62 = vadd.f32 %v4770_v63, %v12161_v24  ;;  %v4772_v37 = vpop.f32.mrb[161].mxu1 }
 0x51a   : > { %v4179_v5 = vadd.f32 %v4178_v35, %v12022_v4  ;;  %v4180_v54 = vpop.f32.mrb[223].mxu0  ;;  %v4773_v36 = vadd.f32 %v4772_v37, %v12167_v23  ;;  %v4774_v19 = vpop.f32.mrb[162].mxu1  ;;  %6192 = vmatprep.mubr.bf16.mxu0 %v5152_v25  ;;  %v4355_v7 = vmax.f32 %v4175_v17, 0.0  ;;  %6987 = vmatpush1.bf16.msra.mxu1 %v9517_v61  ;;  %v9520_v35 = vld [vmem:[#allocation2 + $0x580] ss:$8 sps:$4 sm:$0xff]  }
 0x51b   : > { %v4181_v38 = vadd.f32 %v4180_v54, %v12027_v42  ;;  %v4775_v9 = vadd.f32 %v4774_v19, %v12161_v24  ;;  %v4776_v11 = vpop.f32.mrb[163].mxu1  ;;  %6193 = vmatmul.mubr.bf16.gmra.mrb[28].mxu0 %v5151_v45  ;;  %v4356_v33 = vmax.f32 %v4177_v20, 0.0  ;;  %v5041_v55 = vmax.f32 %v4771_v62, 0.0  ;;  %6988 = vmatprep.subr.bf16.mxu1 %v9522_v41  ;;  %v9525_v62 = vld [vmem:[#allocation2 + $0x594] ss:$8 sps:$4 sm:$0xff]  }
 0x51c   : > { %v4357_v48 = vmax.f32 %v4179_v5, 0.0  ;;  %v4777_v22 = vadd.f32 %v4776_v11, %v12167_v23  ;;  %v5042_v28 = vmax.f32 %v4773_v36, 0.0  ;;  %v9531_v41 = vld [vmem:[#allocation2 + $0x5b4] ss:$8 sps:$4 sm:$0xff]  }
 0x51d   : > { %v4358_v39 = vmax.f32 %v4181_v38, 0.0  ;;  %v5043_v30 = vmax.f32 %v4775_v9, 0.0 }
 0x51e   : > { %v4437_v3 = vpack.c.bf16 %v4357_v48, %v4355_v7  ;;  %v5044_v21 = vmax.f32 %v4777_v22, 0.0  ;;  %6989 = vmatpush1.bf16.msra.mxu1 %v9520_v35  ;;  %v9523_v22 = vld [vmem:[#allocation2 + $0x590] ss:$8 sps:$4 sm:$0xff]  }
 0x51f   : > { %v4438_v53 = vpack.c.bf16 %v4358_v39, %v4356_v33  ;;  %v5153_v40 = vpack.c.bf16 %v5043_v30, %v5041_v55  ;;  %6990 = vmatprep.subr.bf16.mxu1 %v9525_v62 }
 0x520   : > { %v4780_v58 = vpop.f32.mrb[164].mxu1  ;;  %v5154_v34 = vpack.c.bf16 %v5044_v21, %v5042_v28 }
 0x521   : > { %4918 = vmatprep.mubr.bf16.mxu1 %v4438_v53  ;;  %v4781_v44 = vadd.f32 %v4780_v58, %v12161_v24  ;;  %v4782_v16 = vpop.f32.mrb[165].mxu1 }
 0x522   : > { %4919 = vmatmul.mubr.bf16.gmra.mrb[220].mxu1 %v4437_v3  ;;  %v4783_v13 = vadd.f32 %v4782_v16, %v12167_v23  ;;  %v4784_v26 = vpop.f32.mrb[166].mxu1  ;;  %6202 = vmatprep.mubr.bf16.mxu0 %v5154_v34 }
 0x523   : > { %v4785_v56 = vadd.f32 %v4784_v26, %v12161_v24  ;;  %v4786_v32 = vpop.f32.mrb[167].mxu1  ;;  %6203 = vmatmul.mubr.bf16.gmra.mrb[32].mxu0 %v5153_v40  ;;  %v5045_v27 = vmax.f32 %v4781_v44, 0.0  ;;  %6991 = vmatpush1.bf16.msra.mxu1 %v9523_v22  ;;  %v9528_v44 = vld [vmem:[#allocation2 + $0x5a4] ss:$8 sps:$4 sm:$0xff]   ;;  %v9526_v26 = vld [vmem:[#allocation2 + $0x5a0] ss:$8 sps:$4 sm:$0xff]  }
 0x524   : > { %v4787_v57 = vadd.f32 %v4786_v32, %v12167_v23  ;;  %v5046_v17 = vmax.f32 %v4783_v13, 0.0  ;;  %6992 = vmatprep.subr.bf16.mxu1 %v9528_v44  ;;  %v9540_v44 = vld [vmem:[#allocation2 + $0x5e4] ss:$8 sps:$4 sm:$0xff]  }
 0x525   : > { %v5047_v45 = vmax.f32 %v4785_v56, 0.0 }
 0x526   : > { %v5048_v18 = vmax.f32 %v4787_v57, 0.0 }
 0x527   : > { %v5155_v20 = vpack.c.bf16 %v5047_v45, %v5045_v27  ;;  %6993 = vmatpush1.bf16.msra.mxu1 %v9526_v26 }
 0x528   : > { %v4790_v63 = vpop.f32.mrb[168].mxu1  ;;  %v5156_v5 = vpack.c.bf16 %v5048_v18, %v5046_v17  ;;  %v9529_v18 = vld [vmem:[#allocation2 + $0x5b0] ss:$8 sps:$4 sm:$0xff]   ;;  %6994 = vmatprep.subr.bf16.mxu1 %v9531_v41 }
 0x529   : > { %v4184_v25 = vpop.f32.mrb[224].mxu0  ;;  %v4791_v54 = vadd.f32 %v4790_v63, %v12161_v24  ;;  %v4792_v38 = vpop.f32.mrb[169].mxu1  ;;  %v9534_v63 = vld [vmem:[#allocation2 + $0x5c4] ss:$8 sps:$4 sm:$0xff]  }
 0x52a   : > { %v4185_v37 = vadd.f32 %v4184_v25, %v12022_v4  ;;  %v4186_v36 = vpop.f32.mrb[225].mxu0  ;;  %v4793_v19 = vadd.f32 %v4792_v38, %v12167_v23  ;;  %v4794_v48 = vpop.f32.mrb[170].mxu1  ;;  %6212 = vmatprep.mubr.bf16.mxu0 %v5156_v5  ;;  %v9532_v38 = vld [vmem:[#allocation2 + $0x5c0] ss:$8 sps:$4 sm:$0xff]  }
 0x52b   : > { %v4187_v7 = vadd.f32 %v4186_v36, %v12027_v42  ;;  %v4188_v9 = vpop.f32.mrb[226].mxu0  ;;  %v4795_v11 = vadd.f32 %v4794_v48, %v12161_v24  ;;  %v4796_v33 = vpop.f32.mrb[171].mxu1  ;;  %6213 = vmatmul.mubr.bf16.gmra.mrb[36].mxu0 %v5155_v20  ;;  %v5049_v30 = vmax.f32 %v4791_v54, 0.0  ;;  %6995 = vmatpush1.bf16.msra.mxu1 %v9529_v18 }
 0x52c   : > { %v4189_v31 = vadd.f32 %v4188_v9, %v12022_v4  ;;  %v4190_v39 = vpop.f32.mrb[227].mxu0  ;;  %v4797_v29 = vadd.f32 %v4796_v33, %v12167_v23  ;;  %v4359_v3 = vmax.f32 %v4185_v37, 0.0  ;;  %v5050_v53 = vmax.f32 %v4793_v19, 0.0  ;;  %6996 = vmatprep.subr.bf16.mxu1 %v9534_v63 }
 0x52d   : > { %v4191_v55 = vadd.f32 %v4190_v39, %v12027_v42  ;;  %v5051_v28 = vmax.f32 %v4795_v11, 0.0  ;;  %v4360_v0 = vmax.f32 %v4187_v7, 0.0 }
 0x52e   : > { %v4361_v21 = vmax.f32 %v4189_v31, 0.0  ;;  %v5052_v40 = vmax.f32 %v4797_v29, 0.0  ;;  %v9535_v29 = vld [vmem:[#allocation2 + $0x5d0] ss:$8 sps:$4 sm:$0xff]  }
 0x52f   : > { %v4362_v51 = vmax.f32 %v4191_v55, 0.0  ;;  %v5157_v58 = vpack.c.bf16 %v5051_v28, %v5049_v30  ;;  %6997 = vmatpush1.bf16.msra.mxu1 %v9532_v38  ;;  %v9537_v55 = vld [vmem:[#allocation2 + $0x5d4] ss:$8 sps:$4 sm:$0xff]  }
 0x530   : > { %v4439_v34 = vpack.c.bf16 %v4361_v21, %v4359_v3  ;;  %v4800_v16 = vpop.f32.mrb[172].mxu1  ;;  %v5158_v15 = vpack.c.bf16 %v5052_v40, %v5050_v53  ;;  %6998 = vmatprep.subr.bf16.mxu1 %v9537_v55 }
 0x531   : > { %v4440_v13 = vpack.c.bf16 %v4362_v51, %v4360_v0  ;;  %v4801_v56 = vadd.f32 %v4800_v16, %v12161_v24  ;;  %v4802_v32 = vpop.f32.mrb[173].mxu1 }
 0x532   : > { %v4803_v61 = vadd.f32 %v4802_v32, %v12167_v23  ;;  %v4804_v57 = vpop.f32.mrb[174].mxu1  ;;  %6222 = vmatprep.mubr.bf16.mxu0 %v5158_v15 }
 0x533   : > { %4928 = vmatprep.mubr.bf16.mxu1 %v4440_v13  ;;  %v4805_v27 = vadd.f32 %v4804_v57, %v12161_v24  ;;  %v4806_v45 = vpop.f32.mrb[175].mxu1  ;;  %6223 = vmatmul.mubr.bf16.gmra.mrb[40].mxu0 %v5157_v58  ;;  %v5053_v20 = vmax.f32 %v4801_v56, 0.0  ;;  %v9538_v56 = vld [vmem:[#allocation2 + $0x5e0] ss:$8 sps:$4 sm:$0xff]  }
 0x534   : > { %4929 = vmatmul.mubr.bf16.gmra.mrb[224].mxu1 %v4439_v34  ;;  %v4807_v17 = vadd.f32 %v4806_v45, %v12167_v23  ;;  %v5054_v25 = vmax.f32 %v4803_v61, 0.0 }
 0x535   : > { %v5055_v35 = vmax.f32 %v4805_v27, 0.0  ;;  %6999 = vmatpush1.bf16.msra.mxu1 %v9535_v29 }
 0x536   : > { %v5056_v5 = vmax.f32 %v4807_v17, 0.0  ;;  %7000 = vmatprep.subr.bf16.mxu1 %v9540_v44 }
 0x537   : > { %v5159_v62 = vpack.c.bf16 %v5055_v35, %v5053_v20 }
 0x538   : > { %v4810_v54 = vpop.f32.mrb[176].mxu1  ;;  %v5160_v37 = vpack.c.bf16 %v5056_v5, %v5054_v25  ;;  %v9541_v25 = vld [vmem:[#allocation2 + $0x5f0] ss:$8 sps:$4 sm:$0xff]   ;;  %v9543_v5 = vld [vmem:[#allocation2 + $0x5f4] ss:$8 sps:$4 sm:$0xff]  }
 0x539   : > { %v4811_v36 = vadd.f32 %v4810_v54, %v12161_v24  ;;  %v4812_v19 = vpop.f32.mrb[177].mxu1  ;;  %7001 = vmatpush1.bf16.msra.mxu1 %v9538_v56 }
 0x53a   : > { %v4813_v7 = vadd.f32 %v4812_v19, %v12167_v23  ;;  %v4814_v48 = vpop.f32.mrb[178].mxu1  ;;  %6232 = vmatprep.mubr.bf16.mxu0 %v5160_v37  ;;  %7002 = vmatprep.subr.bf16.mxu1 %v9543_v5 }
 0x53b   : > { %v4815_v9 = vadd.f32 %v4814_v48, %v12161_v24  ;;  %v4816_v11 = vpop.f32.mrb[179].mxu1  ;;  %6233 = vmatmul.mubr.bf16.gmra.mrb[44].mxu0 %v5159_v62  ;;  %v5057_v30 = vmax.f32 %v4811_v36, 0.0  ;;  %v14280_v48 = vmov 0  }
 0x53c   : > { %v4194_v31 = vpop.f32.mrb[228].mxu0  ;;  %v4817_v33 = vadd.f32 %v4816_v11, %v12167_v23  ;;  %v5058_v53 = vmax.f32 %v4813_v7, 0.0 }
 0x53d   : > { %v4195_v39 = vadd.f32 %v4194_v31, %v12022_v4  ;;  %v4196_v22 = vpop.f32.mrb[229].mxu0  ;;  %v5059_v3 = vmax.f32 %v4815_v9, 0.0  ;;  %7003 = vmatpush1.bf16.msra.mxu1 %v9541_v25 }
 0x53e   : > { %v4197_v28 = vadd.f32 %v4196_v22, %v12027_v42  ;;  %v4198_v21 = vpop.f32.mrb[230].mxu0  ;;  %v5060_v0 = vmax.f32 %v4817_v33, 0.0  ;;  %8398 = vmatprep.subr.bf16.mxu1 %v14280_v48 }
 0x53f   : > { %v4199_v40 = vadd.f32 %v4198_v21, %v12022_v4  ;;  %v4200_v51 = vpop.f32.mrb[231].mxu0  ;;  %v5161_v58 = vpack.c.bf16 %v5059_v3, %v5057_v30  ;;  %v4363_v16 = vmax.f32 %v4195_v39, 0.0 }
 0x540   : > { %v4201_v34 = vadd.f32 %v4200_v51, %v12027_v42  ;;  %v4820_v13 = vpop.f32.mrb[180].mxu1  ;;  %v5162_v26 = vpack.c.bf16 %v5060_v0, %v5058_v53  ;;  %v4364_v32 = vmax.f32 %v4197_v28, 0.0 }
 0x541   : > { %v4365_v15 = vmax.f32 %v4199_v40, 0.0  ;;  %v4821_v57 = vadd.f32 %v4820_v13, %v12161_v24  ;;  %v4822_v41 = vpop.f32.mrb[181].mxu1 }
 0x542   : > { %v4366_v61 = vmax.f32 %v4201_v34, 0.0  ;;  %v4823_v27 = vadd.f32 %v4822_v41, %v12167_v23  ;;  %v4824_v45 = vpop.f32.mrb[182].mxu1  ;;  %6242 = vmatprep.mubr.bf16.mxu0 %v5162_v26 }
 0x543   : > { %v4441_v17 = vpack.c.bf16 %v4365_v15, %v4363_v16  ;;  %v4825_v18 = vadd.f32 %v4824_v45, %v12161_v24  ;;  %v4826_v20 = vpop.f32.mrb[183].mxu1  ;;  %6243 = vmatmul.mubr.bf16.gmra.mrb[48].mxu0 %v5161_v58  ;;  %v5061_v62 = vmax.f32 %v4821_v57, 0.0 }
 0x544   : > { %v4442_v35 = vpack.c.bf16 %v4366_v61, %v4364_v32  ;;  %v4827_v63 = vadd.f32 %v4826_v20, %v12167_v23  ;;  %v5062_v37 = vmax.f32 %v4823_v27, 0.0 }
 0x545   : > { %v5063_v54 = vmax.f32 %v4825_v18, 0.0 }
 0x546   : > { %4938 = vmatprep.mubr.bf16.mxu1 %v4442_v35  ;;  %v5064_v38 = vmax.f32 %v4827_v63, 0.0 }
 0x547   : > { %4939 = vmatmul.mubr.bf16.gmra.mrb[228].mxu1 %v4441_v17  ;;  %v5163_v36 = vpack.c.bf16 %v5063_v54, %v5061_v62 }
 0x548   : > { %v5164_v19 = vpack.c.bf16 %v5064_v38, %v5062_v37 }
 0x54a   : > { %v4830_v7 = vpop.f32.mrb[184].mxu1  ;;  %6252 = vmatprep.mubr.bf16.mxu0 %v5164_v19 }
 0x54b   : > { %v4831_v9 = vadd.f32 %v4830_v7, %v12161_v24  ;;  %v4832_v11 = vpop.f32.mrb[185].mxu1  ;;  %6253 = vmatmul.mubr.bf16.gmra.mrb[52].mxu0 %v5163_v36 }
 0x54c   : > { %v4833_v31 = vadd.f32 %v4832_v11, %v12167_v23  ;;  %v4834_v33 = vpop.f32.mrb[186].mxu1 }
 0x54d   : > { %v4835_v39 = vadd.f32 %v4834_v33, %v12161_v24  ;;  %v4836_v22 = vpop.f32.mrb[187].mxu1  ;;  %v5065_v55 = vmax.f32 %v4831_v9, 0.0 }
 0x54e   : > { %v4837_v29 = vadd.f32 %v4836_v22, %v12167_v23  ;;  %v5066_v3 = vmax.f32 %v4833_v31, 0.0 }
 0x54f   : > { %v5067_v30 = vmax.f32 %v4835_v39, 0.0 }
 0x550   : > { %v5068_v28 = vmax.f32 %v4837_v29, 0.0  ;;  %v4204_v21 = vpop.f32.mrb[232].mxu0 }
 0x551   : > { %v5165_v53 = vpack.c.bf16 %v5067_v30, %v5065_v55  ;;  %v4205_v0 = vadd.f32 %v4204_v21, %v12022_v4  ;;  %v4206_v40 = vpop.f32.mrb[233].mxu0 }
 0x552   : > { %v4207_v51 = vadd.f32 %v4206_v40, %v12027_v42  ;;  %v4208_v58 = vpop.f32.mrb[234].mxu0  ;;  %v5166_v34 = vpack.c.bf16 %v5068_v28, %v5066_v3 }
 0x553   : > { %v4209_v44 = vadd.f32 %v4208_v58, %v12022_v4  ;;  %v4210_v16 = vpop.f32.mrb[235].mxu0  ;;  %v4367_v13 = vmax.f32 %v4205_v0, 0.0 }
 0x554   : > { %v4211_v15 = vadd.f32 %v4210_v16, %v12027_v42  ;;  %6262 = vmatprep.mubr.bf16.mxu0 %v5166_v34  ;;  %v4368_v56 = vmax.f32 %v4207_v51, 0.0 }
 0x555   : > { %v4369_v26 = vmax.f32 %v4209_v44, 0.0  ;;  %6263 = vmatmul.mubr.bf16.gmra.mrb[56].mxu0 %v5165_v53 }
 0x556   : > { %v4370_v32 = vmax.f32 %v4211_v15, 0.0 }
 0x557   : > { %v4443_v61 = vpack.c.bf16 %v4369_v26, %v4367_v13 }
 0x558   : > { %v4444_v57 = vpack.c.bf16 %v4370_v32, %v4368_v56 }
 0x55a   : > { %4948 = vmatprep.mubr.bf16.mxu1 %v4444_v57 }
 0x55b   : > { %4949 = vmatmul.mubr.bf16.gmra.mrb[232].mxu1 %v4443_v61 }
 0x55c   : > { %v4840_v41 = vpop.f32.mrb[188].mxu1 }
 0x55d   : > { %v4841_v27 = vadd.f32 %v4840_v41, %v12161_v24  ;;  %v4842_v45 = vpop.f32.mrb[189].mxu1 }
 0x55e   : > { %v4843_v17 = vadd.f32 %v4842_v45, %v12167_v23  ;;  %v4844_v18 = vpop.f32.mrb[190].mxu1 }
 0x55f   : > { %v4845_v20 = vadd.f32 %v4844_v18, %v12161_v24  ;;  %v4846_v35 = vpop.f32.mrb[191].mxu1  ;;  %v5069_v25 = vmax.f32 %v4841_v27, 0.0 }
 0x560   : > { %v4847_v63 = vadd.f32 %v4846_v35, %v12167_v23  ;;  %v5070_v62 = vmax.f32 %v4843_v17, 0.0 }
 0x561   : > { %v5071_v5 = vmax.f32 %v4845_v20, 0.0 }
 0x562   : > { %v5072_v54 = vmax.f32 %v4847_v63, 0.0 }
 0x563   : > { %v5167_v37 = vpack.c.bf16 %v5071_v5, %v5069_v25  ;;  %v4214_v38 = vpop.f32.mrb[236].mxu0 }
 0x564   : > { %v4215_v36 = vadd.f32 %v4214_v38, %v12022_v4  ;;  %v4216_v19 = vpop.f32.mrb[237].mxu0  ;;  %v5168_v7 = vpack.c.bf16 %v5072_v54, %v5070_v62 }
 0x565   : > { %v4217_v9 = vadd.f32 %v4216_v19, %v12027_v42  ;;  %v4218_v11 = vpop.f32.mrb[238].mxu0 }
 0x566   : > { %v4219_v31 = vadd.f32 %v4218_v11, %v12022_v4  ;;  %v4220_v33 = vpop.f32.mrb[239].mxu0  ;;  %6272 = vmatprep.mubr.bf16.mxu0 %v5168_v7  ;;  %v4371_v22 = vmax.f32 %v4215_v36, 0.0 }
 0x567   : > { %v4221_v39 = vadd.f32 %v4220_v33, %v12027_v42  ;;  %6273 = vmatmul.mubr.bf16.gmra.mrb[60].mxu0 %v5167_v37  ;;  %v4372_v55 = vmax.f32 %v4217_v9, 0.0 }
 0x568   : > { %v4373_v29 = vmax.f32 %v4219_v31, 0.0 }
 0x569   : > { %v4374_v30 = vmax.f32 %v4221_v39, 0.0 }
 0x56a   : > { %v4445_v3 = vpack.c.bf16 %v4373_v29, %v4371_v22 }
 0x56b   : > { %v4446_v28 = vpack.c.bf16 %v4374_v30, %v4372_v55 }
 0x56d   : > { %4958 = vmatprep.mubr.bf16.mxu1 %v4446_v28 }
 0x56e   : > { %4959 = vmatmul.mubr.bf16.gmra.mrb[236].mxu1 %v4445_v3  ;;  %v4850_v21 = vpop.f32.mrb[192].mxu1 }
 0x56f   : > { %v4851_v53 = vadd.f32 %v4850_v21, %v12161_v24  ;;  %v4852_v0 = vpop.f32.mrb[193].mxu1 }
 0x570   : > { %v4853_v40 = vadd.f32 %v4852_v0, %v12167_v23  ;;  %v4854_v51 = vpop.f32.mrb[194].mxu1 }
 0x571   : > { %v4855_v58 = vadd.f32 %v4854_v51, %v12161_v24  ;;  %v4856_v34 = vpop.f32.mrb[195].mxu1  ;;  %v5073_v16 = vmax.f32 %v4851_v53, 0.0 }
 0x572   : > { %v4857_v44 = vadd.f32 %v4856_v34, %v12167_v23  ;;  %v5074_v13 = vmax.f32 %v4853_v40, 0.0 }
 0x573   : > { %v5075_v15 = vmax.f32 %v4855_v58, 0.0 }
 0x574   : > { %v5076_v26 = vmax.f32 %v4857_v44, 0.0 }
 0x575   : > { %v5169_v56 = vpack.c.bf16 %v5075_v15, %v5073_v16  ;;  %v4224_v32 = vpop.f32.mrb[240].mxu0  ;;  %v14281_v16 = vld [vmem:[#allocation20_spill] sm:$0xff] }
 0x576   : > { %v4225_v61 = vadd.f32 %v4224_v32, %v12022_v4  ;;  %v4226_v57 = vpop.f32.mrb[241].mxu0  ;;  %v5170_v41 = vpack.c.bf16 %v5076_v26, %v5074_v13  ;;  %v5404_v15 = vmul.f32 %v11133_v60, %v14281_v16 }
 0x577   : > { %v4227_v27 = vadd.f32 %v4226_v57, %v12027_v42  ;;  %v4228_v45 = vpop.f32.mrb[242].mxu0 }
 0x578   : > { %v4229_v17 = vadd.f32 %v4228_v45, %v12022_v4  ;;  %v4230_v18 = vpop.f32.mrb[243].mxu0  ;;  %6282 = vmatprep.mubr.bf16.mxu0 %v5170_v41  ;;  %v4375_v35 = vmax.f32 %v4225_v61, 0.0  ;;  %v5405_v61 = vmul.f32 %v11139_v46, %v14281_v16  ;;  %v14283_v41 = vld [vmem:[#allocation9_spill] sm:$0xff]  ;;  %v14293_v16 = vld [vmem:[#allocation27_spill] sm:$0xff] }
 0x579   : > { %v4231_v20 = vadd.f32 %v4230_v18, %v12027_v42  ;;  %6283 = vmatmul.mubr.bf16.gmra.mrb[64].mxu0 %v5169_v56  ;;  %v4376_v25 = vmax.f32 %v4227_v27, 0.0  ;;  %v14282_v56 = vld [vmem:[#allocation8_spill] sm:$0xff]  ;;  %v5674_v27 = vmul.f32 %v11142_v1, %v14283_v41 }
 0x57a   : > { %v4377_v63 = vmax.f32 %v4229_v17, 0.0  ;;  %v5400_v32 = vmul.f32 %v11133_v60, %v14282_v56  ;;  %v5401_v45 = vmul.f32 %v11139_v46, %v14282_v56  ;;  %v14284_v17 = vld [vmem:[#allocation16_spill] sm:$0xff] }
 0x57b   : > { %v4378_v5 = vmax.f32 %v4231_v20, 0.0  ;;  %v5258_v18 = vmul.f32 %v11121_v43, %v14284_v17 }
 0x57c   : > { %v4447_v62 = vpack.c.bf16 %v4377_v63, %v4375_v35  ;;  %v5675_v35 = vmul.f32 %v11149_v59, %v14283_v41  ;;  %v14285_v63 = vld [vmem:[#allocation10_spill] sm:$0xff]  ;;  %v14294_v41 = vld [vmem:[#allocation23_spill] sm:$0xff] }
 0x57d   : > { %v4448_v54 = vpack.c.bf16 %v4378_v5, %v4376_v25  ;;  %v5402_v25 = vmul.f32 %v11133_v60, %v14285_v63  ;;  %v5259_v5 = vmul.f32 %v11124_v14, %v14284_v17  ;;  %v5406_v17 = vmul.f32 %v11133_v60, %v14294_v41 }
 0x57f   : > { %4968 = vmatprep.mubr.bf16.mxu1 %v4448_v54  ;;  %v5532_v54 = vadd.f32 %v5404_v15, %v5258_v18  ;;  %v5256_v15 = vmul.f32 %v11121_v43, %v14293_v16  ;;  %v5407_v18 = vmul.f32 %v11139_v46, %v14294_v41 }
 0x580   : > { %4969 = vmatmul.mubr.bf16.gmra.mrb[240].mxu1 %v4447_v62  ;;  %v5403_v62 = vmul.f32 %v11139_v46, %v14285_v63 }
 0x581   : > { %v4860_v37 = vpop.f32.mrb[196].mxu1 }
 0x582   : > { %v4861_v38 = vadd.f32 %v4860_v37, %v12161_v24  ;;  %v4862_v36 = vpop.f32.mrb[197].mxu1  ;;  %v14286_v37 = vld [vmem:[#allocation11_spill] sm:$0xff] }
 0x583   : > { %v4863_v19 = vadd.f32 %v4862_v36, %v12167_v23  ;;  %v4864_v7 = vpop.f32.mrb[198].mxu1  ;;  %v5679_v36 = vmul.f32 %v11149_v59, %v14286_v37 }
 0x584   : > { %v4865_v9 = vadd.f32 %v4864_v7, %v12161_v24  ;;  %v4866_v11 = vpop.f32.mrb[199].mxu1  ;;  %v5077_v33 = vmax.f32 %v4861_v38, 0.0  ;;  %v5678_v38 = vmul.f32 %v11142_v1, %v14286_v37  ;;  %v14295_v37 = vld [vmem:[#allocation24_spill] sm:$0xff] }
 0x585   : > { %v4867_v31 = vadd.f32 %v4866_v11, %v12167_v23  ;;  %v5078_v22 = vmax.f32 %v4863_v19, 0.0  ;;  %v14287_v19 = vld [vmem:[#allocation13_spill] sm:$0xff]  ;;  %v14288_v11 = vld [vmem:[#allocation12_spill] sm:$0xff] }
 0x586   : > { %v5079_v39 = vmax.f32 %v4865_v9, 0.0  ;;  %v5676_v7 = vmul.f32 %v11142_v1, %v14287_v19  ;;  %v5533_v9 = vadd.f32 %v5405_v61, %v5259_v5 }
 0x587   : > { %v5080_v29 = vmax.f32 %v4867_v31, 0.0  ;;  %v12310_v31 = vmul.f32 %v11142_v1, %v14288_v11 }
 0x588   : > { %v5171_v55 = vpack.c.bf16 %v5079_v39, %v5077_v33  ;;  %v4234_v30 = vpop.f32.mrb[244].mxu0  ;;  %v12314_v33 = vmul.f32 %v11149_v59, %v14288_v11  ;;  %v14289_v39 = vld [vmem:[#allocation26_spill] sm:$0xff] }
 0x589   : > { %v4235_v3 = vadd.f32 %v4234_v30, %v12022_v4  ;;  %v4236_v28 = vpop.f32.mrb[245].mxu0  ;;  %v5172_v21 = vpack.c.bf16 %v5080_v29, %v5078_v22  ;;  %v5254_v22 = vmul.f32 %v11121_v43, %v14289_v39  ;;  %v5255_v29 = vmul.f32 %v11124_v14, %v14289_v39  ;;  %v14290_v30 = vld [vmem:[#allocation14_spill] sm:$0xff] }
 0x58a   : > { %v4237_v53 = vadd.f32 %v4236_v28, %v12027_v42  ;;  %v4238_v0 = vpop.f32.mrb[246].mxu0  ;;  %v12372_v39 = vmul.f32 %v11149_v59, %v14295_v37 }
 0x58b   : > { %v4239_v40 = vadd.f32 %v4238_v0, %v12022_v4  ;;  %v4240_v51 = vpop.f32.mrb[247].mxu0  ;;  %6292 = vmatprep.mubr.bf16.mxu0 %v5172_v21  ;;  %v4379_v34 = vmax.f32 %v4235_v3, 0.0  ;;  %v12326_v3 = vmul.f32 %v11142_v1, %v14290_v30  ;;  %v12330_v21 = vmul.f32 %v11149_v59, %v14290_v30 }
 0x58c   : > { %v4241_v58 = vadd.f32 %v4240_v51, %v12027_v42  ;;  %6293 = vmatmul.mubr.bf16.gmra.mrb[68].mxu0 %v5171_v55  ;;  %v4380_v13 = vmax.f32 %v4237_v53, 0.0  ;;  %v12322_v55 = vmul.f32 %v11149_v59, %v14287_v19  ;;  %v14291_v53 = vld [vmem:[#allocation17_spill] sm:$0xff]  ;;  %v5528_v5 = vadd.f32 %v5400_v32, %v5254_v22 }
 0x58d   : > { %v4381_v44 = vmax.f32 %v4239_v40, 0.0  ;;  %v12334_v0 = vmul.f32 %v11142_v1, %v14291_v53  ;;  %v12338_v40 = vmul.f32 %v11149_v59, %v14291_v53  ;;  %v14292_v51 = vld [vmem:[#allocation21_spill] sm:$0xff]  ;;  %v5530_v32 = vadd.f32 %v5402_v25, %v5256_v15 }
 0x58e   : > { %v4382_v26 = vmax.f32 %v4241_v58, 0.0  ;;  %v12342_v58 = vmul.f32 %v11142_v1, %v14292_v51  ;;  %v12380_v41 = vadd.f32 %v5674_v27, %v5528_v5  ;;  %v14299_v5 = vld [vmem:[#allocation30_spill] sm:$0xff] }
 0x58f   : > { %v4449_v57 = vpack.c.bf16 %v4381_v44, %v4379_v34 }
 0x590   : > { %v4450_v20 = vpack.c.bf16 %v4382_v26, %v4380_v13  ;;  %v12347_v13 = vadd.f32 %v5678_v38, %v5532_v54  ;;  %v12351_v26 = vmul.f32 %v11149_v59, %v14292_v51  ;;  %v5529_v54 = vadd.f32 %v5401_v45, %v5255_v29  ;;  %v14297_v45 = vld [vmem:[#allocation29_spill] sm:$0xff] }
 0x591   : > { %v12363_v38 = vmul.f32 %v11142_v1, %v14295_v37  ;;  %v5260_v22 = vmul.f32 %v11121_v43, %v14297_v45  ;;  %v5261_v51 = vmul.f32 %v11124_v14, %v14297_v45 }
 0x592   : > { %4978 = vmatprep.mubr.bf16.mxu1 %v4450_v20 }
 0x593   : > { %4979 = vmatmul.mubr.bf16.gmra.mrb[244].mxu1 %v4449_v57  ;;  %v12354_v57 = vadd.f32 %v5679_v36, %v5533_v9  ;;  %v5257_v36 = vmul.f32 %v11124_v14, %v14293_v16  ;;  %v14296_v9 = vld [vmem:[#allocation25_spill] sm:$0xff]  ;;  %v5534_v27 = vadd.f32 %v5406_v17, %v5260_v22  ;;  %v14302_v22 = vld [vmem:[#allocation35_spill] sm:$0xff] }
 0x594   : > { %v4870_v28 = vpop.f32.mrb[200].mxu1  ;;  %v5680_v11 = vmul.f32 %v11142_v1, %v14296_v9 }
 0x595   : > { %v4871_v34 = vadd.f32 %v4870_v28, %v12161_v24  ;;  %v4872_v44 = vpop.f32.mrb[201].mxu1  ;;  %v5531_v37 = vadd.f32 %v5403_v62, %v5257_v36  ;;  %v5409_v62 = vmul.f32 %v11139_v46, %v14299_v5  ;;  %v14300_v36 = vld [vmem:[#allocation31_spill] sm:$0xff] }
 0x596   : > { %v4873_v56 = vadd.f32 %v4872_v44, %v12167_v23  ;;  %v4874_v61 = vpop.f32.mrb[202].mxu1  ;;  %v5681_v44 = vmul.f32 %v11149_v59, %v14296_v9 }
 0x597   : > { %v4875_v20 = vadd.f32 %v4874_v61, %v12161_v24  ;;  %v4876_v63 = vpop.f32.mrb[203].mxu1  ;;  %v5081_v30 = vmax.f32 %v4871_v34, 0.0  ;;  %v14298_v34 = vld [vmem:[#allocation28_spill] sm:$0xff] }
 0x598   : > { %v4877_v19 = vadd.f32 %v4876_v63, %v12167_v23  ;;  %v5082_v29 = vmax.f32 %v4873_v56, 0.0  ;;  %v12382_v63 = vadd.f32 %v5675_v35, %v5529_v54  ;;  %v5262_v25 = vmul.f32 %v11121_v43, %v14298_v34 }
 0x599   : > { %v5083_v28 = vmax.f32 %v4875_v20, 0.0  ;;  %v5408_v35 = vmul.f32 %v11133_v60, %v14299_v5 }
 0x59a   : > { %v5084_v53 = vmax.f32 %v4877_v19, 0.0  ;;  %v5263_v19 = vmul.f32 %v11124_v14, %v14298_v34  ;;  %v5412_v34 = vmul.f32 %v11133_v60, %v14302_v22 }
 0x59b   : > { %v5173_v16 = vpack.c.bf16 %v5083_v28, %v5081_v30  ;;  %v4244_v61 = vpop.f32.mrb[248].mxu0  ;;  %v12390_v30 = vadd.f32 %v5676_v7, %v5530_v32  ;;  %v14301_v7 = vld [vmem:[#allocation32_spill] sm:$0xff]  ;;  %v5265_v32 = vmul.f32 %v11124_v14, %v14300_v36 }
 0x59c   : > { %v4245_v15 = vadd.f32 %v4244_v61, %v12022_v4  ;;  %v4246_v20 = vpop.f32.mrb[249].mxu0  ;;  %v5174_v56 = vpack.c.bf16 %v5084_v53, %v5082_v29  ;;  %v5535_v61 = vadd.f32 %v5407_v18, %v5261_v51  ;;  %v5264_v29 = vmul.f32 %v11121_v43, %v14300_v36  ;;  %v14304_v36 = vld [vmem:[#allocation33_spill] sm:$0xff] }
 0x59d   : > { %v4247_v45 = vadd.f32 %v4246_v20, %v12027_v42  ;;  %v4248_v9 = vpop.f32.mrb[250].mxu0  ;;  %v5410_v17 = vmul.f32 %v11133_v60, %v14301_v7  ;;  %v5411_v51 = vmul.f32 %v11139_v46, %v14301_v7  ;;  %v5537_v2 = vadd.f32 %v5409_v62, %v5263_v19  ;;  %v14305_v19 = vld [vmem:[#allocation36_spill] sm:$0xff] }
 0x59e   : > { %v4249_v54 = vadd.f32 %v4248_v9, %v12022_v4  ;;  %v4250_v28 = vpop.f32.mrb[251].mxu0  ;;  %6302 = vmatprep.mubr.bf16.mxu0 %v5174_v56  ;;  %v4383_v20 = vmax.f32 %v4245_v15, 0.0  ;;  %v5413_v56 = vmul.f32 %v11139_v46, %v14302_v22  ;;  %v5684_v8 = vmul.f32 %v11142_v1, %v14304_v36 }
 0x59f   : > { %v4251_v53 = vadd.f32 %v4250_v28, %v12027_v42  ;;  %6303 = vmatmul.mubr.bf16.gmra.mrb[72].mxu0 %v5173_v16  ;;  %v4384_v9 = vmax.f32 %v4247_v45, 0.0  ;;  %v5536_v16 = vadd.f32 %v5408_v35, %v5262_v25  ;;  %v14303_v28 = vld [vmem:[#allocation34_spill] sm:$0xff]  ;;  %v12417_v7 = vadd.f32 %v12322_v55, %v5531_v37 }
 0x5a0   : > { %v4385_v18 = vmax.f32 %v4249_v54, 0.0  ;;  %v5266_v49 = vmul.f32 %v11121_v43, %v14303_v28  ;;  %v5267_v15 = vmul.f32 %v11124_v14, %v14303_v28  ;;  %v5685_v45 = vmul.f32 %v11149_v59, %v14304_v36 }
 0x5a1   : > { %v4386_v5 = vmax.f32 %v4251_v53, 0.0  ;;  %v12421_v25 = vadd.f32 %v5680_v11, %v5534_v27  ;;  %v5538_v35 = vadd.f32 %v5410_v17, %v5264_v29  ;;  %v5539_v22 = vadd.f32 %v5411_v51, %v5265_v32 }
 0x5a2   : > { %v4451_v10 = vpack.c.bf16 %v4385_v18, %v4383_v20  ;;  %v5540_v53 = vadd.f32 %v5412_v34, %v5266_v49  ;;  %v5541_v20 = vadd.f32 %v5413_v56, %v5267_v15  ;;  %v5268_v62 = vmul.f32 %v11121_v43, %v14305_v19  ;;  %v14306_v18 = vld [vmem:[#allocation37_spill] sm:$0xff]  ;;  %v14307_v34 = vld [vmem:[#allocation38_spill] sm:$0xff]  ;;  %v14312_v15 = vld [vmem:[#allocation52_spill] sm:$0xff] }
 0x5a3   : > { %v4452_v54 = vpack.c.bf16 %v4386_v5, %v4384_v9  ;;  %v5414_v28 = vmul.f32 %v11133_v60, %v14306_v18  ;;  %v5269_v55 = vmul.f32 %v11124_v14, %v14305_v19  ;;  %v5415_v37 = vmul.f32 %v11139_v46, %v14306_v18 }
 0x5a4   : > { %v12431_v49 = vadd.f32 %v5681_v44, %v5535_v61  ;;  %v12434_v11 = vadd.f32 %v12310_v31, %v5536_v16  ;;  %v12437_v27 = vadd.f32 %v12314_v33, %v5537_v2  ;;  %v12439_v29 = vadd.f32 %v5684_v8, %v5538_v35  ;;  %v14308_v44 = vld [vmem:[#allocation49_spill] sm:$0xff]  ;;  %v14315_v35 = vld [vmem:[#allocation40_spill] sm:$0xff] }
 0x5a5   : > { %4988 = vmatprep.mubr.bf16.mxu1 %v4452_v54  ;;  %v12441_v17 = vadd.f32 %v5685_v45, %v5539_v22  ;;  %v12444_v32 = vadd.f32 %v12326_v3, %v5540_v53  ;;  %v5688_v51 = vmul.f32 %v11142_v1, %v14307_v34  ;;  %v12452_v31 = vmul.f32 %v11121_v43, %v14308_v44  ;;  %v14311_v3 = vld [vmem:[#allocation41_spill] sm:$0xff] }
 0x5a6   : > { %4989 = vmatmul.mubr.bf16.gmra.mrb[248].mxu1 %v4451_v10  ;;  %v5689_v10 = vmul.f32 %v11149_v59, %v14307_v34  ;;  %v12456_v2 = vmul.f32 %v11124_v14, %v14308_v44  ;;  %v12459_v33 = vadd.f32 %v12330_v21, %v5541_v20  ;;  %v12463_v61 = vmul.f32 %v11121_v43, %v14311_v3  ;;  %v14317_v44 = vld [vmem:[#allocation43_spill] sm:$0xff] }
 0x5a7   : > { %14309 = vst [vmem:[#allocation163_spill] sm:$0xff] %v12452_v31  ;;  %v5542_v5 = vadd.f32 %v5414_v28, %v5268_v62  ;;  %v5543_v16 = vadd.f32 %v5415_v37, %v5269_v55  ;;  %v12468_v36 = vmul.f32 %v11124_v14, %v14311_v3  ;;  %v12472_v54 = vmul.f32 %v11121_v43, %v14312_v15  ;;  %v14316_v28 = vld [vmem:[#allocation39_spill] sm:$0xff] }
 0x5a8   : > { %14310 = vst [vmem:[#allocation169_spill] sm:$0xff] %v12456_v2  ;;  %v4880_v8 = vpop.f32.mrb[204].mxu1  ;;  %v12476_v21 = vmul.f32 %v11124_v14, %v14312_v15  ;;  %v5416_v22 = vmul.f32 %v11133_v60, %v14315_v35  ;;  %v5270_v55 = vmul.f32 %v11121_v43, %v14316_v28  ;;  %v5271_v34 = vmul.f32 %v11124_v14, %v14316_v28 }
 0x5a9   : > { %v4881_v56 = vadd.f32 %v4880_v8, %v12161_v24  ;;  %v4882_v9 = vpop.f32.mrb[205].mxu1  ;;  %14313 = vst [vmem:[#allocation168_spill] sm:$0xff] %v12472_v54  ;;  %v12482_v62 = vadd.f32 %v5688_v51, %v5542_v5  ;;  %v12484_v18 = vadd.f32 %v5689_v10, %v5543_v16  ;;  %v12493_v8 = vmul.f32 %v11121_v43, %v14317_v44  ;;  %v14318_v51 = vld [vmem:[#allocation54_spill] sm:$0xff] }
 0x5aa   : > { %14314 = vst [vmem:[#allocation174_spill] sm:$0xff] %v12476_v21  ;;  %v4883_v45 = vadd.f32 %v4882_v9, %v12167_v23  ;;  %v4884_v53 = vpop.f32.mrb[206].mxu1  ;;  %v12497_v3 = vmul.f32 %v11124_v14, %v14317_v44  ;;  %v12501_v10 = vmul.f32 %v11121_v43, %v14318_v51  ;;  %v12505_v9 = vmul.f32 %v11124_v14, %v14318_v51 }
 0x5ab   : > { %v4885_v20 = vadd.f32 %v4884_v53, %v12161_v24  ;;  %v4886_v19 = vpop.f32.mrb[207].mxu1  ;;  %v5085_v5 = vmax.f32 %v4881_v56, 0.0  ;;  %v5544_v28 = vadd.f32 %v5416_v22, %v5270_v55  ;;  %v5417_v47 = vmul.f32 %v11139_v46, %v14315_v35  ;;  %v14322_v22 = vld [vmem:[#allocation47_spill] sm:$0xff] }
 0x5ac   : > { %v4887_v37 = vadd.f32 %v4886_v19, %v12167_v23  ;;  %14319 = vst [vmem:[#allocation18_spill] sm:$0xff] %v12501_v10  ;;  %14320 = vst [vmem:[#allocation20_spill] sm:$0xff] %v12505_v9  ;;  %v5086_v15 = vmax.f32 %v4883_v45, 0.0  ;;  %v12516_v51 = vmul.f32 %v11124_v14, %v14321_v6  ;;  %v12521_v55 = vmul.f32 %v11121_v43, %v14322_v22  ;;  %v14329_v9 = vld [vmem:[#allocation42_spill] sm:$0xff] }
 0x5ad   : > { %v5087_v16 = vmax.f32 %v4885_v20, 0.0  ;;  %v12525_v35 = vmul.f32 %v11124_v14, %v14322_v22  ;;  %v12546_v48 = vadd.f32 %v12334_v0, %v5544_v28  ;;  %v14335_v10 = vld [vmem:[#allocation46_spill] sm:$0xff] }
 0x5ae   : > { %v5088_v53 = vmax.f32 %v4887_v37, 0.0  ;;  %v4254_v19 = vpop.f32.mrb[252].mxu0  ;;  %v14323_v37 = vld [vmem:[#allocation56_spill] sm:$0xff] }
 0x5af   : > { %v5175_v52 = vpack.c.bf16 %v5087_v16, %v5085_v5  ;;  %v4255_v44 = vadd.f32 %v4254_v19, %v12022_v4  ;;  %v4256_v50 = vpop.f32.mrb[253].mxu0  ;;  %v12529_v5 = vmul.f32 %v11121_v43, %v14323_v37  ;;  %v12533_v6 = vmul.f32 %v11124_v14, %v14323_v37  ;;  %v14326_v16 = vld [vmem:[#allocation58_spill] sm:$0xff] }
 0x5b0   : > { %v4257_v56 = vadd.f32 %v4256_v50, %v12027_v42  ;;  %v4258_v45 = vpop.f32.mrb[254].mxu0  ;;  %v5176_v20 = vpack.c.bf16 %v5088_v53, %v5086_v15  ;;  %v12537_v50 = vmul.f32 %v11121_v43, %v14326_v16  ;;  %v12542_v19 = vmul.f32 %v11124_v14, %v14326_v16 }
 0x5b1   : > { %14324 = vst [vmem:[#allocation8_spill] sm:$0xff] %v12529_v5  ;;  %14325 = vst [vmem:[#allocation9_spill] sm:$0xff] %v12533_v6  ;;  %v4259_v15 = vadd.f32 %v4258_v45, %v12022_v4  ;;  %v4260_v53 = vpop.f32.mrb[255].mxu0  ;;  %v5545_v5 = vadd.f32 %v5417_v47, %v5271_v34  ;;  %v4387_v37 = vmax.f32 %v4255_v44, 0.0  ;;  %v5419_v4 = vmul.f32 %v11139_v46, %v14329_v9  ;;  %v14330_v45 = vld [vmem:[#allocation61_spill] sm:$0xff]  ;;  %v9632_v47 = vld [vmem:[%s13831_s4] sm:$0xff] }
 0x5b2   : > { %14327 = vst [vmem:[#allocation16_spill] sm:$0xff] %v12537_v50  ;;  %14328 = vst [vmem:[#allocation10_spill] sm:$0xff] %v12542_v19  ;;  %v4261_v22 = vadd.f32 %v4260_v53, %v12027_v42  ;;  %6312 = vmatprep.mubr.bf16.mxu0 %v5176_v20  ;;  %v5418_v50 = vmul.f32 %v11133_v60, %v14329_v9  ;;  %v12554_v16 = vmul.f32 %v11121_v43, %v14330_v45  ;;  %v14332_v20 = vld [vmem:[#allocation48_spill] sm:$0xff] }
 0x5b3   : > { %v4389_v6 = vmax.f32 %v4259_v15, 0.0  ;;  %6313 = vmatmul.mubr.bf16.gmra.mrb[76].mxu0 %v5175_v52  ;;  %v4388_v19 = vmax.f32 %v4257_v56, 0.0  ;;  %v5420_v0 = vmul.f32 %v11133_v60, %v14332_v20  ;;  %v14333_v52 = vld [vmem:[#allocation19_spill] sm:$0xff]  ;;  %v14334_v44 = vld [vmem:[#allocation44_spill] sm:$0xff]  ;;  %v5421_v15 = vmul.f32 %v11139_v46, %v14332_v20  ;;  %v9633_v56 = vld [vmem:[%s13831_s4 + $0x8] sm:$0xff] }
 0x5b4   : > { %14331 = vst [vmem:[#allocation11_spill] sm:$0xff] %v12554_v16  ;;  %v4390_v42 = vmax.f32 %v4261_v22, 0.0  ;;  %v12562_v34 = vrot.slane %v9632_v47, %v14333_v52  ;;  %v5692_v9 = vmul.f32 %v11142_v1, %v14334_v44  ;;  %v12572_v22 = vrot.slane %v9633_v56, %v14333_v52 }
 0x5b5   : > { %v4453_v28 = vpack.c.bf16 %v4389_v6, %v4387_v37  ;;  %v5693_v47 = vmul.f32 %v11149_v59, %v14334_v44  ;;  %v5274_v6 = vmul.f32 %v11121_v43, %v14335_v10  ;;  %v12580_v37 = vmul.f32 %v11124_v14, %v14330_v45 }
 0x5b6   : > { %v6124_v53 = vpop.f32.mrb[0].mxu0  ;;  %v4454_v16 = vpack.c.bf16 %v4390_v42, %v4388_v19  ;;  %v5546_v54 = vadd.f32 %v5418_v50, %v12463_v61  ;;  %v5275_v52 = vmul.f32 %v11124_v14, %v14335_v10  ;;  %v12588_v44 = vadd.f32 %v12338_v40, %v5545_v5  ;;  %v14337_v40 = vld [vmem:[#allocation63_spill] sm:$0xff] }
 0x5b7   : > { %14336 = vst [vmem:[#allocation13_spill] sm:$0xff] %v12580_v37  ;;  %v6125_v20 = vadd.f32 %v6124_v53, %v12380_v41  ;;  %v6126_v21 = vpop.f32.mrb[1].mxu0  ;;  %v5547_v56 = vadd.f32 %v5419_v4, %v12468_v36  ;;  %v5548_v2 = vadd.f32 %v5420_v0, %v5274_v6  ;;  %v12601_v5 = vmul.f32 %v11142_v1, %v14337_v40 }
 0x5b8   : > { %v6127_v19 = vadd.f32 %v6126_v21, %v12382_v63  ;;  %4998 = vmatprep.mubr.bf16.mxu1 %v4454_v16  ;;  %v6128_v42 = vpop.f32.mrb[2].mxu0  ;;  %v12593_v61 = vadd.f32 %v5692_v9, %v5546_v54  ;;  %v5549_v50 = vadd.f32 %v5421_v15, %v5275_v52  ;;  %v14338_v54 = vld [vmem:[#allocation68_spill] sm:$0xff] }
 0x5b9   : > { %v6451_v45 = vadd.f32 %v12562_v34, %v6125_v20  ;;  %v6129_v41 = vadd.f32 %v6128_v42, %v12390_v30  ;;  %4999 = vmatmul.mubr.bf16.gmra.mrb[252].mxu1 %v4453_v28  ;;  %v6130_v53 = vpop.f32.mrb[3].mxu0  ;;  %v12597_v21 = vadd.f32 %v5693_v47, %v5547_v56  ;;  %v12606_v30 = vmul.f32 %v11149_v59, %v14337_v40  ;;  %v14340_v47 = vld [vmem:[#allocation73_spill] sm:$0xff] }
 0x5ba   : > { %v6452_v10 = vadd.f32 %v12572_v22, %v6127_v19  ;;  %v6131_v63 = vadd.f32 %v6130_v53, %v12417_v7  ;;  %v12610_v16 = vmul.f32 %v11142_v1, %v14338_v54  ;;  %v12614_v7 = vmul.f32 %v11149_v59, %v14338_v54 }
 0x5bb   : > { %v6453_v36 = vadd.f32 %v12562_v34, %v6129_v41  ;;  %v4890_v4 = vpop.f32.mrb[208].mxu1  ;;  %v12619_v15 = vadd.f32 %v12342_v58, %v5548_v2  ;;  %v12623_v6 = vmul.f32 %v11142_v1, %v14340_v47  ;;  %v6579_v20 = vmax.f32 %v6451_v45, 0.0  ;;  %v14342_v58 = vld [vmem:[#allocation50_spill] sm:$0xff] }
 0x5bc   : > { %14339 = vst [vmem:[#allocation12_spill] sm:$0xff] %v12614_v7  ;;  %v6454_v0 = vadd.f32 %v12572_v22, %v6131_v63  ;;  %v4891_v28 = vadd.f32 %v4890_v4, %v12161_v24  ;;  %v4892_v9 = vpop.f32.mrb[209].mxu1  ;;  %v12627_v56 = vadd.f32 %v12351_v26, %v5549_v50  ;;  %v6580_v41 = vmax.f32 %v6452_v10, 0.0 }
 0x5bd   : > { %14341 = vst [vmem:[#allocation26_spill] sm:$0xff] %v12623_v6  ;;  %v6581_v52 = vmax.f32 %v6453_v36, 0.0  ;;  %v4893_v19 = vadd.f32 %v4892_v9, %v12167_v23  ;;  %v4894_v42 = vpop.f32.mrb[210].mxu1  ;;  %v5422_v2 = vmul.f32 %v11133_v60, %v14342_v58  ;;  %v5423_v9 = vmul.f32 %v11139_v46, %v14342_v58  ;;  %v14343_v58 = vld [vmem:[#allocation51_spill] sm:$0xff] }
 0x5be   : > { %v6582_v53 = vmax.f32 %v6454_v0, 0.0  ;;  %v4895_v63 = vadd.f32 %v4894_v42, %v12161_v24  ;;  %v4896_v40 = vpop.f32.mrb[211].mxu1  ;;  %v6134_v4 = vpop.f32.mrb[4].mxu0  ;;  %v5089_v26 = vmax.f32 %v4891_v28, 0.0  ;;  %v5696_v28 = vmul.f32 %v11142_v1, %v14343_v58 }
 0x5bf   : > { %v6707_v54 = vpack.c.bf16 %v6581_v52, %v6579_v20  ;;  %v4897_v37 = vadd.f32 %v4896_v40, %v12167_v23  ;;  %v6135_v45 = vadd.f32 %v6134_v4, %v12347_v13  ;;  %v6136_v36 = vpop.f32.mrb[5].mxu0  ;;  %v5090_v6 = vmax.f32 %v4893_v19, 0.0 }
 0x5c0   : > { %v5091_v50 = vmax.f32 %v4895_v63, 0.0  ;;  %v6137_v10 = vadd.f32 %v6136_v36, %v12354_v57  ;;  %v6138_v0 = vpop.f32.mrb[6].mxu0  ;;  %v6708_v42 = vpack.c.bf16 %v6582_v53, %v6580_v41  ;;  %v5697_v19 = vmul.f32 %v11149_v59, %v14343_v58  ;;  %v14344_v63 = vld [vmem:[#allocation78_spill] sm:$0xff]  ;;  %v14347_v58 = vld [vmem:[#allocation57_spill] sm:$0xff] }
 0x5c1   : > { %v5092_v31 = vmax.f32 %v4897_v37, 0.0  ;;  %v6455_v7 = vadd.f32 %v12562_v34, %v6135_v45  ;;  %v6139_v20 = vadd.f32 %v6138_v0, %v12421_v25  ;;  %v6140_v52 = vpop.f32.mrb[7].mxu0  ;;  %v5550_v37 = vadd.f32 %v5422_v2, %v12493_v8 }
 0x5c2   : > { %v5177_v40 = vpack.c.bf16 %v5091_v50, %v5089_v26  ;;  %v6456_v13 = vadd.f32 %v12572_v22, %v6137_v10  ;;  %v6141_v4 = vadd.f32 %v6140_v52, %v12431_v49  ;;  %7004 = vmatprep.mubr.bf16.mxu1 %v6708_v42  ;;  %v5551_v53 = vadd.f32 %v5423_v9, %v12497_v3  ;;  %v14346_v42 = vld [vmem:[#allocation53_spill] sm:$0xff] }
 0x5c3   : > { %v6457_v57 = vadd.f32 %v12562_v34, %v6139_v20  ;;  %7005 = vmatmul.mubr.bf16.vlgmr.msra.gmra.mrb[0].mxu1 %v6707_v54  ;;  %v5178_v41 = vpack.c.bf16 %v5092_v31, %v5090_v6  ;;  %v12651_v49 = vmul.f32 %v11149_v59, %v14340_v47  ;;  %v12655_v45 = vmul.f32 %v11142_v1, %v14344_v63  ;;  %v14345_v31 = vld [vmem:[#allocation55_spill] sm:$0xff] }
 0x5c4   : > { %v6458_v25 = vadd.f32 %v12572_v22, %v6141_v4  ;;  %v6583_v36 = vmax.f32 %v6455_v7, 0.0  ;;  %v5424_v8 = vmul.f32 %v11133_v60, %v14345_v31  ;;  %v12661_v6 = vmul.f32 %v11149_v59, %v14344_v63  ;;  %v14348_v63 = vld [vmem:[#allocation59_spill] sm:$0xff] }
 0x5c5   : > { %v6585_v54 = vmax.f32 %v6457_v57, 0.0  ;;  %6322 = vmatprep.mubr.bf16.mxu0 %v5178_v41  ;;  %v6584_v2 = vmax.f32 %v6456_v13, 0.0  ;;  %v12663_v47 = vadd.f32 %v5696_v28, %v5550_v37  ;;  %v5425_v26 = vmul.f32 %v11139_v46, %v14345_v31  ;;  %v14349_v31 = vld [vmem:[#allocation83_spill] sm:$0xff] }
 0x5c6   : > { %v6586_v3 = vmax.f32 %v6458_v25, 0.0  ;;  %v6144_v9 = vpop.f32.mrb[8].mxu0  ;;  %6323 = vmatmul.mubr.bf16.gmra.mrb[80].mxu0 %v5177_v40  ;;  %v12668_v0 = vadd.f32 %v5697_v19, %v5551_v53  ;;  %v5278_v20 = vmul.f32 %v11121_v43, %v14346_v42  ;;  %v5279_v40 = vmul.f32 %v11124_v14, %v14346_v42 }
 0x5c7   : > { %v6709_v50 = vpack.c.bf16 %v6585_v54, %v6583_v36  ;;  %v6145_v7 = vadd.f32 %v6144_v9, %v12434_v11  ;;  %v6146_v10 = vpop.f32.mrb[9].mxu0  ;;  %v5426_v28 = vmul.f32 %v11133_v60, %v14347_v58  ;;  %v5427_v19 = vmul.f32 %v11139_v46, %v14347_v58  ;;  %v14350_v9 = vld [vmem:[#allocation87_spill] sm:$0xff] }
 0x5c8   : > { %v6147_v52 = vadd.f32 %v6146_v10, %v12437_v27  ;;  %v6148_v13 = vpop.f32.mrb[10].mxu0  ;;  %v6710_v4 = vpack.c.bf16 %v6586_v3, %v6584_v2  ;;  %v5552_v37 = vadd.f32 %v5424_v8, %v5278_v20  ;;  %v5553_v53 = vadd.f32 %v5425_v26, %v5279_v40 }
 0x5c9   : > { %v6459_v57 = vadd.f32 %v12562_v34, %v6145_v7  ;;  %v6149_v11 = vadd.f32 %v6148_v13, %v12439_v29  ;;  %v6150_v41 = vpop.f32.mrb[11].mxu0  ;;  %v5700_v36 = vmul.f32 %v11142_v1, %v14348_v63  ;;  %v5701_v29 = vmul.f32 %v11149_v59, %v14348_v63 }
 0x5ca   : > { %v6460_v25 = vadd.f32 %v12572_v22, %v6147_v52  ;;  %v6151_v27 = vadd.f32 %v6150_v41, %v12441_v17  ;;  %7014 = vmatprep.mubr.bf16.mxu1 %v6710_v4  ;;  %v12690_v8 = vmul.f32 %v11142_v1, %v14349_v31  ;;  %v12694_v2 = vmul.f32 %v11149_v59, %v14349_v31 }
 0x5cb   : > { %v6461_v54 = vadd.f32 %v12562_v34, %v6149_v11  ;;  %7015 = vmatmul.mubr.bf16.gmra.mrb[4].mxu1 %v6709_v50  ;;  %v5554_v3 = vadd.f32 %v5426_v28, %v12512_v12  ;;  %v12700_v26 = vmul.f32 %v11142_v1, %v14350_v9  ;;  %v12704_v50 = vmul.f32 %v11149_v59, %v14350_v9 }
 0x5cc   : > { %v6462_v17 = vadd.f32 %v12572_v22, %v6151_v27  ;;  %v6587_v7 = vmax.f32 %v6459_v57, 0.0  ;;  %v12707_v42 = vadd.f32 %v12363_v38, %v5552_v37  ;;  %v5555_v20 = vadd.f32 %v5427_v19, %v12516_v51 }
 0x5cd   : > { %v6589_v10 = vmax.f32 %v6461_v54, 0.0  ;;  %v6588_v52 = vmax.f32 %v6460_v25, 0.0  ;;  %v12711_v12 = vadd.f32 %v12372_v39, %v5553_v53  ;;  %v12713_v58 = vadd.f32 %v5700_v36, %v5554_v3  ;;  %v14351_v39 = vld [vmem:[#allocation62_spill] sm:$0xff] }
 0x5ce   : > { %v6590_v13 = vmax.f32 %v6462_v17, 0.0  ;;  %v6154_v40 = vpop.f32.mrb[12].mxu0  ;;  %v12717_v38 = vadd.f32 %v5701_v29, %v5555_v20  ;;  %v5428_v53 = vmul.f32 %v11133_v60, %v14351_v39  ;;  %v5429_v29 = vmul.f32 %v11139_v46, %v14351_v39 }
 0x5cf   : > { %v4900_v4 = vpop.f32.mrb[212].mxu1  ;;  %v6711_v28 = vpack.c.bf16 %v6589_v10, %v6587_v7  ;;  %v6155_v57 = vadd.f32 %v6154_v40, %v12444_v32  ;;  %v6156_v27 = vpop.f32.mrb[13].mxu0  ;;  %v14352_v7 = vld [vmem:[#allocation60_spill] sm:$0xff] }
 0x5d0   : > { %v4901_v11 = vadd.f32 %v4900_v4, %v12161_v24  ;;  %v4902_v41 = vpop.f32.mrb[213].mxu1  ;;  %v6157_v37 = vadd.f32 %v6156_v27, %v12459_v33  ;;  %v6158_v25 = vpop.f32.mrb[14].mxu0  ;;  %v6712_v63 = vpack.c.bf16 %v6590_v13, %v6588_v52  ;;  %v5282_v10 = vmul.f32 %v11121_v43, %v14352_v7 }
 0x5d1   : > { %v4903_v51 = vadd.f32 %v4902_v41, %v12167_v23  ;;  %v4904_v19 = vpop.f32.mrb[214].mxu1  ;;  %v6463_v36 = vadd.f32 %v12562_v34, %v6155_v57  ;;  %v6159_v32 = vadd.f32 %v6158_v25, %v12482_v62  ;;  %v6160_v17 = vpop.f32.mrb[15].mxu0  ;;  %v5283_v62 = vmul.f32 %v11124_v14, %v14352_v7 }
 0x5d2   : > { %v4905_v54 = vadd.f32 %v4904_v19, %v12161_v24  ;;  %v4906_v31 = vpop.f32.mrb[215].mxu1  ;;  %v6464_v3 = vadd.f32 %v12572_v22, %v6157_v37  ;;  %v6161_v9 = vadd.f32 %v6160_v17, %v12484_v18  ;;  %7024 = vmatprep.mubr.bf16.mxu1 %v6712_v63  ;;  %v5093_v20 = vmax.f32 %v4901_v11, 0.0  ;;  %v14354_v17 = vld [vmem:[#allocation64_spill] sm:$0xff] }
 0x5d3   : > { %v4907_v33 = vadd.f32 %v4906_v31, %v12167_v23  ;;  %v6465_v13 = vadd.f32 %v12562_v34, %v6159_v32  ;;  %7025 = vmatmul.mubr.bf16.gmra.mrb[8].mxu1 %v6711_v28  ;;  %v5094_v4 = vmax.f32 %v4903_v51, 0.0  ;;  %v5556_v41 = vadd.f32 %v5428_v53, %v5282_v10 }
 0x5d4   : > { %v5095_v52 = vmax.f32 %v4905_v54, 0.0  ;;  %v6466_v57 = vadd.f32 %v12572_v22, %v6161_v9  ;;  %v6591_v27 = vmax.f32 %v6463_v36, 0.0  ;;  %v5557_v19 = vadd.f32 %v5429_v29, %v5283_v62  ;;  %v14353_v54 = vld [vmem:[#allocation89_spill] sm:$0xff] }
 0x5d5   : > { %v5096_v40 = vmax.f32 %v4907_v33, 0.0  ;;  %v6593_v18 = vmax.f32 %v6465_v13, 0.0  ;;  %v6592_v25 = vmax.f32 %v6464_v3, 0.0  ;;  %v12739_v32 = vmul.f32 %v11142_v1, %v14353_v54 }
 0x5d6   : > { %v5179_v37 = vpack.c.bf16 %v5095_v52, %v5093_v20  ;;  %v6594_v63 = vmax.f32 %v6466_v57, 0.0  ;;  %v6164_v39 = vpop.f32.mrb[16].mxu0  ;;  %v5430_v33 = vmul.f32 %v11133_v60, %v14354_v17  ;;  %v5431_v53 = vmul.f32 %v11139_v46, %v14354_v17 }
 0x5d7   : > { %v5180_v11 = vpack.c.bf16 %v5096_v40, %v5094_v4  ;;  %v6713_v28 = vpack.c.bf16 %v6593_v18, %v6591_v27  ;;  %v6165_v31 = vadd.f32 %v6164_v39, %v12546_v48  ;;  %v6166_v51 = vpop.f32.mrb[17].mxu0  ;;  %v12748_v9 = vadd.f32 %v12601_v5, %v5556_v41  ;;  %v14356_v4 = vld [vmem:[#allocation65_spill] sm:$0xff]  ;;  %v14357_v18 = vld [vmem:[#allocation66_spill] sm:$0xff] }
 0x5d8   : > { %v6167_v36 = vadd.f32 %v6166_v51, %v12588_v44  ;;  %v6168_v29 = vpop.f32.mrb[18].mxu0  ;;  %v6714_v3 = vpack.c.bf16 %v6594_v63, %v6592_v25  ;;  %v12752_v7 = vmul.f32 %v11149_v59, %v14353_v54  ;;  %v12757_v52 = vadd.f32 %v12606_v30, %v5557_v19  ;;  %v14355_v44 = vld [vmem:[#allocation67_spill] sm:$0xff]  ;;  %v9546_v41 = vld [vmem:[#allocation2 + $0x604] ss:$8 sps:$4 sm:$0xff]  }
 0x5d9   : > { %6332 = vmatprep.mubr.bf16.mxu0 %v5180_v11  ;;  %v6467_v48 = vadd.f32 %v12562_v34, %v6165_v31  ;;  %v6169_v10 = vadd.f32 %v6168_v29, %v12593_v61  ;;  %v6170_v20 = vpop.f32.mrb[19].mxu0  ;;  %v5432_v13 = vmul.f32 %v11133_v60, %v14355_v44  ;;  %v5704_v40 = vmul.f32 %v11142_v1, %v14356_v4  ;;  %v9544_v61 = vld [vmem:[#allocation2 + $0x600] ss:$8 sps:$4 sm:$0xff]  }
 0x5da   : > { %6333 = vmatmul.mubr.bf16.gmra.mrb[84].mxu0 %v5179_v37  ;;  %v6468_v62 = vadd.f32 %v12572_v22, %v6167_v36  ;;  %v6171_v5 = vadd.f32 %v6170_v20, %v12597_v21  ;;  %7034 = vmatprep.mubr.bf16.mxu1 %v6714_v3  ;;  %v5433_v57 = vmul.f32 %v11139_v46, %v14355_v44  ;;  %v14358_v21 = vld [vmem:[#allocation103_spill] sm:$0xff] }
 0x5db   : > { %v6469_v27 = vadd.f32 %v12562_v34, %v6169_v10  ;;  %7035 = vmatmul.mubr.bf16.gmra.mrb[12].mxu1 %v6713_v28  ;;  %v5558_v30 = vadd.f32 %v5430_v33, %v12521_v55  ;;  %v5559_v37 = vadd.f32 %v5431_v53, %v12525_v35  ;;  %v5286_v19 = vmul.f32 %v11121_v43, %v14357_v18  ;;  %v14359_v10 = vld [vmem:[#allocation69_spill] sm:$0xff] }
 0x5dc   : > { %v12774_v25 = vmul.f32 %v11121_v43, %v14358_v21  ;;  %v6470_v63 = vadd.f32 %v12572_v22, %v6171_v5  ;;  %v5705_v39 = vmul.f32 %v11149_v59, %v14356_v4  ;;  %v5287_v11 = vmul.f32 %v11124_v14, %v14357_v18  ;;  %7718 = vmatprep.subr.bf16.mxu0 %v9546_v41  ;;  %v14360_v4 = vld [vmem:[#allocation91_spill] sm:$0xff] }
 0x5dd   : > { %v12783_v55 = vmul.f32 %v11124_v14, %v14358_v21  ;;  %v6595_v35 = vmax.f32 %v6467_v48, 0.0  ;;  %v6597_v54 = vmax.f32 %v6469_v27, 0.0  ;;  %v5560_v28 = vadd.f32 %v5432_v13, %v5286_v19  ;;  %7719 = vmatpush1.bf16.msra.mxu0 %v9544_v61  ;;  %v14361_v21 = vld [vmem:[#allocation12_spill] sm:$0xff] }
 0x5de   : > { %v6596_v31 = vmax.f32 %v6468_v62, 0.0  ;;  %v6598_v51 = vmax.f32 %v6470_v63, 0.0  ;;  %v6174_v17 = vpop.f32.mrb[20].mxu0  ;;  %v12785_v33 = vadd.f32 %v5704_v40, %v5558_v30  ;;  %v5561_v53 = vadd.f32 %v5433_v57, %v5287_v11  ;;  %v14362_v11 = vld [vmem:[#allocation163_spill] sm:$0xff] }
 0x5df   : > { %v6715_v36 = vpack.c.bf16 %v6597_v54, %v6595_v35  ;;  %v6175_v29 = vadd.f32 %v6174_v17, %v12619_v15  ;;  %v6176_v3 = vpop.f32.mrb[21].mxu0  ;;  %v5434_v20 = vmul.f32 %v11133_v60, %v14359_v10  ;;  %v5435_v44 = vmul.f32 %v11139_v46, %v14359_v10  ;;  %v14363_v54 = vld [vmem:[#allocation169_spill] sm:$0xff]  ;;  %v14364_v17 = vld [vmem:[#allocation70_spill] sm:$0xff] }
 0x5e0   : > { %v6177_v48 = vadd.f32 %v6176_v3, %v12627_v56  ;;  %v6178_v13 = vpop.f32.mrb[22].mxu0  ;;  %v6716_v5 = vpack.c.bf16 %v6598_v51, %v6596_v31  ;;  %v12793_v62 = vadd.f32 %v5705_v39, %v5559_v37  ;;  %v12797_v40 = vmul.f32 %v11142_v1, %v14360_v4 }
 0x5e1   : > { %v6471_v57 = vadd.f32 %v12562_v34, %v6175_v29  ;;  %v6179_v15 = vadd.f32 %v6178_v13, %v12663_v47  ;;  %v6180_v41 = vpop.f32.mrb[23].mxu0  ;;  %v12802_v27 = vadd.f32 %v12610_v16, %v5560_v28  ;;  %v12806_v56 = vmul.f32 %v11149_v59, %v14360_v4 }
 0x5e2   : > { %v4910_v61 = vpop.f32.mrb[216].mxu1  ;;  %v6472_v30 = vadd.f32 %v12572_v22, %v6177_v48  ;;  %v6181_v18 = vadd.f32 %v6180_v41, %v12668_v0  ;;  %7044 = vmatprep.mubr.bf16.mxu1 %v6716_v5  ;;  %v12812_v63 = vadd.f32 %v14361_v21, %v5561_v53  ;;  %v5562_v35 = vadd.f32 %v5434_v20, %v14362_v11  ;;  %v14365_v20 = vld [vmem:[#allocation72_spill] sm:$0xff] }
 0x5e3   : > { %v4911_v37 = vadd.f32 %v4910_v61, %v12161_v24  ;;  %v4912_v19 = vpop.f32.mrb[217].mxu1  ;;  %v6473_v47 = vadd.f32 %v12562_v34, %v6179_v15  ;;  %7045 = vmatmul.mubr.bf16.gmra.mrb[16].mxu1 %v6715_v36  ;;  %v12818_v28 = vadd.f32 %v5435_v44, %v14363_v54  ;;  %v5708_v53 = vmul.f32 %v11142_v1, %v14364_v17 }
 0x5e4   : > { %v4913_v16 = vadd.f32 %v4912_v19, %v12167_v23  ;;  %v4914_v39 = vpop.f32.mrb[218].mxu1  ;;  %v6474_v31 = vadd.f32 %v12572_v22, %v6181_v18  ;;  %v12826_v29 = vmul.f32 %v11149_v59, %v14364_v17  ;;  %v6599_v3 = vmax.f32 %v6471_v57, 0.0 }
 0x5e5   : > { %v4915_v0 = vadd.f32 %v4914_v39, %v12161_v24  ;;  %v4916_v51 = vpop.f32.mrb[219].mxu1  ;;  %v6601_v10 = vmax.f32 %v6473_v47, 0.0  ;;  %v5436_v44 = vmul.f32 %v11133_v60, %v14365_v20  ;;  %v6600_v48 = vmax.f32 %v6472_v30, 0.0 }
 0x5e6   : > { %v4917_v36 = vadd.f32 %v4916_v51, %v12167_v23  ;;  %v5097_v13 = vmax.f32 %v4911_v37, 0.0  ;;  %v6602_v5 = vmax.f32 %v6474_v31, 0.0  ;;  %v6184_v15 = vpop.f32.mrb[24].mxu0  ;;  %v5098_v41 = vmax.f32 %v4913_v16, 0.0  ;;  %v9549_v51 = vld [vmem:[#allocation2 + $0x614] ss:$8 sps:$4 sm:$0xff]  }
 0x5e7   : > { %v5099_v4 = vmax.f32 %v4915_v0, 0.0  ;;  %v6717_v61 = vpack.c.bf16 %v6601_v10, %v6599_v3  ;;  %v6185_v19 = vadd.f32 %v6184_v15, %v12707_v42  ;;  %v6186_v21 = vpop.f32.mrb[25].mxu0  ;;  %v5437_v54 = vmul.f32 %v11139_v46, %v14365_v20  ;;  %v14366_v16 = vld [vmem:[#allocation71_spill] sm:$0xff]  ;;  %7720 = vmatprep.subr.bf16.mxu0 %v9549_v51 }
 0x5e8   : > { %v5100_v18 = vmax.f32 %v4917_v36, 0.0  ;;  %v6187_v57 = vadd.f32 %v6186_v21, %v12711_v12  ;;  %v6188_v47 = vpop.f32.mrb[26].mxu0  ;;  %v6718_v11 = vpack.c.bf16 %v6602_v5, %v6600_v48  ;;  %v5290_v17 = vmul.f32 %v11121_v43, %v14366_v16  ;;  %v9547_v42 = vld [vmem:[#allocation2 + $0x610] ss:$8 sps:$4 sm:$0xff]   ;;  %v14367_v5 = vld [vmem:[#allocation77_spill] sm:$0xff] }
 0x5e9   : > { %v5181_v39 = vpack.c.bf16 %v5099_v4, %v5097_v13  ;;  %v6475_v30 = vadd.f32 %v12562_v34, %v6185_v19  ;;  %v6189_v37 = vadd.f32 %v6188_v47, %v12713_v58  ;;  %v6190_v31 = vpop.f32.mrb[27].mxu0  ;;  %v5291_v10 = vmul.f32 %v11124_v14, %v14366_v16  ;;  %7721 = vmatpush1.bf16.msra.mxu0 %v9547_v42 }
 0x5ea   : > { %v5182_v0 = vpack.c.bf16 %v5100_v18, %v5098_v41  ;;  %v6476_v3 = vadd.f32 %v12572_v22, %v6187_v57  ;;  %v6191_v12 = vadd.f32 %v6190_v31, %v12717_v38  ;;  %7054 = vmatprep.mubr.bf16.mxu1 %v6718_v11  ;;  %v12844_v58 = vadd.f32 %v5708_v53, %v5562_v35  ;;  %v14368_v18 = vld [vmem:[#allocation74_spill] sm:$0xff]  ;;  %v9550_v53 = vld [vmem:[#allocation2 + $0x620] ss:$8 sps:$4 sm:$0xff]   ;;  %v14370_v31 = vld [vmem:[#allocation75_spill] sm:$0xff] }
 0x5eb   : > { %v6477_v36 = vadd.f32 %v12562_v34, %v6189_v37  ;;  %7055 = vmatmul.mubr.bf16.gmra.mrb[20].mxu1 %v6717_v61  ;;  %v5564_v20 = vadd.f32 %v5436_v44, %v5290_v17  ;;  %v5565_v13 = vadd.f32 %v5437_v54, %v5291_v10  ;;  %v5440_v4 = vmul.f32 %v11133_v60, %v14367_v5  ;;  %v9552_v44 = vld [vmem:[#allocation2 + $0x624] ss:$8 sps:$4 sm:$0xff]   ;;  %v9555_v54 = vld [vmem:[#allocation2 + $0x634] ss:$8 sps:$4 sm:$0xff]  }
 0x5ec   : > { %6342 = vmatprep.mubr.bf16.mxu0 %v5182_v0  ;;  %v6478_v48 = vadd.f32 %v12572_v22, %v6191_v12  ;;  %v5441_v38 = vmul.f32 %v11139_v46, %v14367_v5  ;;  %v6603_v15 = vmax.f32 %v6475_v30, 0.0  ;;  %v5438_v19 = vmul.f32 %v11133_v60, %v14368_v18  ;;  %v14369_v57 = vld [vmem:[#allocation76_spill] sm:$0xff]  ;;  %7722 = vmatprep.subr.bf16.mxu0 %v9552_v44 }
 0x5ed   : > { %6343 = vmatmul.mubr.bf16.gmra.mrb[88].mxu0 %v5181_v39  ;;  %v6605_v41 = vmax.f32 %v6477_v36, 0.0  ;;  %v5439_v35 = vmul.f32 %v11139_v46, %v14368_v18  ;;  %v6604_v61 = vmax.f32 %v6476_v3, 0.0  ;;  %v5294_v47 = vmul.f32 %v11121_v43, %v14369_v57  ;;  %v9553_v18 = vld [vmem:[#allocation2 + $0x630] ss:$8 sps:$4 sm:$0xff]  }
 0x5ee   : > { %v6606_v21 = vmax.f32 %v6478_v48, 0.0  ;;  %v6194_v39 = vpop.f32.mrb[28].mxu0  ;;  %v5295_v11 = vmul.f32 %v11124_v14, %v14369_v57  ;;  %v5712_v0 = vmul.f32 %v11142_v1, %v14370_v31  ;;  %v5713_v16 = vmul.f32 %v11149_v59, %v14370_v31  ;;  %7723 = vmatpush1.bf16.msra.mxu0 %v9550_v53 }
 0x5ef   : > { %v6719_v51 = vpack.c.bf16 %v6605_v41, %v6603_v15  ;;  %v6195_v30 = vadd.f32 %v6194_v39, %v12748_v9  ;;  %v6196_v37 = vpop.f32.mrb[29].mxu0  ;;  %v5568_v12 = vadd.f32 %v5440_v4, %v5294_v47  ;;  %v5837_v9 = vadd.f32 %v12826_v29, %v12818_v28  ;;  %v14371_v15 = vld [vmem:[#allocation168_spill] sm:$0xff]  ;;  %7724 = vmatprep.subr.bf16.mxu0 %v9555_v54 }
 0x5f0   : > { %v6197_v17 = vadd.f32 %v6196_v37, %v12757_v52  ;;  %v6198_v42 = vpop.f32.mrb[30].mxu0  ;;  %v6720_v3 = vpack.c.bf16 %v6606_v21, %v6604_v61  ;;  %v5569_v10 = vadd.f32 %v5441_v38, %v5295_v11  ;;  %v5566_v41 = vadd.f32 %v5438_v19, %v14371_v15  ;;  %v14372_v61 = vld [vmem:[#allocation174_spill] sm:$0xff]  ;;  %v9558_v38 = vld [vmem:[#allocation2 + $0x644] ss:$8 sps:$4 sm:$0xff]  }
 0x5f1   : > { %v6479_v36 = vadd.f32 %v12562_v34, %v6195_v30  ;;  %v6199_v48 = vadd.f32 %v6198_v42, %v12785_v33  ;;  %v6200_v5 = vpop.f32.mrb[31].mxu0  ;;  %v5567_v4 = vadd.f32 %v5439_v35, %v14372_v61  ;;  %v14373_v33 = vld [vmem:[#allocation26_spill] sm:$0xff]  ;;  %v12878_v28 = vadd.f32 %v12651_v49, %v5565_v13  ;;  %v14374_v49 = vld [vmem:[#allocation79_spill] sm:$0xff] }
 0x5f2   : > { %v6480_v44 = vadd.f32 %v12572_v22, %v6197_v17  ;;  %v6201_v52 = vadd.f32 %v6200_v5, %v12793_v62  ;;  %7064 = vmatprep.mubr.bf16.mxu1 %v6720_v3  ;;  %v12875_v39 = vadd.f32 %v14373_v33, %v5564_v20  ;;  %v12880_v29 = vadd.f32 %v5712_v0, %v5566_v41 }
 0x5f3   : > { %v6481_v21 = vadd.f32 %v12562_v34, %v6199_v48  ;;  %7065 = vmatmul.mubr.bf16.gmra.mrb[24].mxu1 %v6719_v51  ;;  %v12883_v62 = vadd.f32 %v5713_v16, %v5567_v4  ;;  %v12886_v35 = vadd.f32 %v12655_v45, %v5568_v12  ;;  %v12889_v57 = vadd.f32 %v12661_v6, %v5569_v10  ;;  %v9556_v51 = vld [vmem:[#allocation2 + $0x640] ss:$8 sps:$4 sm:$0xff]  }
 0x5f4   : > { %v6482_v19 = vadd.f32 %v12572_v22, %v6201_v52  ;;  %v6607_v47 = vmax.f32 %v6479_v36, 0.0  ;;  %v5442_v13 = vmul.f32 %v11133_v60, %v14374_v49  ;;  %7725 = vmatpush1.bf16.msra.mxu0 %v9553_v18  ;;  %v6608_v30 = vmax.f32 %v6480_v44, 0.0  ;;  %v14375_v10 = vld [vmem:[#allocation80_spill] sm:$0xff]  ;;  %v14376_v18 = vld [vmem:[#allocation82_spill] sm:$0xff] }
 0x5f5   : > { %v4920_v53 = vpop.f32.mrb[220].mxu1  ;;  %v6609_v11 = vmax.f32 %v6481_v21, 0.0  ;;  %v5443_v6 = vmul.f32 %v11139_v46, %v14374_v49  ;;  %7726 = vmatprep.subr.bf16.mxu0 %v9558_v38  ;;  %v5716_v36 = vmul.f32 %v11142_v1, %v14375_v10  ;;  %v5444_v44 = vmul.f32 %v11133_v60, %v14376_v18  ;;  %v9559_v49 = vld [vmem:[#allocation2 + $0x650] ss:$8 sps:$4 sm:$0xff]  }
 0x5f6   : > { %v4921_v20 = vadd.f32 %v4920_v53, %v12161_v24  ;;  %v4922_v54 = vpop.f32.mrb[221].mxu1  ;;  %v6610_v37 = vmax.f32 %v6482_v19, 0.0  ;;  %v6204_v45 = vpop.f32.mrb[32].mxu0 }
 0x5f7   : > { %v4923_v31 = vadd.f32 %v4922_v54, %v12167_v23  ;;  %v4924_v0 = vpop.f32.mrb[222].mxu1  ;;  %v6721_v16 = vpack.c.bf16 %v6609_v11, %v6607_v47  ;;  %v6205_v42 = vadd.f32 %v6204_v45, %v12802_v27  ;;  %v6206_v12 = vpop.f32.mrb[33].mxu0  ;;  %v14377_v11 = vld [vmem:[#allocation81_spill] sm:$0xff]  ;;  %v5445_v54 = vmul.f32 %v11139_v46, %v14376_v18 }
 0x5f8   : > { %v4925_v17 = vadd.f32 %v4924_v0, %v12161_v24  ;;  %v4926_v3 = vpop.f32.mrb[223].mxu1  ;;  %v6207_v5 = vadd.f32 %v6206_v12, %v12812_v63  ;;  %v6208_v15 = vpop.f32.mrb[34].mxu0  ;;  %v6722_v41 = vpack.c.bf16 %v6610_v37, %v6608_v30  ;;  %v5101_v52 = vmax.f32 %v4921_v20, 0.0  ;;  %7727 = vmatpush1.bf16.msra.mxu0 %v9556_v51  ;;  %v14378_v37 = vld [vmem:[#allocation18_spill] sm:$0xff]  ;;  %v9564_v0 = vld [vmem:[#allocation2 + $0x664] ss:$8 sps:$4 sm:$0xff]  }
 0x5f9   : > { %v4927_v48 = vadd.f32 %v4926_v3, %v12167_v23  ;;  %v6483_v4 = vadd.f32 %v12562_v34, %v6205_v42  ;;  %v6209_v27 = vadd.f32 %v6208_v15, %v12844_v58  ;;  %v6210_v38 = vpop.f32.mrb[35].mxu0  ;;  %v5102_v21 = vmax.f32 %v4923_v31, 0.0  ;;  %v9561_v58 = vld [vmem:[#allocation2 + $0x654] ss:$8 sps:$4 sm:$0xff]   ;;  %v14379_v15 = vld [vmem:[#allocation20_spill] sm:$0xff] }
 0x5fa   : > { %v5103_v61 = vmax.f32 %v4925_v17, 0.0  ;;  %v6484_v19 = vadd.f32 %v12572_v22, %v6207_v5  ;;  %v6211_v53 = vadd.f32 %v6210_v38, %v5837_v9  ;;  %7074 = vmatprep.mubr.bf16.mxu1 %v6722_v41  ;;  %v5298_v20 = vmul.f32 %v11121_v43, %v14377_v11  ;;  %7728 = vmatprep.subr.bf16.mxu0 %v9561_v58  ;;  %v14380_v38 = vld [vmem:[#allocation84_spill] sm:$0xff] }
 0x5fb   : > { %v5104_v33 = vmax.f32 %v4927_v48, 0.0  ;;  %v6485_v47 = vadd.f32 %v12562_v34, %v6209_v27  ;;  %7075 = vmatmul.mubr.bf16.gmra.mrb[28].mxu1 %v6721_v16  ;;  %v5570_v31 = vadd.f32 %v5442_v13, %v14378_v37  ;;  %v5717_v9 = vmul.f32 %v11149_v59, %v14375_v10  ;;  %v9562_v13 = vld [vmem:[#allocation2 + $0x660] ss:$8 sps:$4 sm:$0xff]  }
 0x5fc   : > { %v5183_v63 = vpack.c.bf16 %v5103_v61, %v5101_v52  ;;  %v6486_v51 = vadd.f32 %v12572_v22, %v6211_v53  ;;  %v6611_v45 = vmax.f32 %v6483_v4, 0.0  ;;  %v5572_v16 = vadd.f32 %v5444_v44, %v5298_v20  ;;  %7729 = vmatpush1.bf16.msra.mxu0 %v9559_v49  ;;  %v14382_v58 = vld [vmem:[#allocation88_spill] sm:$0xff] }
 0x5fd   : > { %v5184_v30 = vpack.c.bf16 %v5104_v33, %v5102_v21  ;;  %v6613_v17 = vmax.f32 %v6485_v47, 0.0  ;;  %v5299_v42 = vmul.f32 %v11124_v14, %v14377_v11  ;;  %v6612_v3 = vmax.f32 %v6484_v19, 0.0  ;;  %7730 = vmatprep.subr.bf16.mxu0 %v9564_v0  ;;  %v14381_v11 = vld [vmem:[#allocation85_spill] sm:$0xff] }
 0x5fe   : > { %v6614_v12 = vmax.f32 %v6486_v51, 0.0  ;;  %v6214_v48 = vpop.f32.mrb[36].mxu0  ;;  %v12919_v5 = vadd.f32 %v5716_v36, %v5570_v31  ;;  %v5571_v41 = vadd.f32 %v5443_v6, %v14379_v15  ;;  %v5446_v21 = vmul.f32 %v11133_v60, %v14380_v38  ;;  %v9567_v6 = vld [vmem:[#allocation2 + $0x674] ss:$8 sps:$4 sm:$0xff]   ;;  %v9570_v51 = vld [vmem:[#allocation2 + $0x684] ss:$8 sps:$4 sm:$0xff]  }
 0x5ff   : > { %6352 = vmatprep.mubr.bf16.mxu0 %v5184_v30  ;;  %v6723_v18 = vpack.c.bf16 %v6613_v17, %v6611_v45  ;;  %v6215_v10 = vadd.f32 %v6214_v48, %v12875_v39  ;;  %v6216_v52 = vpop.f32.mrb[37].mxu0  ;;  %v5573_v44 = vadd.f32 %v5445_v54, %v5299_v42  ;;  %v5447_v36 = vmul.f32 %v11139_v46, %v14380_v38  ;;  %v9565_v54 = vld [vmem:[#allocation2 + $0x670] ss:$8 sps:$4 sm:$0xff]   ;;  %v14384_v31 = vld [vmem:[#allocation9_spill] sm:$0xff]  ;;  %v9573_v38 = vld [vmem:[#allocation2 + $0x694] ss:$8 sps:$4 sm:$0xff]  }
 0x600   : > { %6353 = vmatmul.mubr.bf16.gmra.mrb[92].mxu0 %v5183_v63  ;;  %v6217_v61 = vadd.f32 %v6216_v52, %v12878_v28  ;;  %v6218_v4 = vpop.f32.mrb[38].mxu0  ;;  %v6724_v27 = vpack.c.bf16 %v6614_v12, %v6612_v3  ;;  %v5845_v53 = vadd.f32 %v5717_v9, %v5571_v41  ;;  %v12931_v63 = vadd.f32 %v12690_v8, %v5572_v16  ;;  %v14385_v16 = vld [vmem:[#allocation86_spill] sm:$0xff] }
 0x601   : > { %v6487_v33 = vadd.f32 %v12562_v34, %v6215_v10  ;;  %v6219_v19 = vadd.f32 %v6218_v4, %v12880_v29  ;;  %v6220_v39 = vpop.f32.mrb[39].mxu0  ;;  %v5720_v20 = vmul.f32 %v11142_v1, %v14381_v11  ;;  %7731 = vmatpush1.bf16.msra.mxu0 %v9562_v13  ;;  %v12939_v29 = vadd.f32 %v12694_v2, %v5573_v44 }
 0x602   : > { %v6488_v28 = vadd.f32 %v12572_v22, %v6217_v61  ;;  %v6221_v47 = vadd.f32 %v6220_v39, %v12883_v62  ;;  %7084 = vmatprep.mubr.bf16.mxu1 %v6724_v27  ;;  %v5448_v8 = vmul.f32 %v11133_v60, %v14382_v58  ;;  %7732 = vmatprep.subr.bf16.mxu0 %v9567_v6  ;;  %v14383_v62 = vld [vmem:[#allocation8_spill] sm:$0xff] }
 0x603   : > { %v6489_v49 = vadd.f32 %v12562_v34, %v6219_v19  ;;  %7085 = vmatmul.mubr.bf16.gmra.mrb[32].mxu1 %v6723_v18  ;;  %v5574_v37 = vadd.f32 %v5446_v21, %v14383_v62  ;;  %v5575_v9 = vadd.f32 %v5447_v36, %v14384_v31  ;;  %v5721_v0 = vmul.f32 %v11149_v59, %v14381_v11  ;;  %v9568_v18 = vld [vmem:[#allocation2 + $0x680] ss:$8 sps:$4 sm:$0xff]  }
 0x604   : > { %v6490_v30 = vadd.f32 %v12572_v22, %v6221_v47  ;;  %v6615_v45 = vmax.f32 %v6487_v33, 0.0  ;;  %v5302_v2 = vmul.f32 %v11121_v43, %v14385_v16  ;;  %v5449_v42 = vmul.f32 %v11139_v46, %v14382_v58 }
 0x605   : > { %v6617_v17 = vmax.f32 %v6489_v49, 0.0  ;;  %v6616_v3 = vmax.f32 %v6488_v28, 0.0  ;;  %v12952_v41 = vadd.f32 %v5720_v20, %v5574_v37  ;;  %v5303_v13 = vmul.f32 %v11124_v14, %v14385_v16  ;;  %7733 = vmatpush1.bf16.msra.mxu0 %v9565_v54 }
 0x606   : > { %v6618_v12 = vmax.f32 %v6490_v30, 0.0  ;;  %v6224_v48 = vpop.f32.mrb[40].mxu0  ;;  %v5576_v27 = vadd.f32 %v5448_v8, %v5302_v2  ;;  %7734 = vmatprep.subr.bf16.mxu0 %v9570_v51  ;;  %v5849_v39 = vadd.f32 %v5721_v0, %v5575_v9  ;;  %v9571_v8 = vld [vmem:[#allocation2 + $0x690] ss:$8 sps:$4 sm:$0xff]  }
 0x607   : > { %v4930_v15 = vpop.f32.mrb[224].mxu1  ;;  %v6725_v10 = vpack.c.bf16 %v6617_v17, %v6615_v45  ;;  %v6225_v52 = vadd.f32 %v6224_v48, %v12886_v35  ;;  %v6226_v61 = vpop.f32.mrb[41].mxu0  ;;  %v5577_v54 = vadd.f32 %v5449_v42, %v5303_v13  ;;  %v14386_v0 = vld [vmem:[#allocation90_spill] sm:$0xff] }
 0x608   : > { %v4931_v44 = vadd.f32 %v4930_v15, %v12161_v24  ;;  %v4932_v4 = vpop.f32.mrb[225].mxu1  ;;  %v6227_v21 = vadd.f32 %v6226_v61, %v12889_v57  ;;  %v6228_v6 = vpop.f32.mrb[42].mxu0  ;;  %v6726_v19 = vpack.c.bf16 %v6618_v12, %v6616_v3  ;;  %v5451_v2 = vmul.f32 %v11139_v46, %v14386_v0  ;;  %v9574_v61 = vld [vmem:[#allocation2 + $0x6a0] ss:$8 sps:$4 sm:$0xff]  }
 0x609   : > { %v4933_v36 = vadd.f32 %v4932_v4, %v12167_v23  ;;  %v4934_v33 = vpop.f32.mrb[226].mxu1  ;;  %v6491_v28 = vadd.f32 %v12562_v34, %v6225_v52  ;;  %v6229_v47 = vadd.f32 %v6228_v6, %v12919_v5  ;;  %v6230_v11 = vpop.f32.mrb[43].mxu0  ;;  %7735 = vmatpush1.bf16.msra.mxu0 %v9568_v18  ;;  %v12967_v5 = vadd.f32 %v12700_v26, %v5576_v27  ;;  %v9576_v4 = vld [vmem:[#allocation2 + $0x6a4] ss:$8 sps:$4 sm:$0xff]   ;;  %v9579_v6 = vld [vmem:[#allocation2 + $0x6b4] ss:$8 sps:$4 sm:$0xff]  }
 0x60a   : > { %v4935_v35 = vadd.f32 %v4934_v33, %v12161_v24  ;;  %v4936_v20 = vpop.f32.mrb[227].mxu1  ;;  %v6492_v49 = vadd.f32 %v12572_v22, %v6227_v21  ;;  %v6231_v58 = vadd.f32 %v6230_v11, %v5845_v53  ;;  %7094 = vmatprep.mubr.bf16.mxu1 %v6726_v19  ;;  %v5105_v51 = vmax.f32 %v4931_v44, 0.0  ;;  %7736 = vmatprep.subr.bf16.mxu0 %v9573_v38 }
 0x60b   : > { %v4937_v57 = vadd.f32 %v4936_v20, %v12167_v23  ;;  %v6493_v30 = vadd.f32 %v12562_v34, %v6229_v47  ;;  %7095 = vmatmul.mubr.bf16.gmra.mrb[36].mxu1 %v6725_v10  ;;  %v5106_v37 = vmax.f32 %v4933_v36, 0.0  ;;  %v5450_v53 = vmul.f32 %v11133_v60, %v14386_v0  ;;  %v14387_v10 = vld [vmem:[#allocation92_spill] sm:$0xff]  ;;  %v14388_v36 = vld [vmem:[#allocation95_spill] sm:$0xff]  ;;  %v14389_v47 = vld [vmem:[#allocation93_spill] sm:$0xff] }
 0x60c   : > { %v5107_v62 = vmax.f32 %v4935_v35, 0.0  ;;  %v6494_v31 = vadd.f32 %v12572_v22, %v6231_v58  ;;  %v6619_v45 = vmax.f32 %v6491_v28, 0.0  ;;  %v6620_v42 = vmax.f32 %v6492_v49, 0.0  ;;  %v14390_v58 = vld [vmem:[#allocation16_spill] sm:$0xff] }
 0x60d   : > { %v5108_v9 = vmax.f32 %v4937_v57, 0.0  ;;  %v6621_v17 = vmax.f32 %v6493_v30, 0.0  ;;  %v5851_v26 = vadd.f32 %v12704_v50, %v5577_v54  ;;  %7737 = vmatpush1.bf16.msra.mxu0 %v9571_v8  ;;  %v5724_v52 = vmul.f32 %v11142_v1, %v14387_v10  ;;  %v9577_v54 = vld [vmem:[#allocation2 + $0x6b0] ss:$8 sps:$4 sm:$0xff]   ;;  %v14391_v57 = vld [vmem:[#allocation97_spill] sm:$0xff] }
 0x60e   : > { %v5185_v16 = vpack.c.bf16 %v5107_v62, %v5105_v51  ;;  %v6622_v3 = vmax.f32 %v6494_v31, 0.0  ;;  %v6234_v12 = vpop.f32.mrb[44].mxu0  ;;  %v5725_v44 = vmul.f32 %v11149_v59, %v14387_v10  ;;  %v5452_v50 = vmul.f32 %v11133_v60, %v14388_v36  ;;  %7738 = vmatprep.subr.bf16.mxu0 %v9576_v4  ;;  %v9582_v51 = vld [vmem:[#allocation2 + $0x6c4] ss:$8 sps:$4 sm:$0xff]   ;;  %v14392_v62 = vld [vmem:[#allocation10_spill] sm:$0xff]  ;;  %v14394_v10 = vld [vmem:[#allocation11_spill] sm:$0xff] }
 0x60f   : > { %v5186_v48 = vpack.c.bf16 %v5108_v9, %v5106_v37  ;;  %v6727_v15 = vpack.c.bf16 %v6621_v17, %v6619_v45  ;;  %v6235_v13 = vadd.f32 %v6234_v12, %v12931_v63  ;;  %v6236_v18 = vpop.f32.mrb[45].mxu0  ;;  %v5453_v63 = vmul.f32 %v11139_v46, %v14388_v36  ;;  %v14393_v45 = vld [vmem:[#allocation99_spill] sm:$0xff] }
 0x610   : > { %v6237_v27 = vadd.f32 %v6236_v18, %v12939_v29  ;;  %v6238_v38 = vpop.f32.mrb[46].mxu0  ;;  %v6728_v21 = vpack.c.bf16 %v6622_v3, %v6620_v42  ;;  %v5306_v35 = vmul.f32 %v11121_v43, %v14389_v47  ;;  %v5307_v20 = vmul.f32 %v11124_v14, %v14389_v47 }
 0x611   : > { %6362 = vmatprep.mubr.bf16.mxu0 %v5186_v48  ;;  %v6495_v33 = vadd.f32 %v12562_v34, %v6235_v13  ;;  %v6239_v19 = vadd.f32 %v6238_v38, %v12952_v41  ;;  %v6240_v28 = vpop.f32.mrb[47].mxu0  ;;  %7739 = vmatpush1.bf16.msra.mxu0 %v9574_v61  ;;  %v5578_v41 = vadd.f32 %v5450_v53, %v14390_v58 }
 0x612   : > { %6363 = vmatmul.mubr.bf16.gmra.mrb[96].mxu0 %v5185_v16  ;;  %v6496_v29 = vadd.f32 %v12572_v22, %v6237_v27  ;;  %v6241_v11 = vadd.f32 %v6240_v28, %v5849_v39  ;;  %7104 = vmatprep.mubr.bf16.mxu1 %v6728_v21  ;;  %v5454_v8 = vmul.f32 %v11133_v60, %v14391_v57  ;;  %v9585_v27 = vld [vmem:[#allocation2 + $0x6d4] ss:$8 sps:$4 sm:$0xff]  }
 0x613   : > { %v6497_v49 = vadd.f32 %v12562_v34, %v6239_v19  ;;  %7105 = vmatmul.mubr.bf16.gmra.mrb[40].mxu1 %v6727_v15  ;;  %7740 = vmatprep.subr.bf16.mxu0 %v9579_v6  ;;  %v5579_v39 = vadd.f32 %v5451_v2, %v14392_v62  ;;  %v5580_v37 = vadd.f32 %v5452_v50, %v5306_v35  ;;  %v6623_v9 = vmax.f32 %v6495_v33, 0.0  ;;  %v9580_v15 = vld [vmem:[#allocation2 + $0x6c0] ss:$8 sps:$4 sm:$0xff]  }
 0x614   : > { %v6498_v30 = vadd.f32 %v12572_v22, %v6241_v11  ;;  %v5581_v31 = vadd.f32 %v5453_v63, %v5307_v20  ;;  %v5728_v17 = vmul.f32 %v11142_v1, %v14393_v45  ;;  %v5455_v16 = vmul.f32 %v11139_v46, %v14391_v57  ;;  %v14395_v19 = vld [vmem:[#allocation13_spill] sm:$0xff]  ;;  %v9583_v11 = vld [vmem:[#allocation2 + $0x6d0] ss:$8 sps:$4 sm:$0xff]  }
 0x615   : > { %v6625_v0 = vmax.f32 %v6497_v49, 0.0  ;;  %v6624_v53 = vmax.f32 %v6496_v29, 0.0  ;;  %v5852_v12 = vadd.f32 %v5724_v52, %v5578_v41  ;;  %v5853_v48 = vadd.f32 %v5725_v44, %v5579_v39  ;;  %7741 = vmatpush1.bf16.msra.mxu0 %v9577_v54  ;;  %v14396_v57 = vld [vmem:[#allocation101_spill] sm:$0xff] }
 0x616   : > { %v6626_v42 = vmax.f32 %v6498_v30, 0.0  ;;  %v6244_v3 = vpop.f32.mrb[48].mxu0  ;;  %v5582_v61 = vadd.f32 %v5454_v8, %v14394_v10  ;;  %v5729_v4 = vmul.f32 %v11149_v59, %v14393_v45  ;;  %7742 = vmatprep.subr.bf16.mxu0 %v9582_v51  ;;  %v5854_v50 = vadd.f32 %v12739_v32, %v5580_v37  ;;  %v14397_v51 = vld [vmem:[#allocation102_spill] sm:$0xff] }
 0x617   : > { %v6729_v13 = vpack.c.bf16 %v6625_v0, %v6623_v9  ;;  %v6245_v2 = vadd.f32 %v6244_v3, %v12967_v5  ;;  %v6246_v18 = vpop.f32.mrb[49].mxu0  ;;  %v5855_v52 = vadd.f32 %v12752_v7, %v5581_v31  ;;  %v5583_v28 = vadd.f32 %v5455_v16, %v14395_v19  ;;  %v9591_v19 = vld [vmem:[#allocation2 + $0x6f4] ss:$8 sps:$4 sm:$0xff]  }
 0x618   : > { %v6247_v38 = vadd.f32 %v6246_v18, %v5851_v26  ;;  %v6248_v21 = vpop.f32.mrb[50].mxu0  ;;  %v6730_v36 = vpack.c.bf16 %v6626_v42, %v6624_v53  ;;  %v5856_v33 = vadd.f32 %v5728_v17, %v5582_v61  ;;  %v5310_v8 = vmul.f32 %v11121_v43, %v14396_v57  ;;  %v9586_v53 = vld [vmem:[#allocation2 + $0x6e0] ss:$8 sps:$4 sm:$0xff]  }
 0x619   : > { %v6499_v44 = vadd.f32 %v12562_v34, %v6245_v2  ;;  %v6249_v63 = vadd.f32 %v6248_v21, %v5852_v12  ;;  %v6250_v6 = vpop.f32.mrb[51].mxu0  ;;  %7743 = vmatpush1.bf16.msra.mxu0 %v9580_v15  ;;  %v5857_v54 = vadd.f32 %v5729_v4, %v5583_v28  ;;  %v5456_v30 = vmul.f32 %v11133_v60, %v14397_v51 }
 0x61a   : > { %v4940_v5 = vpop.f32.mrb[228].mxu1  ;;  %v6500_v47 = vadd.f32 %v12572_v22, %v6247_v38  ;;  %v6251_v35 = vadd.f32 %v6250_v6, %v5853_v48  ;;  %7114 = vmatprep.mubr.bf16.mxu1 %v6730_v36  ;;  %7744 = vmatprep.subr.bf16.mxu0 %v9585_v27  ;;  %v5457_v16 = vmul.f32 %v11139_v46, %v14397_v51 }
 0x61b   : > { %v4941_v29 = vadd.f32 %v4940_v5, %v12161_v24  ;;  %v4942_v26 = vpop.f32.mrb[229].mxu1  ;;  %v6501_v32 = vadd.f32 %v12562_v34, %v6249_v63  ;;  %7115 = vmatmul.mubr.bf16.gmra.mrb[44].mxu1 %v6729_v13  ;;  %v6627_v62 = vmax.f32 %v6499_v44, 0.0  ;;  %v9588_v13 = vld [vmem:[#allocation2 + $0x6e4] ss:$8 sps:$4 sm:$0xff]   ;;  %v5311_v4 = vmul.f32 %v11124_v14, %v14396_v57 }
 0x61c   : > { %v4943_v7 = vadd.f32 %v4942_v26, %v12167_v23  ;;  %v4944_v20 = vpop.f32.mrb[230].mxu1  ;;  %v6502_v49 = vadd.f32 %v12572_v22, %v6251_v35  ;;  %v6628_v39 = vmax.f32 %v6500_v47, 0.0  ;;  %v5584_v44 = vadd.f32 %v5456_v30, %v5310_v8 }
 0x61d   : > { %v4945_v58 = vadd.f32 %v4944_v20, %v12161_v24  ;;  %v4946_v41 = vpop.f32.mrb[231].mxu1  ;;  %v6629_v37 = vmax.f32 %v6501_v32, 0.0  ;;  %v5109_v0 = vmax.f32 %v4941_v29, 0.0  ;;  %7745 = vmatpush1.bf16.msra.mxu0 %v9583_v11  ;;  %v5585_v47 = vadd.f32 %v5457_v16, %v5311_v4  ;;  %v14399_v29 = vld [vmem:[#allocation105_spill] sm:$0xff] }
 0x61e   : > { %v4947_v31 = vadd.f32 %v4946_v41, %v12167_v23  ;;  %v6630_v9 = vmax.f32 %v6502_v49, 0.0  ;;  %v6254_v17 = vpop.f32.mrb[52].mxu0  ;;  %v5110_v3 = vmax.f32 %v4943_v7, 0.0  ;;  %7746 = vmatprep.subr.bf16.mxu0 %v9588_v13  ;;  %v5732_v26 = vmul.f32 %v11142_v1, %v14399_v29 }
 0x61f   : > { %v5111_v45 = vmax.f32 %v4945_v58, 0.0  ;;  %v6731_v42 = vpack.c.bf16 %v6629_v37, %v6627_v62  ;;  %v6255_v48 = vadd.f32 %v6254_v17, %v5854_v50  ;;  %v6256_v15 = vpop.f32.mrb[53].mxu0  ;;  %v14398_v50 = vld [vmem:[#allocation104_spill] sm:$0xff]  ;;  %v5733_v7 = vmul.f32 %v11149_v59, %v14399_v29 }
 0x620   : > { %v5112_v12 = vmax.f32 %v4947_v31, 0.0  ;;  %v6257_v18 = vadd.f32 %v6256_v15, %v5855_v52  ;;  %v6258_v10 = vpop.f32.mrb[54].mxu0  ;;  %v6732_v61 = vpack.c.bf16 %v6630_v9, %v6628_v39  ;;  %v5458_v5 = vmul.f32 %v11133_v60, %v14398_v50  ;;  %v9589_v52 = vld [vmem:[#allocation2 + $0x6f0] ss:$8 sps:$4 sm:$0xff]  }
 0x621   : > { %v5187_v2 = vpack.c.bf16 %v5111_v45, %v5109_v0  ;;  %v6503_v27 = vadd.f32 %v12562_v34, %v6255_v48  ;;  %v6259_v38 = vadd.f32 %v6258_v10, %v5856_v33  ;;  %v6260_v21 = vpop.f32.mrb[55].mxu0  ;;  %7747 = vmatpush1.bf16.msra.mxu0 %v9586_v53  ;;  %v5459_v33 = vmul.f32 %v11139_v46, %v14398_v50 }
 0x622   : > { %v5188_v36 = vpack.c.bf16 %v5112_v12, %v5110_v3  ;;  %v6504_v63 = vadd.f32 %v12572_v22, %v6257_v18  ;;  %v6261_v6 = vadd.f32 %v6260_v21, %v5857_v54  ;;  %7124 = vmatprep.mubr.bf16.mxu1 %v6732_v61  ;;  %7748 = vmatprep.subr.bf16.mxu0 %v9591_v19 }
 0x623   : > { %v6505_v28 = vadd.f32 %v12562_v34, %v6259_v38  ;;  %7125 = vmatmul.mubr.bf16.gmra.mrb[48].mxu1 %v6731_v42  ;;  %v6631_v11 = vmax.f32 %v6503_v27, 0.0  ;;  %v5858_v49 = vadd.f32 %v12797_v40, %v5584_v44  ;;  %v5586_v58 = vadd.f32 %v5458_v5, %v12774_v25  ;;  %v14400_v27 = vld [vmem:[#allocation107_spill] sm:$0xff] }
 0x624   : > { %6372 = vmatprep.mubr.bf16.mxu0 %v5188_v36  ;;  %v6506_v35 = vadd.f32 %v12572_v22, %v6261_v6  ;;  %v6632_v20 = vmax.f32 %v6504_v63, 0.0  ;;  %v5859_v8 = vadd.f32 %v12806_v56, %v5585_v47  ;;  %v5587_v51 = vadd.f32 %v5459_v33, %v12783_v55  ;;  %v14401_v63 = vld [vmem:[#allocation108_spill] sm:$0xff] }
 0x625   : > { %6373 = vmatmul.mubr.bf16.gmra.mrb[100].mxu0 %v5187_v2  ;;  %v6633_v32 = vmax.f32 %v6505_v28, 0.0  ;;  %v5860_v39 = vadd.f32 %v5732_v26, %v5586_v58  ;;  %v5460_v38 = vmul.f32 %v11133_v60, %v14400_v27  ;;  %v5461_v44 = vmul.f32 %v11139_v46, %v14400_v27 }
 0x626   : > { %v6634_v54 = vmax.f32 %v6506_v35, 0.0  ;;  %7749 = vmatpush1.bf16.msra.mxu0 %v9589_v52  ;;  %v5861_v0 = vadd.f32 %v5733_v7, %v5587_v51  ;;  %v5316_v6 = vmul.f32 %v11121_v43, %v14401_v63  ;;  %v14402_v52 = vld [vmem:[#allocation106_spill] sm:$0xff]  ;;  %v5317_v28 = vmul.f32 %v11124_v14, %v14401_v63  ;;  %v14404_v7 = vld [vmem:[#allocation109_spill] sm:$0xff]  ;;  %v14406_v63 = vld [vmem:[#allocation112_spill] sm:$0xff] }
 0x627   : > { %v6733_v41 = vpack.c.bf16 %v6633_v32, %v6631_v11  ;;  %v5314_v19 = vmul.f32 %v11121_v43, %v14402_v52  ;;  %v5315_v35 = vmul.f32 %v11124_v14, %v14402_v52  ;;  %v14403_v11 = vld [vmem:[#allocation94_spill] sm:$0xff]  ;;  %v14407_v52 = vld [vmem:[#allocation113_spill] sm:$0xff] }
 0x628   : > { %v6264_v57 = vpop.f32.mrb[56].mxu0  ;;  %v6734_v37 = vpack.c.bf16 %v6634_v54, %v6632_v20  ;;  %v5734_v32 = vmul.f32 %v11142_v1, %v14403_v11  ;;  %v5462_v20 = vmul.f32 %v11133_v60, %v14404_v7  ;;  %v5735_v58 = vmul.f32 %v11149_v59, %v14403_v11 }
 0x629   : > { %v6265_v30 = vadd.f32 %v6264_v57, %v5858_v49  ;;  %v6266_v62 = vpop.f32.mrb[57].mxu0  ;;  %v5588_v26 = vadd.f32 %v5460_v38, %v5314_v19  ;;  %v5589_v49 = vadd.f32 %v5461_v44, %v5315_v35  ;;  %v14405_v57 = vld [vmem:[#allocation110_spill] sm:$0xff]  ;;  %v5320_v19 = vmul.f32 %v11121_v43, %v14407_v52 }
 0x62a   : > { %v6267_v31 = vadd.f32 %v6266_v62, %v5859_v8  ;;  %v6268_v9 = vpop.f32.mrb[58].mxu0  ;;  %7134 = vmatprep.mubr.bf16.mxu1 %v6734_v37  ;;  %v5736_v8 = vmul.f32 %v11142_v1, %v14405_v57  ;;  %v5737_v51 = vmul.f32 %v11149_v59, %v14405_v57  ;;  %v5590_v62 = vadd.f32 %v5462_v20, %v5316_v6 }
 0x62b   : > { %v6507_v45 = vadd.f32 %v12562_v34, %v6265_v30  ;;  %v6269_v17 = vadd.f32 %v6268_v9, %v5860_v39  ;;  %v6270_v40 = vpop.f32.mrb[59].mxu0  ;;  %7135 = vmatmul.mubr.bf16.gmra.mrb[52].mxu1 %v6733_v41  ;;  %v5463_v41 = vmul.f32 %v11139_v46, %v14404_v7  ;;  %v5862_v30 = vadd.f32 %v5734_v32, %v5588_v26 }
 0x62c   : > { %v6508_v25 = vadd.f32 %v12572_v22, %v6267_v31  ;;  %v6271_v16 = vadd.f32 %v6270_v40, %v5861_v0  ;;  %v5863_v37 = vadd.f32 %v5735_v58, %v5589_v49  ;;  %v5464_v6 = vmul.f32 %v11133_v60, %v14406_v63  ;;  %v14410_v58 = vld [vmem:[#allocation114_spill] sm:$0xff] }
 0x62d   : > { %v6509_v56 = vadd.f32 %v12562_v34, %v6269_v17  ;;  %v6635_v42 = vmax.f32 %v6507_v45, 0.0  ;;  %v5591_v31 = vadd.f32 %v5463_v41, %v5317_v28  ;;  %v5864_v45 = vadd.f32 %v5736_v8, %v5590_v62  ;;  %v14411_v62 = vld [vmem:[#allocation115_spill] sm:$0xff] }
 0x62e   : > { %v6510_v55 = vadd.f32 %v12572_v22, %v6271_v16  ;;  %v4950_v53 = vpop.f32.mrb[232].mxu1  ;;  %v6636_v15 = vmax.f32 %v6508_v25, 0.0  ;;  %v5466_v41 = vmul.f32 %v11133_v60, %v14410_v58 }
 0x62f   : > { %v6637_v3 = vmax.f32 %v6509_v56, 0.0  ;;  %v4951_v12 = vadd.f32 %v4950_v53, %v12161_v24  ;;  %v4952_v48 = vpop.f32.mrb[233].mxu1  ;;  %v5865_v25 = vadd.f32 %v5737_v51, %v5591_v31 }
 0x630   : > { %v6638_v13 = vmax.f32 %v6510_v55, 0.0  ;;  %v4953_v2 = vadd.f32 %v4952_v48, %v12167_v23  ;;  %v4954_v18 = vpop.f32.mrb[234].mxu1 }
 0x631   : > { %v6735_v10 = vpack.c.bf16 %v6637_v3, %v6635_v42  ;;  %v4955_v61 = vadd.f32 %v4954_v18, %v12161_v24  ;;  %v4956_v4 = vpop.f32.mrb[235].mxu1  ;;  %v5113_v50 = vmax.f32 %v4951_v12, 0.0 }
 0x632   : > { %v4957_v21 = vadd.f32 %v4956_v4, %v12167_v23  ;;  %v6736_v36 = vpack.c.bf16 %v6638_v13, %v6636_v15  ;;  %v5114_v47 = vmax.f32 %v4953_v2, 0.0 }
 0x633   : > { %v5115_v5 = vmax.f32 %v4955_v61, 0.0 }
 0x634   : > { %v5116_v33 = vmax.f32 %v4957_v21, 0.0  ;;  %7144 = vmatprep.mubr.bf16.mxu1 %v6736_v36 }
 0x635   : > { %v5189_v29 = vpack.c.bf16 %v5115_v5, %v5113_v50  ;;  %7145 = vmatmul.mubr.bf16.gmra.mrb[56].mxu1 %v6735_v10  ;;  %v5465_v5 = vmul.f32 %v11139_v46, %v14406_v63 }
 0x636   : > { %v5190_v54 = vpack.c.bf16 %v5116_v33, %v5114_v47  ;;  %v14408_v33 = vld [vmem:[#allocation111_spill] sm:$0xff] }
 0x637   : > { %v5318_v35 = vmul.f32 %v11121_v43, %v14408_v33  ;;  %v5319_v32 = vmul.f32 %v11124_v14, %v14408_v33  ;;  %v14413_v33 = vld [vmem:[#allocation117_spill] sm:$0xff] }
 0x638   : > { %6382 = vmatprep.mubr.bf16.mxu0 %v5190_v54  ;;  %v14409_v54 = vld [vmem:[#allocation96_spill] sm:$0xff] }
 0x639   : > { %6383 = vmatmul.mubr.bf16.gmra.mrb[104].mxu0 %v5189_v29  ;;  %v5321_v29 = vmul.f32 %v11124_v14, %v14407_v52  ;;  %v5592_v20 = vadd.f32 %v5464_v6, %v5318_v35  ;;  %v5738_v49 = vmul.f32 %v11142_v1, %v14409_v54  ;;  %v5593_v8 = vadd.f32 %v5465_v5, %v5319_v32  ;;  %v14412_v52 = vld [vmem:[#allocation118_spill] sm:$0xff] }
 0x63a   : > { %v6274_v39 = vpop.f32.mrb[60].mxu0  ;;  %v5739_v51 = vmul.f32 %v11149_v59, %v14409_v54  ;;  %v5324_v35 = vmul.f32 %v11121_v43, %v14413_v33 }
 0x63b   : > { %v6275_v9 = vadd.f32 %v6274_v39, %v5862_v30  ;;  %v6276_v0 = vpop.f32.mrb[61].mxu0  ;;  %v5467_v30 = vmul.f32 %v11139_v46, %v14410_v58  ;;  %v5740_v39 = vmul.f32 %v11142_v1, %v14411_v62  ;;  %v5866_v31 = vadd.f32 %v5738_v49, %v5592_v20 }
 0x63c   : > { %v6277_v17 = vadd.f32 %v6276_v0, %v5863_v37  ;;  %v6278_v40 = vpop.f32.mrb[62].mxu0  ;;  %v5741_v37 = vmul.f32 %v11149_v59, %v14411_v62 }
 0x63d   : > { %v6511_v16 = vadd.f32 %v12562_v34, %v6275_v9  ;;  %v6279_v56 = vadd.f32 %v6278_v40, %v5864_v45  ;;  %v6280_v55 = vpop.f32.mrb[63].mxu0  ;;  %v5594_v9 = vadd.f32 %v5466_v41, %v5320_v19  ;;  %v5867_v45 = vadd.f32 %v5739_v51, %v5593_v8  ;;  %v14416_v51 = vld [vmem:[#allocation120_spill] sm:$0xff] }
 0x63e   : > { %v6512_v53 = vadd.f32 %v12572_v22, %v6277_v17  ;;  %v6281_v42 = vadd.f32 %v6280_v55, %v5865_v25  ;;  %v5595_v17 = vadd.f32 %v5467_v30, %v5321_v29  ;;  %v5468_v19 = vmul.f32 %v11133_v60, %v14412_v52 }
 0x63f   : > { %v6513_v3 = vadd.f32 %v12562_v34, %v6279_v56  ;;  %v6639_v48 = vmax.f32 %v6511_v16, 0.0  ;;  %v5868_v16 = vadd.f32 %v5740_v39, %v5594_v9  ;;  %v5470_v30 = vmul.f32 %v11133_v60, %v14416_v51  ;;  %v14417_v9 = vld [vmem:[#allocation121_spill] sm:$0xff] }
 0x640   : > { %v6514_v12 = vadd.f32 %v12572_v22, %v6281_v42  ;;  %v6640_v2 = vmax.f32 %v6512_v53, 0.0  ;;  %v5869_v53 = vadd.f32 %v5741_v37, %v5595_v17 }
 0x641   : > { %v6641_v15 = vmax.f32 %v6513_v3, 0.0  ;;  %v4960_v13 = vpop.f32.mrb[236].mxu1 }
 0x642   : > { %v6642_v18 = vmax.f32 %v6514_v12, 0.0  ;;  %v4961_v10 = vadd.f32 %v4960_v13, %v12161_v24  ;;  %v4962_v61 = vpop.f32.mrb[237].mxu1 }
 0x643   : > { %v6737_v4 = vpack.c.bf16 %v6641_v15, %v6639_v48  ;;  %v4963_v27 = vadd.f32 %v4962_v61, %v12167_v23  ;;  %v4964_v38 = vpop.f32.mrb[238].mxu1 }
 0x644   : > { %v4965_v21 = vadd.f32 %v4964_v38, %v12161_v24  ;;  %v4966_v36 = vpop.f32.mrb[239].mxu1  ;;  %v6738_v44 = vpack.c.bf16 %v6642_v18, %v6640_v2  ;;  %v5117_v28 = vmax.f32 %v4961_v10, 0.0 }
 0x645   : > { %v4967_v50 = vadd.f32 %v4966_v36, %v12167_v23  ;;  %v5118_v26 = vmax.f32 %v4963_v27, 0.0 }
 0x646   : > { %v5119_v47 = vmax.f32 %v4965_v21, 0.0  ;;  %7154 = vmatprep.mubr.bf16.mxu1 %v6738_v44 }
 0x647   : > { %v5120_v11 = vmax.f32 %v4967_v50, 0.0  ;;  %7155 = vmatmul.mubr.bf16.gmra.mrb[60].mxu1 %v6737_v4 }
 0x648   : > { %v5191_v7 = vpack.c.bf16 %v5119_v47, %v5117_v28  ;;  %v5469_v47 = vmul.f32 %v11139_v46, %v14412_v52 }
 0x649   : > { %v5192_v57 = vpack.c.bf16 %v5120_v11, %v5118_v26  ;;  %v14414_v11 = vld [vmem:[#allocation116_spill] sm:$0xff] }
 0x64a   : > { %v5322_v32 = vmul.f32 %v11121_v43, %v14414_v11  ;;  %v5323_v49 = vmul.f32 %v11124_v14, %v14414_v11  ;;  %v14419_v11 = vld [vmem:[#allocation119_spill] sm:$0xff] }
 0x64b   : > { %6392 = vmatprep.mubr.bf16.mxu0 %v5192_v57  ;;  %v14415_v57 = vld [vmem:[#allocation98_spill] sm:$0xff] }
 0x64c   : > { %6393 = vmatmul.mubr.bf16.gmra.mrb[108].mxu0 %v5191_v7  ;;  %v6284_v0 = vpop.f32.mrb[64].mxu0  ;;  %v5325_v7 = vmul.f32 %v11124_v14, %v14413_v33  ;;  %v5596_v41 = vadd.f32 %v5468_v19, %v5322_v32  ;;  %v5742_v8 = vmul.f32 %v11142_v1, %v14415_v57  ;;  %v5597_v39 = vadd.f32 %v5469_v47, %v5323_v49  ;;  %v14418_v33 = vld [vmem:[#allocation123_spill] sm:$0xff] }
 0x64d   : > { %v6285_v40 = vadd.f32 %v6284_v0, %v5866_v31  ;;  %v6286_v25 = vpop.f32.mrb[65].mxu0  ;;  %v5743_v37 = vmul.f32 %v11149_v59, %v14415_v57  ;;  %v5471_v31 = vmul.f32 %v11139_v46, %v14416_v51  ;;  %v5744_v0 = vmul.f32 %v11142_v1, %v14417_v9 }
 0x64e   : > { %v6287_v56 = vadd.f32 %v6286_v25, %v5867_v45  ;;  %v6288_v55 = vpop.f32.mrb[66].mxu0  ;;  %v5745_v45 = vmul.f32 %v11149_v59, %v14417_v9  ;;  %v5870_v17 = vadd.f32 %v5742_v8, %v5596_v41  ;;  %v5328_v32 = vmul.f32 %v11121_v43, %v14419_v11 }
 0x64f   : > { %v6515_v42 = vadd.f32 %v12562_v34, %v6285_v40  ;;  %v6289_v3 = vadd.f32 %v6288_v55, %v5868_v16  ;;  %v6290_v12 = vpop.f32.mrb[67].mxu0  ;;  %v5598_v40 = vadd.f32 %v5470_v30, %v5324_v35  ;;  %v5871_v16 = vadd.f32 %v5743_v37, %v5597_v39  ;;  %v14422_v37 = vld [vmem:[#allocation124_spill] sm:$0xff] }
 0x650   : > { %v6516_v48 = vadd.f32 %v12572_v22, %v6287_v56  ;;  %v6291_v15 = vadd.f32 %v6290_v12, %v5869_v53  ;;  %v5599_v56 = vadd.f32 %v5471_v31, %v5325_v7  ;;  %v5472_v35 = vmul.f32 %v11133_v60, %v14418_v33 }
 0x651   : > { %v6517_v13 = vadd.f32 %v12562_v34, %v6289_v3  ;;  %v6643_v18 = vmax.f32 %v6515_v42, 0.0  ;;  %v5872_v42 = vadd.f32 %v5744_v0, %v5598_v40  ;;  %v5474_v31 = vmul.f32 %v11133_v60, %v14422_v37  ;;  %v14423_v40 = vld [vmem:[#allocation125_spill] sm:$0xff] }
 0x652   : > { %v6518_v2 = vadd.f32 %v12572_v22, %v6291_v15  ;;  %v6644_v4 = vmax.f32 %v6516_v48, 0.0  ;;  %v5873_v48 = vadd.f32 %v5745_v45, %v5599_v56 }
 0x653   : > { %v6645_v10 = vmax.f32 %v6517_v13, 0.0  ;;  %v4970_v61 = vpop.f32.mrb[240].mxu1 }
 0x654   : > { %v6646_v27 = vmax.f32 %v6518_v2, 0.0  ;;  %v4971_v38 = vadd.f32 %v4970_v61, %v12161_v24  ;;  %v4972_v21 = vpop.f32.mrb[241].mxu1 }
 0x655   : > { %v6739_v36 = vpack.c.bf16 %v6645_v10, %v6643_v18  ;;  %v4973_v44 = vadd.f32 %v4972_v21, %v12167_v23  ;;  %v4974_v63 = vpop.f32.mrb[242].mxu1 }
 0x656   : > { %v4975_v6 = vadd.f32 %v4974_v63, %v12161_v24  ;;  %v4976_v50 = vpop.f32.mrb[243].mxu1  ;;  %v6740_v5 = vpack.c.bf16 %v6646_v27, %v6644_v4  ;;  %v5121_v29 = vmax.f32 %v4971_v38, 0.0 }
 0x657   : > { %v4977_v28 = vadd.f32 %v4976_v50, %v12167_v23  ;;  %v5122_v20 = vmax.f32 %v4973_v44, 0.0 }
 0x658   : > { %v5123_v26 = vmax.f32 %v4975_v6, 0.0  ;;  %7164 = vmatprep.mubr.bf16.mxu1 %v6740_v5 }
 0x659   : > { %v5124_v54 = vmax.f32 %v4977_v28, 0.0  ;;  %7165 = vmatmul.mubr.bf16.gmra.mrb[64].mxu1 %v6739_v36 }
 0x65a   : > { %v5193_v58 = vpack.c.bf16 %v5123_v26, %v5121_v29  ;;  %v5473_v26 = vmul.f32 %v11139_v46, %v14418_v33 }
 0x65b   : > { %v5194_v62 = vpack.c.bf16 %v5124_v54, %v5122_v20  ;;  %v14420_v54 = vld [vmem:[#allocation122_spill] sm:$0xff] }
 0x65c   : > { %v5326_v49 = vmul.f32 %v11121_v43, %v14420_v54  ;;  %v5327_v8 = vmul.f32 %v11124_v14, %v14420_v54 }
 0x65d   : > { %6402 = vmatprep.mubr.bf16.mxu0 %v5194_v62  ;;  %v14421_v62 = vld [vmem:[#allocation100_spill] sm:$0xff] }
 0x65e   : > { %6403 = vmatmul.mubr.bf16.gmra.mrb[112].mxu0 %v5193_v58  ;;  %v5329_v58 = vmul.f32 %v11124_v14, %v14419_v11  ;;  %v5600_v30 = vadd.f32 %v5472_v35, %v5326_v49  ;;  %v5746_v39 = vmul.f32 %v11142_v1, %v14421_v62  ;;  %v5601_v0 = vadd.f32 %v5473_v26, %v5327_v8 }
 0x65f   : > { %v6294_v25 = vpop.f32.mrb[68].mxu0  ;;  %v5747_v45 = vmul.f32 %v11149_v59, %v14421_v62 }
 0x660   : > { %v6295_v55 = vadd.f32 %v6294_v25, %v5870_v17  ;;  %v6296_v53 = vpop.f32.mrb[69].mxu0  ;;  %v5475_v17 = vmul.f32 %v11139_v46, %v14422_v37  ;;  %v5748_v25 = vmul.f32 %v11142_v1, %v14423_v40  ;;  %v5874_v56 = vadd.f32 %v5746_v39, %v5600_v30  ;;  %v14426_v37 = vld [vmem:[#allocation128_spill] sm:$0xff] }
 0x661   : > { %v6297_v3 = vadd.f32 %v6296_v53, %v5871_v16  ;;  %v6298_v12 = vpop.f32.mrb[70].mxu0  ;;  %v5749_v16 = vmul.f32 %v11149_v59, %v14423_v40 }
 0x662   : > { %v6519_v15 = vadd.f32 %v12562_v34, %v6295_v55  ;;  %v6299_v13 = vadd.f32 %v6298_v12, %v5872_v42  ;;  %v6300_v2 = vpop.f32.mrb[71].mxu0  ;;  %v5602_v55 = vadd.f32 %v5474_v31, %v5328_v32  ;;  %v5875_v42 = vadd.f32 %v5747_v45, %v5601_v0  ;;  %v14424_v32 = vld [vmem:[#allocation127_spill] sm:$0xff] }
 0x663   : > { %v6520_v18 = vadd.f32 %v12572_v22, %v6297_v3  ;;  %v6301_v10 = vadd.f32 %v6300_v2, %v5873_v48  ;;  %v5603_v3 = vadd.f32 %v5475_v17, %v5329_v58  ;;  %v5477_v49 = vmul.f32 %v11139_v46, %v14424_v32 }
 0x664   : > { %v6521_v61 = vadd.f32 %v12562_v34, %v6299_v13  ;;  %v6647_v27 = vmax.f32 %v6519_v15, 0.0  ;;  %v5876_v15 = vadd.f32 %v5748_v25, %v5602_v55 }
 0x665   : > { %v6522_v4 = vadd.f32 %v12572_v22, %v6301_v10  ;;  %v6648_v36 = vmax.f32 %v6520_v18, 0.0  ;;  %v5877_v18 = vadd.f32 %v5749_v16, %v5603_v3  ;;  %v14427_v16 = vld [vmem:[#allocation129_spill] sm:$0xff] }
 0x666   : > { %v6649_v38 = vmax.f32 %v6521_v61, 0.0  ;;  %v4980_v21 = vpop.f32.mrb[244].mxu1 }
 0x667   : > { %v6650_v44 = vmax.f32 %v6522_v4, 0.0  ;;  %v4981_v63 = vadd.f32 %v4980_v21, %v12161_v24  ;;  %v4982_v6 = vpop.f32.mrb[245].mxu1 }
 0x668   : > { %v6741_v50 = vpack.c.bf16 %v6649_v38, %v6647_v27  ;;  %v4983_v5 = vadd.f32 %v4982_v6, %v12167_v23  ;;  %v4984_v52 = vpop.f32.mrb[246].mxu1 }
 0x669   : > { %v4985_v19 = vadd.f32 %v4984_v52, %v12161_v24  ;;  %v4986_v28 = vpop.f32.mrb[247].mxu1  ;;  %v6742_v47 = vpack.c.bf16 %v6650_v44, %v6648_v36  ;;  %v5125_v7 = vmax.f32 %v4981_v63, 0.0 }
 0x66a   : > { %v4987_v29 = vadd.f32 %v4986_v28, %v12167_v23  ;;  %v5126_v41 = vmax.f32 %v4983_v5, 0.0 }
 0x66b   : > { %v5127_v20 = vmax.f32 %v4985_v19, 0.0  ;;  %7174 = vmatprep.mubr.bf16.mxu1 %v6742_v47 }
 0x66c   : > { %v5128_v57 = vmax.f32 %v4987_v29, 0.0  ;;  %7175 = vmatmul.mubr.bf16.gmra.mrb[68].mxu1 %v6741_v50 }
 0x66d   : > { %v5195_v51 = vpack.c.bf16 %v5127_v20, %v5125_v7  ;;  %v5476_v7 = vmul.f32 %v11133_v60, %v14424_v32  ;;  %v5750_v60 = vmul.f32 %v11142_v1, %v14426_v37 }
 0x66e   : > { %v5196_v9 = vpack.c.bf16 %v5128_v57, %v5126_v41  ;;  %v14425_v57 = vld [vmem:[#allocation126_spill] sm:$0xff] }
 0x66f   : > { %v5330_v8 = vmul.f32 %v11121_v43, %v14425_v57  ;;  %v5331_v30 = vmul.f32 %v11124_v14, %v14425_v57 }
 0x670   : > { %6412 = vmatprep.mubr.bf16.mxu0 %v5196_v9  ;;  %v5751_v9 = vmul.f32 %v11149_v59, %v14426_v37 }
 0x671   : > { %6413 = vmatmul.mubr.bf16.gmra.mrb[116].mxu0 %v5195_v51  ;;  %v5604_v39 = vadd.f32 %v5476_v7, %v5330_v8  ;;  %v5605_v31 = vadd.f32 %v5477_v49, %v5331_v30  ;;  %v14430_v49 = vld [vmem:[#allocation131_spill] sm:$0xff]  ;;  %v14431_v30 = vld [vmem:[#allocation132_spill] sm:$0xff] }
 0x672   : > { %v6304_v53 = vpop.f32.mrb[72].mxu0 }
 0x673   : > { %v6305_v12 = vadd.f32 %v6304_v53, %v5874_v56  ;;  %v6306_v48 = vpop.f32.mrb[73].mxu0  ;;  %v5878_v46 = vadd.f32 %v5750_v60, %v5604_v39  ;;  %v5879_v45 = vadd.f32 %v5751_v9, %v5605_v31  ;;  %v14428_v53 = vld [vmem:[#allocation130_spill] sm:$0xff]  ;;  %v14432_v9 = vld [vmem:[#allocation133_spill] sm:$0xff] }
 0x674   : > { %v6307_v13 = vadd.f32 %v6306_v48, %v5875_v42  ;;  %v6308_v2 = vpop.f32.mrb[74].mxu0 }
 0x675   : > { %v6523_v10 = vadd.f32 %v12562_v34, %v6305_v12  ;;  %v6309_v61 = vadd.f32 %v6308_v2, %v5876_v15  ;;  %v6310_v4 = vpop.f32.mrb[75].mxu0 }
 0x676   : > { %v6524_v27 = vadd.f32 %v12572_v22, %v6307_v13  ;;  %v6311_v38 = vadd.f32 %v6310_v4, %v5877_v18 }
 0x677   : > { %v6525_v21 = vadd.f32 %v12562_v34, %v6309_v61  ;;  %v6651_v44 = vmax.f32 %v6523_v10, 0.0 }
 0x678   : > { %v6526_v36 = vadd.f32 %v12572_v22, %v6311_v38  ;;  %v6652_v50 = vmax.f32 %v6524_v27, 0.0 }
 0x679   : > { %v6653_v63 = vmax.f32 %v6525_v21, 0.0  ;;  %v4990_v6 = vpop.f32.mrb[248].mxu1 }
 0x67a   : > { %v6654_v5 = vmax.f32 %v6526_v36, 0.0  ;;  %v4991_v52 = vadd.f32 %v4990_v6, %v12161_v24  ;;  %v4992_v19 = vpop.f32.mrb[249].mxu1 }
 0x67b   : > { %v6743_v28 = vpack.c.bf16 %v6653_v63, %v6651_v44  ;;  %v4993_v47 = vadd.f32 %v4992_v19, %v12167_v23  ;;  %v4994_v33 = vpop.f32.mrb[250].mxu1  ;;  %v9634_v19 = vld [vmem:[%s13831_s4] sm:$0xff] }
 0x67c   : > { %v4995_v35 = vadd.f32 %v4994_v33, %v12161_v24  ;;  %v4996_v29 = vpop.f32.mrb[251].mxu1  ;;  %v6744_v26 = vpack.c.bf16 %v6654_v5, %v6652_v50  ;;  %v5129_v20 = vmax.f32 %v4991_v52, 0.0 }
 0x67d   : > { %v4997_v11 = vadd.f32 %v4996_v29, %v12167_v23  ;;  %v5130_v58 = vmax.f32 %v4993_v47, 0.0 }
 0x67e   : > { %v5131_v54 = vmax.f32 %v4995_v35, 0.0  ;;  %7184 = vmatprep.mubr.bf16.mxu1 %v6744_v26 }
 0x67f   : > { %v5132_v41 = vmax.f32 %v4997_v11, 0.0  ;;  %7185 = vmatmul.mubr.bf16.gmra.mrb[72].mxu1 %v6743_v28  ;;  %v14429_v28 = vld [vmem:[#allocation22_spill] sm:$0xff] }
 0x680   : > { %v5197_v51 = vpack.c.bf16 %v5131_v54, %v5129_v20  ;;  %v13203_v47 = vrot.slane %v9634_v19, %v14429_v28 }
 0x681   : > { %v5198_v62 = vpack.c.bf16 %v5132_v41, %v5130_v58 }
 0x683   : > { %6422 = vmatprep.mubr.bf16.mxu0 %v5198_v62 }
 0x684   : > { %6423 = vmatmul.mubr.bf16.gmra.mrb[120].mxu0 %v5197_v51 }
 0x686   : > { %v6314_v0 = vpop.f32.mrb[76].mxu0 }
 0x687   : > { %v6315_v17 = vadd.f32 %v6314_v0, %v5878_v46  ;;  %v6316_v43 = vpop.f32.mrb[77].mxu0 }
 0x688   : > { %v6317_v40 = vadd.f32 %v6316_v43, %v5879_v45  ;;  %v6318_v25 = vpop.f32.mrb[78].mxu0  ;;  %v14433_v43 = vld [vmem:[#allocation134_spill] sm:$0xff] }
 0x689   : > { %v6527_v14 = vadd.f32 %v12562_v34, %v6315_v17  ;;  %v6319_v56 = vadd.f32 %v6318_v25, %v14427_v16  ;;  %v6320_v55 = vpop.f32.mrb[79].mxu0 }
 0x68a   : > { %v6528_v1 = vadd.f32 %v12572_v22, %v6317_v40  ;;  %v6321_v42 = vadd.f32 %v6320_v55, %v14428_v53 }
 0x68b   : > { %v6529_v59 = vadd.f32 %v12562_v34, %v6319_v56  ;;  %v6655_v48 = vmax.f32 %v6527_v14, 0.0 }
 0x68c   : > { %v6530_v3 = vadd.f32 %v12572_v22, %v6321_v42  ;;  %v5000_v12 = vpop.f32.mrb[252].mxu1  ;;  %v6656_v18 = vmax.f32 %v6528_v1, 0.0 }
 0x68d   : > { %v6657_v15 = vmax.f32 %v6529_v59, 0.0  ;;  %v5001_v13 = vadd.f32 %v5000_v12, %v12161_v24  ;;  %v5002_v2 = vpop.f32.mrb[253].mxu1 }
 0x68e   : > { %v6658_v10 = vmax.f32 %v6530_v3, 0.0  ;;  %v5003_v61 = vadd.f32 %v5002_v2, %v12167_v23  ;;  %v5004_v4 = vpop.f32.mrb[254].mxu1 }
 0x68f   : > { %v6745_v27 = vpack.c.bf16 %v6657_v15, %v6655_v48  ;;  %v5005_v38 = vadd.f32 %v5004_v4, %v12161_v24  ;;  %v5006_v21 = vpop.f32.mrb[255].mxu1  ;;  %v5133_v63 = vmax.f32 %v5001_v13, 0.0  ;;  %v9635_v24 = vld [vmem:[%s13831_s4 + $0x8] sm:$0xff] }
 0x690   : > { %v5007_v36 = vadd.f32 %v5006_v21, %v12167_v23  ;;  %v6746_v44 = vpack.c.bf16 %v6658_v10, %v6656_v18  ;;  %v5134_v50 = vmax.f32 %v5003_v61, 0.0  ;;  %v13209_v23 = vrot.slane %v9635_v24, %v14429_v28 }
 0x691   : > { %v5135_v6 = vmax.f32 %v5005_v38, 0.0 }
 0x692   : > { %v5136_v5 = vmax.f32 %v5007_v36, 0.0  ;;  %7194 = vmatprep.mubr.bf16.mxu1 %v6746_v44 }
 0x693   : > { %v5199_v52 = vpack.c.bf16 %v5135_v6, %v5133_v63  ;;  %7195 = vmatmul.mubr.bf16.gmra.mrb[76].mxu1 %v6745_v27 }
 0x694   : > { %v5200_v33 = vpack.c.bf16 %v5136_v5, %v5134_v50 }
 0x696   : > { %6432 = vmatprep.mubr.bf16.mxu0 %v5200_v33  ;;  %v7006_v35 = vpop.f32.mrb[0].mxu1 }
 0x697   : > { %v7007_v29 = vadd.f32 %v7006_v35, %v13203_v47  ;;  %6433 = vmatmul.mubr.bf16.gmra.mrb[124].mxu0 %v5199_v52  ;;  %v7008_v26 = vpop.f32.mrb[1].mxu1 }
 0x698   : > { %v7009_v11 = vadd.f32 %v7008_v26, %v13209_v23  ;;  %v7010_v32 = vpop.f32.mrb[2].mxu1 }
 0x699   : > { %v7011_v7 = vadd.f32 %v7010_v32, %v13203_v47  ;;  %v6324_v20 = vpop.f32.mrb[80].mxu0  ;;  %v7012_v54 = vpop.f32.mrb[3].mxu1  ;;  %v7325_v8 = vmax.f32 %v7007_v29, 0.0  ;;  %v14434_v32 = vld [vmem:[#allocation135_spill] sm:$0xff] }
 0x69a   : > { %v6325_v58 = vadd.f32 %v6324_v20, %v14430_v49  ;;  %v7013_v41 = vadd.f32 %v7012_v54, %v13209_v23  ;;  %v6326_v57 = vpop.f32.mrb[81].mxu0  ;;  %v7326_v37 = vmax.f32 %v7009_v11, 0.0  ;;  %v14435_v49 = vld [vmem:[#allocation136_spill] sm:$0xff] }
 0x69b   : > { %v7327_v51 = vmax.f32 %v7011_v7, 0.0  ;;  %v6327_v62 = vadd.f32 %v6326_v57, %v14431_v30  ;;  %v6328_v39 = vpop.f32.mrb[82].mxu0 }
 0x69c   : > { %v6531_v60 = vadd.f32 %v12562_v34, %v6325_v58  ;;  %v7328_v31 = vmax.f32 %v7013_v41, 0.0  ;;  %v6329_v46 = vadd.f32 %v6328_v39, %v14432_v9  ;;  %v6330_v0 = vpop.f32.mrb[83].mxu0 }
 0x69d   : > { %v7453_v45 = vpack.c.bf16 %v7327_v51, %v7325_v8  ;;  %v6532_v17 = vadd.f32 %v12572_v22, %v6327_v62  ;;  %v6331_v40 = vadd.f32 %v6330_v0, %v14433_v43  ;;  %v14436_v51 = vld [vmem:[#allocation137_spill] sm:$0xff] }
 0x69e   : > { %v7454_v25 = vpack.c.bf16 %v7328_v31, %v7326_v37  ;;  %v6533_v14 = vadd.f32 %v12562_v34, %v6329_v46  ;;  %v7016_v16 = vpop.f32.mrb[4].mxu1  ;;  %v6659_v53 = vmax.f32 %v6531_v60, 0.0  ;;  %v14437_v31 = vld [vmem:[#allocation138_spill] sm:$0xff] }
 0x69f   : > { %v6534_v56 = vadd.f32 %v12572_v22, %v6331_v40  ;;  %v7017_v55 = vadd.f32 %v7016_v16, %v13203_v47  ;;  %v7018_v1 = vpop.f32.mrb[5].mxu1  ;;  %v6660_v12 = vmax.f32 %v6532_v17, 0.0 }
 0x6a0   : > { %v6661_v42 = vmax.f32 %v6533_v14, 0.0  ;;  %v7019_v59 = vadd.f32 %v7018_v1, %v13209_v23  ;;  %v7020_v3 = vpop.f32.mrb[6].mxu1  ;;  %7750 = vmatprep.mubr.bf16.mxu0 %v7454_v25 }
 0x6a1   : > { %v6662_v48 = vmax.f32 %v6534_v56, 0.0  ;;  %v7021_v15 = vadd.f32 %v7020_v3, %v13203_v47  ;;  %v7022_v13 = vpop.f32.mrb[7].mxu1  ;;  %7751 = vmatmul.mubr.bf16.vlgmr.msra.gmra.mrb[128].mxu0 %v7453_v45  ;;  %v7329_v10 = vmax.f32 %v7017_v55, 0.0 }
 0x6a2   : > { %v6747_v2 = vpack.c.bf16 %v6661_v42, %v6659_v53  ;;  %v7023_v18 = vadd.f32 %v7022_v13, %v13209_v23  ;;  %v7330_v27 = vmax.f32 %v7019_v59, 0.0 }
 0x6a3   : > { %v7331_v61 = vmax.f32 %v7021_v15, 0.0  ;;  %v6748_v4 = vpack.c.bf16 %v6662_v48, %v6660_v12 }
 0x6a4   : > { %v7332_v38 = vmax.f32 %v7023_v18, 0.0 }
 0x6a5   : > { %v7455_v21 = vpack.c.bf16 %v7331_v61, %v7329_v10  ;;  %7204 = vmatprep.mubr.bf16.mxu1 %v6748_v4 }
 0x6a6   : > { %v7456_v36 = vpack.c.bf16 %v7332_v38, %v7330_v27  ;;  %v7026_v44 = vpop.f32.mrb[8].mxu1  ;;  %7205 = vmatmul.mubr.bf16.gmra.mrb[80].mxu1 %v6747_v2 }
 0x6a7   : > { %v7027_v63 = vadd.f32 %v7026_v44, %v13203_v47  ;;  %v7028_v6 = vpop.f32.mrb[9].mxu1 }
 0x6a8   : > { %v7029_v50 = vadd.f32 %v7028_v6, %v13209_v23  ;;  %v7030_v5 = vpop.f32.mrb[10].mxu1  ;;  %7760 = vmatprep.mubr.bf16.mxu0 %v7456_v36 }
 0x6a9   : > { %v7031_v52 = vadd.f32 %v7030_v5, %v13203_v47  ;;  %v7032_v19 = vpop.f32.mrb[11].mxu1  ;;  %7761 = vmatmul.mubr.bf16.gmra.mrb[132].mxu0 %v7455_v21  ;;  %v7333_v33 = vmax.f32 %v7027_v63, 0.0  ;;  %v9592_v21 = vld [vmem:[%s13832_s5] sm:$0xff]   ;;  %v14438_v5 = vmov 0  }
 0x6aa   : > { %v7033_v28 = vadd.f32 %v7032_v19, %v13209_v23  ;;  %v7334_v35 = vmax.f32 %v7029_v50, 0.0  ;;  %8399 = vmatpush1.bf16.msra.mxu1 %v9592_v21 }
 0x6ab   : > { %v7335_v24 = vmax.f32 %v7031_v52, 0.0  ;;  %8400 = vmatprep.subr.bf16.mxu1 %v14438_v5 }
 0x6ac   : > { %v7336_v29 = vmax.f32 %v7033_v28, 0.0 }
 0x6ad   : > { %v6334_v26 = vpop.f32.mrb[84].mxu0  ;;  %v7457_v11 = vpack.c.bf16 %v7335_v24, %v7333_v33 }
 0x6ae   : > { %v6335_v7 = vadd.f32 %v6334_v26, %v14434_v32  ;;  %v6336_v20 = vpop.f32.mrb[85].mxu0  ;;  %v7458_v54 = vpack.c.bf16 %v7336_v29, %v7334_v35  ;;  %v7036_v57 = vpop.f32.mrb[12].mxu1  ;;  %v14439_v35 = vld [vmem:[#allocation139_spill] sm:$0xff] }
 0x6af   : > { %v6337_v58 = vadd.f32 %v6336_v20, %v14435_v49  ;;  %v6338_v41 = vpop.f32.mrb[86].mxu0  ;;  %v7037_v62 = vadd.f32 %v7036_v57, %v13203_v47  ;;  %v7038_v37 = vpop.f32.mrb[13].mxu1  ;;  %v14441_v57 = vld [vmem:[#allocation141_spill] sm:$0xff] }
 0x6b0   : > { %v6535_v8 = vadd.f32 %v12562_v34, %v6335_v7  ;;  %v6339_v30 = vadd.f32 %v6338_v41, %v14436_v51  ;;  %v6340_v39 = vpop.f32.mrb[87].mxu0  ;;  %v7039_v46 = vadd.f32 %v7038_v37, %v13209_v23  ;;  %v7040_v0 = vpop.f32.mrb[14].mxu1  ;;  %7770 = vmatprep.mubr.bf16.mxu0 %v7458_v54  ;;  %v14440_v7 = vld [vmem:[#allocation140_spill] sm:$0xff] }
 0x6b1   : > { %v6536_v60 = vadd.f32 %v12572_v22, %v6337_v58  ;;  %v6341_v9 = vadd.f32 %v6340_v39, %v14437_v31  ;;  %v7041_v17 = vadd.f32 %v7040_v0, %v13203_v47  ;;  %v7042_v43 = vpop.f32.mrb[15].mxu1  ;;  %7771 = vmatmul.mubr.bf16.gmra.mrb[136].mxu0 %v7457_v11  ;;  %v7337_v56 = vmax.f32 %v7037_v62, 0.0 }
 0x6b2   : > { %v6537_v45 = vadd.f32 %v12562_v34, %v6339_v30  ;;  %v7043_v25 = vadd.f32 %v7042_v43, %v13209_v23  ;;  %v6663_v14 = vmax.f32 %v6535_v8, 0.0  ;;  %v7338_v42 = vmax.f32 %v7039_v46, 0.0 }
 0x6b3   : > { %v6538_v40 = vadd.f32 %v12572_v22, %v6341_v9  ;;  %v7339_v55 = vmax.f32 %v7041_v17, 0.0  ;;  %v6664_v1 = vmax.f32 %v6536_v60, 0.0  ;;  %v14442_v60 = vld [vmem:[#allocation142_spill] sm:$0xff] }
 0x6b4   : > { %v6665_v16 = vmax.f32 %v6537_v45, 0.0  ;;  %v7340_v59 = vmax.f32 %v7043_v25, 0.0 }
 0x6b5   : > { %v6666_v53 = vmax.f32 %v6538_v40, 0.0  ;;  %v7459_v12 = vpack.c.bf16 %v7339_v55, %v7337_v56 }
 0x6b6   : > { %v6749_v3 = vpack.c.bf16 %v6665_v16, %v6663_v14  ;;  %v7460_v48 = vpack.c.bf16 %v7340_v59, %v7338_v42  ;;  %v7046_v15 = vpop.f32.mrb[16].mxu1 }
 0x6b7   : > { %v6750_v13 = vpack.c.bf16 %v6666_v53, %v6664_v1  ;;  %v7047_v2 = vadd.f32 %v7046_v15, %v13203_v47  ;;  %v7048_v18 = vpop.f32.mrb[17].mxu1  ;;  %v9593_v15 = vld [vmem:[%s13832_s5 + $0x8] sm:$0xff]  }
 0x6b8   : > { %v7049_v10 = vadd.f32 %v7048_v18, %v13209_v23  ;;  %v7050_v61 = vpop.f32.mrb[18].mxu1  ;;  %7780 = vmatprep.mubr.bf16.mxu0 %v7460_v48  ;;  %8401 = vmatpush1.bf16.msra.mxu1 %v9593_v15 }
 0x6b9   : > { %7214 = vmatprep.mubr.bf16.mxu1 %v6750_v13  ;;  %v7051_v4 = vadd.f32 %v7050_v61, %v13203_v47  ;;  %v7052_v27 = vpop.f32.mrb[19].mxu1  ;;  %7781 = vmatmul.mubr.bf16.gmra.mrb[140].mxu0 %v7459_v12  ;;  %v7341_v36 = vmax.f32 %v7047_v2, 0.0 }
 0x6ba   : > { %7215 = vmatmul.mubr.bf16.gmra.mrb[84].mxu1 %v6749_v3  ;;  %v7053_v38 = vadd.f32 %v7052_v27, %v13209_v23  ;;  %v7342_v63 = vmax.f32 %v7049_v10, 0.0  ;;  %8402 = vmatprep.subr.bf16.mxu1 %v14438_v5  ;;  %v9594_v27 = vld [vmem:[%s13832_s5 + $0x10] sm:$0xff]  }
 0x6bb   : > { %v7343_v44 = vmax.f32 %v7051_v4, 0.0 }
 0x6bc   : > { %v7344_v6 = vmax.f32 %v7053_v38, 0.0  ;;  %8403 = vmatpush1.bf16.msra.mxu1 %v9594_v27 }
 0x6bd   : > { %v7461_v50 = vpack.c.bf16 %v7343_v44, %v7341_v36  ;;  %8404 = vmatprep.subr.bf16.mxu1 %v14438_v5 }
 0x6be   : > { %v7462_v52 = vpack.c.bf16 %v7344_v6, %v7342_v63  ;;  %v7056_v19 = vpop.f32.mrb[20].mxu1  ;;  %v9595_v63 = vld [vmem:[%s13832_s5 + $0x18] sm:$0xff]  }
 0x6bf   : > { %v7057_v28 = vadd.f32 %v7056_v19, %v13203_v47  ;;  %v7058_v24 = vpop.f32.mrb[21].mxu1 }
 0x6c0   : > { %v6344_v33 = vpop.f32.mrb[88].mxu0  ;;  %v7059_v26 = vadd.f32 %v7058_v24, %v13209_v23  ;;  %v7060_v32 = vpop.f32.mrb[22].mxu1  ;;  %7790 = vmatprep.mubr.bf16.mxu0 %v7462_v52  ;;  %8405 = vmatpush1.bf16.msra.mxu1 %v9595_v63 }
 0x6c1   : > { %v6345_v29 = vadd.f32 %v6344_v33, %v14439_v35  ;;  %v6346_v11 = vpop.f32.mrb[89].mxu0  ;;  %v7061_v54 = vadd.f32 %v7060_v32, %v13203_v47  ;;  %v7062_v58 = vpop.f32.mrb[23].mxu1  ;;  %7791 = vmatmul.mubr.bf16.gmra.mrb[144].mxu0 %v7461_v50  ;;  %v7345_v62 = vmax.f32 %v7057_v28, 0.0  ;;  %v9596_v32 = vld [vmem:[%s13832_s5 + $0x20] sm:$0xff]   ;;  %8406 = vmatprep.subr.bf16.mxu1 %v14438_v5 }
 0x6c2   : > { %v6347_v20 = vadd.f32 %v6346_v11, %v14440_v7  ;;  %v6348_v49 = vpop.f32.mrb[90].mxu0  ;;  %v7063_v51 = vadd.f32 %v7062_v58, %v13209_v23  ;;  %v7346_v9 = vmax.f32 %v7059_v26, 0.0 }
 0x6c3   : > { %v6539_v41 = vadd.f32 %v12562_v34, %v6345_v29  ;;  %v6349_v8 = vadd.f32 %v6348_v49, %v14441_v57  ;;  %v6350_v30 = vpop.f32.mrb[91].mxu0  ;;  %v7347_v37 = vmax.f32 %v7061_v54, 0.0  ;;  %v14443_v29 = vld [vmem:[#allocation143_spill] sm:$0xff]  ;;  %v14444_v54 = vld [vmem:[#allocation144_spill] sm:$0xff] }
 0x6c4   : > { %v6540_v39 = vadd.f32 %v12572_v22, %v6347_v20  ;;  %v6351_v31 = vadd.f32 %v6350_v30, %v14442_v60  ;;  %v7348_v0 = vmax.f32 %v7063_v51, 0.0  ;;  %8407 = vmatpush1.bf16.msra.mxu1 %v9596_v32  ;;  %v14448_v32 = vld [vmem:[#allocation148_spill] sm:$0xff] }
 0x6c5   : > { %v6541_v46 = vadd.f32 %v12562_v34, %v6349_v8  ;;  %v7463_v45 = vpack.c.bf16 %v7347_v37, %v7345_v62  ;;  %v6667_v43 = vmax.f32 %v6539_v41, 0.0  ;;  %v14445_v8 = vld [vmem:[#allocation145_spill] sm:$0xff]  ;;  %v14446_v37 = vld [vmem:[#allocation146_spill] sm:$0xff]  ;;  %8408 = vmatprep.subr.bf16.mxu1 %v14438_v5 }
 0x6c6   : > { %v6542_v17 = vadd.f32 %v12572_v22, %v6351_v31  ;;  %v7464_v25 = vpack.c.bf16 %v7348_v0, %v7346_v9  ;;  %v7066_v14 = vpop.f32.mrb[24].mxu1  ;;  %v6668_v16 = vmax.f32 %v6540_v39, 0.0 }
 0x6c7   : > { %v6669_v40 = vmax.f32 %v6541_v46, 0.0  ;;  %v7067_v55 = vadd.f32 %v7066_v14, %v13203_v47  ;;  %v7068_v1 = vpop.f32.mrb[25].mxu1 }
 0x6c8   : > { %v6670_v56 = vmax.f32 %v6542_v17, 0.0  ;;  %v7069_v42 = vadd.f32 %v7068_v1, %v13209_v23  ;;  %v7070_v59 = vpop.f32.mrb[26].mxu1  ;;  %7800 = vmatprep.mubr.bf16.mxu0 %v7464_v25 }
 0x6c9   : > { %v6751_v53 = vpack.c.bf16 %v6669_v40, %v6667_v43  ;;  %v7071_v3 = vadd.f32 %v7070_v59, %v13203_v47  ;;  %v7072_v12 = vpop.f32.mrb[27].mxu1  ;;  %7801 = vmatmul.mubr.bf16.gmra.mrb[148].mxu0 %v7463_v45  ;;  %v7349_v2 = vmax.f32 %v7067_v55, 0.0  ;;  %v9597_v45 = vld [vmem:[%s13832_s5 + $0x28] sm:$0xff]  }
 0x6ca   : > { %v6752_v48 = vpack.c.bf16 %v6670_v56, %v6668_v16  ;;  %v7073_v13 = vadd.f32 %v7072_v12, %v13209_v23  ;;  %v7350_v10 = vmax.f32 %v7069_v42, 0.0  ;;  %8409 = vmatpush1.bf16.msra.mxu1 %v9597_v45 }
 0x6cb   : > { %v7351_v18 = vmax.f32 %v7071_v3, 0.0  ;;  %8410 = vmatprep.subr.bf16.mxu1 %v14438_v5 }
 0x6cc   : > { %7224 = vmatprep.mubr.bf16.mxu1 %v6752_v48  ;;  %v7352_v61 = vmax.f32 %v7073_v13, 0.0 }
 0x6cd   : > { %7225 = vmatmul.mubr.bf16.gmra.mrb[88].mxu1 %v6751_v53  ;;  %v7465_v4 = vpack.c.bf16 %v7351_v18, %v7349_v2  ;;  %v9598_v2 = vld [vmem:[%s13832_s5 + $0x30] sm:$0xff]  }
 0x6ce   : > { %v7466_v38 = vpack.c.bf16 %v7352_v61, %v7350_v10  ;;  %v7076_v21 = vpop.f32.mrb[28].mxu1  ;;  %8411 = vmatpush1.bf16.msra.mxu1 %v9598_v2 }
 0x6cf   : > { %v7077_v36 = vadd.f32 %v7076_v21, %v13203_v47  ;;  %v7078_v44 = vpop.f32.mrb[29].mxu1  ;;  %v9599_v21 = vld [vmem:[%s13832_s5 + $0x38] sm:$0xff]   ;;  %8412 = vmatprep.subr.bf16.mxu1 %v14438_v5 }
 0x6d0   : > { %v7079_v6 = vadd.f32 %v7078_v44, %v13209_v23  ;;  %v7080_v50 = vpop.f32.mrb[30].mxu1  ;;  %7810 = vmatprep.mubr.bf16.mxu0 %v7466_v38 }
 0x6d1   : > { %v7081_v52 = vadd.f32 %v7080_v50, %v13203_v47  ;;  %v7082_v19 = vpop.f32.mrb[31].mxu1  ;;  %7811 = vmatmul.mubr.bf16.gmra.mrb[152].mxu0 %v7465_v4  ;;  %v7353_v24 = vmax.f32 %v7077_v36, 0.0 }
 0x6d2   : > { %v7083_v28 = vadd.f32 %v7082_v19, %v13209_v23  ;;  %v7354_v7 = vmax.f32 %v7079_v6, 0.0  ;;  %8413 = vmatpush1.bf16.msra.mxu1 %v9599_v21  ;;  %v9603_v21 = vld [vmem:[%s13832_s5 + $0x58] sm:$0xff]  }
 0x6d3   : > { %v6354_v33 = vpop.f32.mrb[92].mxu0  ;;  %v7355_v35 = vmax.f32 %v7081_v52, 0.0  ;;  %8414 = vmatprep.subr.bf16.mxu1 %v14438_v5 }
 0x6d4   : > { %v6355_v26 = vadd.f32 %v6354_v33, %v14443_v29  ;;  %v6356_v11 = vpop.f32.mrb[93].mxu0  ;;  %v7356_v20 = vmax.f32 %v7083_v28, 0.0  ;;  %v9600_v33 = vld [vmem:[%s13832_s5 + $0x40] sm:$0xff]  }
 0x6d5   : > { %v6357_v49 = vadd.f32 %v6356_v11, %v14444_v54  ;;  %v6358_v58 = vpop.f32.mrb[94].mxu0  ;;  %v7467_v41 = vpack.c.bf16 %v7355_v35, %v7353_v24  ;;  %v14447_v35 = vld [vmem:[#allocation147_spill] sm:$0xff] }
 0x6d6   : > { %v6543_v57 = vadd.f32 %v12562_v34, %v6355_v26  ;;  %v6359_v51 = vadd.f32 %v6358_v58, %v14445_v8  ;;  %v6360_v30 = vpop.f32.mrb[95].mxu0  ;;  %v7468_v62 = vpack.c.bf16 %v7356_v20, %v7354_v7  ;;  %v7086_v31 = vpop.f32.mrb[32].mxu1  ;;  %8415 = vmatpush1.bf16.msra.mxu1 %v9600_v33 }
 0x6d7   : > { %v6544_v39 = vadd.f32 %v12572_v22, %v6357_v49  ;;  %v6361_v60 = vadd.f32 %v6360_v30, %v14446_v37  ;;  %v7087_v46 = vadd.f32 %v7086_v31, %v13203_v47  ;;  %v7088_v0 = vpop.f32.mrb[33].mxu1  ;;  %v9601_v31 = vld [vmem:[%s13832_s5 + $0x48] sm:$0xff]   ;;  %8416 = vmatprep.subr.bf16.mxu1 %v14438_v5 }
 0x6d8   : > { %v6545_v9 = vadd.f32 %v12562_v34, %v6359_v51  ;;  %v7089_v43 = vadd.f32 %v7088_v0, %v13209_v23  ;;  %v7090_v40 = vpop.f32.mrb[34].mxu1  ;;  %7820 = vmatprep.mubr.bf16.mxu0 %v7468_v62  ;;  %v6671_v25 = vmax.f32 %v6543_v57, 0.0 }
 0x6d9   : > { %v6546_v17 = vadd.f32 %v12572_v22, %v6361_v60  ;;  %v7091_v16 = vadd.f32 %v7090_v40, %v13203_v47  ;;  %v7092_v56 = vpop.f32.mrb[35].mxu1  ;;  %7821 = vmatmul.mubr.bf16.gmra.mrb[156].mxu0 %v7467_v41  ;;  %v6672_v55 = vmax.f32 %v6544_v39, 0.0  ;;  %v7357_v59 = vmax.f32 %v7087_v46, 0.0  ;;  %v14449_v41 = vld [vmem:[#allocation149_spill] sm:$0xff]  ;;  %v14450_v39 = vld [vmem:[#allocation150_spill] sm:$0xff] }
 0x6da   : > { %v6673_v14 = vmax.f32 %v6545_v9, 0.0  ;;  %v7093_v53 = vadd.f32 %v7092_v56, %v13209_v23  ;;  %v7358_v12 = vmax.f32 %v7089_v43, 0.0  ;;  %8417 = vmatpush1.bf16.msra.mxu1 %v9601_v31 }
 0x6db   : > { %v6674_v1 = vmax.f32 %v6546_v17, 0.0  ;;  %v7359_v3 = vmax.f32 %v7091_v16, 0.0  ;;  %8418 = vmatprep.subr.bf16.mxu1 %v14438_v5 }
 0x6dc   : > { %v6753_v42 = vpack.c.bf16 %v6673_v14, %v6671_v25  ;;  %v7360_v48 = vmax.f32 %v7093_v53, 0.0 }
 0x6dd   : > { %v6754_v15 = vpack.c.bf16 %v6674_v1, %v6672_v55  ;;  %v7469_v13 = vpack.c.bf16 %v7359_v3, %v7357_v59 }
 0x6de   : > { %v7470_v18 = vpack.c.bf16 %v7360_v48, %v7358_v12  ;;  %v7096_v10 = vpop.f32.mrb[36].mxu1  ;;  %v9602_v48 = vld [vmem:[%s13832_s5 + $0x50] sm:$0xff]  }
 0x6df   : > { %7234 = vmatprep.mubr.bf16.mxu1 %v6754_v15  ;;  %v7097_v61 = vadd.f32 %v7096_v10, %v13203_v47  ;;  %v7098_v4 = vpop.f32.mrb[37].mxu1  ;;  %8419 = vmatpush1.bf16.msra.mxu1 %v9602_v48 }
 0x6e0   : > { %7235 = vmatmul.mubr.bf16.gmra.mrb[92].mxu1 %v6753_v42  ;;  %v7099_v27 = vadd.f32 %v7098_v4, %v13209_v23  ;;  %v7100_v38 = vpop.f32.mrb[38].mxu1  ;;  %7830 = vmatprep.mubr.bf16.mxu0 %v7470_v18 }
 0x6e1   : > { %v7101_v36 = vadd.f32 %v7100_v38, %v13203_v47  ;;  %v7102_v44 = vpop.f32.mrb[39].mxu1  ;;  %7831 = vmatmul.mubr.bf16.gmra.mrb[160].mxu0 %v7469_v13  ;;  %v7361_v6 = vmax.f32 %v7097_v61, 0.0  ;;  %8420 = vmatprep.subr.bf16.mxu1 %v14438_v5 }
 0x6e2   : > { %v7103_v63 = vadd.f32 %v7102_v44, %v13209_v23  ;;  %v7362_v52 = vmax.f32 %v7099_v27, 0.0 }
 0x6e3   : > { %v7363_v50 = vmax.f32 %v7101_v36, 0.0  ;;  %8421 = vmatpush1.bf16.msra.mxu1 %v9603_v21 }
 0x6e4   : > { %v7364_v19 = vmax.f32 %v7103_v63, 0.0  ;;  %8422 = vmatprep.subr.bf16.mxu1 %v14438_v5 }
 0x6e5   : > { %v6364_v28 = vpop.f32.mrb[96].mxu0  ;;  %v7471_v24 = vpack.c.bf16 %v7363_v50, %v7361_v6 }
 0x6e6   : > { %v6365_v29 = vadd.f32 %v6364_v28, %v14447_v35  ;;  %v6366_v26 = vpop.f32.mrb[97].mxu0  ;;  %v7472_v11 = vpack.c.bf16 %v7364_v19, %v7362_v52  ;;  %v7106_v20 = vpop.f32.mrb[40].mxu1  ;;  %v9604_v52 = vld [vmem:[%s13832_s5 + $0x60] sm:$0xff]  }
 0x6e7   : > { %v6367_v7 = vadd.f32 %v6366_v26, %v14448_v32  ;;  %v6368_v54 = vpop.f32.mrb[98].mxu0  ;;  %v7107_v58 = vadd.f32 %v7106_v20, %v13203_v47  ;;  %v7108_v8 = vpop.f32.mrb[41].mxu1  ;;  %v14451_v35 = vld [vmem:[#allocation152_spill] sm:$0xff]  ;;  %8423 = vmatpush1.bf16.msra.mxu1 %v9604_v52 }
 0x6e8   : > { %v6547_v49 = vadd.f32 %v12562_v34, %v6365_v29  ;;  %v6369_v57 = vadd.f32 %v6368_v54, %v14449_v41  ;;  %v6370_v51 = vpop.f32.mrb[99].mxu0  ;;  %v7109_v62 = vadd.f32 %v7108_v8, %v13209_v23  ;;  %v7110_v60 = vpop.f32.mrb[42].mxu1  ;;  %7840 = vmatprep.mubr.bf16.mxu0 %v7472_v11  ;;  %8424 = vmatprep.subr.bf16.mxu1 %v14438_v5 }
 0x6e9   : > { %v6548_v30 = vadd.f32 %v12572_v22, %v6367_v7  ;;  %v6371_v37 = vadd.f32 %v6370_v51, %v14450_v39  ;;  %v7111_v46 = vadd.f32 %v7110_v60, %v13203_v47  ;;  %v7112_v0 = vpop.f32.mrb[43].mxu1  ;;  %7841 = vmatmul.mubr.bf16.gmra.mrb[164].mxu0 %v7471_v24  ;;  %v7365_v40 = vmax.f32 %v7107_v58, 0.0  ;;  %v14452_v7 = vld [vmem:[#allocation153_spill] sm:$0xff]  ;;  %v14454_v60 = vld [vmem:[#allocation155_spill] sm:$0xff] }
 0x6ea   : > { %v6549_v9 = vadd.f32 %v12562_v34, %v6369_v57  ;;  %v7113_v17 = vadd.f32 %v7112_v0, %v13209_v23  ;;  %v6675_v43 = vmax.f32 %v6547_v49, 0.0  ;;  %v7366_v56 = vmax.f32 %v7109_v62, 0.0  ;;  %v14453_v57 = vld [vmem:[#allocation154_spill] sm:$0xff] }
 0x6eb   : > { %v6550_v45 = vadd.f32 %v12572_v22, %v6371_v37  ;;  %v7367_v14 = vmax.f32 %v7111_v46, 0.0  ;;  %v6676_v16 = vmax.f32 %v6548_v30, 0.0  ;;  %v9605_v30 = vld [vmem:[%s13832_s5 + $0x68] sm:$0xff]  }
 0x6ec   : > { %v6677_v25 = vmax.f32 %v6549_v9, 0.0  ;;  %v7368_v1 = vmax.f32 %v7113_v17, 0.0  ;;  %8425 = vmatpush1.bf16.msra.mxu1 %v9605_v30  ;;  %v14458_v30 = vld [vmem:[#allocation158_spill] sm:$0xff] }
 0x6ed   : > { %v6678_v55 = vmax.f32 %v6550_v45, 0.0  ;;  %v7473_v42 = vpack.c.bf16 %v7367_v14, %v7365_v40  ;;  %8426 = vmatprep.subr.bf16.mxu1 %v14438_v5 }
 0x6ee   : > { %v6755_v53 = vpack.c.bf16 %v6677_v25, %v6675_v43  ;;  %v7474_v59 = vpack.c.bf16 %v7368_v1, %v7366_v56  ;;  %v7116_v3 = vpop.f32.mrb[44].mxu1 }
 0x6ef   : > { %v6756_v12 = vpack.c.bf16 %v6678_v55, %v6676_v16  ;;  %v7117_v15 = vadd.f32 %v7116_v3, %v13203_v47  ;;  %v7118_v13 = vpop.f32.mrb[45].mxu1  ;;  %v9606_v16 = vld [vmem:[%s13832_s5 + $0x70] sm:$0xff]  }
 0x6f0   : > { %v7119_v2 = vadd.f32 %v7118_v13, %v13209_v23  ;;  %v7120_v18 = vpop.f32.mrb[46].mxu1  ;;  %7850 = vmatprep.mubr.bf16.mxu0 %v7474_v59  ;;  %8427 = vmatpush1.bf16.msra.mxu1 %v9606_v16 }
 0x6f1   : > { %7244 = vmatprep.mubr.bf16.mxu1 %v6756_v12  ;;  %v7121_v10 = vadd.f32 %v7120_v18, %v13203_v47  ;;  %v7122_v61 = vpop.f32.mrb[47].mxu1  ;;  %7851 = vmatmul.mubr.bf16.gmra.mrb[168].mxu0 %v7473_v42  ;;  %v7369_v27 = vmax.f32 %v7117_v15, 0.0 }
 0x6f2   : > { %7245 = vmatmul.mubr.bf16.gmra.mrb[96].mxu1 %v6755_v53  ;;  %v7123_v4 = vadd.f32 %v7122_v61, %v13209_v23  ;;  %v7370_v36 = vmax.f32 %v7119_v2, 0.0  ;;  %v9607_v2 = vld [vmem:[%s13832_s5 + $0x78] sm:$0xff]   ;;  %8428 = vmatprep.subr.bf16.mxu1 %v14438_v5 }
 0x6f3   : > { %v7371_v38 = vmax.f32 %v7121_v10, 0.0 }
 0x6f4   : > { %v7372_v44 = vmax.f32 %v7123_v4, 0.0  ;;  %8429 = vmatpush1.bf16.msra.mxu1 %v9607_v2  ;;  %v14460_v2 = vld [vmem:[#allocation160_spill] sm:$0xff] }
 0x6f5   : > { %v7475_v63 = vpack.c.bf16 %v7371_v38, %v7369_v27 }
 0x6f6   : > { %v7476_v6 = vpack.c.bf16 %v7372_v44, %v7370_v36  ;;  %v7126_v50 = vpop.f32.mrb[48].mxu1 }
 0x6f7   : > { %v7127_v19 = vadd.f32 %v7126_v50, %v13203_v47  ;;  %v7128_v28 = vpop.f32.mrb[49].mxu1 }
 0x6f8   : > { %v6374_v33 = vpop.f32.mrb[100].mxu0  ;;  %v7129_v24 = vadd.f32 %v7128_v28, %v13209_v23  ;;  %v7130_v26 = vpop.f32.mrb[50].mxu1  ;;  %7860 = vmatprep.mubr.bf16.mxu0 %v7476_v6 }
 0x6f9   : > { %v6375_v29 = vadd.f32 %v6374_v33, %v14451_v35  ;;  %v6376_v11 = vpop.f32.mrb[101].mxu0  ;;  %v7131_v32 = vadd.f32 %v7130_v26, %v13203_v47  ;;  %v7132_v54 = vpop.f32.mrb[51].mxu1  ;;  %7861 = vmatmul.mubr.bf16.gmra.mrb[172].mxu0 %v7475_v63  ;;  %v7373_v62 = vmax.f32 %v7127_v19, 0.0 }
 0x6fa   : > { %v6377_v20 = vadd.f32 %v6376_v11, %v14452_v7  ;;  %v6378_v49 = vpop.f32.mrb[102].mxu0  ;;  %v7133_v41 = vadd.f32 %v7132_v54, %v13209_v23  ;;  %v7374_v9 = vmax.f32 %v7129_v24, 0.0  ;;  %v14455_v24 = vld [vmem:[#allocation156_spill] sm:$0xff] }
 0x6fb   : > { %v6551_v58 = vadd.f32 %v12562_v34, %v6375_v29  ;;  %v6379_v8 = vadd.f32 %v6378_v49, %v14453_v57  ;;  %v6380_v51 = vpop.f32.mrb[103].mxu0  ;;  %v7375_v39 = vmax.f32 %v7131_v32, 0.0  ;;  %v14456_v32 = vld [vmem:[#allocation157_spill] sm:$0xff] }
 0x6fc   : > { %v6552_v37 = vadd.f32 %v12572_v22, %v6377_v20  ;;  %v6381_v31 = vadd.f32 %v6380_v51, %v14454_v60  ;;  %v7376_v46 = vmax.f32 %v7133_v41, 0.0 }
 0x6fd   : > { %v6553_v0 = vadd.f32 %v12562_v34, %v6379_v8  ;;  %v7477_v45 = vpack.c.bf16 %v7375_v39, %v7373_v62  ;;  %v6679_v43 = vmax.f32 %v6551_v58, 0.0  ;;  %v14457_v58 = vld [vmem:[#allocation151_spill] sm:$0xff] }
 0x6fe   : > { %v6554_v17 = vadd.f32 %v12572_v22, %v6381_v31  ;;  %v7478_v40 = vpack.c.bf16 %v7376_v46, %v7374_v9  ;;  %v7136_v14 = vpop.f32.mrb[52].mxu1  ;;  %v6680_v56 = vmax.f32 %v6552_v37, 0.0 }
 0x6ff   : > { %v6681_v25 = vmax.f32 %v6553_v0, 0.0  ;;  %v7137_v1 = vadd.f32 %v7136_v14, %v13203_v47  ;;  %v7138_v53 = vpop.f32.mrb[53].mxu1 }
 0x700   : > { %v6682_v55 = vmax.f32 %v6554_v17, 0.0  ;;  %v7139_v59 = vadd.f32 %v7138_v53, %v13209_v23  ;;  %v7140_v3 = vpop.f32.mrb[54].mxu1  ;;  %7870 = vmatprep.mubr.bf16.mxu0 %v7478_v40 }
 0x701   : > { %v6757_v42 = vpack.c.bf16 %v6681_v25, %v6679_v43  ;;  %v7141_v12 = vadd.f32 %v7140_v3, %v13203_v47  ;;  %v7142_v48 = vpop.f32.mrb[55].mxu1  ;;  %7871 = vmatmul.mubr.bf16.gmra.mrb[176].mxu0 %v7477_v45  ;;  %v7377_v18 = vmax.f32 %v7137_v1, 0.0 }
 0x702   : > { %v6758_v15 = vpack.c.bf16 %v6682_v55, %v6680_v56  ;;  %v7143_v13 = vadd.f32 %v7142_v48, %v13209_v23  ;;  %v7378_v61 = vmax.f32 %v7139_v59, 0.0 }
 0x703   : > { %v7379_v10 = vmax.f32 %v7141_v12, 0.0  ;;  %v14459_v12 = vld [vmem:[#allocation159_spill] sm:$0xff] }
 0x704   : > { %7254 = vmatprep.mubr.bf16.mxu1 %v6758_v15  ;;  %v7380_v4 = vmax.f32 %v7143_v13, 0.0 }
 0x705   : > { %7255 = vmatmul.mubr.bf16.gmra.mrb[100].mxu1 %v6757_v42  ;;  %v7479_v27 = vpack.c.bf16 %v7379_v10, %v7377_v18 }
 0x706   : > { %v7480_v38 = vpack.c.bf16 %v7380_v4, %v7378_v61 }
 0x708   : > { %v7146_v21 = vpop.f32.mrb[56].mxu1  ;;  %7880 = vmatprep.mubr.bf16.mxu0 %v7480_v38 }
 0x709   : > { %v7147_v36 = vadd.f32 %v7146_v21, %v13203_v47  ;;  %v7148_v44 = vpop.f32.mrb[57].mxu1  ;;  %7881 = vmatmul.mubr.bf16.gmra.mrb[180].mxu0 %v7479_v27  ;;  %v14461_v27 = vld [vmem:[#allocation161_spill] sm:$0xff] }
 0x70a   : > { %v7149_v63 = vadd.f32 %v7148_v44, %v13209_v23  ;;  %v7150_v6 = vpop.f32.mrb[58].mxu1  ;;  %v14462_v44 = vld [vmem:[#allocation162_spill] sm:$0xff] }
 0x70b   : > { %v7151_v50 = vadd.f32 %v7150_v6, %v13203_v47  ;;  %v7152_v52 = vpop.f32.mrb[59].mxu1  ;;  %v7381_v28 = vmax.f32 %v7147_v36, 0.0 }
 0x70c   : > { %v7153_v5 = vadd.f32 %v7152_v52, %v13209_v23  ;;  %v6384_v19 = vpop.f32.mrb[104].mxu0  ;;  %v7382_v26 = vmax.f32 %v7149_v63, 0.0 }
 0x70d   : > { %v7383_v33 = vmax.f32 %v7151_v50, 0.0  ;;  %v6385_v35 = vadd.f32 %v6384_v19, %v14455_v24  ;;  %v6386_v29 = vpop.f32.mrb[105].mxu0 }
 0x70e   : > { %v7384_v11 = vmax.f32 %v7153_v5, 0.0  ;;  %v6387_v7 = vadd.f32 %v6386_v29, %v14456_v32  ;;  %v6388_v20 = vpop.f32.mrb[106].mxu0 }
 0x70f   : > { %v7481_v54 = vpack.c.bf16 %v7383_v33, %v7381_v28  ;;  %v6555_v49 = vadd.f32 %v12562_v34, %v6385_v35  ;;  %v6389_v41 = vadd.f32 %v6388_v20, %v14457_v58  ;;  %v6390_v57 = vpop.f32.mrb[107].mxu0 }
 0x710   : > { %v7482_v8 = vpack.c.bf16 %v7384_v11, %v7382_v26  ;;  %v6556_v51 = vadd.f32 %v12572_v22, %v6387_v7  ;;  %v6391_v62 = vadd.f32 %v6390_v57, %v14458_v30 }
 0x711   : > { %v6557_v39 = vadd.f32 %v12562_v34, %v6389_v41  ;;  %v6683_v60 = vmax.f32 %v6555_v49, 0.0 }
 0x712   : > { %v6558_v37 = vadd.f32 %v12572_v22, %v6391_v62  ;;  %7890 = vmatprep.mubr.bf16.mxu0 %v7482_v8  ;;  %v6684_v9 = vmax.f32 %v6556_v51, 0.0  ;;  %v14463_v51 = vld [vmem:[#allocation164_spill] sm:$0xff] }
 0x713   : > { %v6685_v31 = vmax.f32 %v6557_v39, 0.0  ;;  %7891 = vmatmul.mubr.bf16.gmra.mrb[184].mxu0 %v7481_v54 }
 0x714   : > { %v6686_v46 = vmax.f32 %v6558_v37, 0.0  ;;  %v14464_v37 = vld [vmem:[#allocation165_spill] sm:$0xff] }
 0x715   : > { %v6759_v0 = vpack.c.bf16 %v6685_v31, %v6683_v60 }
 0x716   : > { %v6760_v45 = vpack.c.bf16 %v6686_v46, %v6684_v9 }
 0x718   : > { %7264 = vmatprep.mubr.bf16.mxu1 %v6760_v45 }
 0x719   : > { %7265 = vmatmul.mubr.bf16.gmra.mrb[104].mxu1 %v6759_v0  ;;  %v14465_v0 = vld [vmem:[#allocation166_spill] sm:$0xff] }
 0x71a   : > { %v7156_v17 = vpop.f32.mrb[60].mxu1 }
 0x71b   : > { %v7157_v43 = vadd.f32 %v7156_v17, %v13203_v47  ;;  %v7158_v40 = vpop.f32.mrb[61].mxu1 }
 0x71c   : > { %v7159_v25 = vadd.f32 %v7158_v40, %v13209_v23  ;;  %v7160_v14 = vpop.f32.mrb[62].mxu1  ;;  %v14466_v40 = vld [vmem:[#allocation167_spill] sm:$0xff] }
 0x71d   : > { %v7161_v16 = vadd.f32 %v7160_v14, %v13203_v47  ;;  %v7162_v56 = vpop.f32.mrb[63].mxu1  ;;  %v7385_v1 = vmax.f32 %v7157_v43, 0.0 }
 0x71e   : > { %v7163_v55 = vadd.f32 %v7162_v56, %v13209_v23  ;;  %v7386_v59 = vmax.f32 %v7159_v25, 0.0 }
 0x71f   : > { %v7387_v53 = vmax.f32 %v7161_v16, 0.0  ;;  %v6394_v42 = vpop.f32.mrb[108].mxu0 }
 0x720   : > { %v7388_v3 = vmax.f32 %v7163_v55, 0.0  ;;  %v6395_v48 = vadd.f32 %v6394_v42, %v14459_v12  ;;  %v6396_v15 = vpop.f32.mrb[109].mxu0 }
 0x721   : > { %v7483_v13 = vpack.c.bf16 %v7387_v53, %v7385_v1  ;;  %v6397_v18 = vadd.f32 %v6396_v15, %v14460_v2  ;;  %v6398_v10 = vpop.f32.mrb[110].mxu0 }
 0x722   : > { %v7484_v61 = vpack.c.bf16 %v7388_v3, %v7386_v59  ;;  %v6559_v4 = vadd.f32 %v12562_v34, %v6395_v48  ;;  %v6399_v38 = vadd.f32 %v6398_v10, %v14461_v27  ;;  %v6400_v21 = vpop.f32.mrb[111].mxu0 }
 0x723   : > { %v6560_v36 = vadd.f32 %v12572_v22, %v6397_v18  ;;  %v6401_v63 = vadd.f32 %v6400_v21, %v14462_v44 }
 0x724   : > { %v6561_v6 = vadd.f32 %v12562_v34, %v6399_v38  ;;  %7900 = vmatprep.mubr.bf16.mxu0 %v7484_v61  ;;  %v6687_v52 = vmax.f32 %v6559_v4, 0.0 }
 0x725   : > { %v6562_v50 = vadd.f32 %v12572_v22, %v6401_v63  ;;  %7901 = vmatmul.mubr.bf16.gmra.mrb[188].mxu0 %v7483_v13  ;;  %v6688_v19 = vmax.f32 %v6560_v36, 0.0  ;;  %v14467_v36 = vld [vmem:[#allocation170_spill] sm:$0xff] }
 0x726   : > { %v6689_v5 = vmax.f32 %v6561_v6, 0.0 }
 0x727   : > { %v6690_v28 = vmax.f32 %v6562_v50, 0.0  ;;  %v14468_v50 = vld [vmem:[#allocation171_spill] sm:$0xff] }
 0x728   : > { %v6761_v33 = vpack.c.bf16 %v6689_v5, %v6687_v52 }
 0x729   : > { %v6762_v24 = vpack.c.bf16 %v6690_v28, %v6688_v19 }
 0x72b   : > { %7274 = vmatprep.mubr.bf16.mxu1 %v6762_v24 }
 0x72c   : > { %7275 = vmatmul.mubr.bf16.gmra.mrb[108].mxu1 %v6761_v33  ;;  %v7166_v35 = vpop.f32.mrb[64].mxu1  ;;  %v14469_v33 = vld [vmem:[#allocation172_spill] sm:$0xff] }
 0x72d   : > { %v7167_v29 = vadd.f32 %v7166_v35, %v13203_v47  ;;  %v7168_v26 = vpop.f32.mrb[65].mxu1 }
 0x72e   : > { %v7169_v11 = vadd.f32 %v7168_v26, %v13209_v23  ;;  %v7170_v32 = vpop.f32.mrb[66].mxu1  ;;  %v14470_v26 = vld [vmem:[#allocation173_spill] sm:$0xff] }
 0x72f   : > { %v7171_v7 = vadd.f32 %v7170_v32, %v13203_v47  ;;  %v7172_v20 = vpop.f32.mrb[67].mxu1  ;;  %v7389_v49 = vmax.f32 %v7167_v29, 0.0 }
 0x730   : > { %v7173_v54 = vadd.f32 %v7172_v20, %v13209_v23  ;;  %v7390_v57 = vmax.f32 %v7169_v11, 0.0 }
 0x731   : > { %v7391_v58 = vmax.f32 %v7171_v7, 0.0  ;;  %v6404_v41 = vpop.f32.mrb[112].mxu0 }
 0x732   : > { %v7392_v8 = vmax.f32 %v7173_v54, 0.0  ;;  %v6405_v30 = vadd.f32 %v6404_v41, %v14463_v51  ;;  %v6406_v62 = vpop.f32.mrb[113].mxu0 }
 0x733   : > { %v7485_v39 = vpack.c.bf16 %v7391_v58, %v7389_v49  ;;  %v6407_v60 = vadd.f32 %v6406_v62, %v14464_v37  ;;  %v6408_v31 = vpop.f32.mrb[114].mxu0 }
 0x734   : > { %v7486_v9 = vpack.c.bf16 %v7392_v8, %v7390_v57  ;;  %v6563_v46 = vadd.f32 %v12562_v34, %v6405_v30  ;;  %v6409_v45 = vadd.f32 %v6408_v31, %v14465_v0  ;;  %v6410_v17 = vpop.f32.mrb[115].mxu0 }
 0x735   : > { %v6564_v43 = vadd.f32 %v12572_v22, %v6407_v60  ;;  %v6411_v25 = vadd.f32 %v6410_v17, %v14466_v40 }
 0x736   : > { %v6565_v14 = vadd.f32 %v12562_v34, %v6409_v45  ;;  %7910 = vmatprep.mubr.bf16.mxu0 %v7486_v9  ;;  %v6691_v56 = vmax.f32 %v6563_v46, 0.0 }
 0x737   : > { %v6566_v16 = vadd.f32 %v12572_v22, %v6411_v25  ;;  %7911 = vmatmul.mubr.bf16.gmra.mrb[192].mxu0 %v7485_v39  ;;  %v6692_v1 = vmax.f32 %v6564_v43, 0.0  ;;  %v14471_v43 = vld [vmem:[#allocation175_spill] sm:$0xff] }
 0x738   : > { %v6693_v55 = vmax.f32 %v6565_v14, 0.0 }
 0x739   : > { %v6694_v53 = vmax.f32 %v6566_v16, 0.0  ;;  %v14472_v16 = vld [vmem:[#allocation176_spill] sm:$0xff] }
 0x73a   : > { %v6763_v42 = vpack.c.bf16 %v6693_v55, %v6691_v56 }
 0x73b   : > { %v6764_v59 = vpack.c.bf16 %v6694_v53, %v6692_v1 }
 0x73d   : > { %7284 = vmatprep.mubr.bf16.mxu1 %v6764_v59 }
 0x73e   : > { %7285 = vmatmul.mubr.bf16.gmra.mrb[112].mxu1 %v6763_v42  ;;  %v14473_v42 = vld [vmem:[#allocation177_spill] sm:$0xff] }
 0x73f   : > { %v7176_v3 = vpop.f32.mrb[68].mxu1 }
 0x740   : > { %v7177_v12 = vadd.f32 %v7176_v3, %v13203_v47  ;;  %v7178_v48 = vpop.f32.mrb[69].mxu1 }
 0x741   : > { %v7179_v15 = vadd.f32 %v7178_v48, %v13209_v23  ;;  %v7180_v13 = vpop.f32.mrb[70].mxu1  ;;  %v14474_v48 = vld [vmem:[#allocation178_spill] sm:$0xff] }
 0x742   : > { %v7181_v2 = vadd.f32 %v7180_v13, %v13203_v47  ;;  %v7182_v18 = vpop.f32.mrb[71].mxu1  ;;  %v7393_v61 = vmax.f32 %v7177_v12, 0.0 }
 0x743   : > { %v7183_v10 = vadd.f32 %v7182_v18, %v13209_v23  ;;  %v7394_v38 = vmax.f32 %v7179_v15, 0.0 }
 0x744   : > { %v7395_v4 = vmax.f32 %v7181_v2, 0.0  ;;  %v6414_v27 = vpop.f32.mrb[116].mxu0 }
 0x745   : > { %v7396_v21 = vmax.f32 %v7183_v10, 0.0  ;;  %v6415_v44 = vadd.f32 %v6414_v27, %v14467_v36  ;;  %v6416_v63 = vpop.f32.mrb[117].mxu0 }
 0x746   : > { %v7487_v6 = vpack.c.bf16 %v7395_v4, %v7393_v61  ;;  %v6417_v52 = vadd.f32 %v6416_v63, %v14468_v50  ;;  %v6418_v5 = vpop.f32.mrb[118].mxu0 }
 0x747   : > { %v7488_v19 = vpack.c.bf16 %v7396_v21, %v7394_v38  ;;  %v6567_v28 = vadd.f32 %v12562_v34, %v6415_v44  ;;  %v6419_v24 = vadd.f32 %v6418_v5, %v14469_v33  ;;  %v6420_v35 = vpop.f32.mrb[119].mxu0 }
 0x748   : > { %v6568_v29 = vadd.f32 %v12572_v22, %v6417_v52  ;;  %v6421_v11 = vadd.f32 %v6420_v35, %v14470_v26 }
 0x749   : > { %v6569_v32 = vadd.f32 %v12562_v34, %v6419_v24  ;;  %7920 = vmatprep.mubr.bf16.mxu0 %v7488_v19  ;;  %v6695_v20 = vmax.f32 %v6567_v28, 0.0  ;;  %v14475_v24 = vld [vmem:[#allocation179_spill] sm:$0xff] }
 0x74a   : > { %v6570_v7 = vadd.f32 %v12572_v22, %v6421_v11  ;;  %7921 = vmatmul.mubr.bf16.gmra.mrb[196].mxu0 %v7487_v6  ;;  %v6696_v49 = vmax.f32 %v6568_v29, 0.0 }
 0x74b   : > { %v6697_v54 = vmax.f32 %v6569_v32, 0.0  ;;  %v14476_v32 = vld [vmem:[#allocation180_spill] sm:$0xff] }
 0x74c   : > { %v6698_v58 = vmax.f32 %v6570_v7, 0.0 }
 0x74d   : > { %v6765_v41 = vpack.c.bf16 %v6697_v54, %v6695_v20 }
 0x74e   : > { %v6766_v57 = vpack.c.bf16 %v6698_v58, %v6696_v49  ;;  %v14477_v58 = vld [vmem:[#allocation181_spill] sm:$0xff] }
 0x750   : > { %7294 = vmatprep.mubr.bf16.mxu1 %v6766_v57 }
 0x751   : > { %7295 = vmatmul.mubr.bf16.gmra.mrb[116].mxu1 %v6765_v41 }
 0x752   : > { %v7186_v8 = vpop.f32.mrb[72].mxu1 }
 0x753   : > { %v7187_v51 = vadd.f32 %v7186_v8, %v13203_v47  ;;  %v7188_v30 = vpop.f32.mrb[73].mxu1  ;;  %v14478_v8 = vld [vmem:[#allocation15_spill] sm:$0xff] }
 0x754   : > { %v7189_v62 = vadd.f32 %v7188_v30, %v13209_v23  ;;  %v7190_v39 = vpop.f32.mrb[74].mxu1 }
 0x755   : > { %v7191_v37 = vadd.f32 %v7190_v39, %v13203_v47  ;;  %v7192_v60 = vpop.f32.mrb[75].mxu1  ;;  %v7397_v9 = vmax.f32 %v7187_v51, 0.0  ;;  %v7552_v51 = vsub.s32 7, %v14478_v8  ;;  %v14479_v39 = vld [vmem:[#allocation182_spill] sm:$0xff] }
 0x756   : > { %v7193_v31 = vadd.f32 %v7192_v60, %v13209_v23  ;;  %v7398_v45 = vmax.f32 %v7189_v62, 0.0 }
 0x757   : > { %v7399_v46 = vmax.f32 %v7191_v37, 0.0  ;;  %v6424_v0 = vpop.f32.mrb[120].mxu0 }
 0x758   : > { %v7400_v17 = vmax.f32 %v7193_v31, 0.0  ;;  %v6425_v40 = vadd.f32 %v6424_v0, %v14471_v43  ;;  %v6426_v25 = vpop.f32.mrb[121].mxu0  ;;  %v9636_v0 = vld [vmem:[%s13831_s4] sm:$0xff] }
 0x759   : > { %v7489_v14 = vpack.c.bf16 %v7399_v46, %v7397_v9  ;;  %v6427_v56 = vadd.f32 %v6426_v25, %v14472_v16  ;;  %v6428_v55 = vpop.f32.mrb[122].mxu0 }
 0x75a   : > { %v7490_v1 = vpack.c.bf16 %v7400_v17, %v7398_v45  ;;  %v6571_v53 = vadd.f32 %v12562_v34, %v6425_v40  ;;  %v6429_v59 = vadd.f32 %v6428_v55, %v14473_v42  ;;  %v6430_v3 = vpop.f32.mrb[123].mxu0  ;;  %v13454_v45 = vrot.slane %v9636_v0, %v7552_v51  ;;  %v9637_v40 = vld [vmem:[%s13831_s4 + $0x8] sm:$0xff] }
 0x75b   : > { %v6572_v12 = vadd.f32 %v12572_v22, %v6427_v56  ;;  %v6431_v15 = vadd.f32 %v6430_v3, %v14474_v48  ;;  %v13459_v25 = vrot.slane %v9637_v40, %v7552_v51 }
 0x75c   : > { %v6573_v13 = vadd.f32 %v12562_v34, %v6429_v59  ;;  %7930 = vmatprep.mubr.bf16.mxu0 %v7490_v1  ;;  %v6699_v18 = vmax.f32 %v6571_v53, 0.0 }
 0x75d   : > { %v6574_v2 = vadd.f32 %v12572_v22, %v6431_v15  ;;  %7931 = vmatmul.mubr.bf16.gmra.mrb[200].mxu0 %v7489_v14  ;;  %v6700_v61 = vmax.f32 %v6572_v12, 0.0 }
 0x75e   : > { %v6701_v10 = vmax.f32 %v6573_v13, 0.0 }
 0x75f   : > { %v6702_v4 = vmax.f32 %v6574_v2, 0.0 }
 0x760   : > { %v6767_v27 = vpack.c.bf16 %v6701_v10, %v6699_v18 }
 0x761   : > { %v6768_v38 = vpack.c.bf16 %v6702_v4, %v6700_v61 }
 0x763   : > { %7304 = vmatprep.mubr.bf16.mxu1 %v6768_v38 }
 0x764   : > { %7305 = vmatmul.mubr.bf16.gmra.mrb[120].mxu1 %v6767_v27 }
 0x766   : > { %v7196_v21 = vpop.f32.mrb[76].mxu1 }
 0x767   : > { %v7197_v36 = vadd.f32 %v7196_v21, %v13203_v47  ;;  %v7198_v44 = vpop.f32.mrb[77].mxu1 }
 0x768   : > { %v7199_v63 = vadd.f32 %v7198_v44, %v13209_v23  ;;  %v7200_v6 = vpop.f32.mrb[78].mxu1 }
 0x769   : > { %v7201_v50 = vadd.f32 %v7200_v6, %v13203_v47  ;;  %v7202_v52 = vpop.f32.mrb[79].mxu1  ;;  %v7401_v28 = vmax.f32 %v7197_v36, 0.0 }
 0x76a   : > { %v7203_v5 = vadd.f32 %v7202_v52, %v13209_v23  ;;  %v6434_v19 = vpop.f32.mrb[124].mxu0  ;;  %v7402_v26 = vmax.f32 %v7199_v63, 0.0 }
 0x76b   : > { %v7403_v33 = vmax.f32 %v7201_v50, 0.0  ;;  %v6435_v35 = vadd.f32 %v6434_v19, %v14475_v24  ;;  %v6436_v29 = vpop.f32.mrb[125].mxu0 }
 0x76c   : > { %v7404_v11 = vmax.f32 %v7203_v5, 0.0  ;;  %v6437_v7 = vadd.f32 %v6436_v29, %v14476_v32  ;;  %v6438_v20 = vpop.f32.mrb[126].mxu0 }
 0x76d   : > { %v7491_v54 = vpack.c.bf16 %v7403_v33, %v7401_v28  ;;  %v6575_v49 = vadd.f32 %v12562_v34, %v6435_v35  ;;  %v6439_v41 = vadd.f32 %v6438_v20, %v14477_v58  ;;  %v6440_v57 = vpop.f32.mrb[127].mxu0 }
 0x76e   : > { %v7492_v30 = vpack.c.bf16 %v7404_v11, %v7402_v26  ;;  %v6576_v62 = vadd.f32 %v12572_v22, %v6437_v7  ;;  %v6441_v37 = vadd.f32 %v6440_v57, %v14479_v39 }
 0x76f   : > { %v6577_v60 = vadd.f32 %v12562_v34, %v6439_v41  ;;  %v6703_v9 = vmax.f32 %v6575_v49, 0.0 }
 0x770   : > { %v6578_v31 = vadd.f32 %v12572_v22, %v6441_v37  ;;  %7940 = vmatprep.mubr.bf16.mxu0 %v7492_v30  ;;  %v6704_v17 = vmax.f32 %v6576_v62, 0.0 }
 0x771   : > { %v6705_v46 = vmax.f32 %v6577_v60, 0.0  ;;  %7941 = vmatmul.mubr.bf16.gmra.mrb[204].mxu0 %v7491_v54 }
 0x772   : > { %v6706_v43 = vmax.f32 %v6578_v31, 0.0 }
 0x773   : > { %v6769_v34 = vpack.c.bf16 %v6705_v46, %v6703_v9 }
 0x774   : > { %v7752_v22 = vpop.f32.mrb[128].mxu0  ;;  %v6770_v14 = vpack.c.bf16 %v6706_v43, %v6704_v17 }
 0x775   : > { %v7753_v16 = vadd.f32 %v7752_v22, %v13454_v45  ;;  %v7754_v56 = vpop.f32.mrb[129].mxu0 }
 0x776   : > { %v7755_v55 = vadd.f32 %v7754_v56, %v13459_v25  ;;  %7314 = vmatprep.mubr.bf16.mxu1 %v6770_v14  ;;  %v7756_v1 = vpop.f32.mrb[130].mxu0 }
 0x777   : > { %v7757_v53 = vadd.f32 %v7756_v1, %v13454_v45  ;;  %7315 = vmatmul.mubr.bf16.gmra.mrb[124].mxu1 %v6769_v34  ;;  %v7758_v42 = vpop.f32.mrb[131].mxu0  ;;  %v8071_v3 = vmax.f32 %v7753_v16, 0.0 }
 0x778   : > { %v7759_v59 = vadd.f32 %v7758_v42, %v13459_v25  ;;  %v8072_v15 = vmax.f32 %v7755_v55, 0.0 }
 0x779   : > { %v8073_v12 = vmax.f32 %v7757_v53, 0.0  ;;  %v7206_v48 = vpop.f32.mrb[80].mxu1 }
 0x77a   : > { %v8074_v13 = vmax.f32 %v7759_v59, 0.0  ;;  %v7207_v2 = vadd.f32 %v7206_v48, %v13203_v47  ;;  %v7208_v18 = vpop.f32.mrb[81].mxu1 }
 0x77b   : > { %v8199_v10 = vpack.c.bf16 %v8073_v12, %v8071_v3  ;;  %v7209_v61 = vadd.f32 %v7208_v18, %v13209_v23  ;;  %v7210_v4 = vpop.f32.mrb[82].mxu1 }
 0x77c   : > { %v8200_v27 = vpack.c.bf16 %v8074_v13, %v8072_v15  ;;  %v7211_v38 = vadd.f32 %v7210_v4, %v13203_v47  ;;  %v7212_v21 = vpop.f32.mrb[83].mxu1  ;;  %v7762_v36 = vpop.f32.mrb[132].mxu0  ;;  %v7405_v50 = vmax.f32 %v7207_v2, 0.0 }
 0x77d   : > { %v7213_v44 = vadd.f32 %v7212_v21, %v13209_v23  ;;  %v7763_v63 = vadd.f32 %v7762_v36, %v13454_v45  ;;  %v7764_v6 = vpop.f32.mrb[133].mxu0  ;;  %v7406_v28 = vmax.f32 %v7209_v61, 0.0 }
 0x77e   : > { %v7407_v52 = vmax.f32 %v7211_v38, 0.0  ;;  %v7765_v5 = vadd.f32 %v7764_v6, %v13459_v25  ;;  %v7766_v19 = vpop.f32.mrb[134].mxu0  ;;  %8430 = vmatprep.mubr.bf16.mxu1 %v8200_v27 }
 0x77f   : > { %v7408_v33 = vmax.f32 %v7213_v44, 0.0  ;;  %v7767_v24 = vadd.f32 %v7766_v19, %v13454_v45  ;;  %v7768_v35 = vpop.f32.mrb[135].mxu0  ;;  %8431 = vmatmul.mubr.bf16.vlgmr.msra.gmra.mrb[128].mxu1 %v8199_v10  ;;  %v8075_v32 = vmax.f32 %v7763_v63, 0.0 }
 0x780   : > { %v7493_v29 = vpack.c.bf16 %v7407_v52, %v7405_v50  ;;  %v7769_v26 = vadd.f32 %v7768_v35, %v13459_v25  ;;  %v8076_v20 = vmax.f32 %v7765_v5, 0.0 }
 0x781   : > { %v7494_v11 = vpack.c.bf16 %v7408_v33, %v7406_v28  ;;  %v8077_v7 = vmax.f32 %v7767_v24, 0.0 }
 0x782   : > { %v8078_v54 = vmax.f32 %v7769_v26, 0.0 }
 0x783   : > { %v8201_v49 = vpack.c.bf16 %v8077_v7, %v8075_v32  ;;  %7950 = vmatprep.mubr.bf16.mxu0 %v7494_v11 }
 0x784   : > { %v8202_v58 = vpack.c.bf16 %v8078_v54, %v8076_v20  ;;  %v7772_v41 = vpop.f32.mrb[136].mxu0  ;;  %7951 = vmatmul.mubr.bf16.gmra.mrb[208].mxu0 %v7493_v29 }
 0x785   : > { %v7773_v57 = vadd.f32 %v7772_v41, %v13454_v45  ;;  %v7774_v8 = vpop.f32.mrb[137].mxu0 }
 0x786   : > { %v7775_v51 = vadd.f32 %v7774_v8, %v13459_v25  ;;  %v7776_v30 = vpop.f32.mrb[138].mxu0  ;;  %8438 = vmatprep.mubr.bf16.mxu1 %v8202_v58 }
 0x787   : > { %v7777_v62 = vadd.f32 %v7776_v30, %v13454_v45  ;;  %v7778_v39 = vpop.f32.mrb[139].mxu0  ;;  %8439 = vmatmul.mubr.bf16.gmra.mrb[132].mxu1 %v8201_v49  ;;  %v8079_v60 = vmax.f32 %v7773_v57, 0.0 }
 0x788   : > { %v7779_v37 = vadd.f32 %v7778_v39, %v13459_v25  ;;  %v8080_v9 = vmax.f32 %v7775_v51, 0.0 }
 0x789   : > { %v8081_v31 = vmax.f32 %v7777_v62, 0.0 }
 0x78a   : > { %v8082_v46 = vmax.f32 %v7779_v37, 0.0 }
 0x78b   : > { %v8203_v0 = vpack.c.bf16 %v8081_v31, %v8079_v60 }
 0x78c   : > { %v8204_v17 = vpack.c.bf16 %v8082_v46, %v8080_v9  ;;  %v7782_v40 = vpop.f32.mrb[140].mxu0 }
 0x78d   : > { %v7216_v43 = vpop.f32.mrb[84].mxu1  ;;  %v7783_v22 = vadd.f32 %v7782_v40, %v13454_v45  ;;  %v7784_v16 = vpop.f32.mrb[141].mxu0 }
 0x78e   : > { %v7217_v34 = vadd.f32 %v7216_v43, %v13203_v47  ;;  %v7218_v14 = vpop.f32.mrb[85].mxu1  ;;  %v7785_v55 = vadd.f32 %v7784_v16, %v13459_v25  ;;  %v7786_v53 = vpop.f32.mrb[142].mxu0  ;;  %8446 = vmatprep.mubr.bf16.mxu1 %v8204_v17 }
 0x78f   : > { %v7219_v56 = vadd.f32 %v7218_v14, %v13209_v23  ;;  %v7220_v1 = vpop.f32.mrb[86].mxu1  ;;  %v7787_v59 = vadd.f32 %v7786_v53, %v13454_v45  ;;  %v7788_v12 = vpop.f32.mrb[143].mxu0  ;;  %8447 = vmatmul.mubr.bf16.gmra.mrb[136].mxu1 %v8203_v0  ;;  %v8083_v2 = vmax.f32 %v7783_v22, 0.0 }
 0x790   : > { %v7221_v42 = vadd.f32 %v7220_v1, %v13203_v47  ;;  %v7222_v3 = vpop.f32.mrb[87].mxu1  ;;  %v7789_v15 = vadd.f32 %v7788_v12, %v13459_v25  ;;  %v7409_v13 = vmax.f32 %v7217_v34, 0.0  ;;  %v8084_v4 = vmax.f32 %v7785_v55, 0.0 }
 0x791   : > { %v7223_v48 = vadd.f32 %v7222_v3, %v13209_v23  ;;  %v8085_v10 = vmax.f32 %v7787_v59, 0.0  ;;  %v7410_v61 = vmax.f32 %v7219_v56, 0.0 }
 0x792   : > { %v7411_v18 = vmax.f32 %v7221_v42, 0.0  ;;  %v8086_v38 = vmax.f32 %v7789_v15, 0.0 }
 0x793   : > { %v7412_v27 = vmax.f32 %v7223_v48, 0.0  ;;  %v8205_v36 = vpack.c.bf16 %v8085_v10, %v8083_v2 }
 0x794   : > { %v7495_v21 = vpack.c.bf16 %v7411_v18, %v7409_v13  ;;  %v8206_v63 = vpack.c.bf16 %v8086_v38, %v8084_v4  ;;  %v7792_v6 = vpop.f32.mrb[144].mxu0 }
 0x795   : > { %v7496_v44 = vpack.c.bf16 %v7412_v27, %v7410_v61  ;;  %v7793_v50 = vadd.f32 %v7792_v6, %v13454_v45  ;;  %v7794_v52 = vpop.f32.mrb[145].mxu0 }
 0x796   : > { %v7795_v5 = vadd.f32 %v7794_v52, %v13459_v25  ;;  %v7796_v19 = vpop.f32.mrb[146].mxu0  ;;  %8454 = vmatprep.mubr.bf16.mxu1 %v8206_v63 }
 0x797   : > { %7960 = vmatprep.mubr.bf16.mxu0 %v7496_v44  ;;  %v7797_v28 = vadd.f32 %v7796_v19, %v13454_v45  ;;  %v7798_v33 = vpop.f32.mrb[147].mxu0  ;;  %8455 = vmatmul.mubr.bf16.gmra.mrb[140].mxu1 %v8205_v36  ;;  %v8087_v35 = vmax.f32 %v7793_v50, 0.0 }
 0x798   : > { %7961 = vmatmul.mubr.bf16.gmra.mrb[212].mxu0 %v7495_v21  ;;  %v7799_v24 = vadd.f32 %v7798_v33, %v13459_v25  ;;  %v8088_v26 = vmax.f32 %v7795_v5, 0.0 }
 0x799   : > { %v8089_v29 = vmax.f32 %v7797_v28, 0.0 }
 0x79a   : > { %v8090_v11 = vmax.f32 %v7799_v24, 0.0 }
 0x79b   : > { %v8207_v32 = vpack.c.bf16 %v8089_v29, %v8087_v35 }
 0x79c   : > { %v8208_v7 = vpack.c.bf16 %v8090_v11, %v8088_v26  ;;  %v7802_v20 = vpop.f32.mrb[148].mxu0 }
 0x79d   : > { %v7803_v54 = vadd.f32 %v7802_v20, %v13454_v45  ;;  %v7804_v49 = vpop.f32.mrb[149].mxu0 }
 0x79e   : > { %v7805_v58 = vadd.f32 %v7804_v49, %v13459_v25  ;;  %v7806_v41 = vpop.f32.mrb[150].mxu0  ;;  %8462 = vmatprep.mubr.bf16.mxu1 %v8208_v7 }
 0x79f   : > { %v7807_v57 = vadd.f32 %v7806_v41, %v13454_v45  ;;  %v7808_v51 = vpop.f32.mrb[151].mxu0  ;;  %8463 = vmatmul.mubr.bf16.gmra.mrb[144].mxu1 %v8207_v32  ;;  %v8091_v37 = vmax.f32 %v7803_v54, 0.0 }
 0x7a0   : > { %v7226_v8 = vpop.f32.mrb[88].mxu1  ;;  %v7809_v62 = vadd.f32 %v7808_v51, %v13459_v25  ;;  %v8092_v46 = vmax.f32 %v7805_v58, 0.0 }
 0x7a1   : > { %v7227_v30 = vadd.f32 %v7226_v8, %v13203_v47  ;;  %v7228_v39 = vpop.f32.mrb[89].mxu1  ;;  %v8093_v60 = vmax.f32 %v7807_v57, 0.0 }
 0x7a2   : > { %v7229_v31 = vadd.f32 %v7228_v39, %v13209_v23  ;;  %v7230_v9 = vpop.f32.mrb[90].mxu1  ;;  %v8094_v0 = vmax.f32 %v7809_v62, 0.0 }
 0x7a3   : > { %v7231_v17 = vadd.f32 %v7230_v9, %v13203_v47  ;;  %v7232_v43 = vpop.f32.mrb[91].mxu1  ;;  %v8209_v40 = vpack.c.bf16 %v8093_v60, %v8091_v37  ;;  %v7413_v22 = vmax.f32 %v7227_v30, 0.0 }
 0x7a4   : > { %v7233_v34 = vadd.f32 %v7232_v43, %v13209_v23  ;;  %v8210_v14 = vpack.c.bf16 %v8094_v0, %v8092_v46  ;;  %v7812_v56 = vpop.f32.mrb[152].mxu0  ;;  %v7414_v55 = vmax.f32 %v7229_v31, 0.0 }
 0x7a5   : > { %v7415_v16 = vmax.f32 %v7231_v17, 0.0  ;;  %v7813_v53 = vadd.f32 %v7812_v56, %v13454_v45  ;;  %v7814_v42 = vpop.f32.mrb[153].mxu0 }
 0x7a6   : > { %v7416_v1 = vmax.f32 %v7233_v34, 0.0  ;;  %v7815_v3 = vadd.f32 %v7814_v42, %v13459_v25  ;;  %v7816_v12 = vpop.f32.mrb[154].mxu0  ;;  %8470 = vmatprep.mubr.bf16.mxu1 %v8210_v14 }
 0x7a7   : > { %v7497_v59 = vpack.c.bf16 %v7415_v16, %v7413_v22  ;;  %v7817_v15 = vadd.f32 %v7816_v12, %v13454_v45  ;;  %v7818_v13 = vpop.f32.mrb[155].mxu0  ;;  %8471 = vmatmul.mubr.bf16.gmra.mrb[148].mxu1 %v8209_v40  ;;  %v8095_v18 = vmax.f32 %v7813_v53, 0.0 }
 0x7a8   : > { %v7498_v48 = vpack.c.bf16 %v7416_v1, %v7414_v55  ;;  %v7819_v2 = vadd.f32 %v7818_v13, %v13459_v25  ;;  %v8096_v61 = vmax.f32 %v7815_v3, 0.0 }
 0x7a9   : > { %v8097_v10 = vmax.f32 %v7817_v15, 0.0 }
 0x7aa   : > { %7970 = vmatprep.mubr.bf16.mxu0 %v7498_v48  ;;  %v8098_v4 = vmax.f32 %v7819_v2, 0.0 }
 0x7ab   : > { %7971 = vmatmul.mubr.bf16.gmra.mrb[216].mxu0 %v7497_v59  ;;  %v8211_v27 = vpack.c.bf16 %v8097_v10, %v8095_v18 }
 0x7ac   : > { %v8212_v38 = vpack.c.bf16 %v8098_v4, %v8096_v61  ;;  %v7822_v21 = vpop.f32.mrb[156].mxu0 }
 0x7ad   : > { %v7823_v36 = vadd.f32 %v7822_v21, %v13454_v45  ;;  %v7824_v44 = vpop.f32.mrb[157].mxu0 }
 0x7ae   : > { %v7825_v63 = vadd.f32 %v7824_v44, %v13459_v25  ;;  %v7826_v6 = vpop.f32.mrb[158].mxu0  ;;  %8478 = vmatprep.mubr.bf16.mxu1 %v8212_v38 }
 0x7af   : > { %v7827_v50 = vadd.f32 %v7826_v6, %v13454_v45  ;;  %v7828_v52 = vpop.f32.mrb[159].mxu0  ;;  %8479 = vmatmul.mubr.bf16.gmra.mrb[152].mxu1 %v8211_v27  ;;  %v8099_v19 = vmax.f32 %v7823_v36, 0.0 }
 0x7b0   : > { %v7829_v5 = vadd.f32 %v7828_v52, %v13459_v25  ;;  %v8100_v33 = vmax.f32 %v7825_v63, 0.0 }
 0x7b1   : > { %v8101_v28 = vmax.f32 %v7827_v50, 0.0 }
 0x7b2   : > { %v8102_v24 = vmax.f32 %v7829_v5, 0.0 }
 0x7b3   : > { %v7236_v35 = vpop.f32.mrb[92].mxu1  ;;  %v8213_v29 = vpack.c.bf16 %v8101_v28, %v8099_v19 }
 0x7b4   : > { %v7237_v26 = vadd.f32 %v7236_v35, %v13203_v47  ;;  %v7238_v11 = vpop.f32.mrb[93].mxu1  ;;  %v8214_v32 = vpack.c.bf16 %v8102_v24, %v8100_v33  ;;  %v7832_v54 = vpop.f32.mrb[160].mxu0 }
 0x7b5   : > { %v7239_v7 = vadd.f32 %v7238_v11, %v13209_v23  ;;  %v7240_v20 = vpop.f32.mrb[94].mxu1  ;;  %v7833_v58 = vadd.f32 %v7832_v54, %v13454_v45  ;;  %v7834_v57 = vpop.f32.mrb[161].mxu0 }
 0x7b6   : > { %v7241_v49 = vadd.f32 %v7240_v20, %v13203_v47  ;;  %v7242_v41 = vpop.f32.mrb[95].mxu1  ;;  %v7835_v51 = vadd.f32 %v7834_v57, %v13459_v25  ;;  %v7836_v30 = vpop.f32.mrb[162].mxu0  ;;  %8486 = vmatprep.mubr.bf16.mxu1 %v8214_v32  ;;  %v7417_v62 = vmax.f32 %v7237_v26, 0.0 }
 0x7b7   : > { %v7243_v8 = vadd.f32 %v7242_v41, %v13209_v23  ;;  %v7837_v37 = vadd.f32 %v7836_v30, %v13454_v45  ;;  %v7838_v60 = vpop.f32.mrb[163].mxu0  ;;  %8487 = vmatmul.mubr.bf16.gmra.mrb[156].mxu1 %v8213_v29  ;;  %v7418_v31 = vmax.f32 %v7239_v7, 0.0  ;;  %v8103_v17 = vmax.f32 %v7833_v58, 0.0 }
 0x7b8   : > { %v7419_v39 = vmax.f32 %v7241_v49, 0.0  ;;  %v7839_v46 = vadd.f32 %v7838_v60, %v13459_v25  ;;  %v8104_v34 = vmax.f32 %v7835_v51, 0.0 }
 0x7b9   : > { %v7420_v9 = vmax.f32 %v7243_v8, 0.0  ;;  %v8105_v43 = vmax.f32 %v7837_v37, 0.0 }
 0x7ba   : > { %v7499_v0 = vpack.c.bf16 %v7419_v39, %v7417_v62  ;;  %v8106_v22 = vmax.f32 %v7839_v46, 0.0 }
 0x7bb   : > { %v7500_v40 = vpack.c.bf16 %v7420_v9, %v7418_v31  ;;  %v8215_v14 = vpack.c.bf16 %v8105_v43, %v8103_v17 }
 0x7bc   : > { %v8216_v16 = vpack.c.bf16 %v8106_v22, %v8104_v34  ;;  %v7842_v56 = vpop.f32.mrb[164].mxu0 }
 0x7bd   : > { %7980 = vmatprep.mubr.bf16.mxu0 %v7500_v40  ;;  %v7843_v55 = vadd.f32 %v7842_v56, %v13454_v45  ;;  %v7844_v1 = vpop.f32.mrb[165].mxu0 }
 0x7be   : > { %7981 = vmatmul.mubr.bf16.gmra.mrb[220].mxu0 %v7499_v0  ;;  %v7845_v53 = vadd.f32 %v7844_v1, %v13459_v25  ;;  %v7846_v42 = vpop.f32.mrb[166].mxu0  ;;  %8494 = vmatprep.mubr.bf16.mxu1 %v8216_v16 }
 0x7bf   : > { %v7847_v59 = vadd.f32 %v7846_v42, %v13454_v45  ;;  %v7848_v3 = vpop.f32.mrb[167].mxu0  ;;  %8495 = vmatmul.mubr.bf16.gmra.mrb[160].mxu1 %v8215_v14  ;;  %v8107_v48 = vmax.f32 %v7843_v55, 0.0 }
 0x7c0   : > { %v7849_v12 = vadd.f32 %v7848_v3, %v13459_v25  ;;  %v8108_v13 = vmax.f32 %v7845_v53, 0.0 }
 0x7c1   : > { %v8109_v15 = vmax.f32 %v7847_v59, 0.0 }
 0x7c2   : > { %v8110_v2 = vmax.f32 %v7849_v12, 0.0 }
 0x7c3   : > { %v8217_v18 = vpack.c.bf16 %v8109_v15, %v8107_v48 }
 0x7c4   : > { %v8218_v10 = vpack.c.bf16 %v8110_v2, %v8108_v13  ;;  %v7852_v61 = vpop.f32.mrb[168].mxu0 }
 0x7c5   : > { %v7246_v4 = vpop.f32.mrb[96].mxu1  ;;  %v7853_v27 = vadd.f32 %v7852_v61, %v13454_v45  ;;  %v7854_v21 = vpop.f32.mrb[169].mxu0 }
 0x7c6   : > { %v7247_v38 = vadd.f32 %v7246_v4, %v13203_v47  ;;  %v7248_v36 = vpop.f32.mrb[97].mxu1  ;;  %v7855_v44 = vadd.f32 %v7854_v21, %v13459_v25  ;;  %v7856_v6 = vpop.f32.mrb[170].mxu0  ;;  %8502 = vmatprep.mubr.bf16.mxu1 %v8218_v10 }
 0x7c7   : > { %v7249_v63 = vadd.f32 %v7248_v36, %v13209_v23  ;;  %v7250_v50 = vpop.f32.mrb[98].mxu1  ;;  %v7857_v52 = vadd.f32 %v7856_v6, %v13454_v45  ;;  %v7858_v19 = vpop.f32.mrb[171].mxu0  ;;  %8503 = vmatmul.mubr.bf16.gmra.mrb[164].mxu1 %v8217_v18  ;;  %v8111_v35 = vmax.f32 %v7853_v27, 0.0 }
 0x7c8   : > { %v7251_v5 = vadd.f32 %v7250_v50, %v13203_v47  ;;  %v7252_v28 = vpop.f32.mrb[99].mxu1  ;;  %v7859_v33 = vadd.f32 %v7858_v19, %v13459_v25  ;;  %v7421_v29 = vmax.f32 %v7247_v38, 0.0  ;;  %v8112_v32 = vmax.f32 %v7855_v44, 0.0 }
 0x7c9   : > { %v7253_v24 = vadd.f32 %v7252_v28, %v13209_v23  ;;  %v8113_v26 = vmax.f32 %v7857_v52, 0.0  ;;  %v7422_v7 = vmax.f32 %v7249_v63, 0.0 }
 0x7ca   : > { %v7423_v11 = vmax.f32 %v7251_v5, 0.0  ;;  %v8114_v20 = vmax.f32 %v7859_v33, 0.0 }
 0x7cb   : > { %v7424_v54 = vmax.f32 %v7253_v24, 0.0  ;;  %v8219_v49 = vpack.c.bf16 %v8113_v26, %v8111_v35 }
 0x7cc   : > { %v7501_v58 = vpack.c.bf16 %v7423_v11, %v7421_v29  ;;  %v8220_v41 = vpack.c.bf16 %v8114_v20, %v8112_v32  ;;  %v7862_v8 = vpop.f32.mrb[172].mxu0 }
 0x7cd   : > { %v7502_v57 = vpack.c.bf16 %v7424_v54, %v7422_v7  ;;  %v7863_v51 = vadd.f32 %v7862_v8, %v13454_v45  ;;  %v7864_v30 = vpop.f32.mrb[173].mxu0 }
 0x7ce   : > { %v7865_v62 = vadd.f32 %v7864_v30, %v13459_v25  ;;  %v7866_v39 = vpop.f32.mrb[174].mxu0  ;;  %8510 = vmatprep.mubr.bf16.mxu1 %v8220_v41 }
 0x7cf   : > { %7990 = vmatprep.mubr.bf16.mxu0 %v7502_v57  ;;  %v7867_v37 = vadd.f32 %v7866_v39, %v13454_v45  ;;  %v7868_v60 = vpop.f32.mrb[175].mxu0  ;;  %8511 = vmatmul.mubr.bf16.gmra.mrb[168].mxu1 %v8219_v49  ;;  %v8115_v9 = vmax.f32 %v7863_v51, 0.0 }
 0x7d0   : > { %7991 = vmatmul.mubr.bf16.gmra.mrb[224].mxu0 %v7501_v58  ;;  %v7869_v31 = vadd.f32 %v7868_v60, %v13459_v25  ;;  %v8116_v0 = vmax.f32 %v7865_v62, 0.0 }
 0x7d1   : > { %v8117_v46 = vmax.f32 %v7867_v37, 0.0 }
 0x7d2   : > { %v8118_v17 = vmax.f32 %v7869_v31, 0.0 }
 0x7d3   : > { %v8221_v43 = vpack.c.bf16 %v8117_v46, %v8115_v9 }
 0x7d4   : > { %v8222_v40 = vpack.c.bf16 %v8118_v17, %v8116_v0  ;;  %v7872_v34 = vpop.f32.mrb[176].mxu0 }
 0x7d5   : > { %v7873_v22 = vadd.f32 %v7872_v34, %v13454_v45  ;;  %v7874_v14 = vpop.f32.mrb[177].mxu0 }
 0x7d6   : > { %v7875_v16 = vadd.f32 %v7874_v14, %v13459_v25  ;;  %v7876_v56 = vpop.f32.mrb[178].mxu0  ;;  %8518 = vmatprep.mubr.bf16.mxu1 %v8222_v40 }
 0x7d7   : > { %v7877_v55 = vadd.f32 %v7876_v56, %v13454_v45  ;;  %v7878_v1 = vpop.f32.mrb[179].mxu0  ;;  %8519 = vmatmul.mubr.bf16.gmra.mrb[172].mxu1 %v8221_v43  ;;  %v8119_v12 = vmax.f32 %v7873_v22, 0.0 }
 0x7d8   : > { %v7256_v53 = vpop.f32.mrb[100].mxu1  ;;  %v7879_v42 = vadd.f32 %v7878_v1, %v13459_v25  ;;  %v8120_v2 = vmax.f32 %v7875_v16, 0.0 }
 0x7d9   : > { %v7257_v59 = vadd.f32 %v7256_v53, %v13203_v47  ;;  %v7258_v3 = vpop.f32.mrb[101].mxu1  ;;  %v8121_v48 = vmax.f32 %v7877_v55, 0.0 }
 0x7da   : > { %v7259_v15 = vadd.f32 %v7258_v3, %v13209_v23  ;;  %v7260_v13 = vpop.f32.mrb[102].mxu1  ;;  %v8122_v18 = vmax.f32 %v7879_v42, 0.0 }
 0x7db   : > { %v7261_v10 = vadd.f32 %v7260_v13, %v13203_v47  ;;  %v7262_v61 = vpop.f32.mrb[103].mxu1  ;;  %v8223_v4 = vpack.c.bf16 %v8121_v48, %v8119_v12  ;;  %v7425_v21 = vmax.f32 %v7257_v59, 0.0 }
 0x7dc   : > { %v7263_v27 = vadd.f32 %v7262_v61, %v13209_v23  ;;  %v8224_v38 = vpack.c.bf16 %v8122_v18, %v8120_v2  ;;  %v7882_v44 = vpop.f32.mrb[180].mxu0  ;;  %v7426_v63 = vmax.f32 %v7259_v15, 0.0 }
 0x7dd   : > { %v7427_v36 = vmax.f32 %v7261_v10, 0.0  ;;  %v7883_v50 = vadd.f32 %v7882_v44, %v13454_v45  ;;  %v7884_v52 = vpop.f32.mrb[181].mxu0 }
 0x7de   : > { %v7428_v6 = vmax.f32 %v7263_v27, 0.0  ;;  %v7885_v19 = vadd.f32 %v7884_v52, %v13459_v25  ;;  %v7886_v28 = vpop.f32.mrb[182].mxu0  ;;  %8526 = vmatprep.mubr.bf16.mxu1 %v8224_v38 }
 0x7df   : > { %v7503_v5 = vpack.c.bf16 %v7427_v36, %v7425_v21  ;;  %v7887_v24 = vadd.f32 %v7886_v28, %v13454_v45  ;;  %v7888_v35 = vpop.f32.mrb[183].mxu0  ;;  %8527 = vmatmul.mubr.bf16.gmra.mrb[176].mxu1 %v8223_v4  ;;  %v8123_v26 = vmax.f32 %v7883_v50, 0.0 }
 0x7e0   : > { %v7504_v33 = vpack.c.bf16 %v7428_v6, %v7426_v63  ;;  %v7889_v29 = vadd.f32 %v7888_v35, %v13459_v25  ;;  %v8124_v32 = vmax.f32 %v7885_v19, 0.0 }
 0x7e1   : > { %v8125_v11 = vmax.f32 %v7887_v24, 0.0 }
 0x7e2   : > { %8000 = vmatprep.mubr.bf16.mxu0 %v7504_v33  ;;  %v8126_v7 = vmax.f32 %v7889_v29, 0.0 }
 0x7e3   : > { %8001 = vmatmul.mubr.bf16.gmra.mrb[228].mxu0 %v7503_v5  ;;  %v8225_v20 = vpack.c.bf16 %v8125_v11, %v8123_v26 }
 0x7e4   : > { %v8226_v54 = vpack.c.bf16 %v8126_v7, %v8124_v32 }
 0x7e6   : > { %v7892_v49 = vpop.f32.mrb[184].mxu0  ;;  %8534 = vmatprep.mubr.bf16.mxu1 %v8226_v54 }
 0x7e7   : > { %v7893_v58 = vadd.f32 %v7892_v49, %v13454_v45  ;;  %v7894_v41 = vpop.f32.mrb[185].mxu0  ;;  %8535 = vmatmul.mubr.bf16.gmra.mrb[180].mxu1 %v8225_v20 }
 0x7e8   : > { %v7895_v57 = vadd.f32 %v7894_v41, %v13459_v25  ;;  %v7896_v8 = vpop.f32.mrb[186].mxu0 }
 0x7e9   : > { %v7897_v51 = vadd.f32 %v7896_v8, %v13454_v45  ;;  %v7898_v30 = vpop.f32.mrb[187].mxu0  ;;  %v8127_v39 = vmax.f32 %v7893_v58, 0.0 }
 0x7ea   : > { %v7899_v62 = vadd.f32 %v7898_v30, %v13459_v25  ;;  %v8128_v60 = vmax.f32 %v7895_v57, 0.0 }
 0x7eb   : > { %v8129_v37 = vmax.f32 %v7897_v51, 0.0 }
 0x7ec   : > { %v8130_v31 = vmax.f32 %v7899_v62, 0.0  ;;  %v7266_v9 = vpop.f32.mrb[104].mxu1 }
 0x7ed   : > { %v8227_v46 = vpack.c.bf16 %v8129_v37, %v8127_v39  ;;  %v7267_v0 = vadd.f32 %v7266_v9, %v13203_v47  ;;  %v7268_v17 = vpop.f32.mrb[105].mxu1 }
 0x7ee   : > { %v8228_v43 = vpack.c.bf16 %v8130_v31, %v8128_v60  ;;  %v7269_v40 = vadd.f32 %v7268_v17, %v13209_v23  ;;  %v7270_v34 = vpop.f32.mrb[106].mxu1 }
 0x7ef   : > { %v7271_v22 = vadd.f32 %v7270_v34, %v13203_v47  ;;  %v7272_v14 = vpop.f32.mrb[107].mxu1  ;;  %v7429_v56 = vmax.f32 %v7267_v0, 0.0 }
 0x7f0   : > { %v7273_v16 = vadd.f32 %v7272_v14, %v13209_v23  ;;  %8542 = vmatprep.mubr.bf16.mxu1 %v8228_v43  ;;  %v7430_v1 = vmax.f32 %v7269_v40, 0.0 }
 0x7f1   : > { %v7431_v55 = vmax.f32 %v7271_v22, 0.0  ;;  %8543 = vmatmul.mubr.bf16.gmra.mrb[184].mxu1 %v8227_v46 }
 0x7f2   : > { %v7432_v53 = vmax.f32 %v7273_v16, 0.0 }
 0x7f3   : > { %v7505_v42 = vpack.c.bf16 %v7431_v55, %v7429_v56 }
 0x7f4   : > { %v7506_v59 = vpack.c.bf16 %v7432_v53, %v7430_v1 }
 0x7f6   : > { %8010 = vmatprep.mubr.bf16.mxu0 %v7506_v59 }
 0x7f7   : > { %8011 = vmatmul.mubr.bf16.gmra.mrb[232].mxu0 %v7505_v42 }
 0x7f8   : > { %v7902_v3 = vpop.f32.mrb[188].mxu0 }
 0x7f9   : > { %v7903_v12 = vadd.f32 %v7902_v3, %v13454_v45  ;;  %v7904_v48 = vpop.f32.mrb[189].mxu0 }
 0x7fa   : > { %v7905_v15 = vadd.f32 %v7904_v48, %v13459_v25  ;;  %v7906_v13 = vpop.f32.mrb[190].mxu0 }
 0x7fb   : > { %v7907_v2 = vadd.f32 %v7906_v13, %v13454_v45  ;;  %v7908_v18 = vpop.f32.mrb[191].mxu0  ;;  %v8131_v61 = vmax.f32 %v7903_v12, 0.0 }
 0x7fc   : > { %v7909_v10 = vadd.f32 %v7908_v18, %v13459_v25  ;;  %v8132_v27 = vmax.f32 %v7905_v15, 0.0 }
 0x7fd   : > { %v8133_v4 = vmax.f32 %v7907_v2, 0.0 }
 0x7fe   : > { %v8134_v38 = vmax.f32 %v7909_v10, 0.0 }
 0x7ff   : > { %v8229_v21 = vpack.c.bf16 %v8133_v4, %v8131_v61  ;;  %v7276_v36 = vpop.f32.mrb[108].mxu1 }
 0x800   : > { %v8230_v44 = vpack.c.bf16 %v8134_v38, %v8132_v27  ;;  %v7277_v63 = vadd.f32 %v7276_v36, %v13203_v47  ;;  %v7278_v6 = vpop.f32.mrb[109].mxu1 }
 0x801   : > { %v7279_v50 = vadd.f32 %v7278_v6, %v13209_v23  ;;  %v7280_v52 = vpop.f32.mrb[110].mxu1 }
 0x802   : > { %v7281_v5 = vadd.f32 %v7280_v52, %v13203_v47  ;;  %v7282_v19 = vpop.f32.mrb[111].mxu1  ;;  %8550 = vmatprep.mubr.bf16.mxu1 %v8230_v44  ;;  %v7433_v33 = vmax.f32 %v7277_v63, 0.0 }
 0x803   : > { %v7283_v28 = vadd.f32 %v7282_v19, %v13209_v23  ;;  %8551 = vmatmul.mubr.bf16.gmra.mrb[188].mxu1 %v8229_v21  ;;  %v7434_v35 = vmax.f32 %v7279_v50, 0.0 }
 0x804   : > { %v7435_v24 = vmax.f32 %v7281_v5, 0.0 }
 0x805   : > { %v7436_v29 = vmax.f32 %v7283_v28, 0.0 }
 0x806   : > { %v7507_v26 = vpack.c.bf16 %v7435_v24, %v7433_v33 }
 0x807   : > { %v7508_v11 = vpack.c.bf16 %v7436_v29, %v7434_v35 }
 0x809   : > { %8020 = vmatprep.mubr.bf16.mxu0 %v7508_v11 }
 0x80a   : > { %8021 = vmatmul.mubr.bf16.gmra.mrb[236].mxu0 %v7507_v26  ;;  %v7912_v32 = vpop.f32.mrb[192].mxu0 }
 0x80b   : > { %v7913_v7 = vadd.f32 %v7912_v32, %v13454_v45  ;;  %v7914_v20 = vpop.f32.mrb[193].mxu0 }
 0x80c   : > { %v7915_v54 = vadd.f32 %v7914_v20, %v13459_v25  ;;  %v7916_v49 = vpop.f32.mrb[194].mxu0 }
 0x80d   : > { %v7917_v58 = vadd.f32 %v7916_v49, %v13454_v45  ;;  %v7918_v41 = vpop.f32.mrb[195].mxu0  ;;  %v8135_v8 = vmax.f32 %v7913_v7, 0.0 }
 0x80e   : > { %v7919_v57 = vadd.f32 %v7918_v41, %v13459_v25  ;;  %v8136_v30 = vmax.f32 %v7915_v54, 0.0 }
 0x80f   : > { %v8137_v51 = vmax.f32 %v7917_v58, 0.0 }
 0x810   : > { %v8138_v62 = vmax.f32 %v7919_v57, 0.0 }
 0x811   : > { %v8231_v39 = vpack.c.bf16 %v8137_v51, %v8135_v8  ;;  %v7286_v37 = vpop.f32.mrb[112].mxu1 }
 0x812   : > { %v8232_v60 = vpack.c.bf16 %v8138_v62, %v8136_v30  ;;  %v7287_v31 = vadd.f32 %v7286_v37, %v13203_v47  ;;  %v7288_v9 = vpop.f32.mrb[113].mxu1 }
 0x813   : > { %v7289_v46 = vadd.f32 %v7288_v9, %v13209_v23  ;;  %v7290_v0 = vpop.f32.mrb[114].mxu1 }
 0x814   : > { %v7291_v17 = vadd.f32 %v7290_v0, %v13203_v47  ;;  %v7292_v43 = vpop.f32.mrb[115].mxu1  ;;  %8558 = vmatprep.mubr.bf16.mxu1 %v8232_v60  ;;  %v7437_v34 = vmax.f32 %v7287_v31, 0.0 }
 0x815   : > { %v7293_v40 = vadd.f32 %v7292_v43, %v13209_v23  ;;  %8559 = vmatmul.mubr.bf16.gmra.mrb[192].mxu1 %v8231_v39  ;;  %v7438_v14 = vmax.f32 %v7289_v46, 0.0 }
 0x816   : > { %v7439_v22 = vmax.f32 %v7291_v17, 0.0 }
 0x817   : > { %v7440_v16 = vmax.f32 %v7293_v40, 0.0 }
 0x818   : > { %v7509_v56 = vpack.c.bf16 %v7439_v22, %v7437_v34 }
 0x819   : > { %v7510_v55 = vpack.c.bf16 %v7440_v16, %v7438_v14 }
 0x81b   : > { %8030 = vmatprep.mubr.bf16.mxu0 %v7510_v55 }
 0x81c   : > { %8031 = vmatmul.mubr.bf16.gmra.mrb[240].mxu0 %v7509_v56 }
 0x81d   : > { %v7922_v1 = vpop.f32.mrb[196].mxu0 }
 0x81e   : > { %v7923_v53 = vadd.f32 %v7922_v1, %v13454_v45  ;;  %v7924_v42 = vpop.f32.mrb[197].mxu0 }
 0x81f   : > { %v7925_v59 = vadd.f32 %v7924_v42, %v13459_v25  ;;  %v7926_v3 = vpop.f32.mrb[198].mxu0 }
 0x820   : > { %v7927_v12 = vadd.f32 %v7926_v3, %v13454_v45  ;;  %v7928_v48 = vpop.f32.mrb[199].mxu0  ;;  %v8139_v13 = vmax.f32 %v7923_v53, 0.0 }
 0x821   : > { %v7929_v15 = vadd.f32 %v7928_v48, %v13459_v25  ;;  %v8140_v18 = vmax.f32 %v7925_v59, 0.0 }
 0x822   : > { %v8141_v2 = vmax.f32 %v7927_v12, 0.0 }
 0x823   : > { %v8142_v10 = vmax.f32 %v7929_v15, 0.0 }
 0x824   : > { %v8233_v61 = vpack.c.bf16 %v8141_v2, %v8139_v13  ;;  %v7296_v4 = vpop.f32.mrb[116].mxu1 }
 0x825   : > { %v8234_v27 = vpack.c.bf16 %v8142_v10, %v8140_v18  ;;  %v7297_v38 = vadd.f32 %v7296_v4, %v13203_v47  ;;  %v7298_v21 = vpop.f32.mrb[117].mxu1 }
 0x826   : > { %v7299_v36 = vadd.f32 %v7298_v21, %v13209_v23  ;;  %v7300_v44 = vpop.f32.mrb[118].mxu1 }
 0x827   : > { %v7301_v63 = vadd.f32 %v7300_v44, %v13203_v47  ;;  %v7302_v6 = vpop.f32.mrb[119].mxu1  ;;  %8566 = vmatprep.mubr.bf16.mxu1 %v8234_v27  ;;  %v7441_v52 = vmax.f32 %v7297_v38, 0.0 }
 0x828   : > { %v7303_v50 = vadd.f32 %v7302_v6, %v13209_v23  ;;  %8567 = vmatmul.mubr.bf16.gmra.mrb[196].mxu1 %v8233_v61  ;;  %v7442_v19 = vmax.f32 %v7299_v36, 0.0 }
 0x829   : > { %v7443_v5 = vmax.f32 %v7301_v63, 0.0 }
 0x82a   : > { %v7444_v28 = vmax.f32 %v7303_v50, 0.0 }
 0x82b   : > { %v7511_v33 = vpack.c.bf16 %v7443_v5, %v7441_v52  ;;  %v13595_v52 = vld [vmem:[%s13833_s6] ss:$0 sm:$0xff] }
 0x82c   : > { %v7512_v24 = vpack.c.bf16 %v7444_v28, %v7442_v19 }
 0x82e   : > { %8040 = vmatprep.mubr.bf16.mxu0 %v7512_v24 }
 0x82f   : > { %8041 = vmatmul.mubr.bf16.gmra.mrb[244].mxu0 %v7511_v33 }
 0x830   : > { %v7932_v35 = vpop.f32.mrb[200].mxu0 }
 0x831   : > { %v7933_v29 = vadd.f32 %v7932_v35, %v13454_v45  ;;  %v7934_v26 = vpop.f32.mrb[201].mxu0 }
 0x832   : > { %v7935_v11 = vadd.f32 %v7934_v26, %v13459_v25  ;;  %v7936_v32 = vpop.f32.mrb[202].mxu0 }
 0x833   : > { %v7937_v7 = vadd.f32 %v7936_v32, %v13454_v45  ;;  %v7938_v20 = vpop.f32.mrb[203].mxu0  ;;  %v8143_v49 = vmax.f32 %v7933_v29, 0.0 }
 0x834   : > { %v7939_v54 = vadd.f32 %v7938_v20, %v13459_v25  ;;  %v8144_v41 = vmax.f32 %v7935_v11, 0.0 }
 0x835   : > { %v8145_v58 = vmax.f32 %v7937_v7, 0.0 }
 0x836   : > { %v8146_v57 = vmax.f32 %v7939_v54, 0.0 }
 0x837   : > { %v8235_v8 = vpack.c.bf16 %v8145_v58, %v8143_v49  ;;  %v7306_v51 = vpop.f32.mrb[120].mxu1 }
 0x838   : > { %v8236_v30 = vpack.c.bf16 %v8146_v57, %v8144_v41  ;;  %v7307_v62 = vadd.f32 %v7306_v51, %v13203_v47  ;;  %v7308_v39 = vpop.f32.mrb[121].mxu1 }
 0x839   : > { %v7309_v37 = vadd.f32 %v7308_v39, %v13209_v23  ;;  %v7310_v60 = vpop.f32.mrb[122].mxu1 }
 0x83a   : > { %v7311_v31 = vadd.f32 %v7310_v60, %v13203_v47  ;;  %v7312_v9 = vpop.f32.mrb[123].mxu1  ;;  %8574 = vmatprep.mubr.bf16.mxu1 %v8236_v30  ;;  %v7445_v0 = vmax.f32 %v7307_v62, 0.0 }
 0x83b   : > { %v7313_v46 = vadd.f32 %v7312_v9, %v13209_v23  ;;  %8575 = vmatmul.mubr.bf16.gmra.mrb[200].mxu1 %v8235_v8  ;;  %v7446_v43 = vmax.f32 %v7309_v37, 0.0 }
 0x83c   : > { %v7447_v17 = vmax.f32 %v7311_v31, 0.0 }
 0x83d   : > { %v7448_v40 = vmax.f32 %v7313_v46, 0.0 }
 0x83e   : > { %v7513_v34 = vpack.c.bf16 %v7447_v17, %v7445_v0 }
 0x83f   : > { %v7514_v22 = vpack.c.bf16 %v7448_v40, %v7446_v43 }
 0x841   : > { %8050 = vmatprep.mubr.bf16.mxu0 %v7514_v22 }
 0x842   : > { %8051 = vmatmul.mubr.bf16.gmra.mrb[248].mxu0 %v7513_v34 }
 0x844   : > { %v7942_v14 = vpop.f32.mrb[204].mxu0 }
 0x845   : > { %v7943_v16 = vadd.f32 %v7942_v14, %v13454_v45  ;;  %v7944_v56 = vpop.f32.mrb[205].mxu0 }
 0x846   : > { %v7945_v55 = vadd.f32 %v7944_v56, %v13459_v25  ;;  %v7946_v1 = vpop.f32.mrb[206].mxu0 }
 0x847   : > { %v7947_v53 = vadd.f32 %v7946_v1, %v13454_v45  ;;  %v7948_v42 = vpop.f32.mrb[207].mxu0  ;;  %v8147_v3 = vmax.f32 %v7943_v16, 0.0 }
 0x848   : > { %v7949_v59 = vadd.f32 %v7948_v42, %v13459_v25  ;;  %v8148_v48 = vmax.f32 %v7945_v55, 0.0 }
 0x849   : > { %v8149_v12 = vmax.f32 %v7947_v53, 0.0 }
 0x84a   : > { %v8150_v15 = vmax.f32 %v7949_v59, 0.0  ;;  %v7316_v13 = vpop.f32.mrb[124].mxu1 }
 0x84b   : > { %v8237_v2 = vpack.c.bf16 %v8149_v12, %v8147_v3  ;;  %v7317_v18 = vadd.f32 %v7316_v13, %v13203_v47  ;;  %v7318_v10 = vpop.f32.mrb[125].mxu1 }
 0x84c   : > { %v8238_v61 = vpack.c.bf16 %v8150_v15, %v8148_v48  ;;  %v7319_v4 = vadd.f32 %v7318_v10, %v13209_v23  ;;  %v7320_v27 = vpop.f32.mrb[126].mxu1 }
 0x84d   : > { %v7321_v38 = vadd.f32 %v7320_v27, %v13203_v47  ;;  %v7322_v21 = vpop.f32.mrb[127].mxu1  ;;  %v7449_v44 = vmax.f32 %v7317_v18, 0.0 }
 0x84e   : > { %v7323_v36 = vadd.f32 %v7322_v21, %v13209_v23  ;;  %8582 = vmatprep.mubr.bf16.mxu1 %v8238_v61  ;;  %v7450_v6 = vmax.f32 %v7319_v4, 0.0 }
 0x84f   : > { %v7451_v63 = vmax.f32 %v7321_v38, 0.0  ;;  %8583 = vmatmul.mubr.bf16.gmra.mrb[204].mxu1 %v8237_v2 }
 0x850   : > { %v7452_v50 = vmax.f32 %v7323_v36, 0.0 }
 0x851   : > { %v7515_v5 = vpack.c.bf16 %v7451_v63, %v7449_v44 }
 0x852   : > { %v7516_v19 = vpack.c.bf16 %v7452_v50, %v7450_v6  ;;  %v8432_v28 = vpop.f32.mrb[128].mxu1 }
 0x853   : > { %v8433_v47 = vadd.f32 %v13595_v52, %v8432_v28  ;;  %v8434_v33 = vpop.f32.mrb[129].mxu1 }
 0x854   : > { %8060 = vmatprep.mubr.bf16.mxu0 %v7516_v19  ;;  %v8435_v23 = vpop.f32.mrb[130].mxu1 }
 0x855   : > { %8687 = vst [vmem:[%s13598_s22] sm:$0xff] %v8433_v47  ;;  %v8436_v24 = vadd.f32 %v13595_v52, %v8435_v23  ;;  %8061 = vmatmul.mubr.bf16.gmra.mrb[252].mxu0 %v7515_v5  ;;  %v8437_v35 = vpop.f32.mrb[131].mxu1 }
 0x857   : > { %8688 = vst [vmem:[%s13598_s22 + $0x8] sm:$0xff] %v8436_v24  ;;  %v7952_v29 = vpop.f32.mrb[208].mxu0 }
 0x858   : > { %v7953_v26 = vadd.f32 %v7952_v29, %v13454_v45  ;;  %v7954_v11 = vpop.f32.mrb[209].mxu0 }
 0x859   : > { %v7955_v32 = vadd.f32 %v7954_v11, %v13459_v25  ;;  %v7956_v7 = vpop.f32.mrb[210].mxu0 }
 0x85a   : > { %v7957_v20 = vadd.f32 %v7956_v7, %v13454_v45  ;;  %v7958_v54 = vpop.f32.mrb[211].mxu0  ;;  %v8440_v49 = vpop.f32.mrb[132].mxu1  ;;  %v8151_v8 = vmax.f32 %v7953_v26, 0.0 }
 0x85b   : > { %v7959_v58 = vadd.f32 %v7958_v54, %v13459_v25  ;;  %v8441_v41 = vadd.f32 %v13595_v52, %v8440_v49  ;;  %v8442_v57 = vpop.f32.mrb[133].mxu1  ;;  %v8152_v62 = vmax.f32 %v7955_v32, 0.0 }
 0x85c   : > { %v8153_v51 = vmax.f32 %v7957_v20, 0.0  ;;  %v8443_v30 = vpop.f32.mrb[134].mxu1 }
 0x85d   : > { %v8154_v39 = vmax.f32 %v7959_v58, 0.0  ;;  %8689 = vst [vmem:[%s13598_s22 + $0x10] sm:$0xff] %v8441_v41  ;;  %v8444_v37 = vadd.f32 %v13595_v52, %v8443_v30  ;;  %v8445_v60 = vpop.f32.mrb[135].mxu1 }
 0x85e   : > { %v8239_v31 = vpack.c.bf16 %v8153_v51, %v8151_v8 }
 0x85f   : > { %v8240_v9 = vpack.c.bf16 %v8154_v39, %v8152_v62  ;;  %8690 = vst [vmem:[%s13598_s22 + $0x18] sm:$0xff] %v8444_v37 }
 0x861   : > { %8590 = vmatprep.mubr.bf16.mxu1 %v8240_v9 }
 0x862   : > { %v8448_v46 = vpop.f32.mrb[136].mxu1  ;;  %8591 = vmatmul.mubr.bf16.gmra.mrb[208].mxu1 %v8239_v31 }
 0x863   : > { %v8449_v0 = vadd.f32 %v13595_v52, %v8448_v46  ;;  %v8450_v17 = vpop.f32.mrb[137].mxu1 }
 0x864   : > { %v8451_v43 = vpop.f32.mrb[138].mxu1 }
 0x865   : > { %8691 = vst [vmem:[%s13598_s22 + $0x20] sm:$0xff] %v8449_v0  ;;  %v8452_v40 = vadd.f32 %v13595_v52, %v8451_v43  ;;  %v8453_v34 = vpop.f32.mrb[139].mxu1 }
 0x867   : > { %8692 = vst [vmem:[%s13598_s22 + $0x28] sm:$0xff] %v8452_v40 }
 0x86a   : > { %v8456_v14 = vpop.f32.mrb[140].mxu1 }
 0x86b   : > { %v7962_v22 = vpop.f32.mrb[212].mxu0  ;;  %v8457_v56 = vadd.f32 %v13595_v52, %v8456_v14  ;;  %v8458_v1 = vpop.f32.mrb[141].mxu1 }
 0x86c   : > { %v7963_v16 = vadd.f32 %v7962_v22, %v13454_v45  ;;  %v7964_v55 = vpop.f32.mrb[213].mxu0  ;;  %v8459_v59 = vpop.f32.mrb[142].mxu1 }
 0x86d   : > { %v7965_v53 = vadd.f32 %v7964_v55, %v13459_v25  ;;  %v7966_v42 = vpop.f32.mrb[214].mxu0  ;;  %8693 = vst [vmem:[%s13598_s22 + $0x30] sm:$0xff] %v8457_v56  ;;  %v8460_v12 = vadd.f32 %v13595_v52, %v8459_v59  ;;  %v8461_v15 = vpop.f32.mrb[143].mxu1 }
 0x86e   : > { %v7967_v3 = vadd.f32 %v7966_v42, %v13454_v45  ;;  %v7968_v48 = vpop.f32.mrb[215].mxu0  ;;  %v8155_v2 = vmax.f32 %v7963_v16, 0.0 }
 0x86f   : > { %v7969_v13 = vadd.f32 %v7968_v48, %v13459_v25  ;;  %8694 = vst [vmem:[%s13598_s22 + $0x38] sm:$0xff] %v8460_v12  ;;  %v8156_v10 = vmax.f32 %v7965_v53, 0.0 }
 0x870   : > { %v8157_v18 = vmax.f32 %v7967_v3, 0.0 }
 0x871   : > { %v8158_v61 = vmax.f32 %v7969_v13, 0.0 }
 0x872   : > { %v8241_v4 = vpack.c.bf16 %v8157_v18, %v8155_v2  ;;  %v8464_v38 = vpop.f32.mrb[144].mxu1 }
 0x873   : > { %v8242_v27 = vpack.c.bf16 %v8158_v61, %v8156_v10  ;;  %v8465_v21 = vadd.f32 %v13595_v52, %v8464_v38  ;;  %v8466_v36 = vpop.f32.mrb[145].mxu1 }
 0x874   : > { %v8467_v44 = vpop.f32.mrb[146].mxu1 }
 0x875   : > { %8598 = vmatprep.mubr.bf16.mxu1 %v8242_v27  ;;  %8695 = vst [vmem:[%s13598_s22 + $0x40] sm:$0xff] %v8465_v21  ;;  %v8468_v63 = vadd.f32 %v13595_v52, %v8467_v44  ;;  %v8469_v6 = vpop.f32.mrb[147].mxu1 }
 0x876   : > { %8599 = vmatmul.mubr.bf16.gmra.mrb[212].mxu1 %v8241_v4 }
 0x877   : > { %8696 = vst [vmem:[%s13598_s22 + $0x48] sm:$0xff] %v8468_v63 }
 0x87a   : > { %v8472_v50 = vpop.f32.mrb[148].mxu1 }
 0x87b   : > { %v8473_v5 = vadd.f32 %v13595_v52, %v8472_v50  ;;  %v8474_v19 = vpop.f32.mrb[149].mxu1 }
 0x87c   : > { %v8475_v28 = vpop.f32.mrb[150].mxu1 }
 0x87d   : > { %8697 = vst [vmem:[%s13598_s22 + $0x50] sm:$0xff] %v8473_v5  ;;  %v8476_v47 = vadd.f32 %v13595_v52, %v8475_v28  ;;  %v8477_v23 = vpop.f32.mrb[151].mxu1 }
 0x87e   : > { %v7972_v33 = vpop.f32.mrb[216].mxu0 }
 0x87f   : > { %v7973_v24 = vadd.f32 %v7972_v33, %v13454_v45  ;;  %v7974_v35 = vpop.f32.mrb[217].mxu0  ;;  %8698 = vst [vmem:[%s13598_s22 + $0x58] sm:$0xff] %v8476_v47 }
 0x880   : > { %v7975_v29 = vadd.f32 %v7974_v35, %v13459_v25  ;;  %v7976_v26 = vpop.f32.mrb[218].mxu0 }
 0x881   : > { %v7977_v11 = vadd.f32 %v7976_v26, %v13454_v45  ;;  %v7978_v32 = vpop.f32.mrb[219].mxu0  ;;  %v8159_v20 = vmax.f32 %v7973_v24, 0.0 }
 0x882   : > { %v7979_v7 = vadd.f32 %v7978_v32, %v13459_v25  ;;  %v8480_v49 = vpop.f32.mrb[152].mxu1  ;;  %v8160_v58 = vmax.f32 %v7975_v29, 0.0 }
 0x883   : > { %v8161_v54 = vmax.f32 %v7977_v11, 0.0  ;;  %v8481_v57 = vadd.f32 %v13595_v52, %v8480_v49  ;;  %v8482_v8 = vpop.f32.mrb[153].mxu1 }
 0x884   : > { %v8162_v41 = vmax.f32 %v7979_v7, 0.0  ;;  %v8483_v30 = vpop.f32.mrb[154].mxu1 }
 0x885   : > { %v8243_v51 = vpack.c.bf16 %v8161_v54, %v8159_v20  ;;  %8699 = vst [vmem:[%s13598_s22 + $0x60] sm:$0xff] %v8481_v57  ;;  %v8484_v39 = vadd.f32 %v13595_v52, %v8483_v30  ;;  %v8485_v37 = vpop.f32.mrb[155].mxu1 }
 0x886   : > { %v8244_v62 = vpack.c.bf16 %v8162_v41, %v8160_v58 }
 0x887   : > { %8700 = vst [vmem:[%s13598_s22 + $0x68] sm:$0xff] %v8484_v39 }
 0x888   : > { %8606 = vmatprep.mubr.bf16.mxu1 %v8244_v62 }
 0x889   : > { %8607 = vmatmul.mubr.bf16.gmra.mrb[216].mxu1 %v8243_v51 }
 0x88a   : > { %v8488_v60 = vpop.f32.mrb[156].mxu1 }
 0x88b   : > { %v8489_v31 = vadd.f32 %v13595_v52, %v8488_v60  ;;  %v8490_v9 = vpop.f32.mrb[157].mxu1 }
 0x88c   : > { %v8491_v46 = vpop.f32.mrb[158].mxu1 }
 0x88d   : > { %8701 = vst [vmem:[%s13598_s22 + $0x70] sm:$0xff] %v8489_v31  ;;  %v8492_v0 = vadd.f32 %v13595_v52, %v8491_v46  ;;  %v8493_v17 = vpop.f32.mrb[159].mxu1 }
 0x88f   : > { %8702 = vst [vmem:[%s13598_s22 + $0x78] sm:$0xff] %v8492_v0 }
 0x891   : > { %v7982_v43 = vpop.f32.mrb[220].mxu0 }
 0x892   : > { %v7983_v40 = vadd.f32 %v7982_v43, %v13454_v45  ;;  %v7984_v34 = vpop.f32.mrb[221].mxu0  ;;  %v8496_v16 = vpop.f32.mrb[160].mxu1 }
 0x893   : > { %v7985_v22 = vadd.f32 %v7984_v34, %v13459_v25  ;;  %v7986_v14 = vpop.f32.mrb[222].mxu0  ;;  %v8497_v55 = vadd.f32 %v13595_v52, %v8496_v16  ;;  %v8498_v53 = vpop.f32.mrb[161].mxu1 }
 0x894   : > { %v7987_v56 = vadd.f32 %v7986_v14, %v13454_v45  ;;  %v7988_v1 = vpop.f32.mrb[223].mxu0  ;;  %v8499_v59 = vpop.f32.mrb[162].mxu1  ;;  %v8163_v3 = vmax.f32 %v7983_v40, 0.0 }
 0x895   : > { %v7989_v42 = vadd.f32 %v7988_v1, %v13459_v25  ;;  %8703 = vst [vmem:[%s13598_s22 + $0x80] sm:$0xff] %v8497_v55  ;;  %v8500_v48 = vadd.f32 %v13595_v52, %v8499_v59  ;;  %v8501_v15 = vpop.f32.mrb[163].mxu1  ;;  %v8164_v13 = vmax.f32 %v7985_v22, 0.0 }
 0x896   : > { %v8165_v12 = vmax.f32 %v7987_v56, 0.0 }
 0x897   : > { %v8166_v2 = vmax.f32 %v7989_v42, 0.0  ;;  %8704 = vst [vmem:[%s13598_s22 + $0x88] sm:$0xff] %v8500_v48 }
 0x898   : > { %v8245_v18 = vpack.c.bf16 %v8165_v12, %v8163_v3 }
 0x899   : > { %v8246_v10 = vpack.c.bf16 %v8166_v2, %v8164_v13 }
 0x89a   : > { %v8504_v61 = vpop.f32.mrb[164].mxu1 }
 0x89b   : > { %8614 = vmatprep.mubr.bf16.mxu1 %v8246_v10  ;;  %v8505_v4 = vadd.f32 %v13595_v52, %v8504_v61  ;;  %v8506_v27 = vpop.f32.mrb[165].mxu1 }
 0x89c   : > { %8615 = vmatmul.mubr.bf16.gmra.mrb[220].mxu1 %v8245_v18  ;;  %v8507_v38 = vpop.f32.mrb[166].mxu1 }
 0x89d   : > { %8705 = vst [vmem:[%s13598_s22 + $0x90] sm:$0xff] %v8505_v4  ;;  %v8508_v21 = vadd.f32 %v13595_v52, %v8507_v38  ;;  %v8509_v36 = vpop.f32.mrb[167].mxu1 }
 0x89f   : > { %8706 = vst [vmem:[%s13598_s22 + $0x98] sm:$0xff] %v8508_v21 }
 0x8a2   : > { %v8512_v44 = vpop.f32.mrb[168].mxu1 }
 0x8a3   : > { %v7992_v63 = vpop.f32.mrb[224].mxu0  ;;  %v8513_v6 = vadd.f32 %v13595_v52, %v8512_v44  ;;  %v8514_v5 = vpop.f32.mrb[169].mxu1 }
 0x8a4   : > { %v7993_v50 = vadd.f32 %v7992_v63, %v13454_v45  ;;  %v7994_v19 = vpop.f32.mrb[225].mxu0  ;;  %v8515_v47 = vpop.f32.mrb[170].mxu1 }
 0x8a5   : > { %v7995_v28 = vadd.f32 %v7994_v19, %v13459_v25  ;;  %v7996_v33 = vpop.f32.mrb[226].mxu0  ;;  %8707 = vst [vmem:[%s13598_s22 + $0xa0] sm:$0xff] %v8513_v6  ;;  %v8516_v23 = vadd.f32 %v13595_v52, %v8515_v47  ;;  %v8517_v35 = vpop.f32.mrb[171].mxu1 }
 0x8a6   : > { %v7997_v24 = vadd.f32 %v7996_v33, %v13454_v45  ;;  %v7998_v29 = vpop.f32.mrb[227].mxu0  ;;  %v8167_v11 = vmax.f32 %v7993_v50, 0.0 }
 0x8a7   : > { %v7999_v26 = vadd.f32 %v7998_v29, %v13459_v25  ;;  %8708 = vst [vmem:[%s13598_s22 + $0xa8] sm:$0xff] %v8516_v23  ;;  %v8168_v7 = vmax.f32 %v7995_v28, 0.0 }
 0x8a8   : > { %v8169_v32 = vmax.f32 %v7997_v24, 0.0 }
 0x8a9   : > { %v8170_v20 = vmax.f32 %v7999_v26, 0.0 }
 0x8aa   : > { %v8247_v54 = vpack.c.bf16 %v8169_v32, %v8167_v11  ;;  %v8520_v58 = vpop.f32.mrb[172].mxu1 }
 0x8ab   : > { %v8248_v49 = vpack.c.bf16 %v8170_v20, %v8168_v7  ;;  %v8521_v41 = vadd.f32 %v13595_v52, %v8520_v58  ;;  %v8522_v57 = vpop.f32.mrb[173].mxu1 }
 0x8ac   : > { %v8523_v8 = vpop.f32.mrb[174].mxu1 }
 0x8ad   : > { %8622 = vmatprep.mubr.bf16.mxu1 %v8248_v49  ;;  %8709 = vst [vmem:[%s13598_s22 + $0xb0] sm:$0xff] %v8521_v41  ;;  %v8524_v51 = vadd.f32 %v13595_v52, %v8523_v8  ;;  %v8525_v30 = vpop.f32.mrb[175].mxu1 }
 0x8ae   : > { %8623 = vmatmul.mubr.bf16.gmra.mrb[224].mxu1 %v8247_v54 }
 0x8af   : > { %8710 = vst [vmem:[%s13598_s22 + $0xb8] sm:$0xff] %v8524_v51 }
 0x8b2   : > { %v8528_v62 = vpop.f32.mrb[176].mxu1 }
 0x8b3   : > { %v8529_v39 = vadd.f32 %v13595_v52, %v8528_v62  ;;  %v8530_v37 = vpop.f32.mrb[177].mxu1 }
 0x8b4   : > { %v8531_v60 = vpop.f32.mrb[178].mxu1 }
 0x8b5   : > { %8711 = vst [vmem:[%s13598_s22 + $0xc0] sm:$0xff] %v8529_v39  ;;  %v8532_v31 = vadd.f32 %v13595_v52, %v8531_v60  ;;  %v8533_v9 = vpop.f32.mrb[179].mxu1 }
 0x8b6   : > { %v8002_v46 = vpop.f32.mrb[228].mxu0 }
 0x8b7   : > { %v8003_v0 = vadd.f32 %v8002_v46, %v13454_v45  ;;  %v8004_v17 = vpop.f32.mrb[229].mxu0  ;;  %8712 = vst [vmem:[%s13598_s22 + $0xc8] sm:$0xff] %v8532_v31 }
 0x8b8   : > { %v8005_v43 = vadd.f32 %v8004_v17, %v13459_v25  ;;  %v8006_v40 = vpop.f32.mrb[230].mxu0 }
 0x8b9   : > { %v8007_v34 = vadd.f32 %v8006_v40, %v13454_v45  ;;  %v8008_v22 = vpop.f32.mrb[231].mxu0  ;;  %v8171_v16 = vmax.f32 %v8003_v0, 0.0 }
 0x8ba   : > { %v8009_v14 = vadd.f32 %v8008_v22, %v13459_v25  ;;  %v8536_v55 = vpop.f32.mrb[180].mxu1  ;;  %v8172_v1 = vmax.f32 %v8005_v43, 0.0 }
 0x8bb   : > { %v8173_v56 = vmax.f32 %v8007_v34, 0.0  ;;  %v8537_v42 = vadd.f32 %v13595_v52, %v8536_v55  ;;  %v8538_v59 = vpop.f32.mrb[181].mxu1 }
 0x8bc   : > { %v8174_v53 = vmax.f32 %v8009_v14, 0.0  ;;  %v8539_v12 = vpop.f32.mrb[182].mxu1 }
 0x8bd   : > { %v8249_v3 = vpack.c.bf16 %v8173_v56, %v8171_v16  ;;  %8713 = vst [vmem:[%s13598_s22 + $0xd0] sm:$0xff] %v8537_v42  ;;  %v8540_v15 = vadd.f32 %v13595_v52, %v8539_v12  ;;  %v8541_v13 = vpop.f32.mrb[183].mxu1 }
 0x8be   : > { %v8250_v48 = vpack.c.bf16 %v8174_v53, %v8172_v1 }
 0x8bf   : > { %8714 = vst [vmem:[%s13598_s22 + $0xd8] sm:$0xff] %v8540_v15 }
 0x8c0   : > { %8630 = vmatprep.mubr.bf16.mxu1 %v8250_v48 }
 0x8c1   : > { %8631 = vmatmul.mubr.bf16.gmra.mrb[228].mxu1 %v8249_v3 }
 0x8c4   : > { %v8544_v2 = vpop.f32.mrb[184].mxu1 }
 0x8c5   : > { %v8545_v18 = vadd.f32 %v13595_v52, %v8544_v2  ;;  %v8546_v10 = vpop.f32.mrb[185].mxu1 }
 0x8c6   : > { %v8547_v61 = vpop.f32.mrb[186].mxu1 }
 0x8c7   : > { %8715 = vst [vmem:[%s13598_s22 + $0xe0] sm:$0xff] %v8545_v18  ;;  %v8548_v4 = vadd.f32 %v13595_v52, %v8547_v61  ;;  %v8549_v27 = vpop.f32.mrb[187].mxu1 }
 0x8c9   : > { %8716 = vst [vmem:[%s13598_s22 + $0xe8] sm:$0xff] %v8548_v4 }
 0x8ca   : > { %v8012_v38 = vpop.f32.mrb[232].mxu0 }
 0x8cb   : > { %v8013_v21 = vadd.f32 %v8012_v38, %v13454_v45  ;;  %v8014_v36 = vpop.f32.mrb[233].mxu0 }
 0x8cc   : > { %v8015_v44 = vadd.f32 %v8014_v36, %v13459_v25  ;;  %v8016_v63 = vpop.f32.mrb[234].mxu0 }
 0x8cd   : > { %v8017_v6 = vadd.f32 %v8016_v63, %v13454_v45  ;;  %v8018_v50 = vpop.f32.mrb[235].mxu0  ;;  %v8175_v19 = vmax.f32 %v8013_v21, 0.0 }
 0x8ce   : > { %v8019_v5 = vadd.f32 %v8018_v50, %v13459_v25  ;;  %v8176_v47 = vmax.f32 %v8015_v44, 0.0 }
 0x8cf   : > { %v8177_v28 = vmax.f32 %v8017_v6, 0.0 }
 0x8d0   : > { %v8178_v33 = vmax.f32 %v8019_v5, 0.0 }
 0x8d1   : > { %v8251_v23 = vpack.c.bf16 %v8177_v28, %v8175_v19 }
 0x8d2   : > { %v8252_v24 = vpack.c.bf16 %v8178_v33, %v8176_v47 }
 0x8d4   : > { %8638 = vmatprep.mubr.bf16.mxu1 %v8252_v24 }
 0x8d5   : > { %8639 = vmatmul.mubr.bf16.gmra.mrb[232].mxu1 %v8251_v23 }
 0x8d6   : > { %v8552_v35 = vpop.f32.mrb[188].mxu1 }
 0x8d7   : > { %v8553_v29 = vadd.f32 %v13595_v52, %v8552_v35  ;;  %v8554_v26 = vpop.f32.mrb[189].mxu1 }
 0x8d8   : > { %v8555_v11 = vpop.f32.mrb[190].mxu1 }
 0x8d9   : > { %8717 = vst [vmem:[%s13598_s22 + $0xf0] sm:$0xff] %v8553_v29  ;;  %v8556_v32 = vadd.f32 %v13595_v52, %v8555_v11  ;;  %v8557_v7 = vpop.f32.mrb[191].mxu1 }
 0x8db   : > { %8718 = vst [vmem:[%s13598_s22 + $0xf8] sm:$0xff] %v8556_v32 }
 0x8dd   : > { %v8022_v20 = vpop.f32.mrb[236].mxu0 }
 0x8de   : > { %v8023_v54 = vadd.f32 %v8022_v20, %v13454_v45  ;;  %v8024_v49 = vpop.f32.mrb[237].mxu0 }
 0x8df   : > { %v8025_v58 = vadd.f32 %v8024_v49, %v13459_v25  ;;  %v8026_v41 = vpop.f32.mrb[238].mxu0 }
 0x8e0   : > { %v8027_v57 = vadd.f32 %v8026_v41, %v13454_v45  ;;  %v8028_v8 = vpop.f32.mrb[239].mxu0  ;;  %v8179_v30 = vmax.f32 %v8023_v54, 0.0 }
 0x8e1   : > { %v8029_v51 = vadd.f32 %v8028_v8, %v13459_v25  ;;  %v8180_v39 = vmax.f32 %v8025_v58, 0.0 }
 0x8e2   : > { %v8181_v62 = vmax.f32 %v8027_v57, 0.0 }
 0x8e3   : > { %v8182_v37 = vmax.f32 %v8029_v51, 0.0 }
 0x8e4   : > { %v8253_v60 = vpack.c.bf16 %v8181_v62, %v8179_v30 }
 0x8e5   : > { %v8254_v31 = vpack.c.bf16 %v8182_v37, %v8180_v39 }
 0x8e7   : > { %8646 = vmatprep.mubr.bf16.mxu1 %v8254_v31 }
 0x8e8   : > { %8647 = vmatmul.mubr.bf16.gmra.mrb[236].mxu1 %v8253_v60  ;;  %v8560_v9 = vpop.f32.mrb[192].mxu1 }
 0x8e9   : > { %v8561_v46 = vadd.f32 %v13595_v52, %v8560_v9  ;;  %v8562_v0 = vpop.f32.mrb[193].mxu1 }
 0x8ea   : > { %v8563_v17 = vpop.f32.mrb[194].mxu1 }
 0x8eb   : > { %8719 = vst [vmem:[%s13598_s22 + $0x100] sm:$0xff] %v8561_v46  ;;  %v8564_v43 = vadd.f32 %v13595_v52, %v8563_v17  ;;  %v8565_v40 = vpop.f32.mrb[195].mxu1 }
 0x8ed   : > { %8720 = vst [vmem:[%s13598_s22 + $0x108] sm:$0xff] %v8564_v43 }
 0x8ef   : > { %v8032_v34 = vpop.f32.mrb[240].mxu0 }
 0x8f0   : > { %v8033_v22 = vadd.f32 %v8032_v34, %v13454_v45  ;;  %v8034_v14 = vpop.f32.mrb[241].mxu0 }
 0x8f1   : > { %v8035_v16 = vadd.f32 %v8034_v14, %v13459_v25  ;;  %v8036_v56 = vpop.f32.mrb[242].mxu0 }
 0x8f2   : > { %v8037_v55 = vadd.f32 %v8036_v56, %v13454_v45  ;;  %v8038_v1 = vpop.f32.mrb[243].mxu0  ;;  %v8183_v42 = vmax.f32 %v8033_v22, 0.0 }
 0x8f3   : > { %v8039_v53 = vadd.f32 %v8038_v1, %v13459_v25  ;;  %v8184_v3 = vmax.f32 %v8035_v16, 0.0 }
 0x8f4   : > { %v8185_v59 = vmax.f32 %v8037_v55, 0.0 }
 0x8f5   : > { %v8186_v12 = vmax.f32 %v8039_v53, 0.0 }
 0x8f6   : > { %v8255_v48 = vpack.c.bf16 %v8185_v59, %v8183_v42 }
 0x8f7   : > { %v8256_v15 = vpack.c.bf16 %v8186_v12, %v8184_v3 }
 0x8f9   : > { %8654 = vmatprep.mubr.bf16.mxu1 %v8256_v15 }
 0x8fa   : > { %8655 = vmatmul.mubr.bf16.gmra.mrb[240].mxu1 %v8255_v48 }
 0x8fb   : > { %v8568_v13 = vpop.f32.mrb[196].mxu1 }
 0x8fc   : > { %v8569_v2 = vadd.f32 %v13595_v52, %v8568_v13  ;;  %v8570_v18 = vpop.f32.mrb[197].mxu1 }
 0x8fd   : > { %v8571_v10 = vpop.f32.mrb[198].mxu1 }
 0x8fe   : > { %8721 = vst [vmem:[%s13598_s22 + $0x110] sm:$0xff] %v8569_v2  ;;  %v8572_v61 = vadd.f32 %v13595_v52, %v8571_v10  ;;  %v8573_v4 = vpop.f32.mrb[199].mxu1 }
 0x900   : > { %8722 = vst [vmem:[%s13598_s22 + $0x118] sm:$0xff] %v8572_v61 }
 0x902   : > { %v8042_v27 = vpop.f32.mrb[244].mxu0 }
 0x903   : > { %v8043_v38 = vadd.f32 %v8042_v27, %v13454_v45  ;;  %v8044_v21 = vpop.f32.mrb[245].mxu0 }
 0x904   : > { %v8045_v36 = vadd.f32 %v8044_v21, %v13459_v25  ;;  %v8046_v44 = vpop.f32.mrb[246].mxu0 }
 0x905   : > { %v8047_v63 = vadd.f32 %v8046_v44, %v13454_v45  ;;  %v8048_v6 = vpop.f32.mrb[247].mxu0  ;;  %v8187_v5 = vmax.f32 %v8043_v38, 0.0 }
 0x906   : > { %v8049_v50 = vadd.f32 %v8048_v6, %v13459_v25  ;;  %v8188_v28 = vmax.f32 %v8045_v36, 0.0 }
 0x907   : > { %v8189_v19 = vmax.f32 %v8047_v63, 0.0 }
 0x908   : > { %v8190_v47 = vmax.f32 %v8049_v50, 0.0 }
 0x909   : > { %v8257_v33 = vpack.c.bf16 %v8189_v19, %v8187_v5 }
 0x90a   : > { %v8258_v23 = vpack.c.bf16 %v8190_v47, %v8188_v28 }
 0x90c   : > { %8662 = vmatprep.mubr.bf16.mxu1 %v8258_v23 }
 0x90d   : > { %8663 = vmatmul.mubr.bf16.gmra.mrb[244].mxu1 %v8257_v33 }
 0x90e   : > { %v8576_v24 = vpop.f32.mrb[200].mxu1 }
 0x90f   : > { %v8577_v35 = vadd.f32 %v13595_v52, %v8576_v24  ;;  %v8578_v29 = vpop.f32.mrb[201].mxu1 }
 0x910   : > { %v8579_v26 = vpop.f32.mrb[202].mxu1 }
 0x911   : > { %8723 = vst [vmem:[%s13598_s22 + $0x120] sm:$0xff] %v8577_v35  ;;  %v8580_v11 = vadd.f32 %v13595_v52, %v8579_v26  ;;  %v8581_v32 = vpop.f32.mrb[203].mxu1 }
 0x913   : > { %8724 = vst [vmem:[%s13598_s22 + $0x128] sm:$0xff] %v8580_v11 }
 0x915   : > { %v8052_v7 = vpop.f32.mrb[248].mxu0 }
 0x916   : > { %v8053_v20 = vadd.f32 %v8052_v7, %v13454_v45  ;;  %v8054_v54 = vpop.f32.mrb[249].mxu0 }
 0x917   : > { %v8055_v49 = vadd.f32 %v8054_v54, %v13459_v25  ;;  %v8056_v58 = vpop.f32.mrb[250].mxu0 }
 0x918   : > { %v8057_v41 = vadd.f32 %v8056_v58, %v13454_v45  ;;  %v8058_v57 = vpop.f32.mrb[251].mxu0  ;;  %v8191_v51 = vmax.f32 %v8053_v20, 0.0 }
 0x919   : > { %v8059_v8 = vadd.f32 %v8058_v57, %v13459_v25  ;;  %v8192_v62 = vmax.f32 %v8055_v49, 0.0 }
 0x91a   : > { %v8193_v30 = vmax.f32 %v8057_v41, 0.0 }
 0x91b   : > { %v8194_v39 = vmax.f32 %v8059_v8, 0.0 }
 0x91c   : > { %v8259_v37 = vpack.c.bf16 %v8193_v30, %v8191_v51 }
 0x91d   : > { %v8260_v60 = vpack.c.bf16 %v8194_v39, %v8192_v62 }
 0x91f   : > { %8670 = vmatprep.mubr.bf16.mxu1 %v8260_v60 }
 0x920   : > { %8671 = vmatmul.mubr.bf16.gmra.mrb[248].mxu1 %v8259_v37 }
 0x922   : > { %v8584_v31 = vpop.f32.mrb[204].mxu1 }
 0x923   : > { %v8585_v9 = vadd.f32 %v13595_v52, %v8584_v31  ;;  %v8586_v46 = vpop.f32.mrb[205].mxu1 }
 0x924   : > { %v8587_v0 = vpop.f32.mrb[206].mxu1 }
 0x925   : > { %8725 = vst [vmem:[%s13598_s22 + $0x130] sm:$0xff] %v8585_v9  ;;  %v8588_v17 = vadd.f32 %v13595_v52, %v8587_v0  ;;  %v8589_v43 = vpop.f32.mrb[207].mxu1 }
 0x927   : > { %8726 = vst [vmem:[%s13598_s22 + $0x138] sm:$0xff] %v8588_v17 }
 0x928   : > { %v8062_v40 = vpop.f32.mrb[252].mxu0 }
 0x929   : > { %v8063_v34 = vadd.f32 %v8062_v40, %v13454_v45  ;;  %v8064_v22 = vpop.f32.mrb[253].mxu0 }
 0x92a   : > { %v8065_v14 = vadd.f32 %v8064_v22, %v13459_v25  ;;  %v8066_v16 = vpop.f32.mrb[254].mxu0 }
 0x92b   : > { %v8067_v56 = vadd.f32 %v8066_v16, %v13454_v45  ;;  %v8068_v55 = vpop.f32.mrb[255].mxu0  ;;  %v8195_v53 = vmax.f32 %v8063_v34, 0.0 }
 0x92c   : > { %v8069_v1 = vadd.f32 %v8068_v55, %v13459_v25  ;;  %v8196_v59 = vmax.f32 %v8065_v14, 0.0 }
 0x92d   : > { %v8197_v42 = vmax.f32 %v8067_v56, 0.0 }
 0x92e   : > { %v8198_v3 = vmax.f32 %v8069_v1, 0.0 }
 0x92f   : > { %v8261_v12 = vpack.c.bf16 %v8197_v42, %v8195_v53 }
 0x930   : > { %v8262_v48 = vpack.c.bf16 %v8198_v3, %v8196_v59 }
 0x932   : > { %8678 = vmatprep.mubr.bf16.mxu1 %v8262_v48 }
 0x933   : > { %8679 = vmatmul.mubr.bf16.gmra.mrb[252].mxu1 %v8261_v12 }
 0x935   : > { %v8592_v15 = vpop.f32.mrb[208].mxu1 }
 0x936   : > { %v8593_v13 = vadd.f32 %v13595_v52, %v8592_v15  ;;  %v8594_v2 = vpop.f32.mrb[209].mxu1 }
 0x937   : > { %v8595_v18 = vpop.f32.mrb[210].mxu1 }
 0x938   : > { %8727 = vst [vmem:[%s13598_s22 + $0x140] sm:$0xff] %v8593_v13  ;;  %v8596_v45 = vadd.f32 %v13595_v52, %v8595_v18  ;;  %v8597_v25 = vpop.f32.mrb[211].mxu1 }
 0x93a   : > { %8728 = vst [vmem:[%s13598_s22 + $0x148] sm:$0xff] %v8596_v45 }
 0x949   : > { %v8600_v10 = vpop.f32.mrb[212].mxu1 }
 0x94a   : > { %v8601_v61 = vadd.f32 %v13595_v52, %v8600_v10  ;;  %v8602_v4 = vpop.f32.mrb[213].mxu1 }
 0x94b   : > { %v8603_v27 = vpop.f32.mrb[214].mxu1 }
 0x94c   : > { %8729 = vst [vmem:[%s13598_s22 + $0x150] sm:$0xff] %v8601_v61  ;;  %v8604_v38 = vadd.f32 %v13595_v52, %v8603_v27  ;;  %v8605_v21 = vpop.f32.mrb[215].mxu1 }
 0x94e   : > { %8730 = vst [vmem:[%s13598_s22 + $0x158] sm:$0xff] %v8604_v38 }
 0x95c   : > { %v8608_v36 = vpop.f32.mrb[216].mxu1 }
 0x95d   : > { %v8609_v44 = vadd.f32 %v13595_v52, %v8608_v36  ;;  %v8610_v63 = vpop.f32.mrb[217].mxu1 }
 0x95e   : > { %v8611_v6 = vpop.f32.mrb[218].mxu1 }
 0x95f   : > { %8731 = vst [vmem:[%s13598_s22 + $0x160] sm:$0xff] %v8609_v44  ;;  %v8612_v50 = vadd.f32 %v13595_v52, %v8611_v6  ;;  %v8613_v5 = vpop.f32.mrb[219].mxu1 }
 0x961   : > { %8732 = vst [vmem:[%s13598_s22 + $0x168] sm:$0xff] %v8612_v50 }
 0x96f   : > { %v8616_v19 = vpop.f32.mrb[220].mxu1 }
 0x970   : > { %v8617_v28 = vadd.f32 %v13595_v52, %v8616_v19  ;;  %v8618_v47 = vpop.f32.mrb[221].mxu1 }
 0x971   : > { %v8619_v33 = vpop.f32.mrb[222].mxu1 }
 0x972   : > { %8733 = vst [vmem:[%s13598_s22 + $0x170] sm:$0xff] %v8617_v28  ;;  %v8620_v23 = vadd.f32 %v13595_v52, %v8619_v33  ;;  %v8621_v24 = vpop.f32.mrb[223].mxu1 }
 0x974   : > { %8734 = vst [vmem:[%s13598_s22 + $0x178] sm:$0xff] %v8620_v23 }
 0x981   : > { %v8624_v35 = vpop.f32.mrb[224].mxu1 }
 0x982   : > { %v8625_v29 = vadd.f32 %v13595_v52, %v8624_v35  ;;  %v8626_v26 = vpop.f32.mrb[225].mxu1 }
 0x983   : > { %v8627_v11 = vpop.f32.mrb[226].mxu1 }
 0x984   : > { %8735 = vst [vmem:[%s13598_s22 + $0x180] sm:$0xff] %v8625_v29  ;;  %v8628_v32 = vadd.f32 %v13595_v52, %v8627_v11  ;;  %v8629_v7 = vpop.f32.mrb[227].mxu1 }
 0x986   : > { %8736 = vst [vmem:[%s13598_s22 + $0x188] sm:$0xff] %v8628_v32 }
 0x994   : > { %v8632_v20 = vpop.f32.mrb[228].mxu1 }
 0x995   : > { %v8633_v54 = vadd.f32 %v13595_v52, %v8632_v20  ;;  %v8634_v49 = vpop.f32.mrb[229].mxu1 }
 0x996   : > { %v8635_v58 = vpop.f32.mrb[230].mxu1 }
 0x997   : > { %8737 = vst [vmem:[%s13598_s22 + $0x190] sm:$0xff] %v8633_v54  ;;  %v8636_v41 = vadd.f32 %v13595_v52, %v8635_v58  ;;  %v8637_v57 = vpop.f32.mrb[231].mxu1 }
 0x999   : > { %8738 = vst [vmem:[%s13598_s22 + $0x198] sm:$0xff] %v8636_v41 }
 0x9a8   : > { %v8640_v8 = vpop.f32.mrb[232].mxu1 }
 0x9a9   : > { %v8641_v51 = vadd.f32 %v13595_v52, %v8640_v8  ;;  %v8642_v30 = vpop.f32.mrb[233].mxu1 }
 0x9aa   : > { %v8643_v62 = vpop.f32.mrb[234].mxu1 }
 0x9ab   : > { %8739 = vst [vmem:[%s13598_s22 + $0x1a0] sm:$0xff] %v8641_v51  ;;  %v8644_v39 = vadd.f32 %v13595_v52, %v8643_v62  ;;  %v8645_v37 = vpop.f32.mrb[235].mxu1 }
 0x9ad   : > { %8740 = vst [vmem:[%s13598_s22 + $0x1a8] sm:$0xff] %v8644_v39 }
 0x9bb   : > { %v8648_v60 = vpop.f32.mrb[236].mxu1 }
 0x9bc   : > { %v8649_v31 = vadd.f32 %v13595_v52, %v8648_v60  ;;  %v8650_v9 = vpop.f32.mrb[237].mxu1 }
 0x9bd   : > { %v8651_v46 = vpop.f32.mrb[238].mxu1 }
 0x9be   : > { %8741 = vst [vmem:[%s13598_s22 + $0x1b0] sm:$0xff] %v8649_v31  ;;  %v8652_v0 = vadd.f32 %v13595_v52, %v8651_v46  ;;  %v8653_v17 = vpop.f32.mrb[239].mxu1 }
 0x9c0   : > { %8742 = vst [vmem:[%s13598_s22 + $0x1b8] sm:$0xff] %v8652_v0 }
 0x9cd   : > { %v8656_v43 = vpop.f32.mrb[240].mxu1 }
 0x9ce   : > { %v8657_v40 = vadd.f32 %v13595_v52, %v8656_v43  ;;  %v8658_v34 = vpop.f32.mrb[241].mxu1 }
 0x9cf   : > { %v8659_v22 = vpop.f32.mrb[242].mxu1 }
 0x9d0   : > { %8743 = vst [vmem:[%s13598_s22 + $0x1c0] sm:$0xff] %v8657_v40  ;;  %v8660_v14 = vadd.f32 %v13595_v52, %v8659_v22  ;;  %v8661_v16 = vpop.f32.mrb[243].mxu1 }
 0x9d2   : > { %8744 = vst [vmem:[%s13598_s22 + $0x1c8] sm:$0xff] %v8660_v14 }
 0x9e0   : > { %v8664_v56 = vpop.f32.mrb[244].mxu1 }
 0x9e1   : > { %v8665_v55 = vadd.f32 %v13595_v52, %v8664_v56  ;;  %v8666_v1 = vpop.f32.mrb[245].mxu1 }
 0x9e2   : > { %v8667_v53 = vpop.f32.mrb[246].mxu1 }
 0x9e3   : > { %8745 = vst [vmem:[%s13598_s22 + $0x1d0] sm:$0xff] %v8665_v55  ;;  %v8668_v42 = vadd.f32 %v13595_v52, %v8667_v53  ;;  %v8669_v59 = vpop.f32.mrb[247].mxu1 }
 0x9e5   : > { %8746 = vst [vmem:[%s13598_s22 + $0x1d8] sm:$0xff] %v8668_v42 }
 0x9f3   : > { %v8672_v3 = vpop.f32.mrb[248].mxu1 }
 0x9f4   : > { %v8673_v12 = vadd.f32 %v13595_v52, %v8672_v3  ;;  %v8674_v48 = vpop.f32.mrb[249].mxu1 }
 0x9f5   : > { %v8675_v15 = vpop.f32.mrb[250].mxu1 }
 0x9f6   : > { %8747 = vst [vmem:[%s13598_s22 + $0x1e0] sm:$0xff] %v8673_v12  ;;  %v8676_v13 = vadd.f32 %v13595_v52, %v8675_v15  ;;  %v8677_v2 = vpop.f32.mrb[251].mxu1 }
 0x9f8   : > { %8748 = vst [vmem:[%s13598_s22 + $0x1e8] sm:$0xff] %v8676_v13 }
 0xa06   : > { %v8680_v18 = vpop.f32.mrb[252].mxu1 }
 0xa07   : > { %v8681_v45 = vadd.f32 %v13595_v52, %v8680_v18  ;;  %v8682_v25 = vpop.f32.mrb[253].mxu1 }
 0xa08   : > { %v8683_v10 = vpop.f32.mrb[254].mxu1 }
 0xa09   : > { %8749 = vst [vmem:[%s13598_s22 + $0x1f0] sm:$0xff] %v8681_v45  ;;  %v8684_v61 = vadd.f32 %v13595_v52, %v8683_v10  ;;  %v8685_v4 = vpop.f32.mrb[255].mxu1 }
 0xa0b   : > { %8750 = vst [vmem:[%s13598_s22 + $0x1f8] sm:$0xff] %v8684_v61 }
 0xa0c   : > { %9679 = shalt.err (!%p9676_p7)
}
 0xa0d   : > { %s9680_s13 = scalar_lea.hbm %s13777_s14, 8192  ;;  %s9684_s21 = scalar_lea.hbm %s13834_s7, 16384 }
 0xa0e   : > { %p9681_p8 = scmp.ne.s32.totalorder %s13777_s14, %s9680_s13  ;;  %p9685_p1 = scmp.lt.u32.totalorder %s13777_s14, %s13834_s7 }
 0xa0f   : > { %p9686_p0 = scmp.lt.u32.totalorder %s9684_s21, %s9680_s13  ;;  %p9688_p6 = scmp.lt.u32.totalorder %s9680_s13, %s13777_s14 }
 0xa10   : > { %p9682_p11 = pnand %p9681_p8, %p14480_p9 }
 0xa11   : > { %p9687_p5 = por %p9686_p0, %p9685_p1 }
 0xa12   : > { %p9683_p13 = pneg %p9682_p11 }
 0xa13   : > { %p9689_p10 = por %p9688_p6, %p9687_p5 }
 0xa15   : > { %p9690_p12 = pnand %p9689_p10, %p9683_p13 }
 0xa17   : > { %9693 = shalt.err (!%p9690_p12)
}
 0xa18   : > { %s9741_s8 = smov 128   ;;  %s9742_s9 = smov 8  }
 0xa19   : > { %9099 = dma.vmem_to_hbm [thread:$0]  (%p14480_p9), %s13779_s29, 8192, %s13777_s14, %s13786_s28, %s9741_s8, %s9741_s8, %s9742_s9  }
 0xa1a PF: > { %p9111_p2 = scmp.ge.s32.totalorder %s9732_s27, 2  ;;  %s8780_s17 = sand.u32 1, %s9720_s24  }
 0xa1b   : > { %p14481_p3 = scmp.ne.s32.totalorder %s14088_s12, 0  ;;  %s8781_s18 = scalar_lea.sflag [#allocation4], %s8780_s17 }
 0xa1d   : > { %p9106_p4 = pnand %p9111_p2, %p14481_p3 }
 0xa1f   : > { %9715 = dma.done.wait (!%p9106_p4), %s8781_s18, 8192  }
 0xa20   : > { %9717 = vsyncadd (!%p9106_p4), %s8781_s18, 4294959104  ;;  %p18_p7 = scmp.ge.s32.totalorder %s9808_s30, 4   ;;  %s14482_s24 = smov %s9724_s25 }
 0xa21   : > { %s14483_s25 = smov %s9728_s26  ;;  %s14484_s26 = smov %s9819_s10 }
 0xa22   : > { %s14485_s27 = smov %s9808_s30  ;;  %20 = sbr.rel (!%p18_p7) target bundleno = 4 (0x4), region = 94 }
 0xa29   :  { %8786 = vsyncpa [#allocation3], 1 }
 0xa2a   :  { %8788 = vsyncpa [#allocation3 + $0x1], 1 }
 0xa2b   :  { %8789 = vsyncpa [#allocation4], 1 }
 0xa2c   :  { %8791 = vsyncpa [#allocation4 + $0x1], 1 }

</bundles_post_ra>
